<compile_context>
chip_gen: v7x
topology: tpu7x:2x2x1
jax: 0.10.0
libtpu: 0.0.40
codegen_flags: <defaults>
</compile_context>

<pallas_src>
import math
import jax
import jax.numpy as jnp
from jax.experimental import pallas as pl
from jax.experimental.pallas import tpu as pltpu

NUM_HEADS = 4
KV_SIZE_CONST = 960.0   # module hardcodes self.KV_size = 960 for the scale
EPS = 1e-5              # nn.InstanceNorm2d default eps (affine=False)
HEAD_PAD = 128          # per-head V column block padded to one full lane tile


def _make_kernel(BF, N, chans, D3):
    """Kernel handling BF folded batch elements per grid step."""
    H = NUM_HEADS
    DP = HEAD_PAD
    inv_h = 1.0 / H
    f32 = jnp.float32

    def kernel(emb1_ref, emb2_ref, emb3_ref, emb_all_ref,
               wq1_ref, wq2_ref, wq3_ref, wkv_ref,
               wo1_ref, wo2_ref, wo3_ref,
               o1_ref, o2_ref, o3_ref,
               w1_ref, w2_ref, w3_ref,
               p_stack_ref):
        mm_dtype = wkv_ref.dtype   # f32, or bf16 when matmul_dtype=bfloat16

        # ---- one fat K|V projection for all heads and all folded batches ---
        # (BF*N, D3) @ (D3, H*D3 + H*DP) -> f32 accumulation.  K heads occupy
        # the first H*D3 columns (unpadded); V heads the last H*DP columns,
        # each zero-padded from D3 to DP=128 for lane alignment downstream.
        kv_all = jnp.dot(emb_all_ref[...].astype(mm_dtype), wkv_ref[...],
                         preferred_element_type=f32)

        streams = ((emb1_ref, wq1_ref, wo1_ref, o1_ref, w1_ref),
                   (emb2_ref, wq2_ref, wo2_ref, o2_ref, w2_ref),
                   (emb3_ref, wq3_ref, wo3_ref, o3_ref, w3_ref))

        for b in range(BF):
            kv_b = kv_all[b * N:(b + 1) * N, :]        # (N, H*D3 + H*DP)
            v_stack = kv_b[:, H * D3:]                 # (N, H*DP), zero pads
            for (emb_ref, wq_ref, wo_ref, o_ref, w_ref), Ci in zip(streams,
                                                                   chans):
                emb_b = emb_ref[b]                     # (N, Ci), f32
                inv_n = 1.0 / (Ci * D3)
                pad = jnp.zeros((Ci, DP - D3), f32)
                w_acc = None
                for h in range(H):
                    # Q^T_h: (Ci, Ci) x (N, Ci) contracted on last dims ->
                    # (Ci, N).  No transposes, no scratch staging; the
                    # 1/sqrt(960) scale is pre-folded into the weights.
                    qT_h = jax.lax.dot_general(
                        wq_ref[h], emb_b.astype(mm_dtype),
                        (((1,), (1,)), ((), ())),
                        preferred_element_type=f32)
                    k_h = kv_b[:, h * D3:(h + 1) * D3]          # (N, D3)
                    # scores: canonical (Ci, N) x (N, D3) -> (Ci, D3) on MXU.
                    s = jnp.dot(qT_h.astype(mm_dtype), k_h.astype(mm_dtype),
                                preferred_element_type=f32)
                    # InstanceNorm2d over the whole (Ci, D3) slice: two-pass,
                    # biased variance (matches PyTorch, avoids cancellation).
                    mu = jnp.sum(s) * inv_n
                    d = s - mu
                    var = jnp.sum(d * d) * inv_n
                    s_n = d * jax.lax.rsqrt(var + EPS)
                    # softmax over D3 with an exact denominator.
                    e = jnp.exp(s_n - jnp.max(s_n, axis=-1, keepdims=True))
                    p = e / jnp.sum(e, axis=-1, keepdims=True)  # (Ci, D3) f32
                    w_acc = p if h == 0 else w_acc + p
                    # park this head's probs at a 128-aligned lane offset
                    # (unmasked full-vreg stores; pad lanes written as zero).
                    p_stack_ref[0:Ci, h * DP:(h + 1) * DP] = (
                        jnp.concatenate([p, pad], axis=-1))
                # ONE stacked context contraction per (batch, stream):
                # (N, H*DP) x (Ci, H*DP) contracted over the 512-wide last
                # dim -> (N, Ci); the head-sum falls out of the contraction
                # (V pad columns are zero, so p pad lanes contribute nothing).
                ctx = jax.lax.dot_general(
                    v_stack.astype(mm_dtype),
                    p_stack_ref[0:Ci, :].astype(mm_dtype),
                    (((1,), (1,)), ((), ())),
                    preferred_element_type=f32) * inv_h        # (N, Ci)
                # output projection (trans_b, natural layout), written once.
                o_ref[b] = jax.lax.dot_general(
                    ctx.astype(mm_dtype), wo_ref[...],
                    (((1,), (1,)), ((), ())),
                    preferred_element_type=f32)
                # head-mean attention weights, written exactly once.
                w_ref[b] = w_acc * inv_h

    return kernel


def _auto_grid_steps(B):
    """Two parallel grid steps on dual-TensorCore parts (v7x); otherwise fold
    the whole batch into a single step (v5e/v6e have one TensorCore, so extra
    grid steps are pure per-step + DMA overhead at these tiny shapes)."""
    try:
        kind = jax.devices()[0].device_kind.lower()
    except Exception:
        kind = ""
    if ("v7" in kind or "7x" in kind) and B >= 2 and B % 2 == 0:
        return 2
    return 1


def attention_org_pallas(emb1, emb2, emb3, emb_all, params,
                         matmul_dtype=jnp.float32, grid_steps=None):
    B, N, C1 = emb1.shape
    C2 = emb2.shape[-1]
    C3 = emb3.shape[-1]
    D3 = emb_all.shape[-1]
    H = NUM_HEADS
    DP = HEAD_PAD
    f32 = jnp.float32
    mmd = matmul_dtype
    chans = (C1, C2, C3)
    cmax = max(chans)
    scale = 1.0 / math.sqrt(KV_SIZE_CONST)

    if grid_steps is None:
        grid_steps = _auto_grid_steps(B)
    if grid_steps < 1 or B % grid_steps != 0:
        grid_steps = 1
    BF = B // grid_steps

    # ---- weight prep (pure JAX, once, outside the kernel) -------------------
    # Q: (H, Ci, Ci), score scale folded in (applied pre-norm either way).
    wq1 = (params["wq1"] * scale).astype(mmd)
    wq2 = (params["wq2"] * scale).astype(mmd)
    wq3 = (params["wq3"] * scale).astype(mmd)
    # K|V: PyTorch Linear does y = x @ W^T, so column block h is W_h^T.
    # K heads column-stacked unpadded; V heads zero-padded to DP=128 columns
    # each so the in-kernel prob stores / stacked contraction stay aligned.
    wk_cols = jnp.transpose(params["wk"], (2, 0, 1)).reshape(D3, H * D3)
    wv_cols = jnp.transpose(params["wv"], (2, 0, 1))             # (D3, H, D3)
    wv_cols = jnp.pad(wv_cols, ((0, 0), (0, 0), (0, DP - D3)))
    wv_cols = wv_cols.reshape(D3, H * DP)
    wkv = jnp.concatenate([wk_cols, wv_cols], axis=1).astype(mmd)
    wo1 = params["wo1"].astype(mmd)
    wo2 = params["wo2"].astype(mmd)
    wo3 = params["wo3"].astype(mmd)

    # emb_all pre-flattened so the fat K|V projection needs no in-kernel
    # reshape; activations stay f32 (casts happen only at dot operands).
    emb_all_flat = emb_all.reshape(B * N, D3).astype(f32)

    def emb_spec(c):
        return pl.BlockSpec((BF, N, c), lambda g: (g, 0, 0))

    def w_out_spec(c):
        return pl.BlockSpec((BF, c, D3), lambda g: (g, 0, 0))

    def full_spec(shape):
        if len(shape) == 3:
            return pl.BlockSpec(shape, lambda g: (0, 0, 0))
        return pl.BlockSpec(shape, lambda g: (0, 0))

    in_specs = [
        emb_spec(C1), emb_spec(C2), emb_spec(C3),
        pl.BlockSpec((BF * N, D3), lambda g: (g, 0)),
        full_spec((H, C1, C1)), full_spec((H, C2, C2)), full_spec((H, C3, C3)),
        full_spec((D3, H * D3 + H * DP)),
        full_spec((C1, C1)), full_spec((C2, C2)), full_spec((C3, C3)),
    ]
    out_specs = [
        emb_spec(C1), emb_spec(C2), emb_spec(C3),
        w_out_spec(C1), w_out_spec(C2), w_out_spec(C3),
    ]
    out_shape = (
        jax.ShapeDtypeStruct((B, N, C1), f32),
        jax.ShapeDtypeStruct((B, N, C2), f32),
        jax.ShapeDtypeStruct((B, N, C3), f32),
        jax.ShapeDtypeStruct((B, C1, D3), f32),
        jax.ShapeDtypeStruct((B, C2, D3), f32),
        jax.ShapeDtypeStruct((B, C3, D3), f32),
    )

    kernel = _make_kernel(BF, N, chans, D3)
    o1, o2, o3, w1, w2, w3 = pl.pallas_call(
        kernel,
        out_shape=out_shape,
        grid=(grid_steps,),
        in_specs=in_specs,
        out_specs=out_specs,
        scratch_shapes=[pltpu.VMEM((cmax, H * DP), f32)],  # stacked probs
        compiler_params=pltpu.CompilerParams(
            dimension_semantics=("parallel",)),
    )(emb1.astype(f32), emb2.astype(f32), emb3.astype(f32), emb_all_flat,
      wq1, wq2, wq3, wkv, wo1, wo2, wo3)
    return o1, o2, o3, (w1, w2, w3)


def attention_org_reference(emb1, emb2, emb3, emb_all, params):
    """Pure-JAX reference mirroring the PyTorch forward (eval mode)."""
    scale = 1.0 / math.sqrt(KV_SIZE_CONST)

    def proj_heads(x, w):  # x (B,N,Cin), w (H,Cout,Cin) -> (B,H,N,Cout)
        return jnp.einsum("bnc,hdc->bhnd", x, w)

    K = proj_heads(emb_all, params["wk"])   # (B,H,N,D3)
    V = proj_heads(emb_all, params["wv"])   # (B,H,N,D3)

    outs, weights = [], []
    for emb, wq, wo in ((emb1, params["wq1"], params["wo1"]),
                        (emb2, params["wq2"], params["wo2"]),
                        (emb3, params["wq3"], params["wo3"])):
        Q = proj_heads(emb, wq)                                    # (B,H,N,Ci)
        S = jnp.einsum("bhnc,bhnd->bhcd", Q, K) * scale            # (B,H,Ci,D3)
        mu = jnp.mean(S, axis=(2, 3), keepdims=True)
        var = jnp.mean((S - mu) ** 2, axis=(2, 3), keepdims=True)
        Sn = (S - mu) / jnp.sqrt(var + EPS)
        P = jax.nn.softmax(Sn, axis=-1)
        weights.append(jnp.mean(P, axis=1))                        # (B,Ci,D3)
        ctx = jnp.einsum("bhcd,bhnd->bhcn", P, V)                  # (B,H,Ci,N)
        ctx = jnp.mean(ctx, axis=1)                                # (B,Ci,N)
        ctx = jnp.swapaxes(ctx, 1, 2)                              # (B,N,Ci)
        outs.append(jnp.einsum("bnc,dc->bnd", ctx, wo))
    return outs[0], outs[1], outs[2], tuple(weights)


def _init_params(key, channel_num, dim):
    d3 = dim * 3
    keys = jax.random.split(key, 9)

    def lin(k, cout, cin, heads=None):
        bound = 1.0 / math.sqrt(cin)
        shape = (cout, cin) if heads is None else (heads, cout, cin)
        return jax.random.uniform(k, shape, jnp.float32, -bound, bound)

    return {
        "wq1": lin(keys[0], channel_num[0], channel_num[0], NUM_HEADS),
        "wq2": lin(keys[1], channel_num[1], channel_num[1], NUM_HEADS),
        "wq3": lin(keys[2], channel_num[2], channel_num[2], NUM_HEADS),
        "wk":  lin(keys[3], d3, d3, NUM_HEADS),
        "wv":  lin(keys[4], d3, d3, NUM_HEADS),
        "wo1": lin(keys[5], channel_num[0], channel_num[0]),
        "wo2": lin(keys[6], channel_num[1], channel_num[1]),
        "wo3": lin(keys[7], channel_num[2], channel_num[2]),
    }


if __name__ == "__main__":
    B, N = 2, 8
    channel_num = [16, 32, 64]
    dim = 32                 # emb_all feature dim = dim * 3 = 96
    D3 = dim * 3

    key = jax.random.PRNGKey(0)
    k_e1, k_e2, k_e3, k_ea, k_p = jax.random.split(key, 5)
    emb1 = jax.random.normal(k_e1, (B, N, channel_num[0]), jnp.float32)
    emb2 = jax.random.normal(k_e2, (B, N, channel_num[1]), jnp.float32)
    emb3 = jax.random.normal(k_e3, (B, N, channel_num[2]), jnp.float32)
    emb_all = jax.random.normal(k_ea, (B, N, D3), jnp.float32)
    params = _init_params(k_p, channel_num, dim)

    # f32-operand run: parity path against the PyTorch-equivalent reference.
    o1, o2, o3, (w1, w2, w3) = attention_org_pallas(
        emb1, emb2, emb3, emb_all, params, matmul_dtype=jnp.float32)
    jax.block_until_ready((o1, o2, o3, w1, w2, w3))

    r1, r2, r3, (rw1, rw2, rw3) = attention_org_reference(
        emb1, emb2, emb3, emb_all, params)
    for got, want in ((o1, r1), (o2, r2), (o3, r3),
                      (w1, rw1), (w2, rw2), (w3, rw3)):
        assert got.shape == want.shape, (got.shape, want.shape)
        assert jnp.allclose(got, want, rtol=1e-3, atol=1e-3), \
            float(jnp.max(jnp.abs(got - want)))

    # bf16-operand run (the v6e/v7x MXU optimization: bf16 matmul operands,
    # f32 accumulation, f32 elementwise math).  Loose sanity check only.
    b1, b2, b3, (bw1, bw2, bw3) = attention_org_pallas(
        emb1, emb2, emb3, emb_all, params, matmul_dtype=jnp.bfloat16)
    jax.block_until_ready((b1, b2, b3, bw1, bw2, bw3))
    for got, want in ((b1, r1), (b2, r2), (b3, r3)):
        assert bool(jnp.all(jnp.isfinite(got)))
        assert float(jnp.max(jnp.abs(got - want))) < 0.5

    print("KERNEL_OK")
</pallas_src>

<mosaic_0001>
module attributes {stable_mosaic.version = 11 : i64} {
  func.func @kernel(%arg0: i32, %arg1: memref<2x8x16xf32, #tpu.memory_space<vmem>>, %arg2: memref<2x8x32xf32, #tpu.memory_space<vmem>>, %arg3: memref<2x8x64xf32, #tpu.memory_space<vmem>>, %arg4: memref<16x96xf32, #tpu.memory_space<vmem>>, %arg5: memref<4x16x16xf32, #tpu.memory_space<vmem>>, %arg6: memref<4x32x32xf32, #tpu.memory_space<vmem>>, %arg7: memref<4x64x64xf32, #tpu.memory_space<vmem>>, %arg8: memref<96x896xf32, #tpu.memory_space<vmem>>, %arg9: memref<16x16xf32, #tpu.memory_space<vmem>>, %arg10: memref<32x32xf32, #tpu.memory_space<vmem>>, %arg11: memref<64x64xf32, #tpu.memory_space<vmem>>, %arg12: memref<2x8x16xf32, #tpu.memory_space<vmem>>, %arg13: memref<2x8x32xf32, #tpu.memory_space<vmem>>, %arg14: memref<2x8x64xf32, #tpu.memory_space<vmem>>, %arg15: memref<2x16x96xf32, #tpu.memory_space<vmem>>, %arg16: memref<2x32x96xf32, #tpu.memory_space<vmem>>, %arg17: memref<2x64x96xf32, #tpu.memory_space<vmem>>, %arg18: memref<64x512xf32, #tpu.memory_space<vmem>>) attributes {dimension_semantics = [#tpu.dimension_semantics<parallel>], iteration_bounds = array<i64: 1>, scalar_prefetch = 0 : i64, scratch_operands = 1 : i64, tpu.core_type = #tpu.core_type<tc>, window_params = [{transform_indices = @transform_0, window_bounds = array<i64: 2, 8, 16>}, {transform_indices = @transform_1, window_bounds = array<i64: 2, 8, 32>}, {transform_indices = @transform_2, window_bounds = array<i64: 2, 8, 64>}, {transform_indices = @transform_3, window_bounds = array<i64: 16, 96>}, {pipeline_mode = #tpu.pipeline_mode<synchronous>, transform_indices = @transform_4, window_bounds = array<i64: 4, 16, 16>}, {pipeline_mode = #tpu.pipeline_mode<synchronous>, transform_indices = @transform_5, window_bounds = array<i64: 4, 32, 32>}, {pipeline_mode = #tpu.pipeline_mode<synchronous>, transform_indices = @transform_6, window_bounds = array<i64: 4, 64, 64>}, {pipeline_mode = #tpu.pipeline_mode<synchronous>, transform_indices = @transform_7, window_bounds = array<i64: 96, 896>}, {pipeline_mode = #tpu.pipeline_mode<synchronous>, transform_indices = @transform_8, window_bounds = array<i64: 16, 16>}, {pipeline_mode = #tpu.pipeline_mode<synchronous>, transform_indices = @transform_9, window_bounds = array<i64: 32, 32>}, {pipeline_mode = #tpu.pipeline_mode<synchronous>, transform_indices = @transform_10, window_bounds = array<i64: 64, 64>}, {transform_indices = @transform_11, window_bounds = array<i64: 2, 8, 16>}, {transform_indices = @transform_12, window_bounds = array<i64: 2, 8, 32>}, {transform_indices = @transform_13, window_bounds = array<i64: 2, 8, 64>}, {transform_indices = @transform_14, window_bounds = array<i64: 2, 16, 96>}, {transform_indices = @transform_15, window_bounds = array<i64: 2, 32, 96>}, {transform_indices = @transform_16, window_bounds = array<i64: 2, 64, 96>}]} {
    %c0 = arith.constant 0 : index
    %c0_0 = arith.constant 0 : index
    %0 = vector.load %arg4[%c0, %c0_0] : memref<16x96xf32, #tpu.memory_space<vmem>>, vector<16x96xf32>
    %c0_1 = arith.constant 0 : index
    %c0_2 = arith.constant 0 : index
    %1 = vector.load %arg8[%c0_1, %c0_2] : memref<96x896xf32, #tpu.memory_space<vmem>>, vector<96x896xf32>
    %cst = arith.constant dense<0.000000e+00> : vector<16x896xf32>
    %2 = tpu.matmul %0, %1, %cst {dimension_numbers = #tpu.dot_dimension_numbers<[1], [0], [0], [1], [0, 0, 1, 1], [], []>} : vector<16x96xf32>, vector<96x896xf32>, vector<16x896xf32> -> vector<16x896xf32>
    %3 = vector.extract_strided_slice %2 {offsets = [0, 0], sizes = [8, 896], strides = [1, 1]} : vector<16x896xf32> to vector<8x896xf32>
    %4 = vector.extract_strided_slice %3 {offsets = [0, 384], sizes = [8, 512], strides = [1, 1]} : vector<8x896xf32> to vector<8x512xf32>
    %c0_3 = arith.constant 0 : index
    %c0_4 = arith.constant 0 : index
    %c0_5 = arith.constant 0 : index
    %5 = vector.load %arg1[%c0_3, %c0_4, %c0_5] : memref<2x8x16xf32, #tpu.memory_space<vmem>>, vector<1x8x16xf32>
    %6 = vector.shape_cast %5 : vector<1x8x16xf32> to vector<8x16xf32>
    %cst_6 = arith.constant 0.000000e+00 : f32
    %7 = vector.broadcast %cst_6 : f32 to vector<16x32xf32>
    %c0_7 = arith.constant 0 : index
    %c0_8 = arith.constant 0 : index
    %c0_9 = arith.constant 0 : index
    %8 = vector.load %arg5[%c0_7, %c0_8, %c0_9] : memref<4x16x16xf32, #tpu.memory_space<vmem>>, vector<1x16x16xf32>
    %9 = vector.shape_cast %8 : vector<1x16x16xf32> to vector<16x16xf32>
    %cst_10 = arith.constant dense<0.000000e+00> : vector<16x8xf32>
    %10 = tpu.matmul %9, %6, %cst_10 {dimension_numbers = #tpu.dot_dimension_numbers<[1], [1], [0], [0], [0, 0, 1, 0], [], []>} : vector<16x16xf32>, vector<8x16xf32>, vector<16x8xf32> -> vector<16x8xf32>
    %11 = vector.extract_strided_slice %3 {offsets = [0, 0], sizes = [8, 96], strides = [1, 1]} : vector<8x896xf32> to vector<8x96xf32>
    %cst_11 = arith.constant dense<0.000000e+00> : vector<16x96xf32>
    %12 = tpu.matmul %10, %11, %cst_11 {dimension_numbers = #tpu.dot_dimension_numbers<[1], [0], [0], [1], [0, 0, 1, 1], [], []>} : vector<16x8xf32>, vector<8x96xf32>, vector<16x96xf32> -> vector<16x96xf32>
    %13 = vector.shape_cast %12 : vector<16x96xf32> to vector<1x16x96xf32>
    %cst_12 = arith.constant dense<0.000000e+00> : vector<1xf32>
    %14 = vector.multi_reduction <add>, %13, %cst_12 [1, 2] : vector<1x16x96xf32> to vector<1xf32>
    %15 = vector.shape_cast %14 : vector<1xf32> to vector<1x1x1xf32>
    %16 = vector.extract %15[0, 0, 0] : f32 from vector<1x1x1xf32>
    %cst_13 = arith.constant 6.51041686E-4 : f32
    %17 = arith.mulf %16, %cst_13 : f32
    %18 = vector.broadcast %17 : f32 to vector<16x96xf32>
    %19 = arith.subf %12, %18 : vector<16x96xf32>
    %20 = arith.mulf %19, %19 : vector<16x96xf32>
    %21 = vector.shape_cast %20 : vector<16x96xf32> to vector<1x16x96xf32>
    %cst_14 = arith.constant dense<0.000000e+00> : vector<1xf32>
    %22 = vector.multi_reduction <add>, %21, %cst_14 [1, 2] : vector<1x16x96xf32> to vector<1xf32>
    %23 = vector.shape_cast %22 : vector<1xf32> to vector<1x1x1xf32>
    %24 = vector.extract %23[0, 0, 0] : f32 from vector<1x1x1xf32>
    %cst_15 = arith.constant 6.51041686E-4 : f32
    %25 = arith.mulf %24, %cst_15 : f32
    %cst_16 = arith.constant 9.99999974E-6 : f32
    %26 = arith.addf %25, %cst_16 : f32
    %27 = math.rsqrt %26 : f32
    %28 = vector.broadcast %27 : f32 to vector<16x96xf32>
    %29 = arith.mulf %19, %28 : vector<16x96xf32>
    %cst_17 = arith.constant dense<0xFF800000> : vector<16xf32>
    %30 = vector.multi_reduction <maximumf>, %29, %cst_17 [1] : vector<16x96xf32> to vector<16xf32>
    %31 = vector.shape_cast %30 : vector<16xf32> to vector<16x1xf32>
    %32 = vector.broadcast %31 : vector<16x1xf32> to vector<16x96xf32>
    %33 = arith.subf %29, %32 : vector<16x96xf32>
    %34 = math.exp %33 : vector<16x96xf32>
    %cst_18 = arith.constant dense<0.000000e+00> : vector<16xf32>
    %35 = vector.multi_reduction <add>, %34, %cst_18 [1] : vector<16x96xf32> to vector<16xf32>
    %36 = vector.shape_cast %35 : vector<16xf32> to vector<16x1xf32>
    %37 = vector.broadcast %36 : vector<16x1xf32> to vector<16x96xf32>
    %38 = arith.divf %34, %37 : vector<16x96xf32>
    %39 = tpu.concatenate %38, %7 in 1 : vector<16x96xf32>, vector<16x32xf32> -> vector<16x128xf32>
    %c0_19 = arith.constant 0 : index
    %c0_20 = arith.constant 0 : index
    %40 = vector.load %arg18[%c0_19, %c0_20] : memref<64x512xf32, #tpu.memory_space<vmem>>, vector<16x128xf32>
    tpu.vector_store %arg18[%c0_19, %c0_20], %39 {strides = array<i32>} : memref<64x512xf32, #tpu.memory_space<vmem>>, vector<16x128xf32>,
    %c1 = arith.constant 1 : index
    %c0_21 = arith.constant 0 : index
    %c0_22 = arith.constant 0 : index
    %41 = vector.load %arg5[%c1, %c0_21, %c0_22] : memref<4x16x16xf32, #tpu.memory_space<vmem>>, vector<1x16x16xf32>
    %42 = vector.shape_cast %41 : vector<1x16x16xf32> to vector<16x16xf32>
    %cst_23 = arith.constant dense<0.000000e+00> : vector<16x8xf32>
    %43 = tpu.matmul %42, %6, %cst_23 {dimension_numbers = #tpu.dot_dimension_numbers<[1], [1], [0], [0], [0, 0, 1, 0], [], []>} : vector<16x16xf32>, vector<8x16xf32>, vector<16x8xf32> -> vector<16x8xf32>
    %44 = vector.extract_strided_slice %3 {offsets = [0, 96], sizes = [8, 96], strides = [1, 1]} : vector<8x896xf32> to vector<8x96xf32>
    %cst_24 = arith.constant dense<0.000000e+00> : vector<16x96xf32>
    %45 = tpu.matmul %43, %44, %cst_24 {dimension_numbers = #tpu.dot_dimension_numbers<[1], [0], [0], [1], [0, 0, 1, 1], [], []>} : vector<16x8xf32>, vector<8x96xf32>, vector<16x96xf32> -> vector<16x96xf32>
    %46 = vector.shape_cast %45 : vector<16x96xf32> to vector<1x16x96xf32>
    %cst_25 = arith.constant dense<0.000000e+00> : vector<1xf32>
    %47 = vector.multi_reduction <add>, %46, %cst_25 [1, 2] : vector<1x16x96xf32> to vector<1xf32>
    %48 = vector.shape_cast %47 : vector<1xf32> to vector<1x1x1xf32>
    %49 = vector.extract %48[0, 0, 0] : f32 from vector<1x1x1xf32>
    %cst_26 = arith.constant 6.51041686E-4 : f32
    %50 = arith.mulf %49, %cst_26 : f32
    %51 = vector.broadcast %50 : f32 to vector<16x96xf32>
    %52 = arith.subf %45, %51 : vector<16x96xf32>
    %53 = arith.mulf %52, %52 : vector<16x96xf32>
    %54 = vector.shape_cast %53 : vector<16x96xf32> to vector<1x16x96xf32>
    %cst_27 = arith.constant dense<0.000000e+00> : vector<1xf32>
    %55 = vector.multi_reduction <add>, %54, %cst_27 [1, 2] : vector<1x16x96xf32> to vector<1xf32>
    %56 = vector.shape_cast %55 : vector<1xf32> to vector<1x1x1xf32>
    %57 = vector.extract %56[0, 0, 0] : f32 from vector<1x1x1xf32>
    %cst_28 = arith.constant 6.51041686E-4 : f32
    %58 = arith.mulf %57, %cst_28 : f32
    %cst_29 = arith.constant 9.99999974E-6 : f32
    %59 = arith.addf %58, %cst_29 : f32
    %60 = math.rsqrt %59 : f32
    %61 = vector.broadcast %60 : f32 to vector<16x96xf32>
    %62 = arith.mulf %52, %61 : vector<16x96xf32>
    %cst_30 = arith.constant dense<0xFF800000> : vector<16xf32>
    %63 = vector.multi_reduction <maximumf>, %62, %cst_30 [1] : vector<16x96xf32> to vector<16xf32>
    %64 = vector.shape_cast %63 : vector<16xf32> to vector<16x1xf32>
    %65 = vector.broadcast %64 : vector<16x1xf32> to vector<16x96xf32>
    %66 = arith.subf %62, %65 : vector<16x96xf32>
    %67 = math.exp %66 : vector<16x96xf32>
    %cst_31 = arith.constant dense<0.000000e+00> : vector<16xf32>
    %68 = vector.multi_reduction <add>, %67, %cst_31 [1] : vector<16x96xf32> to vector<16xf32>
    %69 = vector.shape_cast %68 : vector<16xf32> to vector<16x1xf32>
    %70 = vector.broadcast %69 : vector<16x1xf32> to vector<16x96xf32>
    %71 = arith.divf %67, %70 : vector<16x96xf32>
    %72 = arith.addf %38, %71 : vector<16x96xf32>
    %73 = tpu.concatenate %71, %7 in 1 : vector<16x96xf32>, vector<16x32xf32> -> vector<16x128xf32>
    %c0_32 = arith.constant 0 : index
    %c128 = arith.constant 128 : index
    %74 = vector.load %arg18[%c0_32, %c128] : memref<64x512xf32, #tpu.memory_space<vmem>>, vector<16x128xf32>
    tpu.vector_store %arg18[%c0_32, %c128], %73 {strides = array<i32>} : memref<64x512xf32, #tpu.memory_space<vmem>>, vector<16x128xf32>,
    %c2 = arith.constant 2 : index
    %c0_33 = arith.constant 0 : index
    %c0_34 = arith.constant 0 : index
    %75 = vector.load %arg5[%c2, %c0_33, %c0_34] : memref<4x16x16xf32, #tpu.memory_space<vmem>>, vector<1x16x16xf32>
    %76 = vector.shape_cast %75 : vector<1x16x16xf32> to vector<16x16xf32>
    %cst_35 = arith.constant dense<0.000000e+00> : vector<16x8xf32>
    %77 = tpu.matmul %76, %6, %cst_35 {dimension_numbers = #tpu.dot_dimension_numbers<[1], [1], [0], [0], [0, 0, 1, 0], [], []>} : vector<16x16xf32>, vector<8x16xf32>, vector<16x8xf32> -> vector<16x8xf32>
    %78 = vector.extract_strided_slice %3 {offsets = [0, 192], sizes = [8, 96], strides = [1, 1]} : vector<8x896xf32> to vector<8x96xf32>
    %cst_36 = arith.constant dense<0.000000e+00> : vector<16x96xf32>
    %79 = tpu.matmul %77, %78, %cst_36 {dimension_numbers = #tpu.dot_dimension_numbers<[1], [0], [0], [1], [0, 0, 1, 1], [], []>} : vector<16x8xf32>, vector<8x96xf32>, vector<16x96xf32> -> vector<16x96xf32>
    %80 = vector.shape_cast %79 : vector<16x96xf32> to vector<1x16x96xf32>
    %cst_37 = arith.constant dense<0.000000e+00> : vector<1xf32>
    %81 = vector.multi_reduction <add>, %80, %cst_37 [1, 2] : vector<1x16x96xf32> to vector<1xf32>
    %82 = vector.shape_cast %81 : vector<1xf32> to vector<1x1x1xf32>
    %83 = vector.extract %82[0, 0, 0] : f32 from vector<1x1x1xf32>
    %cst_38 = arith.constant 6.51041686E-4 : f32
    %84 = arith.mulf %83, %cst_38 : f32
    %85 = vector.broadcast %84 : f32 to vector<16x96xf32>
    %86 = arith.subf %79, %85 : vector<16x96xf32>
    %87 = arith.mulf %86, %86 : vector<16x96xf32>
    %88 = vector.shape_cast %87 : vector<16x96xf32> to vector<1x16x96xf32>
    %cst_39 = arith.constant dense<0.000000e+00> : vector<1xf32>
    %89 = vector.multi_reduction <add>, %88, %cst_39 [1, 2] : vector<1x16x96xf32> to vector<1xf32>
    %90 = vector.shape_cast %89 : vector<1xf32> to vector<1x1x1xf32>
    %91 = vector.extract %90[0, 0, 0] : f32 from vector<1x1x1xf32>
    %cst_40 = arith.constant 6.51041686E-4 : f32
    %92 = arith.mulf %91, %cst_40 : f32
    %cst_41 = arith.constant 9.99999974E-6 : f32
    %93 = arith.addf %92, %cst_41 : f32
    %94 = math.rsqrt %93 : f32
    %95 = vector.broadcast %94 : f32 to vector<16x96xf32>
    %96 = arith.mulf %86, %95 : vector<16x96xf32>
    %cst_42 = arith.constant dense<0xFF800000> : vector<16xf32>
    %97 = vector.multi_reduction <maximumf>, %96, %cst_42 [1] : vector<16x96xf32> to vector<16xf32>
    %98 = vector.shape_cast %97 : vector<16xf32> to vector<16x1xf32>
    %99 = vector.broadcast %98 : vector<16x1xf32> to vector<16x96xf32>
    %100 = arith.subf %96, %99 : vector<16x96xf32>
    %101 = math.exp %100 : vector<16x96xf32>
    %cst_43 = arith.constant dense<0.000000e+00> : vector<16xf32>
    %102 = vector.multi_reduction <add>, %101, %cst_43 [1] : vector<16x96xf32> to vector<16xf32>
    %103 = vector.shape_cast %102 : vector<16xf32> to vector<16x1xf32>
    %104 = vector.broadcast %103 : vector<16x1xf32> to vector<16x96xf32>
    %105 = arith.divf %101, %104 : vector<16x96xf32>
    %106 = arith.addf %72, %105 : vector<16x96xf32>
    %107 = tpu.concatenate %105, %7 in 1 : vector<16x96xf32>, vector<16x32xf32> -> vector<16x128xf32>
    %c0_44 = arith.constant 0 : index
    %c256 = arith.constant 256 : index
    %108 = vector.load %arg18[%c0_44, %c256] : memref<64x512xf32, #tpu.memory_space<vmem>>, vector<16x128xf32>
    tpu.vector_store %arg18[%c0_44, %c256], %107 {strides = array<i32>} : memref<64x512xf32, #tpu.memory_space<vmem>>, vector<16x128xf32>,
    %c3 = arith.constant 3 : index
    %c0_45 = arith.constant 0 : index
    %c0_46 = arith.constant 0 : index
    %109 = vector.load %arg5[%c3, %c0_45, %c0_46] : memref<4x16x16xf32, #tpu.memory_space<vmem>>, vector<1x16x16xf32>
    %110 = vector.shape_cast %109 : vector<1x16x16xf32> to vector<16x16xf32>
    %cst_47 = arith.constant dense<0.000000e+00> : vector<16x8xf32>
    %111 = tpu.matmul %110, %6, %cst_47 {dimension_numbers = #tpu.dot_dimension_numbers<[1], [1], [0], [0], [0, 0, 1, 0], [], []>} : vector<16x16xf32>, vector<8x16xf32>, vector<16x8xf32> -> vector<16x8xf32>
    %112 = vector.extract_strided_slice %3 {offsets = [0, 288], sizes = [8, 96], strides = [1, 1]} : vector<8x896xf32> to vector<8x96xf32>
    %cst_48 = arith.constant dense<0.000000e+00> : vector<16x96xf32>
    %113 = tpu.matmul %111, %112, %cst_48 {dimension_numbers = #tpu.dot_dimension_numbers<[1], [0], [0], [1], [0, 0, 1, 1], [], []>} : vector<16x8xf32>, vector<8x96xf32>, vector<16x96xf32> -> vector<16x96xf32>
    %114 = vector.shape_cast %113 : vector<16x96xf32> to vector<1x16x96xf32>
    %cst_49 = arith.constant dense<0.000000e+00> : vector<1xf32>
    %115 = vector.multi_reduction <add>, %114, %cst_49 [1, 2] : vector<1x16x96xf32> to vector<1xf32>
    %116 = vector.shape_cast %115 : vector<1xf32> to vector<1x1x1xf32>
    %117 = vector.extract %116[0, 0, 0] : f32 from vector<1x1x1xf32>
    %cst_50 = arith.constant 6.51041686E-4 : f32
    %118 = arith.mulf %117, %cst_50 : f32
    %119 = vector.broadcast %118 : f32 to vector<16x96xf32>
    %120 = arith.subf %113, %119 : vector<16x96xf32>
    %121 = arith.mulf %120, %120 : vector<16x96xf32>
    %122 = vector.shape_cast %121 : vector<16x96xf32> to vector<1x16x96xf32>
    %cst_51 = arith.constant dense<0.000000e+00> : vector<1xf32>
    %123 = vector.multi_reduction <add>, %122, %cst_51 [1, 2] : vector<1x16x96xf32> to vector<1xf32>
    %124 = vector.shape_cast %123 : vector<1xf32> to vector<1x1x1xf32>
    %125 = vector.extract %124[0, 0, 0] : f32 from vector<1x1x1xf32>
    %cst_52 = arith.constant 6.51041686E-4 : f32
    %126 = arith.mulf %125, %cst_52 : f32
    %cst_53 = arith.constant 9.99999974E-6 : f32
    %127 = arith.addf %126, %cst_53 : f32
    %128 = math.rsqrt %127 : f32
    %129 = vector.broadcast %128 : f32 to vector<16x96xf32>
    %130 = arith.mulf %120, %129 : vector<16x96xf32>
    %cst_54 = arith.constant dense<0xFF800000> : vector<16xf32>
    %131 = vector.multi_reduction <maximumf>, %130, %cst_54 [1] : vector<16x96xf32> to vector<16xf32>
    %132 = vector.shape_cast %131 : vector<16xf32> to vector<16x1xf32>
    %133 = vector.broadcast %132 : vector<16x1xf32> to vector<16x96xf32>
    %134 = arith.subf %130, %133 : vector<16x96xf32>
    %135 = math.exp %134 : vector<16x96xf32>
    %cst_55 = arith.constant dense<0.000000e+00> : vector<16xf32>
    %136 = vector.multi_reduction <add>, %135, %cst_55 [1] : vector<16x96xf32> to vector<16xf32>
    %137 = vector.shape_cast %136 : vector<16xf32> to vector<16x1xf32>
    %138 = vector.broadcast %137 : vector<16x1xf32> to vector<16x96xf32>
    %139 = arith.divf %135, %138 : vector<16x96xf32>
    %140 = arith.addf %106, %139 : vector<16x96xf32>
    %141 = tpu.concatenate %139, %7 in 1 : vector<16x96xf32>, vector<16x32xf32> -> vector<16x128xf32>
    %c0_56 = arith.constant 0 : index
    %c384 = arith.constant 384 : index
    %142 = vector.load %arg18[%c0_56, %c384] : memref<64x512xf32, #tpu.memory_space<vmem>>, vector<16x128xf32>
    tpu.vector_store %arg18[%c0_56, %c384], %141 {strides = array<i32>} : memref<64x512xf32, #tpu.memory_space<vmem>>, vector<16x128xf32>,
    %c0_57 = arith.constant 0 : index
    %c0_58 = arith.constant 0 : index
    %143 = vector.load %arg18[%c0_57, %c0_58] : memref<64x512xf32, #tpu.memory_space<vmem>>, vector<16x512xf32>
    %cst_59 = arith.constant dense<0.000000e+00> : vector<8x16xf32>
    %144 = tpu.matmul %4, %143, %cst_59 {dimension_numbers = #tpu.dot_dimension_numbers<[1], [1], [0], [0], [0, 0, 1, 0], [], []>} : vector<8x512xf32>, vector<16x512xf32>, vector<8x16xf32> -> vector<8x16xf32>
    %cst_60 = arith.constant 2.500000e-01 : f32
    %145 = vector.broadcast %cst_60 : f32 to vector<8x16xf32>
    %146 = arith.mulf %144, %145 : vector<8x16xf32>
    %c0_61 = arith.constant 0 : index
    %c0_62 = arith.constant 0 : index
    %147 = vector.load %arg9[%c0_61, %c0_62] : memref<16x16xf32, #tpu.memory_space<vmem>>, vector<16x16xf32>
    %cst_63 = arith.constant dense<0.000000e+00> : vector<8x16xf32>
    %148 = tpu.matmul %146, %147, %cst_63 {dimension_numbers = #tpu.dot_dimension_numbers<[1], [1], [0], [0], [0, 0, 1, 0], [], []>} : vector<8x16xf32>, vector<16x16xf32>, vector<8x16xf32> -> vector<8x16xf32>
    %c0_64 = arith.constant 0 : index
    %c0_65 = arith.constant 0 : index
    %c0_66 = arith.constant 0 : index
    %149 = vector.load %arg12[%c0_64, %c0_65, %c0_66] : memref<2x8x16xf32, #tpu.memory_space<vmem>>, vector<1x8x16xf32>
    %150 = vector.shape_cast %149 : vector<1x8x16xf32> to vector<8x16xf32>
    %151 = vector.shape_cast %148 : vector<8x16xf32> to vector<1x8x16xf32>
    tpu.vector_store %arg12[%c0_64, %c0_65, %c0_66], %151 {strides = array<i32>} : memref<2x8x16xf32, #tpu.memory_space<vmem>>, vector<1x8x16xf32>,
    %cst_67 = arith.constant 2.500000e-01 : f32
    %152 = vector.broadcast %cst_67 : f32 to vector<16x96xf32>
    %153 = arith.mulf %140, %152 : vector<16x96xf32>
    %c0_68 = arith.constant 0 : index
    %c0_69 = arith.constant 0 : index
    %c0_70 = arith.constant 0 : index
    %154 = vector.load %arg15[%c0_68, %c0_69, %c0_70] : memref<2x16x96xf32, #tpu.memory_space<vmem>>, vector<1x16x96xf32>
    %155 = vector.shape_cast %154 : vector<1x16x96xf32> to vector<16x96xf32>
    %156 = vector.shape_cast %153 : vector<16x96xf32> to vector<1x16x96xf32>
    tpu.vector_store %arg15[%c0_68, %c0_69, %c0_70], %156 {strides = array<i32>} : memref<2x16x96xf32, #tpu.memory_space<vmem>>, vector<1x16x96xf32>,
    %c0_71 = arith.constant 0 : index
    %c0_72 = arith.constant 0 : index
    %c0_73 = arith.constant 0 : index
    %157 = vector.load %arg2[%c0_71, %c0_72, %c0_73] : memref<2x8x32xf32, #tpu.memory_space<vmem>>, vector<1x8x32xf32>
    %158 = vector.shape_cast %157 : vector<1x8x32xf32> to vector<8x32xf32>
    %cst_74 = arith.constant 0.000000e+00 : f32
    %159 = vector.broadcast %cst_74 : f32 to vector<32x32xf32>
    %c0_75 = arith.constant 0 : index
    %c0_76 = arith.constant 0 : index
    %c0_77 = arith.constant 0 : index
    %160 = vector.load %arg6[%c0_75, %c0_76, %c0_77] : memref<4x32x32xf32, #tpu.memory_space<vmem>>, vector<1x32x32xf32>
    %161 = vector.shape_cast %160 : vector<1x32x32xf32> to vector<32x32xf32>
    %cst_78 = arith.constant dense<0.000000e+00> : vector<32x8xf32>
    %162 = tpu.matmul %161, %158, %cst_78 {dimension_numbers = #tpu.dot_dimension_numbers<[1], [1], [0], [0], [0, 0, 1, 0], [], []>} : vector<32x32xf32>, vector<8x32xf32>, vector<32x8xf32> -> vector<32x8xf32>
    %163 = vector.extract_strided_slice %3 {offsets = [0, 0], sizes = [8, 96], strides = [1, 1]} : vector<8x896xf32> to vector<8x96xf32>
    %cst_79 = arith.constant dense<0.000000e+00> : vector<32x96xf32>
    %164 = tpu.matmul %162, %163, %cst_79 {dimension_numbers = #tpu.dot_dimension_numbers<[1], [0], [0], [1], [0, 0, 1, 1], [], []>} : vector<32x8xf32>, vector<8x96xf32>, vector<32x96xf32> -> vector<32x96xf32>
    %165 = vector.shape_cast %164 : vector<32x96xf32> to vector<1x32x96xf32>
    %cst_80 = arith.constant dense<0.000000e+00> : vector<1xf32>
    %166 = vector.multi_reduction <add>, %165, %cst_80 [1, 2] : vector<1x32x96xf32> to vector<1xf32>
    %167 = vector.shape_cast %166 : vector<1xf32> to vector<1x1x1xf32>
    %168 = vector.extract %167[0, 0, 0] : f32 from vector<1x1x1xf32>
    %cst_81 = arith.constant 3.25520843E-4 : f32
    %169 = arith.mulf %168, %cst_81 : f32
    %170 = vector.broadcast %169 : f32 to vector<32x96xf32>
    %171 = arith.subf %164, %170 : vector<32x96xf32>
    %172 = arith.mulf %171, %171 : vector<32x96xf32>
    %173 = vector.shape_cast %172 : vector<32x96xf32> to vector<1x32x96xf32>
    %cst_82 = arith.constant dense<0.000000e+00> : vector<1xf32>
    %174 = vector.multi_reduction <add>, %173, %cst_82 [1, 2] : vector<1x32x96xf32> to vector<1xf32>
    %175 = vector.shape_cast %174 : vector<1xf32> to vector<1x1x1xf32>
    %176 = vector.extract %175[0, 0, 0] : f32 from vector<1x1x1xf32>
    %cst_83 = arith.constant 3.25520843E-4 : f32
    %177 = arith.mulf %176, %cst_83 : f32
    %cst_84 = arith.constant 9.99999974E-6 : f32
    %178 = arith.addf %177, %cst_84 : f32
    %179 = math.rsqrt %178 : f32
    %180 = vector.broadcast %179 : f32 to vector<32x96xf32>
    %181 = arith.mulf %171, %180 : vector<32x96xf32>
    %cst_85 = arith.constant dense<0xFF800000> : vector<32xf32>
    %182 = vector.multi_reduction <maximumf>, %181, %cst_85 [1] : vector<32x96xf32> to vector<32xf32>
    %183 = vector.shape_cast %182 : vector<32xf32> to vector<32x1xf32>
    %184 = vector.broadcast %183 : vector<32x1xf32> to vector<32x96xf32>
    %185 = arith.subf %181, %184 : vector<32x96xf32>
    %186 = math.exp %185 : vector<32x96xf32>
    %cst_86 = arith.constant dense<0.000000e+00> : vector<32xf32>
    %187 = vector.multi_reduction <add>, %186, %cst_86 [1] : vector<32x96xf32> to vector<32xf32>
    %188 = vector.shape_cast %187 : vector<32xf32> to vector<32x1xf32>
    %189 = vector.broadcast %188 : vector<32x1xf32> to vector<32x96xf32>
    %190 = arith.divf %186, %189 : vector<32x96xf32>
    %191 = tpu.concatenate %190, %159 in 1 : vector<32x96xf32>, vector<32x32xf32> -> vector<32x128xf32>
    %c0_87 = arith.constant 0 : index
    %c0_88 = arith.constant 0 : index
    %192 = vector.load %arg18[%c0_87, %c0_88] : memref<64x512xf32, #tpu.memory_space<vmem>>, vector<32x128xf32>
    tpu.vector_store %arg18[%c0_87, %c0_88], %191 {strides = array<i32>} : memref<64x512xf32, #tpu.memory_space<vmem>>, vector<32x128xf32>,
    %c1_89 = arith.constant 1 : index
    %c0_90 = arith.constant 0 : index
    %c0_91 = arith.constant 0 : index
    %193 = vector.load %arg6[%c1_89, %c0_90, %c0_91] : memref<4x32x32xf32, #tpu.memory_space<vmem>>, vector<1x32x32xf32>
    %194 = vector.shape_cast %193 : vector<1x32x32xf32> to vector<32x32xf32>
    %cst_92 = arith.constant dense<0.000000e+00> : vector<32x8xf32>
    %195 = tpu.matmul %194, %158, %cst_92 {dimension_numbers = #tpu.dot_dimension_numbers<[1], [1], [0], [0], [0, 0, 1, 0], [], []>} : vector<32x32xf32>, vector<8x32xf32>, vector<32x8xf32> -> vector<32x8xf32>
    %196 = vector.extract_strided_slice %3 {offsets = [0, 96], sizes = [8, 96], strides = [1, 1]} : vector<8x896xf32> to vector<8x96xf32>
    %cst_93 = arith.constant dense<0.000000e+00> : vector<32x96xf32>
    %197 = tpu.matmul %195, %196, %cst_93 {dimension_numbers = #tpu.dot_dimension_numbers<[1], [0], [0], [1], [0, 0, 1, 1], [], []>} : vector<32x8xf32>, vector<8x96xf32>, vector<32x96xf32> -> vector<32x96xf32>
    %198 = vector.shape_cast %197 : vector<32x96xf32> to vector<1x32x96xf32>
    %cst_94 = arith.constant dense<0.000000e+00> : vector<1xf32>
    %199 = vector.multi_reduction <add>, %198, %cst_94 [1, 2] : vector<1x32x96xf32> to vector<1xf32>
    %200 = vector.shape_cast %199 : vector<1xf32> to vector<1x1x1xf32>
    %201 = vector.extract %200[0, 0, 0] : f32 from vector<1x1x1xf32>
    %cst_95 = arith.constant 3.25520843E-4 : f32
    %202 = arith.mulf %201, %cst_95 : f32
    %203 = vector.broadcast %202 : f32 to vector<32x96xf32>
    %204 = arith.subf %197, %203 : vector<32x96xf32>
    %205 = arith.mulf %204, %204 : vector<32x96xf32>
    %206 = vector.shape_cast %205 : vector<32x96xf32> to vector<1x32x96xf32>
    %cst_96 = arith.constant dense<0.000000e+00> : vector<1xf32>
    %207 = vector.multi_reduction <add>, %206, %cst_96 [1, 2] : vector<1x32x96xf32> to vector<1xf32>
    %208 = vector.shape_cast %207 : vector<1xf32> to vector<1x1x1xf32>
    %209 = vector.extract %208[0, 0, 0] : f32 from vector<1x1x1xf32>
    %cst_97 = arith.constant 3.25520843E-4 : f32
    %210 = arith.mulf %209, %cst_97 : f32
    %cst_98 = arith.constant 9.99999974E-6 : f32
    %211 = arith.addf %210, %cst_98 : f32
    %212 = math.rsqrt %211 : f32
    %213 = vector.broadcast %212 : f32 to vector<32x96xf32>
    %214 = arith.mulf %204, %213 : vector<32x96xf32>
    %cst_99 = arith.constant dense<0xFF800000> : vector<32xf32>
    %215 = vector.multi_reduction <maximumf>, %214, %cst_99 [1] : vector<32x96xf32> to vector<32xf32>
    %216 = vector.shape_cast %215 : vector<32xf32> to vector<32x1xf32>
    %217 = vector.broadcast %216 : vector<32x1xf32> to vector<32x96xf32>
    %218 = arith.subf %214, %217 : vector<32x96xf32>
    %219 = math.exp %218 : vector<32x96xf32>
    %cst_100 = arith.constant dense<0.000000e+00> : vector<32xf32>
    %220 = vector.multi_reduction <add>, %219, %cst_100 [1] : vector<32x96xf32> to vector<32xf32>
    %221 = vector.shape_cast %220 : vector<32xf32> to vector<32x1xf32>
    %222 = vector.broadcast %221 : vector<32x1xf32> to vector<32x96xf32>
    %223 = arith.divf %219, %222 : vector<32x96xf32>
    %224 = arith.addf %190, %223 : vector<32x96xf32>
    %225 = tpu.concatenate %223, %159 in 1 : vector<32x96xf32>, vector<32x32xf32> -> vector<32x128xf32>
    %c0_101 = arith.constant 0 : index
    %c128_102 = arith.constant 128 : index
    %226 = vector.load %arg18[%c0_101, %c128_102] : memref<64x512xf32, #tpu.memory_space<vmem>>, vector<32x128xf32>
    tpu.vector_store %arg18[%c0_101, %c128_102], %225 {strides = array<i32>} : memref<64x512xf32, #tpu.memory_space<vmem>>, vector<32x128xf32>,
    %c2_103 = arith.constant 2 : index
    %c0_104 = arith.constant 0 : index
    %c0_105 = arith.constant 0 : index
    %227 = vector.load %arg6[%c2_103, %c0_104, %c0_105] : memref<4x32x32xf32, #tpu.memory_space<vmem>>, vector<1x32x32xf32>
    %228 = vector.shape_cast %227 : vector<1x32x32xf32> to vector<32x32xf32>
    %cst_106 = arith.constant dense<0.000000e+00> : vector<32x8xf32>
    %229 = tpu.matmul %228, %158, %cst_106 {dimension_numbers = #tpu.dot_dimension_numbers<[1], [1], [0], [0], [0, 0, 1, 0], [], []>} : vector<32x32xf32>, vector<8x32xf32>, vector<32x8xf32> -> vector<32x8xf32>
    %230 = vector.extract_strided_slice %3 {offsets = [0, 192], sizes = [8, 96], strides = [1, 1]} : vector<8x896xf32> to vector<8x96xf32>
    %cst_107 = arith.constant dense<0.000000e+00> : vector<32x96xf32>
    %231 = tpu.matmul %229, %230, %cst_107 {dimension_numbers = #tpu.dot_dimension_numbers<[1], [0], [0], [1], [0, 0, 1, 1], [], []>} : vector<32x8xf32>, vector<8x96xf32>, vector<32x96xf32> -> vector<32x96xf32>
    %232 = vector.shape_cast %231 : vector<32x96xf32> to vector<1x32x96xf32>
    %cst_108 = arith.constant dense<0.000000e+00> : vector<1xf32>
    %233 = vector.multi_reduction <add>, %232, %cst_108 [1, 2] : vector<1x32x96xf32> to vector<1xf32>
    %234 = vector.shape_cast %233 : vector<1xf32> to vector<1x1x1xf32>
    %235 = vector.extract %234[0, 0, 0] : f32 from vector<1x1x1xf32>
    %cst_109 = arith.constant 3.25520843E-4 : f32
    %236 = arith.mulf %235, %cst_109 : f32
    %237 = vector.broadcast %236 : f32 to vector<32x96xf32>
    %238 = arith.subf %231, %237 : vector<32x96xf32>
    %239 = arith.mulf %238, %238 : vector<32x96xf32>
    %240 = vector.shape_cast %239 : vector<32x96xf32> to vector<1x32x96xf32>
    %cst_110 = arith.constant dense<0.000000e+00> : vector<1xf32>
    %241 = vector.multi_reduction <add>, %240, %cst_110 [1, 2] : vector<1x32x96xf32> to vector<1xf32>
    %242 = vector.shape_cast %241 : vector<1xf32> to vector<1x1x1xf32>
    %243 = vector.extract %242[0, 0, 0] : f32 from vector<1x1x1xf32>
    %cst_111 = arith.constant 3.25520843E-4 : f32
    %244 = arith.mulf %243, %cst_111 : f32
    %cst_112 = arith.constant 9.99999974E-6 : f32
    %245 = arith.addf %244, %cst_112 : f32
    %246 = math.rsqrt %245 : f32
    %247 = vector.broadcast %246 : f32 to vector<32x96xf32>
    %248 = arith.mulf %238, %247 : vector<32x96xf32>
    %cst_113 = arith.constant dense<0xFF800000> : vector<32xf32>
    %249 = vector.multi_reduction <maximumf>, %248, %cst_113 [1] : vector<32x96xf32> to vector<32xf32>
    %250 = vector.shape_cast %249 : vector<32xf32> to vector<32x1xf32>
    %251 = vector.broadcast %250 : vector<32x1xf32> to vector<32x96xf32>
    %252 = arith.subf %248, %251 : vector<32x96xf32>
    %253 = math.exp %252 : vector<32x96xf32>
    %cst_114 = arith.constant dense<0.000000e+00> : vector<32xf32>
    %254 = vector.multi_reduction <add>, %253, %cst_114 [1] : vector<32x96xf32> to vector<32xf32>
    %255 = vector.shape_cast %254 : vector<32xf32> to vector<32x1xf32>
    %256 = vector.broadcast %255 : vector<32x1xf32> to vector<32x96xf32>
    %257 = arith.divf %253, %256 : vector<32x96xf32>
    %258 = arith.addf %224, %257 : vector<32x96xf32>
    %259 = tpu.concatenate %257, %159 in 1 : vector<32x96xf32>, vector<32x32xf32> -> vector<32x128xf32>
    %c0_115 = arith.constant 0 : index
    %c256_116 = arith.constant 256 : index
    %260 = vector.load %arg18[%c0_115, %c256_116] : memref<64x512xf32, #tpu.memory_space<vmem>>, vector<32x128xf32>
    tpu.vector_store %arg18[%c0_115, %c256_116], %259 {strides = array<i32>} : memref<64x512xf32, #tpu.memory_space<vmem>>, vector<32x128xf32>,
    %c3_117 = arith.constant 3 : index
    %c0_118 = arith.constant 0 : index
    %c0_119 = arith.constant 0 : index
    %261 = vector.load %arg6[%c3_117, %c0_118, %c0_119] : memref<4x32x32xf32, #tpu.memory_space<vmem>>, vector<1x32x32xf32>
    %262 = vector.shape_cast %261 : vector<1x32x32xf32> to vector<32x32xf32>
    %cst_120 = arith.constant dense<0.000000e+00> : vector<32x8xf32>
    %263 = tpu.matmul %262, %158, %cst_120 {dimension_numbers = #tpu.dot_dimension_numbers<[1], [1], [0], [0], [0, 0, 1, 0], [], []>} : vector<32x32xf32>, vector<8x32xf32>, vector<32x8xf32> -> vector<32x8xf32>
    %264 = vector.extract_strided_slice %3 {offsets = [0, 288], sizes = [8, 96], strides = [1, 1]} : vector<8x896xf32> to vector<8x96xf32>
    %cst_121 = arith.constant dense<0.000000e+00> : vector<32x96xf32>
    %265 = tpu.matmul %263, %264, %cst_121 {dimension_numbers = #tpu.dot_dimension_numbers<[1], [0], [0], [1], [0, 0, 1, 1], [], []>} : vector<32x8xf32>, vector<8x96xf32>, vector<32x96xf32> -> vector<32x96xf32>
    %266 = vector.shape_cast %265 : vector<32x96xf32> to vector<1x32x96xf32>
    %cst_122 = arith.constant dense<0.000000e+00> : vector<1xf32>
    %267 = vector.multi_reduction <add>, %266, %cst_122 [1, 2] : vector<1x32x96xf32> to vector<1xf32>
    %268 = vector.shape_cast %267 : vector<1xf32> to vector<1x1x1xf32>
    %269 = vector.extract %268[0, 0, 0] : f32 from vector<1x1x1xf32>
    %cst_123 = arith.constant 3.25520843E-4 : f32
    %270 = arith.mulf %269, %cst_123 : f32
    %271 = vector.broadcast %270 : f32 to vector<32x96xf32>
    %272 = arith.subf %265, %271 : vector<32x96xf32>
    %273 = arith.mulf %272, %272 : vector<32x96xf32>
    %274 = vector.shape_cast %273 : vector<32x96xf32> to vector<1x32x96xf32>
    %cst_124 = arith.constant dense<0.000000e+00> : vector<1xf32>
    %275 = vector.multi_reduction <add>, %274, %cst_124 [1, 2] : vector<1x32x96xf32> to vector<1xf32>
    %276 = vector.shape_cast %275 : vector<1xf32> to vector<1x1x1xf32>
    %277 = vector.extract %276[0, 0, 0] : f32 from vector<1x1x1xf32>
    %cst_125 = arith.constant 3.25520843E-4 : f32
    %278 = arith.mulf %277, %cst_125 : f32
    %cst_126 = arith.constant 9.99999974E-6 : f32
    %279 = arith.addf %278, %cst_126 : f32
    %280 = math.rsqrt %279 : f32
    %281 = vector.broadcast %280 : f32 to vector<32x96xf32>
    %282 = arith.mulf %272, %281 : vector<32x96xf32>
    %cst_127 = arith.constant dense<0xFF800000> : vector<32xf32>
    %283 = vector.multi_reduction <maximumf>, %282, %cst_127 [1] : vector<32x96xf32> to vector<32xf32>
    %284 = vector.shape_cast %283 : vector<32xf32> to vector<32x1xf32>
    %285 = vector.broadcast %284 : vector<32x1xf32> to vector<32x96xf32>
    %286 = arith.subf %282, %285 : vector<32x96xf32>
    %287 = math.exp %286 : vector<32x96xf32>
    %cst_128 = arith.constant dense<0.000000e+00> : vector<32xf32>
    %288 = vector.multi_reduction <add>, %287, %cst_128 [1] : vector<32x96xf32> to vector<32xf32>
    %289 = vector.shape_cast %288 : vector<32xf32> to vector<32x1xf32>
    %290 = vector.broadcast %289 : vector<32x1xf32> to vector<32x96xf32>
    %291 = arith.divf %287, %290 : vector<32x96xf32>
    %292 = arith.addf %258, %291 : vector<32x96xf32>
    %293 = tpu.concatenate %291, %159 in 1 : vector<32x96xf32>, vector<32x32xf32> -> vector<32x128xf32>
    %c0_129 = arith.constant 0 : index
    %c384_130 = arith.constant 384 : index
    %294 = vector.load %arg18[%c0_129, %c384_130] : memref<64x512xf32, #tpu.memory_space<vmem>>, vector<32x128xf32>
    tpu.vector_store %arg18[%c0_129, %c384_130], %293 {strides = array<i32>} : memref<64x512xf32, #tpu.memory_space<vmem>>, vector<32x128xf32>,
    %c0_131 = arith.constant 0 : index
    %c0_132 = arith.constant 0 : index
    %295 = vector.load %arg18[%c0_131, %c0_132] : memref<64x512xf32, #tpu.memory_space<vmem>>, vector<32x512xf32>
    %cst_133 = arith.constant dense<0.000000e+00> : vector<8x32xf32>
    %296 = tpu.matmul %4, %295, %cst_133 {dimension_numbers = #tpu.dot_dimension_numbers<[1], [1], [0], [0], [0, 0, 1, 0], [], []>} : vector<8x512xf32>, vector<32x512xf32>, vector<8x32xf32> -> vector<8x32xf32>
    %cst_134 = arith.constant 2.500000e-01 : f32
    %297 = vector.broadcast %cst_134 : f32 to vector<8x32xf32>
    %298 = arith.mulf %296, %297 : vector<8x32xf32>
    %c0_135 = arith.constant 0 : index
    %c0_136 = arith.constant 0 : index
    %299 = vector.load %arg10[%c0_135, %c0_136] : memref<32x32xf32, #tpu.memory_space<vmem>>, vector<32x32xf32>
    %cst_137 = arith.constant dense<0.000000e+00> : vector<8x32xf32>
    %300 = tpu.matmul %298, %299, %cst_137 {dimension_numbers = #tpu.dot_dimension_numbers<[1], [1], [0], [0], [0, 0, 1, 0], [], []>} : vector<8x32xf32>, vector<32x32xf32>, vector<8x32xf32> -> vector<8x32xf32>
    %c0_138 = arith.constant 0 : index
    %c0_139 = arith.constant 0 : index
    %c0_140 = arith.constant 0 : index
    %301 = vector.load %arg13[%c0_138, %c0_139, %c0_140] : memref<2x8x32xf32, #tpu.memory_space<vmem>>, vector<1x8x32xf32>
    %302 = vector.shape_cast %301 : vector<1x8x32xf32> to vector<8x32xf32>
    %303 = vector.shape_cast %300 : vector<8x32xf32> to vector<1x8x32xf32>
    tpu.vector_store %arg13[%c0_138, %c0_139, %c0_140], %303 {strides = array<i32>} : memref<2x8x32xf32, #tpu.memory_space<vmem>>, vector<1x8x32xf32>,
    %cst_141 = arith.constant 2.500000e-01 : f32
    %304 = vector.broadcast %cst_141 : f32 to vector<32x96xf32>
    %305 = arith.mulf %292, %304 : vector<32x96xf32>
    %c0_142 = arith.constant 0 : index
    %c0_143 = arith.constant 0 : index
    %c0_144 = arith.constant 0 : index
    %306 = vector.load %arg16[%c0_142, %c0_143, %c0_144] : memref<2x32x96xf32, #tpu.memory_space<vmem>>, vector<1x32x96xf32>
    %307 = vector.shape_cast %306 : vector<1x32x96xf32> to vector<32x96xf32>
    %308 = vector.shape_cast %305 : vector<32x96xf32> to vector<1x32x96xf32>
    tpu.vector_store %arg16[%c0_142, %c0_143, %c0_144], %308 {strides = array<i32>} : memref<2x32x96xf32, #tpu.memory_space<vmem>>, vector<1x32x96xf32>,
    %c0_145 = arith.constant 0 : index
    %c0_146 = arith.constant 0 : index
    %c0_147 = arith.constant 0 : index
    %309 = vector.load %arg3[%c0_145, %c0_146, %c0_147] : memref<2x8x64xf32, #tpu.memory_space<vmem>>, vector<1x8x64xf32>
    %310 = vector.shape_cast %309 : vector<1x8x64xf32> to vector<8x64xf32>
    %cst_148 = arith.constant 0.000000e+00 : f32
    %311 = vector.broadcast %cst_148 : f32 to vector<64x32xf32>
    %c0_149 = arith.constant 0 : index
    %c0_150 = arith.constant 0 : index
    %c0_151 = arith.constant 0 : index
    %312 = vector.load %arg7[%c0_149, %c0_150, %c0_151] : memref<4x64x64xf32, #tpu.memory_space<vmem>>, vector<1x64x64xf32>
    %313 = vector.shape_cast %312 : vector<1x64x64xf32> to vector<64x64xf32>
    %cst_152 = arith.constant dense<0.000000e+00> : vector<64x8xf32>
    %314 = tpu.matmul %313, %310, %cst_152 {dimension_numbers = #tpu.dot_dimension_numbers<[1], [1], [0], [0], [0, 0, 1, 0], [], []>} : vector<64x64xf32>, vector<8x64xf32>, vector<64x8xf32> -> vector<64x8xf32>
    %315 = vector.extract_strided_slice %3 {offsets = [0, 0], sizes = [8, 96], strides = [1, 1]} : vector<8x896xf32> to vector<8x96xf32>
    %cst_153 = arith.constant dense<0.000000e+00> : vector<64x96xf32>
    %316 = tpu.matmul %314, %315, %cst_153 {dimension_numbers = #tpu.dot_dimension_numbers<[1], [0], [0], [1], [0, 0, 1, 1], [], []>} : vector<64x8xf32>, vector<8x96xf32>, vector<64x96xf32> -> vector<64x96xf32>
    %317 = vector.shape_cast %316 : vector<64x96xf32> to vector<1x64x96xf32>
    %cst_154 = arith.constant dense<0.000000e+00> : vector<1xf32>
    %318 = vector.multi_reduction <add>, %317, %cst_154 [1, 2] : vector<1x64x96xf32> to vector<1xf32>
    %319 = vector.shape_cast %318 : vector<1xf32> to vector<1x1x1xf32>
    %320 = vector.extract %319[0, 0, 0] : f32 from vector<1x1x1xf32>
    %cst_155 = arith.constant 1.62760422E-4 : f32
    %321 = arith.mulf %320, %cst_155 : f32
    %322 = vector.broadcast %321 : f32 to vector<64x96xf32>
    %323 = arith.subf %316, %322 : vector<64x96xf32>
    %324 = arith.mulf %323, %323 : vector<64x96xf32>
    %325 = vector.shape_cast %324 : vector<64x96xf32> to vector<1x64x96xf32>
    %cst_156 = arith.constant dense<0.000000e+00> : vector<1xf32>
    %326 = vector.multi_reduction <add>, %325, %cst_156 [1, 2] : vector<1x64x96xf32> to vector<1xf32>
    %327 = vector.shape_cast %326 : vector<1xf32> to vector<1x1x1xf32>
    %328 = vector.extract %327[0, 0, 0] : f32 from vector<1x1x1xf32>
    %cst_157 = arith.constant 1.62760422E-4 : f32
    %329 = arith.mulf %328, %cst_157 : f32
    %cst_158 = arith.constant 9.99999974E-6 : f32
    %330 = arith.addf %329, %cst_158 : f32
    %331 = math.rsqrt %330 : f32
    %332 = vector.broadcast %331 : f32 to vector<64x96xf32>
    %333 = arith.mulf %323, %332 : vector<64x96xf32>
    %cst_159 = arith.constant dense<0xFF800000> : vector<64xf32>
    %334 = vector.multi_reduction <maximumf>, %333, %cst_159 [1] : vector<64x96xf32> to vector<64xf32>
    %335 = vector.shape_cast %334 : vector<64xf32> to vector<64x1xf32>
    %336 = vector.broadcast %335 : vector<64x1xf32> to vector<64x96xf32>
    %337 = arith.subf %333, %336 : vector<64x96xf32>
    %338 = math.exp %337 : vector<64x96xf32>
    %cst_160 = arith.constant dense<0.000000e+00> : vector<64xf32>
    %339 = vector.multi_reduction <add>, %338, %cst_160 [1] : vector<64x96xf32> to vector<64xf32>
    %340 = vector.shape_cast %339 : vector<64xf32> to vector<64x1xf32>
    %341 = vector.broadcast %340 : vector<64x1xf32> to vector<64x96xf32>
    %342 = arith.divf %338, %341 : vector<64x96xf32>
    %343 = tpu.concatenate %342, %311 in 1 : vector<64x96xf32>, vector<64x32xf32> -> vector<64x128xf32>
    %c0_161 = arith.constant 0 : index
    %c0_162 = arith.constant 0 : index
    %344 = vector.load %arg18[%c0_161, %c0_162] : memref<64x512xf32, #tpu.memory_space<vmem>>, vector<64x128xf32>
    tpu.vector_store %arg18[%c0_161, %c0_162], %343 {strides = array<i32>} : memref<64x512xf32, #tpu.memory_space<vmem>>, vector<64x128xf32>,
    %c1_163 = arith.constant 1 : index
    %c0_164 = arith.constant 0 : index
    %c0_165 = arith.constant 0 : index
    %345 = vector.load %arg7[%c1_163, %c0_164, %c0_165] : memref<4x64x64xf32, #tpu.memory_space<vmem>>, vector<1x64x64xf32>
    %346 = vector.shape_cast %345 : vector<1x64x64xf32> to vector<64x64xf32>
    %cst_166 = arith.constant dense<0.000000e+00> : vector<64x8xf32>
    %347 = tpu.matmul %346, %310, %cst_166 {dimension_numbers = #tpu.dot_dimension_numbers<[1], [1], [0], [0], [0, 0, 1, 0], [], []>} : vector<64x64xf32>, vector<8x64xf32>, vector<64x8xf32> -> vector<64x8xf32>
    %348 = vector.extract_strided_slice %3 {offsets = [0, 96], sizes = [8, 96], strides = [1, 1]} : vector<8x896xf32> to vector<8x96xf32>
    %cst_167 = arith.constant dense<0.000000e+00> : vector<64x96xf32>
    %349 = tpu.matmul %347, %348, %cst_167 {dimension_numbers = #tpu.dot_dimension_numbers<[1], [0], [0], [1], [0, 0, 1, 1], [], []>} : vector<64x8xf32>, vector<8x96xf32>, vector<64x96xf32> -> vector<64x96xf32>
    %350 = vector.shape_cast %349 : vector<64x96xf32> to vector<1x64x96xf32>
    %cst_168 = arith.constant dense<0.000000e+00> : vector<1xf32>
    %351 = vector.multi_reduction <add>, %350, %cst_168 [1, 2] : vector<1x64x96xf32> to vector<1xf32>
    %352 = vector.shape_cast %351 : vector<1xf32> to vector<1x1x1xf32>
    %353 = vector.extract %352[0, 0, 0] : f32 from vector<1x1x1xf32>
    %cst_169 = arith.constant 1.62760422E-4 : f32
    %354 = arith.mulf %353, %cst_169 : f32
    %355 = vector.broadcast %354 : f32 to vector<64x96xf32>
    %356 = arith.subf %349, %355 : vector<64x96xf32>
    %357 = arith.mulf %356, %356 : vector<64x96xf32>
    %358 = vector.shape_cast %357 : vector<64x96xf32> to vector<1x64x96xf32>
    %cst_170 = arith.constant dense<0.000000e+00> : vector<1xf32>
    %359 = vector.multi_reduction <add>, %358, %cst_170 [1, 2] : vector<1x64x96xf32> to vector<1xf32>
    %360 = vector.shape_cast %359 : vector<1xf32> to vector<1x1x1xf32>
    %361 = vector.extract %360[0, 0, 0] : f32 from vector<1x1x1xf32>
    %cst_171 = arith.constant 1.62760422E-4 : f32
    %362 = arith.mulf %361, %cst_171 : f32
    %cst_172 = arith.constant 9.99999974E-6 : f32
    %363 = arith.addf %362, %cst_172 : f32
    %364 = math.rsqrt %363 : f32
    %365 = vector.broadcast %364 : f32 to vector<64x96xf32>
    %366 = arith.mulf %356, %365 : vector<64x96xf32>
    %cst_173 = arith.constant dense<0xFF800000> : vector<64xf32>
    %367 = vector.multi_reduction <maximumf>, %366, %cst_173 [1] : vector<64x96xf32> to vector<64xf32>
    %368 = vector.shape_cast %367 : vector<64xf32> to vector<64x1xf32>
    %369 = vector.broadcast %368 : vector<64x1xf32> to vector<64x96xf32>
    %370 = arith.subf %366, %369 : vector<64x96xf32>
    %371 = math.exp %370 : vector<64x96xf32>
    %cst_174 = arith.constant dense<0.000000e+00> : vector<64xf32>
    %372 = vector.multi_reduction <add>, %371, %cst_174 [1] : vector<64x96xf32> to vector<64xf32>
    %373 = vector.shape_cast %372 : vector<64xf32> to vector<64x1xf32>
    %374 = vector.broadcast %373 : vector<64x1xf32> to vector<64x96xf32>
    %375 = arith.divf %371, %374 : vector<64x96xf32>
    %376 = arith.addf %342, %375 : vector<64x96xf32>
    %377 = tpu.concatenate %375, %311 in 1 : vector<64x96xf32>, vector<64x32xf32> -> vector<64x128xf32>
    %c0_175 = arith.constant 0 : index
    %c128_176 = arith.constant 128 : index
    %378 = vector.load %arg18[%c0_175, %c128_176] : memref<64x512xf32, #tpu.memory_space<vmem>>, vector<64x128xf32>
    tpu.vector_store %arg18[%c0_175, %c128_176], %377 {strides = array<i32>} : memref<64x512xf32, #tpu.memory_space<vmem>>, vector<64x128xf32>,
    %c2_177 = arith.constant 2 : index
    %c0_178 = arith.constant 0 : index
    %c0_179 = arith.constant 0 : index
    %379 = vector.load %arg7[%c2_177, %c0_178, %c0_179] : memref<4x64x64xf32, #tpu.memory_space<vmem>>, vector<1x64x64xf32>
    %380 = vector.shape_cast %379 : vector<1x64x64xf32> to vector<64x64xf32>
    %cst_180 = arith.constant dense<0.000000e+00> : vector<64x8xf32>
    %381 = tpu.matmul %380, %310, %cst_180 {dimension_numbers = #tpu.dot_dimension_numbers<[1], [1], [0], [0], [0, 0, 1, 0], [], []>} : vector<64x64xf32>, vector<8x64xf32>, vector<64x8xf32> -> vector<64x8xf32>
    %382 = vector.extract_strided_slice %3 {offsets = [0, 192], sizes = [8, 96], strides = [1, 1]} : vector<8x896xf32> to vector<8x96xf32>
    %cst_181 = arith.constant dense<0.000000e+00> : vector<64x96xf32>
    %383 = tpu.matmul %381, %382, %cst_181 {dimension_numbers = #tpu.dot_dimension_numbers<[1], [0], [0], [1], [0, 0, 1, 1], [], []>} : vector<64x8xf32>, vector<8x96xf32>, vector<64x96xf32> -> vector<64x96xf32>
    %384 = vector.shape_cast %383 : vector<64x96xf32> to vector<1x64x96xf32>
    %cst_182 = arith.constant dense<0.000000e+00> : vector<1xf32>
    %385 = vector.multi_reduction <add>, %384, %cst_182 [1, 2] : vector<1x64x96xf32> to vector<1xf32>
    %386 = vector.shape_cast %385 : vector<1xf32> to vector<1x1x1xf32>
    %387 = vector.extract %386[0, 0, 0] : f32 from vector<1x1x1xf32>
    %cst_183 = arith.constant 1.62760422E-4 : f32
    %388 = arith.mulf %387, %cst_183 : f32
    %389 = vector.broadcast %388 : f32 to vector<64x96xf32>
    %390 = arith.subf %383, %389 : vector<64x96xf32>
    %391 = arith.mulf %390, %390 : vector<64x96xf32>
    %392 = vector.shape_cast %391 : vector<64x96xf32> to vector<1x64x96xf32>
    %cst_184 = arith.constant dense<0.000000e+00> : vector<1xf32>
    %393 = vector.multi_reduction <add>, %392, %cst_184 [1, 2] : vector<1x64x96xf32> to vector<1xf32>
    %394 = vector.shape_cast %393 : vector<1xf32> to vector<1x1x1xf32>
    %395 = vector.extract %394[0, 0, 0] : f32 from vector<1x1x1xf32>
    %cst_185 = arith.constant 1.62760422E-4 : f32
    %396 = arith.mulf %395, %cst_185 : f32
    %cst_186 = arith.constant 9.99999974E-6 : f32
    %397 = arith.addf %396, %cst_186 : f32
    %398 = math.rsqrt %397 : f32
    %399 = vector.broadcast %398 : f32 to vector<64x96xf32>
    %400 = arith.mulf %390, %399 : vector<64x96xf32>
    %cst_187 = arith.constant dense<0xFF800000> : vector<64xf32>
    %401 = vector.multi_reduction <maximumf>, %400, %cst_187 [1] : vector<64x96xf32> to vector<64xf32>
    %402 = vector.shape_cast %401 : vector<64xf32> to vector<64x1xf32>
    %403 = vector.broadcast %402 : vector<64x1xf32> to vector<64x96xf32>
    %404 = arith.subf %400, %403 : vector<64x96xf32>
    %405 = math.exp %404 : vector<64x96xf32>
    %cst_188 = arith.constant dense<0.000000e+00> : vector<64xf32>
    %406 = vector.multi_reduction <add>, %405, %cst_188 [1] : vector<64x96xf32> to vector<64xf32>
    %407 = vector.shape_cast %406 : vector<64xf32> to vector<64x1xf32>
    %408 = vector.broadcast %407 : vector<64x1xf32> to vector<64x96xf32>
    %409 = arith.divf %405, %408 : vector<64x96xf32>
    %410 = arith.addf %376, %409 : vector<64x96xf32>
    %411 = tpu.concatenate %409, %311 in 1 : vector<64x96xf32>, vector<64x32xf32> -> vector<64x128xf32>
    %c0_189 = arith.constant 0 : index
    %c256_190 = arith.constant 256 : index
    %412 = vector.load %arg18[%c0_189, %c256_190] : memref<64x512xf32, #tpu.memory_space<vmem>>, vector<64x128xf32>
    tpu.vector_store %arg18[%c0_189, %c256_190], %411 {strides = array<i32>} : memref<64x512xf32, #tpu.memory_space<vmem>>, vector<64x128xf32>,
    %c3_191 = arith.constant 3 : index
    %c0_192 = arith.constant 0 : index
    %c0_193 = arith.constant 0 : index
    %413 = vector.load %arg7[%c3_191, %c0_192, %c0_193] : memref<4x64x64xf32, #tpu.memory_space<vmem>>, vector<1x64x64xf32>
    %414 = vector.shape_cast %413 : vector<1x64x64xf32> to vector<64x64xf32>
    %cst_194 = arith.constant dense<0.000000e+00> : vector<64x8xf32>
    %415 = tpu.matmul %414, %310, %cst_194 {dimension_numbers = #tpu.dot_dimension_numbers<[1], [1], [0], [0], [0, 0, 1, 0], [], []>} : vector<64x64xf32>, vector<8x64xf32>, vector<64x8xf32> -> vector<64x8xf32>
    %416 = vector.extract_strided_slice %3 {offsets = [0, 288], sizes = [8, 96], strides = [1, 1]} : vector<8x896xf32> to vector<8x96xf32>
    %cst_195 = arith.constant dense<0.000000e+00> : vector<64x96xf32>
    %417 = tpu.matmul %415, %416, %cst_195 {dimension_numbers = #tpu.dot_dimension_numbers<[1], [0], [0], [1], [0, 0, 1, 1], [], []>} : vector<64x8xf32>, vector<8x96xf32>, vector<64x96xf32> -> vector<64x96xf32>
    %418 = vector.shape_cast %417 : vector<64x96xf32> to vector<1x64x96xf32>
    %cst_196 = arith.constant dense<0.000000e+00> : vector<1xf32>
    %419 = vector.multi_reduction <add>, %418, %cst_196 [1, 2] : vector<1x64x96xf32> to vector<1xf32>
    %420 = vector.shape_cast %419 : vector<1xf32> to vector<1x1x1xf32>
    %421 = vector.extract %420[0, 0, 0] : f32 from vector<1x1x1xf32>
    %cst_197 = arith.constant 1.62760422E-4 : f32
    %422 = arith.mulf %421, %cst_197 : f32
    %423 = vector.broadcast %422 : f32 to vector<64x96xf32>
    %424 = arith.subf %417, %423 : vector<64x96xf32>
    %425 = arith.mulf %424, %424 : vector<64x96xf32>
    %426 = vector.shape_cast %425 : vector<64x96xf32> to vector<1x64x96xf32>
    %cst_198 = arith.constant dense<0.000000e+00> : vector<1xf32>
    %427 = vector.multi_reduction <add>, %426, %cst_198 [1, 2] : vector<1x64x96xf32> to vector<1xf32>
    %428 = vector.shape_cast %427 : vector<1xf32> to vector<1x1x1xf32>
    %429 = vector.extract %428[0, 0, 0] : f32 from vector<1x1x1xf32>
    %cst_199 = arith.constant 1.62760422E-4 : f32
    %430 = arith.mulf %429, %cst_199 : f32
    %cst_200 = arith.constant 9.99999974E-6 : f32
    %431 = arith.addf %430, %cst_200 : f32
    %432 = math.rsqrt %431 : f32
    %433 = vector.broadcast %432 : f32 to vector<64x96xf32>
    %434 = arith.mulf %424, %433 : vector<64x96xf32>
    %cst_201 = arith.constant dense<0xFF800000> : vector<64xf32>
    %435 = vector.multi_reduction <maximumf>, %434, %cst_201 [1] : vector<64x96xf32> to vector<64xf32>
    %436 = vector.shape_cast %435 : vector<64xf32> to vector<64x1xf32>
    %437 = vector.broadcast %436 : vector<64x1xf32> to vector<64x96xf32>
    %438 = arith.subf %434, %437 : vector<64x96xf32>
    %439 = math.exp %438 : vector<64x96xf32>
    %cst_202 = arith.constant dense<0.000000e+00> : vector<64xf32>
    %440 = vector.multi_reduction <add>, %439, %cst_202 [1] : vector<64x96xf32> to vector<64xf32>
    %441 = vector.shape_cast %440 : vector<64xf32> to vector<64x1xf32>
    %442 = vector.broadcast %441 : vector<64x1xf32> to vector<64x96xf32>
    %443 = arith.divf %439, %442 : vector<64x96xf32>
    %444 = arith.addf %410, %443 : vector<64x96xf32>
    %445 = tpu.concatenate %443, %311 in 1 : vector<64x96xf32>, vector<64x32xf32> -> vector<64x128xf32>
    %c0_203 = arith.constant 0 : index
    %c384_204 = arith.constant 384 : index
    %446 = vector.load %arg18[%c0_203, %c384_204] : memref<64x512xf32, #tpu.memory_space<vmem>>, vector<64x128xf32>
    tpu.vector_store %arg18[%c0_203, %c384_204], %445 {strides = array<i32>} : memref<64x512xf32, #tpu.memory_space<vmem>>, vector<64x128xf32>,
    %c0_205 = arith.constant 0 : index
    %c0_206 = arith.constant 0 : index
    %447 = vector.load %arg18[%c0_205, %c0_206] : memref<64x512xf32, #tpu.memory_space<vmem>>, vector<64x512xf32>
    %cst_207 = arith.constant dense<0.000000e+00> : vector<8x64xf32>
    %448 = tpu.matmul %4, %447, %cst_207 {dimension_numbers = #tpu.dot_dimension_numbers<[1], [1], [0], [0], [0, 0, 1, 0], [], []>} : vector<8x512xf32>, vector<64x512xf32>, vector<8x64xf32> -> vector<8x64xf32>
    %cst_208 = arith.constant 2.500000e-01 : f32
    %449 = vector.broadcast %cst_208 : f32 to vector<8x64xf32>
    %450 = arith.mulf %448, %449 : vector<8x64xf32>
    %c0_209 = arith.constant 0 : index
    %c0_210 = arith.constant 0 : index
    %451 = vector.load %arg11[%c0_209, %c0_210] : memref<64x64xf32, #tpu.memory_space<vmem>>, vector<64x64xf32>
    %cst_211 = arith.constant dense<0.000000e+00> : vector<8x64xf32>
    %452 = tpu.matmul %450, %451, %cst_211 {dimension_numbers = #tpu.dot_dimension_numbers<[1], [1], [0], [0], [0, 0, 1, 0], [], []>} : vector<8x64xf32>, vector<64x64xf32>, vector<8x64xf32> -> vector<8x64xf32>
    %c0_212 = arith.constant 0 : index
    %c0_213 = arith.constant 0 : index
    %c0_214 = arith.constant 0 : index
    %453 = vector.load %arg14[%c0_212, %c0_213, %c0_214] : memref<2x8x64xf32, #tpu.memory_space<vmem>>, vector<1x8x64xf32>
    %454 = vector.shape_cast %453 : vector<1x8x64xf32> to vector<8x64xf32>
    %455 = vector.shape_cast %452 : vector<8x64xf32> to vector<1x8x64xf32>
    tpu.vector_store %arg14[%c0_212, %c0_213, %c0_214], %455 {strides = array<i32>} : memref<2x8x64xf32, #tpu.memory_space<vmem>>, vector<1x8x64xf32>,
    %cst_215 = arith.constant 2.500000e-01 : f32
    %456 = vector.broadcast %cst_215 : f32 to vector<64x96xf32>
    %457 = arith.mulf %444, %456 : vector<64x96xf32>
    %c0_216 = arith.constant 0 : index
    %c0_217 = arith.constant 0 : index
    %c0_218 = arith.constant 0 : index
    %458 = vector.load %arg17[%c0_216, %c0_217, %c0_218] : memref<2x64x96xf32, #tpu.memory_space<vmem>>, vector<1x64x96xf32>
    %459 = vector.shape_cast %458 : vector<1x64x96xf32> to vector<64x96xf32>
    %460 = vector.shape_cast %457 : vector<64x96xf32> to vector<1x64x96xf32>
    tpu.vector_store %arg17[%c0_216, %c0_217, %c0_218], %460 {strides = array<i32>} : memref<2x64x96xf32, #tpu.memory_space<vmem>>, vector<1x64x96xf32>,
    %461 = vector.extract_strided_slice %2 {offsets = [8, 0], sizes = [8, 896], strides = [1, 1]} : vector<16x896xf32> to vector<8x896xf32>
    %462 = vector.extract_strided_slice %461 {offsets = [0, 384], sizes = [8, 512], strides = [1, 1]} : vector<8x896xf32> to vector<8x512xf32>
    %c1_219 = arith.constant 1 : index
    %c0_220 = arith.constant 0 : index
    %c0_221 = arith.constant 0 : index
    %463 = vector.load %arg1[%c1_219, %c0_220, %c0_221] : memref<2x8x16xf32, #tpu.memory_space<vmem>>, vector<1x8x16xf32>
    %464 = vector.shape_cast %463 : vector<1x8x16xf32> to vector<8x16xf32>
    %cst_222 = arith.constant 0.000000e+00 : f32
    %465 = vector.broadcast %cst_222 : f32 to vector<16x32xf32>
    %c0_223 = arith.constant 0 : index
    %c0_224 = arith.constant 0 : index
    %c0_225 = arith.constant 0 : index
    %466 = vector.load %arg5[%c0_223, %c0_224, %c0_225] : memref<4x16x16xf32, #tpu.memory_space<vmem>>, vector<1x16x16xf32>
    %467 = vector.shape_cast %466 : vector<1x16x16xf32> to vector<16x16xf32>
    %cst_226 = arith.constant dense<0.000000e+00> : vector<16x8xf32>
    %468 = tpu.matmul %467, %464, %cst_226 {dimension_numbers = #tpu.dot_dimension_numbers<[1], [1], [0], [0], [0, 0, 1, 0], [], []>} : vector<16x16xf32>, vector<8x16xf32>, vector<16x8xf32> -> vector<16x8xf32>
    %469 = vector.extract_strided_slice %461 {offsets = [0, 0], sizes = [8, 96], strides = [1, 1]} : vector<8x896xf32> to vector<8x96xf32>
    %cst_227 = arith.constant dense<0.000000e+00> : vector<16x96xf32>
    %470 = tpu.matmul %468, %469, %cst_227 {dimension_numbers = #tpu.dot_dimension_numbers<[1], [0], [0], [1], [0, 0, 1, 1], [], []>} : vector<16x8xf32>, vector<8x96xf32>, vector<16x96xf32> -> vector<16x96xf32>
    %471 = vector.shape_cast %470 : vector<16x96xf32> to vector<1x16x96xf32>
    %cst_228 = arith.constant dense<0.000000e+00> : vector<1xf32>
    %472 = vector.multi_reduction <add>, %471, %cst_228 [1, 2] : vector<1x16x96xf32> to vector<1xf32>
    %473 = vector.shape_cast %472 : vector<1xf32> to vector<1x1x1xf32>
    %474 = vector.extract %473[0, 0, 0] : f32 from vector<1x1x1xf32>
    %cst_229 = arith.constant 6.51041686E-4 : f32
    %475 = arith.mulf %474, %cst_229 : f32
    %476 = vector.broadcast %475 : f32 to vector<16x96xf32>
    %477 = arith.subf %470, %476 : vector<16x96xf32>
    %478 = arith.mulf %477, %477 : vector<16x96xf32>
    %479 = vector.shape_cast %478 : vector<16x96xf32> to vector<1x16x96xf32>
    %cst_230 = arith.constant dense<0.000000e+00> : vector<1xf32>
    %480 = vector.multi_reduction <add>, %479, %cst_230 [1, 2] : vector<1x16x96xf32> to vector<1xf32>
    %481 = vector.shape_cast %480 : vector<1xf32> to vector<1x1x1xf32>
    %482 = vector.extract %481[0, 0, 0] : f32 from vector<1x1x1xf32>
    %cst_231 = arith.constant 6.51041686E-4 : f32
    %483 = arith.mulf %482, %cst_231 : f32
    %cst_232 = arith.constant 9.99999974E-6 : f32
    %484 = arith.addf %483, %cst_232 : f32
    %485 = math.rsqrt %484 : f32
    %486 = vector.broadcast %485 : f32 to vector<16x96xf32>
    %487 = arith.mulf %477, %486 : vector<16x96xf32>
    %cst_233 = arith.constant dense<0xFF800000> : vector<16xf32>
    %488 = vector.multi_reduction <maximumf>, %487, %cst_233 [1] : vector<16x96xf32> to vector<16xf32>
    %489 = vector.shape_cast %488 : vector<16xf32> to vector<16x1xf32>
    %490 = vector.broadcast %489 : vector<16x1xf32> to vector<16x96xf32>
    %491 = arith.subf %487, %490 : vector<16x96xf32>
    %492 = math.exp %491 : vector<16x96xf32>
    %cst_234 = arith.constant dense<0.000000e+00> : vector<16xf32>
    %493 = vector.multi_reduction <add>, %492, %cst_234 [1] : vector<16x96xf32> to vector<16xf32>
    %494 = vector.shape_cast %493 : vector<16xf32> to vector<16x1xf32>
    %495 = vector.broadcast %494 : vector<16x1xf32> to vector<16x96xf32>
    %496 = arith.divf %492, %495 : vector<16x96xf32>
    %497 = tpu.concatenate %496, %465 in 1 : vector<16x96xf32>, vector<16x32xf32> -> vector<16x128xf32>
    %c0_235 = arith.constant 0 : index
    %c0_236 = arith.constant 0 : index
    %498 = vector.load %arg18[%c0_235, %c0_236] : memref<64x512xf32, #tpu.memory_space<vmem>>, vector<16x128xf32>
    tpu.vector_store %arg18[%c0_235, %c0_236], %497 {strides = array<i32>} : memref<64x512xf32, #tpu.memory_space<vmem>>, vector<16x128xf32>,
    %c1_237 = arith.constant 1 : index
    %c0_238 = arith.constant 0 : index
    %c0_239 = arith.constant 0 : index
    %499 = vector.load %arg5[%c1_237, %c0_238, %c0_239] : memref<4x16x16xf32, #tpu.memory_space<vmem>>, vector<1x16x16xf32>
    %500 = vector.shape_cast %499 : vector<1x16x16xf32> to vector<16x16xf32>
    %cst_240 = arith.constant dense<0.000000e+00> : vector<16x8xf32>
    %501 = tpu.matmul %500, %464, %cst_240 {dimension_numbers = #tpu.dot_dimension_numbers<[1], [1], [0], [0], [0, 0, 1, 0], [], []>} : vector<16x16xf32>, vector<8x16xf32>, vector<16x8xf32> -> vector<16x8xf32>
    %502 = vector.extract_strided_slice %461 {offsets = [0, 96], sizes = [8, 96], strides = [1, 1]} : vector<8x896xf32> to vector<8x96xf32>
    %cst_241 = arith.constant dense<0.000000e+00> : vector<16x96xf32>
    %503 = tpu.matmul %501, %502, %cst_241 {dimension_numbers = #tpu.dot_dimension_numbers<[1], [0], [0], [1], [0, 0, 1, 1], [], []>} : vector<16x8xf32>, vector<8x96xf32>, vector<16x96xf32> -> vector<16x96xf32>
    %504 = vector.shape_cast %503 : vector<16x96xf32> to vector<1x16x96xf32>
    %cst_242 = arith.constant dense<0.000000e+00> : vector<1xf32>
    %505 = vector.multi_reduction <add>, %504, %cst_242 [1, 2] : vector<1x16x96xf32> to vector<1xf32>
    %506 = vector.shape_cast %505 : vector<1xf32> to vector<1x1x1xf32>
    %507 = vector.extract %506[0, 0, 0] : f32 from vector<1x1x1xf32>
    %cst_243 = arith.constant 6.51041686E-4 : f32
    %508 = arith.mulf %507, %cst_243 : f32
    %509 = vector.broadcast %508 : f32 to vector<16x96xf32>
    %510 = arith.subf %503, %509 : vector<16x96xf32>
    %511 = arith.mulf %510, %510 : vector<16x96xf32>
    %512 = vector.shape_cast %511 : vector<16x96xf32> to vector<1x16x96xf32>
    %cst_244 = arith.constant dense<0.000000e+00> : vector<1xf32>
    %513 = vector.multi_reduction <add>, %512, %cst_244 [1, 2] : vector<1x16x96xf32> to vector<1xf32>
    %514 = vector.shape_cast %513 : vector<1xf32> to vector<1x1x1xf32>
    %515 = vector.extract %514[0, 0, 0] : f32 from vector<1x1x1xf32>
    %cst_245 = arith.constant 6.51041686E-4 : f32
    %516 = arith.mulf %515, %cst_245 : f32
    %cst_246 = arith.constant 9.99999974E-6 : f32
    %517 = arith.addf %516, %cst_246 : f32
    %518 = math.rsqrt %517 : f32
    %519 = vector.broadcast %518 : f32 to vector<16x96xf32>
    %520 = arith.mulf %510, %519 : vector<16x96xf32>
    %cst_247 = arith.constant dense<0xFF800000> : vector<16xf32>
    %521 = vector.multi_reduction <maximumf>, %520, %cst_247 [1] : vector<16x96xf32> to vector<16xf32>
    %522 = vector.shape_cast %521 : vector<16xf32> to vector<16x1xf32>
    %523 = vector.broadcast %522 : vector<16x1xf32> to vector<16x96xf32>
    %524 = arith.subf %520, %523 : vector<16x96xf32>
    %525 = math.exp %524 : vector<16x96xf32>
    %cst_248 = arith.constant dense<0.000000e+00> : vector<16xf32>
    %526 = vector.multi_reduction <add>, %525, %cst_248 [1] : vector<16x96xf32> to vector<16xf32>
    %527 = vector.shape_cast %526 : vector<16xf32> to vector<16x1xf32>
    %528 = vector.broadcast %527 : vector<16x1xf32> to vector<16x96xf32>
    %529 = arith.divf %525, %528 : vector<16x96xf32>
    %530 = arith.addf %496, %529 : vector<16x96xf32>
    %531 = tpu.concatenate %529, %465 in 1 : vector<16x96xf32>, vector<16x32xf32> -> vector<16x128xf32>
    %c0_249 = arith.constant 0 : index
    %c128_250 = arith.constant 128 : index
    %532 = vector.load %arg18[%c0_249, %c128_250] : memref<64x512xf32, #tpu.memory_space<vmem>>, vector<16x128xf32>
    tpu.vector_store %arg18[%c0_249, %c128_250], %531 {strides = array<i32>} : memref<64x512xf32, #tpu.memory_space<vmem>>, vector<16x128xf32>,
    %c2_251 = arith.constant 2 : index
    %c0_252 = arith.constant 0 : index
    %c0_253 = arith.constant 0 : index
    %533 = vector.load %arg5[%c2_251, %c0_252, %c0_253] : memref<4x16x16xf32, #tpu.memory_space<vmem>>, vector<1x16x16xf32>
    %534 = vector.shape_cast %533 : vector<1x16x16xf32> to vector<16x16xf32>
    %cst_254 = arith.constant dense<0.000000e+00> : vector<16x8xf32>
    %535 = tpu.matmul %534, %464, %cst_254 {dimension_numbers = #tpu.dot_dimension_numbers<[1], [1], [0], [0], [0, 0, 1, 0], [], []>} : vector<16x16xf32>, vector<8x16xf32>, vector<16x8xf32> -> vector<16x8xf32>
    %536 = vector.extract_strided_slice %461 {offsets = [0, 192], sizes = [8, 96], strides = [1, 1]} : vector<8x896xf32> to vector<8x96xf32>
    %cst_255 = arith.constant dense<0.000000e+00> : vector<16x96xf32>
    %537 = tpu.matmul %535, %536, %cst_255 {dimension_numbers = #tpu.dot_dimension_numbers<[1], [0], [0], [1], [0, 0, 1, 1], [], []>} : vector<16x8xf32>, vector<8x96xf32>, vector<16x96xf32> -> vector<16x96xf32>
    %538 = vector.shape_cast %537 : vector<16x96xf32> to vector<1x16x96xf32>
    %cst_256 = arith.constant dense<0.000000e+00> : vector<1xf32>
    %539 = vector.multi_reduction <add>, %538, %cst_256 [1, 2] : vector<1x16x96xf32> to vector<1xf32>
    %540 = vector.shape_cast %539 : vector<1xf32> to vector<1x1x1xf32>
    %541 = vector.extract %540[0, 0, 0] : f32 from vector<1x1x1xf32>
    %cst_257 = arith.constant 6.51041686E-4 : f32
    %542 = arith.mulf %541, %cst_257 : f32
    %543 = vector.broadcast %542 : f32 to vector<16x96xf32>
    %544 = arith.subf %537, %543 : vector<16x96xf32>
    %545 = arith.mulf %544, %544 : vector<16x96xf32>
    %546 = vector.shape_cast %545 : vector<16x96xf32> to vector<1x16x96xf32>
    %cst_258 = arith.constant dense<0.000000e+00> : vector<1xf32>
    %547 = vector.multi_reduction <add>, %546, %cst_258 [1, 2] : vector<1x16x96xf32> to vector<1xf32>
    %548 = vector.shape_cast %547 : vector<1xf32> to vector<1x1x1xf32>
    %549 = vector.extract %548[0, 0, 0] : f32 from vector<1x1x1xf32>
    %cst_259 = arith.constant 6.51041686E-4 : f32
    %550 = arith.mulf %549, %cst_259 : f32
    %cst_260 = arith.constant 9.99999974E-6 : f32
    %551 = arith.addf %550, %cst_260 : f32
    %552 = math.rsqrt %551 : f32
    %553 = vector.broadcast %552 : f32 to vector<16x96xf32>
    %554 = arith.mulf %544, %553 : vector<16x96xf32>
    %cst_261 = arith.constant dense<0xFF800000> : vector<16xf32>
    %555 = vector.multi_reduction <maximumf>, %554, %cst_261 [1] : vector<16x96xf32> to vector<16xf32>
    %556 = vector.shape_cast %555 : vector<16xf32> to vector<16x1xf32>
    %557 = vector.broadcast %556 : vector<16x1xf32> to vector<16x96xf32>
    %558 = arith.subf %554, %557 : vector<16x96xf32>
    %559 = math.exp %558 : vector<16x96xf32>
    %cst_262 = arith.constant dense<0.000000e+00> : vector<16xf32>
    %560 = vector.multi_reduction <add>, %559, %cst_262 [1] : vector<16x96xf32> to vector<16xf32>
    %561 = vector.shape_cast %560 : vector<16xf32> to vector<16x1xf32>
    %562 = vector.broadcast %561 : vector<16x1xf32> to vector<16x96xf32>
    %563 = arith.divf %559, %562 : vector<16x96xf32>
    %564 = arith.addf %530, %563 : vector<16x96xf32>
    %565 = tpu.concatenate %563, %465 in 1 : vector<16x96xf32>, vector<16x32xf32> -> vector<16x128xf32>
    %c0_263 = arith.constant 0 : index
    %c256_264 = arith.constant 256 : index
    %566 = vector.load %arg18[%c0_263, %c256_264] : memref<64x512xf32, #tpu.memory_space<vmem>>, vector<16x128xf32>
    tpu.vector_store %arg18[%c0_263, %c256_264], %565 {strides = array<i32>} : memref<64x512xf32, #tpu.memory_space<vmem>>, vector<16x128xf32>,
    %c3_265 = arith.constant 3 : index
    %c0_266 = arith.constant 0 : index
    %c0_267 = arith.constant 0 : index
    %567 = vector.load %arg5[%c3_265, %c0_266, %c0_267] : memref<4x16x16xf32, #tpu.memory_space<vmem>>, vector<1x16x16xf32>
    %568 = vector.shape_cast %567 : vector<1x16x16xf32> to vector<16x16xf32>
    %cst_268 = arith.constant dense<0.000000e+00> : vector<16x8xf32>
    %569 = tpu.matmul %568, %464, %cst_268 {dimension_numbers = #tpu.dot_dimension_numbers<[1], [1], [0], [0], [0, 0, 1, 0], [], []>} : vector<16x16xf32>, vector<8x16xf32>, vector<16x8xf32> -> vector<16x8xf32>
    %570 = vector.extract_strided_slice %461 {offsets = [0, 288], sizes = [8, 96], strides = [1, 1]} : vector<8x896xf32> to vector<8x96xf32>
    %cst_269 = arith.constant dense<0.000000e+00> : vector<16x96xf32>
    %571 = tpu.matmul %569, %570, %cst_269 {dimension_numbers = #tpu.dot_dimension_numbers<[1], [0], [0], [1], [0, 0, 1, 1], [], []>} : vector<16x8xf32>, vector<8x96xf32>, vector<16x96xf32> -> vector<16x96xf32>
    %572 = vector.shape_cast %571 : vector<16x96xf32> to vector<1x16x96xf32>
    %cst_270 = arith.constant dense<0.000000e+00> : vector<1xf32>
    %573 = vector.multi_reduction <add>, %572, %cst_270 [1, 2] : vector<1x16x96xf32> to vector<1xf32>
    %574 = vector.shape_cast %573 : vector<1xf32> to vector<1x1x1xf32>
    %575 = vector.extract %574[0, 0, 0] : f32 from vector<1x1x1xf32>
    %cst_271 = arith.constant 6.51041686E-4 : f32
    %576 = arith.mulf %575, %cst_271 : f32
    %577 = vector.broadcast %576 : f32 to vector<16x96xf32>
    %578 = arith.subf %571, %577 : vector<16x96xf32>
    %579 = arith.mulf %578, %578 : vector<16x96xf32>
    %580 = vector.shape_cast %579 : vector<16x96xf32> to vector<1x16x96xf32>
    %cst_272 = arith.constant dense<0.000000e+00> : vector<1xf32>
    %581 = vector.multi_reduction <add>, %580, %cst_272 [1, 2] : vector<1x16x96xf32> to vector<1xf32>
    %582 = vector.shape_cast %581 : vector<1xf32> to vector<1x1x1xf32>
    %583 = vector.extract %582[0, 0, 0] : f32 from vector<1x1x1xf32>
    %cst_273 = arith.constant 6.51041686E-4 : f32
    %584 = arith.mulf %583, %cst_273 : f32
    %cst_274 = arith.constant 9.99999974E-6 : f32
    %585 = arith.addf %584, %cst_274 : f32
    %586 = math.rsqrt %585 : f32
    %587 = vector.broadcast %586 : f32 to vector<16x96xf32>
    %588 = arith.mulf %578, %587 : vector<16x96xf32>
    %cst_275 = arith.constant dense<0xFF800000> : vector<16xf32>
    %589 = vector.multi_reduction <maximumf>, %588, %cst_275 [1] : vector<16x96xf32> to vector<16xf32>
    %590 = vector.shape_cast %589 : vector<16xf32> to vector<16x1xf32>
    %591 = vector.broadcast %590 : vector<16x1xf32> to vector<16x96xf32>
    %592 = arith.subf %588, %591 : vector<16x96xf32>
    %593 = math.exp %592 : vector<16x96xf32>
    %cst_276 = arith.constant dense<0.000000e+00> : vector<16xf32>
    %594 = vector.multi_reduction <add>, %593, %cst_276 [1] : vector<16x96xf32> to vector<16xf32>
    %595 = vector.shape_cast %594 : vector<16xf32> to vector<16x1xf32>
    %596 = vector.broadcast %595 : vector<16x1xf32> to vector<16x96xf32>
    %597 = arith.divf %593, %596 : vector<16x96xf32>
    %598 = arith.addf %564, %597 : vector<16x96xf32>
    %599 = tpu.concatenate %597, %465 in 1 : vector<16x96xf32>, vector<16x32xf32> -> vector<16x128xf32>
    %c0_277 = arith.constant 0 : index
    %c384_278 = arith.constant 384 : index
    %600 = vector.load %arg18[%c0_277, %c384_278] : memref<64x512xf32, #tpu.memory_space<vmem>>, vector<16x128xf32>
    tpu.vector_store %arg18[%c0_277, %c384_278], %599 {strides = array<i32>} : memref<64x512xf32, #tpu.memory_space<vmem>>, vector<16x128xf32>,
    %c0_279 = arith.constant 0 : index
    %c0_280 = arith.constant 0 : index
    %601 = vector.load %arg18[%c0_279, %c0_280] : memref<64x512xf32, #tpu.memory_space<vmem>>, vector<16x512xf32>
    %cst_281 = arith.constant dense<0.000000e+00> : vector<8x16xf32>
    %602 = tpu.matmul %462, %601, %cst_281 {dimension_numbers = #tpu.dot_dimension_numbers<[1], [1], [0], [0], [0, 0, 1, 0], [], []>} : vector<8x512xf32>, vector<16x512xf32>, vector<8x16xf32> -> vector<8x16xf32>
    %cst_282 = arith.constant 2.500000e-01 : f32
    %603 = vector.broadcast %cst_282 : f32 to vector<8x16xf32>
    %604 = arith.mulf %602, %603 : vector<8x16xf32>
    %c0_283 = arith.constant 0 : index
    %c0_284 = arith.constant 0 : index
    %605 = vector.load %arg9[%c0_283, %c0_284] : memref<16x16xf32, #tpu.memory_space<vmem>>, vector<16x16xf32>
    %cst_285 = arith.constant dense<0.000000e+00> : vector<8x16xf32>
    %606 = tpu.matmul %604, %605, %cst_285 {dimension_numbers = #tpu.dot_dimension_numbers<[1], [1], [0], [0], [0, 0, 1, 0], [], []>} : vector<8x16xf32>, vector<16x16xf32>, vector<8x16xf32> -> vector<8x16xf32>
    %c1_286 = arith.constant 1 : index
    %c0_287 = arith.constant 0 : index
    %c0_288 = arith.constant 0 : index
    %607 = vector.load %arg12[%c1_286, %c0_287, %c0_288] : memref<2x8x16xf32, #tpu.memory_space<vmem>>, vector<1x8x16xf32>
    %608 = vector.shape_cast %607 : vector<1x8x16xf32> to vector<8x16xf32>
    %609 = vector.shape_cast %606 : vector<8x16xf32> to vector<1x8x16xf32>
    tpu.vector_store %arg12[%c1_286, %c0_287, %c0_288], %609 {strides = array<i32>} : memref<2x8x16xf32, #tpu.memory_space<vmem>>, vector<1x8x16xf32>,
    %cst_289 = arith.constant 2.500000e-01 : f32
    %610 = vector.broadcast %cst_289 : f32 to vector<16x96xf32>
    %611 = arith.mulf %598, %610 : vector<16x96xf32>
    %c1_290 = arith.constant 1 : index
    %c0_291 = arith.constant 0 : index
    %c0_292 = arith.constant 0 : index
    %612 = vector.load %arg15[%c1_290, %c0_291, %c0_292] : memref<2x16x96xf32, #tpu.memory_space<vmem>>, vector<1x16x96xf32>
    %613 = vector.shape_cast %612 : vector<1x16x96xf32> to vector<16x96xf32>
    %614 = vector.shape_cast %611 : vector<16x96xf32> to vector<1x16x96xf32>
    tpu.vector_store %arg15[%c1_290, %c0_291, %c0_292], %614 {strides = array<i32>} : memref<2x16x96xf32, #tpu.memory_space<vmem>>, vector<1x16x96xf32>,
    %c1_293 = arith.constant 1 : index
    %c0_294 = arith.constant 0 : index
    %c0_295 = arith.constant 0 : index
    %615 = vector.load %arg2[%c1_293, %c0_294, %c0_295] : memref<2x8x32xf32, #tpu.memory_space<vmem>>, vector<1x8x32xf32>
    %616 = vector.shape_cast %615 : vector<1x8x32xf32> to vector<8x32xf32>
    %cst_296 = arith.constant 0.000000e+00 : f32
    %617 = vector.broadcast %cst_296 : f32 to vector<32x32xf32>
    %c0_297 = arith.constant 0 : index
    %c0_298 = arith.constant 0 : index
    %c0_299 = arith.constant 0 : index
    %618 = vector.load %arg6[%c0_297, %c0_298, %c0_299] : memref<4x32x32xf32, #tpu.memory_space<vmem>>, vector<1x32x32xf32>
    %619 = vector.shape_cast %618 : vector<1x32x32xf32> to vector<32x32xf32>
    %cst_300 = arith.constant dense<0.000000e+00> : vector<32x8xf32>
    %620 = tpu.matmul %619, %616, %cst_300 {dimension_numbers = #tpu.dot_dimension_numbers<[1], [1], [0], [0], [0, 0, 1, 0], [], []>} : vector<32x32xf32>, vector<8x32xf32>, vector<32x8xf32> -> vector<32x8xf32>
    %621 = vector.extract_strided_slice %461 {offsets = [0, 0], sizes = [8, 96], strides = [1, 1]} : vector<8x896xf32> to vector<8x96xf32>
    %cst_301 = arith.constant dense<0.000000e+00> : vector<32x96xf32>
    %622 = tpu.matmul %620, %621, %cst_301 {dimension_numbers = #tpu.dot_dimension_numbers<[1], [0], [0], [1], [0, 0, 1, 1], [], []>} : vector<32x8xf32>, vector<8x96xf32>, vector<32x96xf32> -> vector<32x96xf32>
    %623 = vector.shape_cast %622 : vector<32x96xf32> to vector<1x32x96xf32>
    %cst_302 = arith.constant dense<0.000000e+00> : vector<1xf32>
    %624 = vector.multi_reduction <add>, %623, %cst_302 [1, 2] : vector<1x32x96xf32> to vector<1xf32>
    %625 = vector.shape_cast %624 : vector<1xf32> to vector<1x1x1xf32>
    %626 = vector.extract %625[0, 0, 0] : f32 from vector<1x1x1xf32>
    %cst_303 = arith.constant 3.25520843E-4 : f32
    %627 = arith.mulf %626, %cst_303 : f32
    %628 = vector.broadcast %627 : f32 to vector<32x96xf32>
    %629 = arith.subf %622, %628 : vector<32x96xf32>
    %630 = arith.mulf %629, %629 : vector<32x96xf32>
    %631 = vector.shape_cast %630 : vector<32x96xf32> to vector<1x32x96xf32>
    %cst_304 = arith.constant dense<0.000000e+00> : vector<1xf32>
    %632 = vector.multi_reduction <add>, %631, %cst_304 [1, 2] : vector<1x32x96xf32> to vector<1xf32>
    %633 = vector.shape_cast %632 : vector<1xf32> to vector<1x1x1xf32>
    %634 = vector.extract %633[0, 0, 0] : f32 from vector<1x1x1xf32>
    %cst_305 = arith.constant 3.25520843E-4 : f32
    %635 = arith.mulf %634, %cst_305 : f32
    %cst_306 = arith.constant 9.99999974E-6 : f32
    %636 = arith.addf %635, %cst_306 : f32
    %637 = math.rsqrt %636 : f32
    %638 = vector.broadcast %637 : f32 to vector<32x96xf32>
    %639 = arith.mulf %629, %638 : vector<32x96xf32>
    %cst_307 = arith.constant dense<0xFF800000> : vector<32xf32>
    %640 = vector.multi_reduction <maximumf>, %639, %cst_307 [1] : vector<32x96xf32> to vector<32xf32>
    %641 = vector.shape_cast %640 : vector<32xf32> to vector<32x1xf32>
    %642 = vector.broadcast %641 : vector<32x1xf32> to vector<32x96xf32>
    %643 = arith.subf %639, %642 : vector<32x96xf32>
    %644 = math.exp %643 : vector<32x96xf32>
    %cst_308 = arith.constant dense<0.000000e+00> : vector<32xf32>
    %645 = vector.multi_reduction <add>, %644, %cst_308 [1] : vector<32x96xf32> to vector<32xf32>
    %646 = vector.shape_cast %645 : vector<32xf32> to vector<32x1xf32>
    %647 = vector.broadcast %646 : vector<32x1xf32> to vector<32x96xf32>
    %648 = arith.divf %644, %647 : vector<32x96xf32>
    %649 = tpu.concatenate %648, %617 in 1 : vector<32x96xf32>, vector<32x32xf32> -> vector<32x128xf32>
    %c0_309 = arith.constant 0 : index
    %c0_310 = arith.constant 0 : index
    %650 = vector.load %arg18[%c0_309, %c0_310] : memref<64x512xf32, #tpu.memory_space<vmem>>, vector<32x128xf32>
    tpu.vector_store %arg18[%c0_309, %c0_310], %649 {strides = array<i32>} : memref<64x512xf32, #tpu.memory_space<vmem>>, vector<32x128xf32>,
    %c1_311 = arith.constant 1 : index
    %c0_312 = arith.constant 0 : index
    %c0_313 = arith.constant 0 : index
    %651 = vector.load %arg6[%c1_311, %c0_312, %c0_313] : memref<4x32x32xf32, #tpu.memory_space<vmem>>, vector<1x32x32xf32>
    %652 = vector.shape_cast %651 : vector<1x32x32xf32> to vector<32x32xf32>
    %cst_314 = arith.constant dense<0.000000e+00> : vector<32x8xf32>
    %653 = tpu.matmul %652, %616, %cst_314 {dimension_numbers = #tpu.dot_dimension_numbers<[1], [1], [0], [0], [0, 0, 1, 0], [], []>} : vector<32x32xf32>, vector<8x32xf32>, vector<32x8xf32> -> vector<32x8xf32>
    %654 = vector.extract_strided_slice %461 {offsets = [0, 96], sizes = [8, 96], strides = [1, 1]} : vector<8x896xf32> to vector<8x96xf32>
    %cst_315 = arith.constant dense<0.000000e+00> : vector<32x96xf32>
    %655 = tpu.matmul %653, %654, %cst_315 {dimension_numbers = #tpu.dot_dimension_numbers<[1], [0], [0], [1], [0, 0, 1, 1], [], []>} : vector<32x8xf32>, vector<8x96xf32>, vector<32x96xf32> -> vector<32x96xf32>
    %656 = vector.shape_cast %655 : vector<32x96xf32> to vector<1x32x96xf32>
    %cst_316 = arith.constant dense<0.000000e+00> : vector<1xf32>
    %657 = vector.multi_reduction <add>, %656, %cst_316 [1, 2] : vector<1x32x96xf32> to vector<1xf32>
    %658 = vector.shape_cast %657 : vector<1xf32> to vector<1x1x1xf32>
    %659 = vector.extract %658[0, 0, 0] : f32 from vector<1x1x1xf32>
    %cst_317 = arith.constant 3.25520843E-4 : f32
    %660 = arith.mulf %659, %cst_317 : f32
    %661 = vector.broadcast %660 : f32 to vector<32x96xf32>
    %662 = arith.subf %655, %661 : vector<32x96xf32>
    %663 = arith.mulf %662, %662 : vector<32x96xf32>
    %664 = vector.shape_cast %663 : vector<32x96xf32> to vector<1x32x96xf32>
    %cst_318 = arith.constant dense<0.000000e+00> : vector<1xf32>
    %665 = vector.multi_reduction <add>, %664, %cst_318 [1, 2] : vector<1x32x96xf32> to vector<1xf32>
    %666 = vector.shape_cast %665 : vector<1xf32> to vector<1x1x1xf32>
    %667 = vector.extract %666[0, 0, 0] : f32 from vector<1x1x1xf32>
    %cst_319 = arith.constant 3.25520843E-4 : f32
    %668 = arith.mulf %667, %cst_319 : f32
    %cst_320 = arith.constant 9.99999974E-6 : f32
    %669 = arith.addf %668, %cst_320 : f32
    %670 = math.rsqrt %669 : f32
    %671 = vector.broadcast %670 : f32 to vector<32x96xf32>
    %672 = arith.mulf %662, %671 : vector<32x96xf32>
    %cst_321 = arith.constant dense<0xFF800000> : vector<32xf32>
    %673 = vector.multi_reduction <maximumf>, %672, %cst_321 [1] : vector<32x96xf32> to vector<32xf32>
    %674 = vector.shape_cast %673 : vector<32xf32> to vector<32x1xf32>
    %675 = vector.broadcast %674 : vector<32x1xf32> to vector<32x96xf32>
    %676 = arith.subf %672, %675 : vector<32x96xf32>
    %677 = math.exp %676 : vector<32x96xf32>
    %cst_322 = arith.constant dense<0.000000e+00> : vector<32xf32>
    %678 = vector.multi_reduction <add>, %677, %cst_322 [1] : vector<32x96xf32> to vector<32xf32>
    %679 = vector.shape_cast %678 : vector<32xf32> to vector<32x1xf32>
    %680 = vector.broadcast %679 : vector<32x1xf32> to vector<32x96xf32>
    %681 = arith.divf %677, %680 : vector<32x96xf32>
    %682 = arith.addf %648, %681 : vector<32x96xf32>
    %683 = tpu.concatenate %681, %617 in 1 : vector<32x96xf32>, vector<32x32xf32> -> vector<32x128xf32>
    %c0_323 = arith.constant 0 : index
    %c128_324 = arith.constant 128 : index
    %684 = vector.load %arg18[%c0_323, %c128_324] : memref<64x512xf32, #tpu.memory_space<vmem>>, vector<32x128xf32>
    tpu.vector_store %arg18[%c0_323, %c128_324], %683 {strides = array<i32>} : memref<64x512xf32, #tpu.memory_space<vmem>>, vector<32x128xf32>,
    %c2_325 = arith.constant 2 : index
    %c0_326 = arith.constant 0 : index
    %c0_327 = arith.constant 0 : index
    %685 = vector.load %arg6[%c2_325, %c0_326, %c0_327] : memref<4x32x32xf32, #tpu.memory_space<vmem>>, vector<1x32x32xf32>
    %686 = vector.shape_cast %685 : vector<1x32x32xf32> to vector<32x32xf32>
    %cst_328 = arith.constant dense<0.000000e+00> : vector<32x8xf32>
    %687 = tpu.matmul %686, %616, %cst_328 {dimension_numbers = #tpu.dot_dimension_numbers<[1], [1], [0], [0], [0, 0, 1, 0], [], []>} : vector<32x32xf32>, vector<8x32xf32>, vector<32x8xf32> -> vector<32x8xf32>
    %688 = vector.extract_strided_slice %461 {offsets = [0, 192], sizes = [8, 96], strides = [1, 1]} : vector<8x896xf32> to vector<8x96xf32>
    %cst_329 = arith.constant dense<0.000000e+00> : vector<32x96xf32>
    %689 = tpu.matmul %687, %688, %cst_329 {dimension_numbers = #tpu.dot_dimension_numbers<[1], [0], [0], [1], [0, 0, 1, 1], [], []>} : vector<32x8xf32>, vector<8x96xf32>, vector<32x96xf32> -> vector<32x96xf32>
    %690 = vector.shape_cast %689 : vector<32x96xf32> to vector<1x32x96xf32>
    %cst_330 = arith.constant dense<0.000000e+00> : vector<1xf32>
    %691 = vector.multi_reduction <add>, %690, %cst_330 [1, 2] : vector<1x32x96xf32> to vector<1xf32>
    %692 = vector.shape_cast %691 : vector<1xf32> to vector<1x1x1xf32>
    %693 = vector.extract %692[0, 0, 0] : f32 from vector<1x1x1xf32>
    %cst_331 = arith.constant 3.25520843E-4 : f32
    %694 = arith.mulf %693, %cst_331 : f32
    %695 = vector.broadcast %694 : f32 to vector<32x96xf32>
    %696 = arith.subf %689, %695 : vector<32x96xf32>
    %697 = arith.mulf %696, %696 : vector<32x96xf32>
    %698 = vector.shape_cast %697 : vector<32x96xf32> to vector<1x32x96xf32>
    %cst_332 = arith.constant dense<0.000000e+00> : vector<1xf32>
    %699 = vector.multi_reduction <add>, %698, %cst_332 [1, 2] : vector<1x32x96xf32> to vector<1xf32>
    %700 = vector.shape_cast %699 : vector<1xf32> to vector<1x1x1xf32>
    %701 = vector.extract %700[0, 0, 0] : f32 from vector<1x1x1xf32>
    %cst_333 = arith.constant 3.25520843E-4 : f32
    %702 = arith.mulf %701, %cst_333 : f32
    %cst_334 = arith.constant 9.99999974E-6 : f32
    %703 = arith.addf %702, %cst_334 : f32
    %704 = math.rsqrt %703 : f32
    %705 = vector.broadcast %704 : f32 to vector<32x96xf32>
    %706 = arith.mulf %696, %705 : vector<32x96xf32>
    %cst_335 = arith.constant dense<0xFF800000> : vector<32xf32>
    %707 = vector.multi_reduction <maximumf>, %706, %cst_335 [1] : vector<32x96xf32> to vector<32xf32>
    %708 = vector.shape_cast %707 : vector<32xf32> to vector<32x1xf32>
    %709 = vector.broadcast %708 : vector<32x1xf32> to vector<32x96xf32>
    %710 = arith.subf %706, %709 : vector<32x96xf32>
    %711 = math.exp %710 : vector<32x96xf32>
    %cst_336 = arith.constant dense<0.000000e+00> : vector<32xf32>
    %712 = vector.multi_reduction <add>, %711, %cst_336 [1] : vector<32x96xf32> to vector<32xf32>
    %713 = vector.shape_cast %712 : vector<32xf32> to vector<32x1xf32>
    %714 = vector.broadcast %713 : vector<32x1xf32> to vector<32x96xf32>
    %715 = arith.divf %711, %714 : vector<32x96xf32>
    %716 = arith.addf %682, %715 : vector<32x96xf32>
    %717 = tpu.concatenate %715, %617 in 1 : vector<32x96xf32>, vector<32x32xf32> -> vector<32x128xf32>
    %c0_337 = arith.constant 0 : index
    %c256_338 = arith.constant 256 : index
    %718 = vector.load %arg18[%c0_337, %c256_338] : memref<64x512xf32, #tpu.memory_space<vmem>>, vector<32x128xf32>
    tpu.vector_store %arg18[%c0_337, %c256_338], %717 {strides = array<i32>} : memref<64x512xf32, #tpu.memory_space<vmem>>, vector<32x128xf32>,
    %c3_339 = arith.constant 3 : index
    %c0_340 = arith.constant 0 : index
    %c0_341 = arith.constant 0 : index
    %719 = vector.load %arg6[%c3_339, %c0_340, %c0_341] : memref<4x32x32xf32, #tpu.memory_space<vmem>>, vector<1x32x32xf32>
    %720 = vector.shape_cast %719 : vector<1x32x32xf32> to vector<32x32xf32>
    %cst_342 = arith.constant dense<0.000000e+00> : vector<32x8xf32>
    %721 = tpu.matmul %720, %616, %cst_342 {dimension_numbers = #tpu.dot_dimension_numbers<[1], [1], [0], [0], [0, 0, 1, 0], [], []>} : vector<32x32xf32>, vector<8x32xf32>, vector<32x8xf32> -> vector<32x8xf32>
    %722 = vector.extract_strided_slice %461 {offsets = [0, 288], sizes = [8, 96], strides = [1, 1]} : vector<8x896xf32> to vector<8x96xf32>
    %cst_343 = arith.constant dense<0.000000e+00> : vector<32x96xf32>
    %723 = tpu.matmul %721, %722, %cst_343 {dimension_numbers = #tpu.dot_dimension_numbers<[1], [0], [0], [1], [0, 0, 1, 1], [], []>} : vector<32x8xf32>, vector<8x96xf32>, vector<32x96xf32> -> vector<32x96xf32>
    %724 = vector.shape_cast %723 : vector<32x96xf32> to vector<1x32x96xf32>
    %cst_344 = arith.constant dense<0.000000e+00> : vector<1xf32>
    %725 = vector.multi_reduction <add>, %724, %cst_344 [1, 2] : vector<1x32x96xf32> to vector<1xf32>
    %726 = vector.shape_cast %725 : vector<1xf32> to vector<1x1x1xf32>
    %727 = vector.extract %726[0, 0, 0] : f32 from vector<1x1x1xf32>
    %cst_345 = arith.constant 3.25520843E-4 : f32
    %728 = arith.mulf %727, %cst_345 : f32
    %729 = vector.broadcast %728 : f32 to vector<32x96xf32>
    %730 = arith.subf %723, %729 : vector<32x96xf32>
    %731 = arith.mulf %730, %730 : vector<32x96xf32>
    %732 = vector.shape_cast %731 : vector<32x96xf32> to vector<1x32x96xf32>
    %cst_346 = arith.constant dense<0.000000e+00> : vector<1xf32>
    %733 = vector.multi_reduction <add>, %732, %cst_346 [1, 2] : vector<1x32x96xf32> to vector<1xf32>
    %734 = vector.shape_cast %733 : vector<1xf32> to vector<1x1x1xf32>
    %735 = vector.extract %734[0, 0, 0] : f32 from vector<1x1x1xf32>
    %cst_347 = arith.constant 3.25520843E-4 : f32
    %736 = arith.mulf %735, %cst_347 : f32
    %cst_348 = arith.constant 9.99999974E-6 : f32
    %737 = arith.addf %736, %cst_348 : f32
    %738 = math.rsqrt %737 : f32
    %739 = vector.broadcast %738 : f32 to vector<32x96xf32>
    %740 = arith.mulf %730, %739 : vector<32x96xf32>
    %cst_349 = arith.constant dense<0xFF800000> : vector<32xf32>
    %741 = vector.multi_reduction <maximumf>, %740, %cst_349 [1] : vector<32x96xf32> to vector<32xf32>
    %742 = vector.shape_cast %741 : vector<32xf32> to vector<32x1xf32>
    %743 = vector.broadcast %742 : vector<32x1xf32> to vector<32x96xf32>
    %744 = arith.subf %740, %743 : vector<32x96xf32>
    %745 = math.exp %744 : vector<32x96xf32>
    %cst_350 = arith.constant dense<0.000000e+00> : vector<32xf32>
    %746 = vector.multi_reduction <add>, %745, %cst_350 [1] : vector<32x96xf32> to vector<32xf32>
    %747 = vector.shape_cast %746 : vector<32xf32> to vector<32x1xf32>
    %748 = vector.broadcast %747 : vector<32x1xf32> to vector<32x96xf32>
    %749 = arith.divf %745, %748 : vector<32x96xf32>
    %750 = arith.addf %716, %749 : vector<32x96xf32>
    %751 = tpu.concatenate %749, %617 in 1 : vector<32x96xf32>, vector<32x32xf32> -> vector<32x128xf32>
    %c0_351 = arith.constant 0 : index
    %c384_352 = arith.constant 384 : index
    %752 = vector.load %arg18[%c0_351, %c384_352] : memref<64x512xf32, #tpu.memory_space<vmem>>, vector<32x128xf32>
    tpu.vector_store %arg18[%c0_351, %c384_352], %751 {strides = array<i32>} : memref<64x512xf32, #tpu.memory_space<vmem>>, vector<32x128xf32>,
    %c0_353 = arith.constant 0 : index
    %c0_354 = arith.constant 0 : index
    %753 = vector.load %arg18[%c0_353, %c0_354] : memref<64x512xf32, #tpu.memory_space<vmem>>, vector<32x512xf32>
    %cst_355 = arith.constant dense<0.000000e+00> : vector<8x32xf32>
    %754 = tpu.matmul %462, %753, %cst_355 {dimension_numbers = #tpu.dot_dimension_numbers<[1], [1], [0], [0], [0, 0, 1, 0], [], []>} : vector<8x512xf32>, vector<32x512xf32>, vector<8x32xf32> -> vector<8x32xf32>
    %cst_356 = arith.constant 2.500000e-01 : f32
    %755 = vector.broadcast %cst_356 : f32 to vector<8x32xf32>
    %756 = arith.mulf %754, %755 : vector<8x32xf32>
    %c0_357 = arith.constant 0 : index
    %c0_358 = arith.constant 0 : index
    %757 = vector.load %arg10[%c0_357, %c0_358] : memref<32x32xf32, #tpu.memory_space<vmem>>, vector<32x32xf32>
    %cst_359 = arith.constant dense<0.000000e+00> : vector<8x32xf32>
    %758 = tpu.matmul %756, %757, %cst_359 {dimension_numbers = #tpu.dot_dimension_numbers<[1], [1], [0], [0], [0, 0, 1, 0], [], []>} : vector<8x32xf32>, vector<32x32xf32>, vector<8x32xf32> -> vector<8x32xf32>
    %c1_360 = arith.constant 1 : index
    %c0_361 = arith.constant 0 : index
    %c0_362 = arith.constant 0 : index
    %759 = vector.load %arg13[%c1_360, %c0_361, %c0_362] : memref<2x8x32xf32, #tpu.memory_space<vmem>>, vector<1x8x32xf32>
    %760 = vector.shape_cast %759 : vector<1x8x32xf32> to vector<8x32xf32>
    %761 = vector.shape_cast %758 : vector<8x32xf32> to vector<1x8x32xf32>
    tpu.vector_store %arg13[%c1_360, %c0_361, %c0_362], %761 {strides = array<i32>} : memref<2x8x32xf32, #tpu.memory_space<vmem>>, vector<1x8x32xf32>,
    %cst_363 = arith.constant 2.500000e-01 : f32
    %762 = vector.broadcast %cst_363 : f32 to vector<32x96xf32>
    %763 = arith.mulf %750, %762 : vector<32x96xf32>
    %c1_364 = arith.constant 1 : index
    %c0_365 = arith.constant 0 : index
    %c0_366 = arith.constant 0 : index
    %764 = vector.load %arg16[%c1_364, %c0_365, %c0_366] : memref<2x32x96xf32, #tpu.memory_space<vmem>>, vector<1x32x96xf32>
    %765 = vector.shape_cast %764 : vector<1x32x96xf32> to vector<32x96xf32>
    %766 = vector.shape_cast %763 : vector<32x96xf32> to vector<1x32x96xf32>
    tpu.vector_store %arg16[%c1_364, %c0_365, %c0_366], %766 {strides = array<i32>} : memref<2x32x96xf32, #tpu.memory_space<vmem>>, vector<1x32x96xf32>,
    %c1_367 = arith.constant 1 : index
    %c0_368 = arith.constant 0 : index
    %c0_369 = arith.constant 0 : index
    %767 = vector.load %arg3[%c1_367, %c0_368, %c0_369] : memref<2x8x64xf32, #tpu.memory_space<vmem>>, vector<1x8x64xf32>
    %768 = vector.shape_cast %767 : vector<1x8x64xf32> to vector<8x64xf32>
    %cst_370 = arith.constant 0.000000e+00 : f32
    %769 = vector.broadcast %cst_370 : f32 to vector<64x32xf32>
    %c0_371 = arith.constant 0 : index
    %c0_372 = arith.constant 0 : index
    %c0_373 = arith.constant 0 : index
    %770 = vector.load %arg7[%c0_371, %c0_372, %c0_373] : memref<4x64x64xf32, #tpu.memory_space<vmem>>, vector<1x64x64xf32>
    %771 = vector.shape_cast %770 : vector<1x64x64xf32> to vector<64x64xf32>
    %cst_374 = arith.constant dense<0.000000e+00> : vector<64x8xf32>
    %772 = tpu.matmul %771, %768, %cst_374 {dimension_numbers = #tpu.dot_dimension_numbers<[1], [1], [0], [0], [0, 0, 1, 0], [], []>} : vector<64x64xf32>, vector<8x64xf32>, vector<64x8xf32> -> vector<64x8xf32>
    %773 = vector.extract_strided_slice %461 {offsets = [0, 0], sizes = [8, 96], strides = [1, 1]} : vector<8x896xf32> to vector<8x96xf32>
    %cst_375 = arith.constant dense<0.000000e+00> : vector<64x96xf32>
    %774 = tpu.matmul %772, %773, %cst_375 {dimension_numbers = #tpu.dot_dimension_numbers<[1], [0], [0], [1], [0, 0, 1, 1], [], []>} : vector<64x8xf32>, vector<8x96xf32>, vector<64x96xf32> -> vector<64x96xf32>
    %775 = vector.shape_cast %774 : vector<64x96xf32> to vector<1x64x96xf32>
    %cst_376 = arith.constant dense<0.000000e+00> : vector<1xf32>
    %776 = vector.multi_reduction <add>, %775, %cst_376 [1, 2] : vector<1x64x96xf32> to vector<1xf32>
    %777 = vector.shape_cast %776 : vector<1xf32> to vector<1x1x1xf32>
    %778 = vector.extract %777[0, 0, 0] : f32 from vector<1x1x1xf32>
    %cst_377 = arith.constant 1.62760422E-4 : f32
    %779 = arith.mulf %778, %cst_377 : f32
    %780 = vector.broadcast %779 : f32 to vector<64x96xf32>
    %781 = arith.subf %774, %780 : vector<64x96xf32>
    %782 = arith.mulf %781, %781 : vector<64x96xf32>
    %783 = vector.shape_cast %782 : vector<64x96xf32> to vector<1x64x96xf32>
    %cst_378 = arith.constant dense<0.000000e+00> : vector<1xf32>
    %784 = vector.multi_reduction <add>, %783, %cst_378 [1, 2] : vector<1x64x96xf32> to vector<1xf32>
    %785 = vector.shape_cast %784 : vector<1xf32> to vector<1x1x1xf32>
    %786 = vector.extract %785[0, 0, 0] : f32 from vector<1x1x1xf32>
    %cst_379 = arith.constant 1.62760422E-4 : f32
    %787 = arith.mulf %786, %cst_379 : f32
    %cst_380 = arith.constant 9.99999974E-6 : f32
    %788 = arith.addf %787, %cst_380 : f32
    %789 = math.rsqrt %788 : f32
    %790 = vector.broadcast %789 : f32 to vector<64x96xf32>
    %791 = arith.mulf %781, %790 : vector<64x96xf32>
    %cst_381 = arith.constant dense<0xFF800000> : vector<64xf32>
    %792 = vector.multi_reduction <maximumf>, %791, %cst_381 [1] : vector<64x96xf32> to vector<64xf32>
    %793 = vector.shape_cast %792 : vector<64xf32> to vector<64x1xf32>
    %794 = vector.broadcast %793 : vector<64x1xf32> to vector<64x96xf32>
    %795 = arith.subf %791, %794 : vector<64x96xf32>
    %796 = math.exp %795 : vector<64x96xf32>
    %cst_382 = arith.constant dense<0.000000e+00> : vector<64xf32>
    %797 = vector.multi_reduction <add>, %796, %cst_382 [1] : vector<64x96xf32> to vector<64xf32>
    %798 = vector.shape_cast %797 : vector<64xf32> to vector<64x1xf32>
    %799 = vector.broadcast %798 : vector<64x1xf32> to vector<64x96xf32>
    %800 = arith.divf %796, %799 : vector<64x96xf32>
    %801 = tpu.concatenate %800, %769 in 1 : vector<64x96xf32>, vector<64x32xf32> -> vector<64x128xf32>
    %c0_383 = arith.constant 0 : index
    %c0_384 = arith.constant 0 : index
    %802 = vector.load %arg18[%c0_383, %c0_384] : memref<64x512xf32, #tpu.memory_space<vmem>>, vector<64x128xf32>
    tpu.vector_store %arg18[%c0_383, %c0_384], %801 {strides = array<i32>} : memref<64x512xf32, #tpu.memory_space<vmem>>, vector<64x128xf32>,
    %c1_385 = arith.constant 1 : index
    %c0_386 = arith.constant 0 : index
    %c0_387 = arith.constant 0 : index
    %803 = vector.load %arg7[%c1_385, %c0_386, %c0_387] : memref<4x64x64xf32, #tpu.memory_space<vmem>>, vector<1x64x64xf32>
    %804 = vector.shape_cast %803 : vector<1x64x64xf32> to vector<64x64xf32>
    %cst_388 = arith.constant dense<0.000000e+00> : vector<64x8xf32>
    %805 = tpu.matmul %804, %768, %cst_388 {dimension_numbers = #tpu.dot_dimension_numbers<[1], [1], [0], [0], [0, 0, 1, 0], [], []>} : vector<64x64xf32>, vector<8x64xf32>, vector<64x8xf32> -> vector<64x8xf32>
    %806 = vector.extract_strided_slice %461 {offsets = [0, 96], sizes = [8, 96], strides = [1, 1]} : vector<8x896xf32> to vector<8x96xf32>
    %cst_389 = arith.constant dense<0.000000e+00> : vector<64x96xf32>
    %807 = tpu.matmul %805, %806, %cst_389 {dimension_numbers = #tpu.dot_dimension_numbers<[1], [0], [0], [1], [0, 0, 1, 1], [], []>} : vector<64x8xf32>, vector<8x96xf32>, vector<64x96xf32> -> vector<64x96xf32>
    %808 = vector.shape_cast %807 : vector<64x96xf32> to vector<1x64x96xf32>
    %cst_390 = arith.constant dense<0.000000e+00> : vector<1xf32>
    %809 = vector.multi_reduction <add>, %808, %cst_390 [1, 2] : vector<1x64x96xf32> to vector<1xf32>
    %810 = vector.shape_cast %809 : vector<1xf32> to vector<1x1x1xf32>
    %811 = vector.extract %810[0, 0, 0] : f32 from vector<1x1x1xf32>
    %cst_391 = arith.constant 1.62760422E-4 : f32
    %812 = arith.mulf %811, %cst_391 : f32
    %813 = vector.broadcast %812 : f32 to vector<64x96xf32>
    %814 = arith.subf %807, %813 : vector<64x96xf32>
    %815 = arith.mulf %814, %814 : vector<64x96xf32>
    %816 = vector.shape_cast %815 : vector<64x96xf32> to vector<1x64x96xf32>
    %cst_392 = arith.constant dense<0.000000e+00> : vector<1xf32>
    %817 = vector.multi_reduction <add>, %816, %cst_392 [1, 2] : vector<1x64x96xf32> to vector<1xf32>
    %818 = vector.shape_cast %817 : vector<1xf32> to vector<1x1x1xf32>
    %819 = vector.extract %818[0, 0, 0] : f32 from vector<1x1x1xf32>
    %cst_393 = arith.constant 1.62760422E-4 : f32
    %820 = arith.mulf %819, %cst_393 : f32
    %cst_394 = arith.constant 9.99999974E-6 : f32
    %821 = arith.addf %820, %cst_394 : f32
    %822 = math.rsqrt %821 : f32
    %823 = vector.broadcast %822 : f32 to vector<64x96xf32>
    %824 = arith.mulf %814, %823 : vector<64x96xf32>
    %cst_395 = arith.constant dense<0xFF800000> : vector<64xf32>
    %825 = vector.multi_reduction <maximumf>, %824, %cst_395 [1] : vector<64x96xf32> to vector<64xf32>
    %826 = vector.shape_cast %825 : vector<64xf32> to vector<64x1xf32>
    %827 = vector.broadcast %826 : vector<64x1xf32> to vector<64x96xf32>
    %828 = arith.subf %824, %827 : vector<64x96xf32>
    %829 = math.exp %828 : vector<64x96xf32>
    %cst_396 = arith.constant dense<0.000000e+00> : vector<64xf32>
    %830 = vector.multi_reduction <add>, %829, %cst_396 [1] : vector<64x96xf32> to vector<64xf32>
    %831 = vector.shape_cast %830 : vector<64xf32> to vector<64x1xf32>
    %832 = vector.broadcast %831 : vector<64x1xf32> to vector<64x96xf32>
    %833 = arith.divf %829, %832 : vector<64x96xf32>
    %834 = arith.addf %800, %833 : vector<64x96xf32>
    %835 = tpu.concatenate %833, %769 in 1 : vector<64x96xf32>, vector<64x32xf32> -> vector<64x128xf32>
    %c0_397 = arith.constant 0 : index
    %c128_398 = arith.constant 128 : index
    %836 = vector.load %arg18[%c0_397, %c128_398] : memref<64x512xf32, #tpu.memory_space<vmem>>, vector<64x128xf32>
    tpu.vector_store %arg18[%c0_397, %c128_398], %835 {strides = array<i32>} : memref<64x512xf32, #tpu.memory_space<vmem>>, vector<64x128xf32>,
    %c2_399 = arith.constant 2 : index
    %c0_400 = arith.constant 0 : index
    %c0_401 = arith.constant 0 : index
    %837 = vector.load %arg7[%c2_399, %c0_400, %c0_401] : memref<4x64x64xf32, #tpu.memory_space<vmem>>, vector<1x64x64xf32>
    %838 = vector.shape_cast %837 : vector<1x64x64xf32> to vector<64x64xf32>
    %cst_402 = arith.constant dense<0.000000e+00> : vector<64x8xf32>
    %839 = tpu.matmul %838, %768, %cst_402 {dimension_numbers = #tpu.dot_dimension_numbers<[1], [1], [0], [0], [0, 0, 1, 0], [], []>} : vector<64x64xf32>, vector<8x64xf32>, vector<64x8xf32> -> vector<64x8xf32>
    %840 = vector.extract_strided_slice %461 {offsets = [0, 192], sizes = [8, 96], strides = [1, 1]} : vector<8x896xf32> to vector<8x96xf32>
    %cst_403 = arith.constant dense<0.000000e+00> : vector<64x96xf32>
    %841 = tpu.matmul %839, %840, %cst_403 {dimension_numbers = #tpu.dot_dimension_numbers<[1], [0], [0], [1], [0, 0, 1, 1], [], []>} : vector<64x8xf32>, vector<8x96xf32>, vector<64x96xf32> -> vector<64x96xf32>
    %842 = vector.shape_cast %841 : vector<64x96xf32> to vector<1x64x96xf32>
    %cst_404 = arith.constant dense<0.000000e+00> : vector<1xf32>
    %843 = vector.multi_reduction <add>, %842, %cst_404 [1, 2] : vector<1x64x96xf32> to vector<1xf32>
    %844 = vector.shape_cast %843 : vector<1xf32> to vector<1x1x1xf32>
    %845 = vector.extract %844[0, 0, 0] : f32 from vector<1x1x1xf32>
    %cst_405 = arith.constant 1.62760422E-4 : f32
    %846 = arith.mulf %845, %cst_405 : f32
    %847 = vector.broadcast %846 : f32 to vector<64x96xf32>
    %848 = arith.subf %841, %847 : vector<64x96xf32>
    %849 = arith.mulf %848, %848 : vector<64x96xf32>
    %850 = vector.shape_cast %849 : vector<64x96xf32> to vector<1x64x96xf32>
    %cst_406 = arith.constant dense<0.000000e+00> : vector<1xf32>
    %851 = vector.multi_reduction <add>, %850, %cst_406 [1, 2] : vector<1x64x96xf32> to vector<1xf32>
    %852 = vector.shape_cast %851 : vector<1xf32> to vector<1x1x1xf32>
    %853 = vector.extract %852[0, 0, 0] : f32 from vector<1x1x1xf32>
    %cst_407 = arith.constant 1.62760422E-4 : f32
    %854 = arith.mulf %853, %cst_407 : f32
    %cst_408 = arith.constant 9.99999974E-6 : f32
    %855 = arith.addf %854, %cst_408 : f32
    %856 = math.rsqrt %855 : f32
    %857 = vector.broadcast %856 : f32 to vector<64x96xf32>
    %858 = arith.mulf %848, %857 : vector<64x96xf32>
    %cst_409 = arith.constant dense<0xFF800000> : vector<64xf32>
    %859 = vector.multi_reduction <maximumf>, %858, %cst_409 [1] : vector<64x96xf32> to vector<64xf32>
    %860 = vector.shape_cast %859 : vector<64xf32> to vector<64x1xf32>
    %861 = vector.broadcast %860 : vector<64x1xf32> to vector<64x96xf32>
    %862 = arith.subf %858, %861 : vector<64x96xf32>
    %863 = math.exp %862 : vector<64x96xf32>
    %cst_410 = arith.constant dense<0.000000e+00> : vector<64xf32>
    %864 = vector.multi_reduction <add>, %863, %cst_410 [1] : vector<64x96xf32> to vector<64xf32>
    %865 = vector.shape_cast %864 : vector<64xf32> to vector<64x1xf32>
    %866 = vector.broadcast %865 : vector<64x1xf32> to vector<64x96xf32>
    %867 = arith.divf %863, %866 : vector<64x96xf32>
    %868 = arith.addf %834, %867 : vector<64x96xf32>
    %869 = tpu.concatenate %867, %769 in 1 : vector<64x96xf32>, vector<64x32xf32> -> vector<64x128xf32>
    %c0_411 = arith.constant 0 : index
    %c256_412 = arith.constant 256 : index
    %870 = vector.load %arg18[%c0_411, %c256_412] : memref<64x512xf32, #tpu.memory_space<vmem>>, vector<64x128xf32>
    tpu.vector_store %arg18[%c0_411, %c256_412], %869 {strides = array<i32>} : memref<64x512xf32, #tpu.memory_space<vmem>>, vector<64x128xf32>,
    %c3_413 = arith.constant 3 : index
    %c0_414 = arith.constant 0 : index
    %c0_415 = arith.constant 0 : index
    %871 = vector.load %arg7[%c3_413, %c0_414, %c0_415] : memref<4x64x64xf32, #tpu.memory_space<vmem>>, vector<1x64x64xf32>
    %872 = vector.shape_cast %871 : vector<1x64x64xf32> to vector<64x64xf32>
    %cst_416 = arith.constant dense<0.000000e+00> : vector<64x8xf32>
    %873 = tpu.matmul %872, %768, %cst_416 {dimension_numbers = #tpu.dot_dimension_numbers<[1], [1], [0], [0], [0, 0, 1, 0], [], []>} : vector<64x64xf32>, vector<8x64xf32>, vector<64x8xf32> -> vector<64x8xf32>
    %874 = vector.extract_strided_slice %461 {offsets = [0, 288], sizes = [8, 96], strides = [1, 1]} : vector<8x896xf32> to vector<8x96xf32>
    %cst_417 = arith.constant dense<0.000000e+00> : vector<64x96xf32>
    %875 = tpu.matmul %873, %874, %cst_417 {dimension_numbers = #tpu.dot_dimension_numbers<[1], [0], [0], [1], [0, 0, 1, 1], [], []>} : vector<64x8xf32>, vector<8x96xf32>, vector<64x96xf32> -> vector<64x96xf32>
    %876 = vector.shape_cast %875 : vector<64x96xf32> to vector<1x64x96xf32>
    %cst_418 = arith.constant dense<0.000000e+00> : vector<1xf32>
    %877 = vector.multi_reduction <add>, %876, %cst_418 [1, 2] : vector<1x64x96xf32> to vector<1xf32>
    %878 = vector.shape_cast %877 : vector<1xf32> to vector<1x1x1xf32>
    %879 = vector.extract %878[0, 0, 0] : f32 from vector<1x1x1xf32>
    %cst_419 = arith.constant 1.62760422E-4 : f32
    %880 = arith.mulf %879, %cst_419 : f32
    %881 = vector.broadcast %880 : f32 to vector<64x96xf32>
    %882 = arith.subf %875, %881 : vector<64x96xf32>
    %883 = arith.mulf %882, %882 : vector<64x96xf32>
    %884 = vector.shape_cast %883 : vector<64x96xf32> to vector<1x64x96xf32>
    %cst_420 = arith.constant dense<0.000000e+00> : vector<1xf32>
    %885 = vector.multi_reduction <add>, %884, %cst_420 [1, 2] : vector<1x64x96xf32> to vector<1xf32>
    %886 = vector.shape_cast %885 : vector<1xf32> to vector<1x1x1xf32>
    %887 = vector.extract %886[0, 0, 0] : f32 from vector<1x1x1xf32>
    %cst_421 = arith.constant 1.62760422E-4 : f32
    %888 = arith.mulf %887, %cst_421 : f32
    %cst_422 = arith.constant 9.99999974E-6 : f32
    %889 = arith.addf %888, %cst_422 : f32
    %890 = math.rsqrt %889 : f32
    %891 = vector.broadcast %890 : f32 to vector<64x96xf32>
    %892 = arith.mulf %882, %891 : vector<64x96xf32>
    %cst_423 = arith.constant dense<0xFF800000> : vector<64xf32>
    %893 = vector.multi_reduction <maximumf>, %892, %cst_423 [1] : vector<64x96xf32> to vector<64xf32>
    %894 = vector.shape_cast %893 : vector<64xf32> to vector<64x1xf32>
    %895 = vector.broadcast %894 : vector<64x1xf32> to vector<64x96xf32>
    %896 = arith.subf %892, %895 : vector<64x96xf32>
    %897 = math.exp %896 : vector<64x96xf32>
    %cst_424 = arith.constant dense<0.000000e+00> : vector<64xf32>
    %898 = vector.multi_reduction <add>, %897, %cst_424 [1] : vector<64x96xf32> to vector<64xf32>
    %899 = vector.shape_cast %898 : vector<64xf32> to vector<64x1xf32>
    %900 = vector.broadcast %899 : vector<64x1xf32> to vector<64x96xf32>
    %901 = arith.divf %897, %900 : vector<64x96xf32>
    %902 = arith.addf %868, %901 : vector<64x96xf32>
    %903 = tpu.concatenate %901, %769 in 1 : vector<64x96xf32>, vector<64x32xf32> -> vector<64x128xf32>
    %c0_425 = arith.constant 0 : index
    %c384_426 = arith.constant 384 : index
    %904 = vector.load %arg18[%c0_425, %c384_426] : memref<64x512xf32, #tpu.memory_space<vmem>>, vector<64x128xf32>
    tpu.vector_store %arg18[%c0_425, %c384_426], %903 {strides = array<i32>} : memref<64x512xf32, #tpu.memory_space<vmem>>, vector<64x128xf32>,
    %c0_427 = arith.constant 0 : index
    %c0_428 = arith.constant 0 : index
    %905 = vector.load %arg18[%c0_427, %c0_428] : memref<64x512xf32, #tpu.memory_space<vmem>>, vector<64x512xf32>
    %cst_429 = arith.constant dense<0.000000e+00> : vector<8x64xf32>
    %906 = tpu.matmul %462, %905, %cst_429 {dimension_numbers = #tpu.dot_dimension_numbers<[1], [1], [0], [0], [0, 0, 1, 0], [], []>} : vector<8x512xf32>, vector<64x512xf32>, vector<8x64xf32> -> vector<8x64xf32>
    %cst_430 = arith.constant 2.500000e-01 : f32
    %907 = vector.broadcast %cst_430 : f32 to vector<8x64xf32>
    %908 = arith.mulf %906, %907 : vector<8x64xf32>
    %c0_431 = arith.constant 0 : index
    %c0_432 = arith.constant 0 : index
    %909 = vector.load %arg11[%c0_431, %c0_432] : memref<64x64xf32, #tpu.memory_space<vmem>>, vector<64x64xf32>
    %cst_433 = arith.constant dense<0.000000e+00> : vector<8x64xf32>
    %910 = tpu.matmul %908, %909, %cst_433 {dimension_numbers = #tpu.dot_dimension_numbers<[1], [1], [0], [0], [0, 0, 1, 0], [], []>} : vector<8x64xf32>, vector<64x64xf32>, vector<8x64xf32> -> vector<8x64xf32>
    %c1_434 = arith.constant 1 : index
    %c0_435 = arith.constant 0 : index
    %c0_436 = arith.constant 0 : index
    %911 = vector.load %arg14[%c1_434, %c0_435, %c0_436] : memref<2x8x64xf32, #tpu.memory_space<vmem>>, vector<1x8x64xf32>
    %912 = vector.shape_cast %911 : vector<1x8x64xf32> to vector<8x64xf32>
    %913 = vector.shape_cast %910 : vector<8x64xf32> to vector<1x8x64xf32>
    tpu.vector_store %arg14[%c1_434, %c0_435, %c0_436], %913 {strides = array<i32>} : memref<2x8x64xf32, #tpu.memory_space<vmem>>, vector<1x8x64xf32>,
    %cst_437 = arith.constant 2.500000e-01 : f32
    %914 = vector.broadcast %cst_437 : f32 to vector<64x96xf32>
    %915 = arith.mulf %902, %914 : vector<64x96xf32>
    %c1_438 = arith.constant 1 : index
    %c0_439 = arith.constant 0 : index
    %c0_440 = arith.constant 0 : index
    %916 = vector.load %arg17[%c1_438, %c0_439, %c0_440] : memref<2x64x96xf32, #tpu.memory_space<vmem>>, vector<1x64x96xf32>
    %917 = vector.shape_cast %916 : vector<1x64x96xf32> to vector<64x96xf32>
    %918 = vector.shape_cast %915 : vector<64x96xf32> to vector<1x64x96xf32>
    tpu.vector_store %arg17[%c1_438, %c0_439, %c0_440], %918 {strides = array<i32>} : memref<2x64x96xf32, #tpu.memory_space<vmem>>, vector<1x64x96xf32>,
    return
  }
  func.func @transform_0(%arg0: i32) -> (i32, i32, i32) {
    %c0_i32 = arith.constant 0 : i32
    %c0_i32_0 = arith.constant 0 : i32
    %c0_i32_1 = arith.constant 0 : i32
    return %arg0, %c0_i32, %c0_i32_0 : i32, i32, i32
  }
  func.func @transform_1(%arg0: i32) -> (i32, i32, i32) {
    %c0_i32 = arith.constant 0 : i32
    %c0_i32_0 = arith.constant 0 : i32
    %c0_i32_1 = arith.constant 0 : i32
    return %arg0, %c0_i32, %c0_i32_0 : i32, i32, i32
  }
  func.func @transform_2(%arg0: i32) -> (i32, i32, i32) {
    %c0_i32 = arith.constant 0 : i32
    %c0_i32_0 = arith.constant 0 : i32
    %c0_i32_1 = arith.constant 0 : i32
    return %arg0, %c0_i32, %c0_i32_0 : i32, i32, i32
  }
  func.func @transform_3(%arg0: i32) -> (i32, i32) {
    %c0_i32 = arith.constant 0 : i32
    %c0_i32_0 = arith.constant 0 : i32
    return %arg0, %c0_i32 : i32, i32
  }
  func.func @transform_4(%arg0: i32) -> (i32, i32, i32) {
    %c0_i32 = arith.constant 0 : i32
    %c0_i32_0 = arith.constant 0 : i32
    %c0_i32_1 = arith.constant 0 : i32
    %c0_i32_2 = arith.constant 0 : i32
    return %c0_i32, %c0_i32_0, %c0_i32_1 : i32, i32, i32
  }
  func.func @transform_5(%arg0: i32) -> (i32, i32, i32) {
    %c0_i32 = arith.constant 0 : i32
    %c0_i32_0 = arith.constant 0 : i32
    %c0_i32_1 = arith.constant 0 : i32
    %c0_i32_2 = arith.constant 0 : i32
    return %c0_i32, %c0_i32_0, %c0_i32_1 : i32, i32, i32
  }
  func.func @transform_6(%arg0: i32) -> (i32, i32, i32) {
    %c0_i32 = arith.constant 0 : i32
    %c0_i32_0 = arith.constant 0 : i32
    %c0_i32_1 = arith.constant 0 : i32
    %c0_i32_2 = arith.constant 0 : i32
    return %c0_i32, %c0_i32_0, %c0_i32_1 : i32, i32, i32
  }
  func.func @transform_7(%arg0: i32) -> (i32, i32) {
    %c0_i32 = arith.constant 0 : i32
    %c0_i32_0 = arith.constant 0 : i32
    %c0_i32_1 = arith.constant 0 : i32
    return %c0_i32, %c0_i32_0 : i32, i32
  }
  func.func @transform_8(%arg0: i32) -> (i32, i32) {
    %c0_i32 = arith.constant 0 : i32
    %c0_i32_0 = arith.constant 0 : i32
    %c0_i32_1 = arith.constant 0 : i32
    return %c0_i32, %c0_i32_0 : i32, i32
  }
  func.func @transform_9(%arg0: i32) -> (i32, i32) {
    %c0_i32 = arith.constant 0 : i32
    %c0_i32_0 = arith.constant 0 : i32
    %c0_i32_1 = arith.constant 0 : i32
    return %c0_i32, %c0_i32_0 : i32, i32
  }
  func.func @transform_10(%arg0: i32) -> (i32, i32) {
    %c0_i32 = arith.constant 0 : i32
    %c0_i32_0 = arith.constant 0 : i32
    %c0_i32_1 = arith.constant 0 : i32
    return %c0_i32, %c0_i32_0 : i32, i32
  }
  func.func @transform_11(%arg0: i32) -> (i32, i32, i32) {
    %c0_i32 = arith.constant 0 : i32
    %c0_i32_0 = arith.constant 0 : i32
    %c0_i32_1 = arith.constant 0 : i32
    return %arg0, %c0_i32, %c0_i32_0 : i32, i32, i32
  }
  func.func @transform_12(%arg0: i32) -> (i32, i32, i32) {
    %c0_i32 = arith.constant 0 : i32
    %c0_i32_0 = arith.constant 0 : i32
    %c0_i32_1 = arith.constant 0 : i32
    return %arg0, %c0_i32, %c0_i32_0 : i32, i32, i32
  }
  func.func @transform_13(%arg0: i32) -> (i32, i32, i32) {
    %c0_i32 = arith.constant 0 : i32
    %c0_i32_0 = arith.constant 0 : i32
    %c0_i32_1 = arith.constant 0 : i32
    return %arg0, %c0_i32, %c0_i32_0 : i32, i32, i32
  }
  func.func @transform_14(%arg0: i32) -> (i32, i32, i32) {
    %c0_i32 = arith.constant 0 : i32
    %c0_i32_0 = arith.constant 0 : i32
    %c0_i32_1 = arith.constant 0 : i32
    return %arg0, %c0_i32, %c0_i32_0 : i32, i32, i32
  }
  func.func @transform_15(%arg0: i32) -> (i32, i32, i32) {
    %c0_i32 = arith.constant 0 : i32
    %c0_i32_0 = arith.constant 0 : i32
    %c0_i32_1 = arith.constant 0 : i32
    return %arg0, %c0_i32, %c0_i32_0 : i32, i32, i32
  }
  func.func @transform_16(%arg0: i32) -> (i32, i32, i32) {
    %c0_i32 = arith.constant 0 : i32
    %c0_i32_0 = arith.constant 0 : i32
    %c0_i32_1 = arith.constant 0 : i32
    return %arg0, %c0_i32, %c0_i32_0 : i32, i32, i32
  }
}

</mosaic_0001>

<bundles_post_ra>
// kernel: tpu_custom_call.1
= control target key start
LH: loop header
LB: loop body
LE: loop exit
PB: predicated region body
PF: predicated region fallthrough
CT: control target
= control target key end

     0   :  { %s16244_s0 = inlined_call_operand.hbm [shape: f32[2,8,16], index: 0, kind: input, shape index: {}]   ;;  %s16245_s1 = inlined_call_operand.hbm [shape: f32[2,8,32], index: 1, kind: input, shape index: {}]   ;;  %s16246_s2 = inlined_call_operand.hbm [shape: f32[2,8,64], index: 2, kind: input, shape index: {}]   ;;  %s16247_s3 = inlined_call_operand.hbm [shape: f32[16,96], index: 3, kind: input, shape index: {}]   ;;  %s16248_s4 = inlined_call_operand.hbm [shape: f32[4,16,16], index: 4, kind: input, shape index: {}]   ;;  %s16249_s5 = inlined_call_operand.hbm [shape: f32[4,32,32], index: 5, kind: input, shape index: {}]   ;;  %s16250_s6 = inlined_call_operand.hbm [shape: f32[4,64,64], index: 6, kind: input, shape index: {}]   ;;  %s16251_s7 = inlined_call_operand.hbm [shape: f32[96,896], index: 7, kind: input, shape index: {}]   ;;  %s16252_s8 = inlined_call_operand.hbm [shape: f32[16,16], index: 8, kind: input, shape index: {}]   ;;  %s16253_s9 = inlined_call_operand.vmem [shape: f32[32,32], index: 9, kind: input, shape index: {}]   ;;  %s16254_s10 = inlined_call_operand.hbm [shape: f32[64,64], index: 10, kind: input, shape index: {}]   ;;  %s16255_s11 = inlined_call_operand.hbm [shape: f32[2,8,16], index: 11, kind: output, shape index: {0}]   ;;  %s16256_s12 = inlined_call_operand.hbm [shape: f32[2,8,32], index: 12, kind: output, shape index: {1}]   ;;  %s16257_s13 = inlined_call_operand.hbm [shape: f32[2,8,64], index: 13, kind: output, shape index: {2}]   ;;  %s16258_s14 = inlined_call_operand.hbm [shape: f32[2,16,96], index: 14, kind: output, shape index: {3}]   ;;  %s16259_s15 = inlined_call_operand.hbm [shape: f32[2,32,96], index: 15, kind: output, shape index: {4}]   ;;  %s16260_s16 = inlined_call_operand.hbm [shape: f32[2,64,96], index: 16, kind: output, shape index: {5}]  }
   0x1   :  { %16266 = sst [smem:[#allocation39_spill]] %s16244_s0 }
   0x2   :  { %22 = vsyncpa [#allocation4], 0 }
   0x3   :  { %23 = vsyncpa [#allocation7], 0 }
   0x4   :  { %24 = vsyncpa [#allocation10], 0 }
   0x5   :  { %25 = vsyncpa [#allocation13], 0 }
   0x6   :  { %26 = vsyncpa [#allocation16], 0 }
   0x7   :  { %27 = vsyncpa [#allocation19], 0 }
   0x8   :  { %28 = vsyncpa [#allocation5], 0 }
   0x9   :  { %29 = vsyncpa [#allocation22], 0 }
   0xa   :  { %30 = vsyncpa [#allocation25], 0 }
   0xb   :  { %31 = vsyncpa [#allocation28], 0  ;;  %s12883_s21 = smov [#allocation6]   ;;  %s12884_s23 = smov [#allocation9]  }
   0xc   :  { %s49_s22 = sshll.u32 %s12883_s21, 4  ;;  %s73_s24 = sshll.u32 %s12884_s23, 4  ;;  %s50_s22 = int_to_ptr.vmem [resolvable:$true] %s49_s22  ;;  %s12994_s24 = int_to_ptr.vmem [resolvable:$true] %s73_s24 }
   0xd   :  { %s12511_s27 = scalar_lea.hbm %s16245_s1, 256 }
   0xe   :  { %p12512_p0 = scmp.ne.s32.totalorder %s16245_s1, %s12511_s27  ;;  %p12515_p1 = scmp.lt.u32.totalorder %s12511_s27, %s16245_s1 }
  0x10   :  { %p12517_p2 = pnand %p12515_p1, %p12512_p0 }
  0x12   :  { %12520 = shalt.err (!%p12517_p2)
}
  0x13   :  { %s12521_s17 = scalar_lea.vmem %s50_s22, 256  ;;  %p12526_p4 = scmp.lt.s32.totalorder %s50_s22, %s50_s22 }
  0x14   :  { %p12522_p3 = scmp.ne.s32.totalorder %s50_s22, %s12521_s17  ;;  %p12527_p5 = scmp.lt.s32.totalorder %s12521_s17, %s12521_s17 }
  0x16   :  { %p12528_p6 = por %p12527_p5, %p12526_p4 }
  0x18   :  { %p12529_p7 = pnand %p12528_p6, %p12522_p3 }
  0x1a   :  { %12532 = shalt.err (!%p12529_p7)
}
  0x1b   :  { %s16262_s18 = smov 128   ;;  %s12886_s19 = smov 8  }
  0x1c   :  { %55 = dma.hbm_to_vmem [thread:$0]  %s16245_s1, 256, %s50_s22, [#allocation7], %s16262_s18, %s16262_s18, %s12886_s19  }
  0x1d   :  { %s12533_s26 = scalar_lea.hbm %s16247_s3, 256 }
  0x1e   :  { %p12534_p8 = scmp.ne.s32.totalorder %s16247_s3, %s12533_s26  ;;  %p12537_p9 = scmp.lt.u32.totalorder %s12533_s26, %s16247_s3 }
  0x20   :  { %p12539_p10 = pnand %p12537_p9, %p12534_p8 }
  0x22   :  { %12542 = shalt.err (!%p12539_p10)
}
  0x23   :  { %s12543_s0 = scalar_lea.vmem %s12994_s24, 256  ;;  %p12548_p12 = scmp.lt.s32.totalorder %s12994_s24, %s12994_s24 }
  0x24   :  { %p12544_p11 = scmp.ne.s32.totalorder %s12994_s24, %s12543_s0  ;;  %p12549_p13 = scmp.lt.s32.totalorder %s12543_s0, %s12543_s0 }
  0x26   :  { %p12550_p0 = por %p12549_p13, %p12548_p12 }
  0x28   :  { %p12551_p1 = pnand %p12550_p0, %p12544_p11 }
  0x2a   :  { %12554 = shalt.err (!%p12551_p1)
}
  0x2b   :  { %79 = dma.hbm_to_vmem [thread:$0]  %s16247_s3, 256, %s12994_s24, [#allocation10], %s16262_s18, %s16262_s18, %s12886_s19  }
  0x2c   :  { %s12887_s17 = smov [#allocation12]   ;;  %s12888_s21 = smov [#allocation15]  }
  0x2d   :  { %s97_s20 = sshll.u32 %s12887_s17, 4  ;;  %s121_s23 = sshll.u32 %s12888_s21, 4  ;;  %s98_s20 = int_to_ptr.vmem [resolvable:$true] %s97_s20  ;;  %s13031_s23 = int_to_ptr.vmem [resolvable:$true] %s121_s23 }
  0x2e   :  { %s12555_s27 = scalar_lea.hbm %s16249_s5, 2048 }
  0x2f   :  { %p12556_p2 = scmp.ne.s32.totalorder %s16249_s5, %s12555_s27  ;;  %p12559_p3 = scmp.lt.u32.totalorder %s12555_s27, %s16249_s5 }
  0x31   :  { %p12561_p4 = pnand %p12559_p3, %p12556_p2 }
  0x33   :  { %12564 = shalt.err (!%p12561_p4)
}
  0x34   :  { %s12565_s3 = scalar_lea.vmem %s98_s20, 2048  ;;  %p12570_p6 = scmp.lt.s32.totalorder %s98_s20, %s98_s20 }
  0x35   :  { %p12566_p5 = scmp.ne.s32.totalorder %s98_s20, %s12565_s3  ;;  %p12571_p7 = scmp.lt.s32.totalorder %s12565_s3, %s12565_s3 }
  0x37   :  { %p12572_p8 = por %p12571_p7, %p12570_p6 }
  0x39   :  { %p12573_p9 = pnand %p12572_p8, %p12566_p5 }
  0x3b   :  { %12576 = shalt.err (!%p12573_p9)
}
  0x3c   :  { %103 = dma.hbm_to_vmem [thread:$0]  %s16249_s5, 2048, %s98_s20, [#allocation13], %s16262_s18, %s16262_s18, %s12886_s19  }
  0x3d   :  { %s12577_s21 = scalar_lea.hbm %s16251_s7, 10752 }
  0x3e   :  { %p12578_p10 = scmp.ne.s32.totalorder %s16251_s7, %s12577_s21  ;;  %p12581_p11 = scmp.lt.u32.totalorder %s12577_s21, %s16251_s7 }
  0x40   :  { %p12583_p12 = pnand %p12581_p11, %p12578_p10 }
  0x42   :  { %12586 = shalt.err (!%p12583_p12)
}
  0x43   :  { %s12587_s29 = scalar_lea.vmem %s13031_s23, 10752  ;;  %p12592_p0 = scmp.lt.s32.totalorder %s13031_s23, %s13031_s23 }
  0x44   :  { %p12588_p13 = scmp.ne.s32.totalorder %s13031_s23, %s12587_s29  ;;  %p12593_p1 = scmp.lt.s32.totalorder %s12587_s29, %s12587_s29 }
  0x46   :  { %p12594_p2 = por %p12593_p1, %p12592_p0 }
  0x48   :  { %p12595_p3 = pnand %p12594_p2, %p12588_p13 }
  0x4a   :  { %12598 = shalt.err (!%p12595_p3)
}
  0x4b   :  { %s12889_s5 = smov 896   ;;  %s12890_s20 = smov 56  }
  0x4c   :  { %127 = dma.hbm_to_vmem [thread:$0]  %s16251_s7, 10752, %s13031_s23, [#allocation16], %s12889_s5, %s12889_s5, %s12890_s20  }
  0x4d   :  { %s12891_s3 = smov [#allocation3]   ;;  %s12892_s1 = smov [#allocation8]  }
  0x4e   :  { %s37_s24 = sshll.u32 %s12891_s3, 4  ;;  %s61_s22 = sshll.u32 %s12892_s1, 4  ;;  %s38_s24 = int_to_ptr.vmem [resolvable:$true] %s37_s24  ;;  %s13065_s22 = int_to_ptr.vmem [resolvable:$true] %s61_s22 }
  0x4f   :  { %s16267_s25 = sld [smem:[#allocation39_spill]] }
  0x55   :  { %s12599_s26 = scalar_lea.hbm %s16267_s25, 256 }
  0x56   :  { %p12600_p4 = scmp.ne.s32.totalorder %s16267_s25, %s12599_s26  ;;  %p12603_p5 = scmp.lt.u32.totalorder %s12599_s26, %s16267_s25 }
  0x58   :  { %p12605_p6 = pnand %p12603_p5, %p12600_p4 }
  0x5a   :  { %12608 = shalt.err (!%p12605_p6)
}
  0x5b   :  { %s12609_s7 = scalar_lea.vmem %s38_s24, 256  ;;  %p12614_p8 = scmp.lt.s32.totalorder %s38_s24, %s38_s24 }
  0x5c   :  { %p12610_p7 = scmp.ne.s32.totalorder %s38_s24, %s12609_s7  ;;  %p12615_p9 = scmp.lt.s32.totalorder %s12609_s7, %s12609_s7 }
  0x5e   :  { %p12616_p10 = por %p12615_p9, %p12614_p8 }
  0x60   :  { %p12617_p11 = pnand %p12616_p10, %p12610_p7 }
  0x62   :  { %12620 = shalt.err (!%p12617_p11)
}
  0x63   :  { %s16268_s23 = smov 128   ;;  %s12621_s18 = scalar_lea.hbm %s16246_s2, 256 }
  0x64   :  { %43 = dma.hbm_to_vmem [thread:$0]  %s16267_s25, 256, %s38_s24, [#allocation4], %s16268_s23, %s16268_s23, %s12886_s19  }
  0x65   :  { %p12622_p12 = scmp.ne.s32.totalorder %s16246_s2, %s12621_s18  ;;  %p12625_p13 = scmp.lt.u32.totalorder %s12621_s18, %s16246_s2 }
  0x67   :  { %p12627_p0 = pnand %p12625_p13, %p12622_p12 }
  0x69   :  { %12630 = shalt.err (!%p12627_p0)
}
  0x6a   :  { %s12631_s26 = scalar_lea.vmem %s13065_s22, 256  ;;  %p12636_p2 = scmp.lt.s32.totalorder %s13065_s22, %s13065_s22 }
  0x6b   :  { %p12632_p1 = scmp.ne.s32.totalorder %s13065_s22, %s12631_s26  ;;  %p12637_p3 = scmp.lt.s32.totalorder %s12631_s26, %s12631_s26 }
  0x6d   :  { %p12638_p4 = por %p12637_p3, %p12636_p2 }
  0x6f   :  { %p12639_p5 = pnand %p12638_p4, %p12632_p1 }
  0x71   :  { %12642 = shalt.err (!%p12639_p5)
}
  0x72   :  { %67 = dma.hbm_to_vmem [thread:$0]  %s16246_s2, 256, %s13065_s22, [#allocation7], %s16268_s23, %s16268_s23, %s12886_s19  }
  0x73   :  { %s12893_s27 = smov [#allocation11]   ;;  %s12894_s29 = smov [#allocation14]  }
  0x74   :  { %s85_s28 = sshll.u32 %s12893_s27, 4  ;;  %s109_s7 = sshll.u32 %s12894_s29, 4  ;;  %s86_s28 = int_to_ptr.vmem [resolvable:$true] %s85_s28  ;;  %s13102_s7 = int_to_ptr.vmem [resolvable:$true] %s109_s7 }
  0x75   :  { %s12643_s30 = scalar_lea.hbm %s16248_s4, 1024 }
  0x76   :  { %p12644_p6 = scmp.ne.s32.totalorder %s16248_s4, %s12643_s30  ;;  %p12647_p7 = scmp.lt.u32.totalorder %s12643_s30, %s16248_s4 }
  0x78   :  { %p12649_p8 = pnand %p12647_p7, %p12644_p6 }
  0x7a   :  { %12652 = shalt.err (!%p12649_p8)
}
  0x7b   :  { %s12653_s2 = scalar_lea.vmem %s86_s28, 1024  ;;  %p12658_p10 = scmp.lt.s32.totalorder %s86_s28, %s86_s28 }
  0x7c   :  { %p12654_p9 = scmp.ne.s32.totalorder %s86_s28, %s12653_s2  ;;  %p12659_p11 = scmp.lt.s32.totalorder %s12653_s2, %s12653_s2 }
  0x7e   :  { %p12660_p12 = por %p12659_p11, %p12658_p10 }
  0x80   :  { %p12661_p13 = pnand %p12660_p12, %p12654_p9 }
  0x82   :  { %12664 = shalt.err (!%p12661_p13)
}
  0x83   :  { %91 = dma.hbm_to_vmem [thread:$0]  %s16248_s4, 1024, %s86_s28, [#allocation10], %s16268_s23, %s16268_s23, %s12886_s19  }
  0x84   :  { %s12665_s24 = scalar_lea.hbm %s16250_s6, 4096 }
  0x85   :  { %p12666_p0 = scmp.ne.s32.totalorder %s16250_s6, %s12665_s24  ;;  %p12669_p1 = scmp.lt.u32.totalorder %s12665_s24, %s16250_s6 }
  0x87   :  { %p12671_p2 = pnand %p12669_p1, %p12666_p0 }
  0x89   :  { %12674 = shalt.err (!%p12671_p2)
}
  0x8a   :  { %s12675_s20 = scalar_lea.vmem %s13102_s7, 4096  ;;  %p12680_p4 = scmp.lt.s32.totalorder %s13102_s7, %s13102_s7 }
  0x8b   :  { %p12676_p3 = scmp.ne.s32.totalorder %s13102_s7, %s12675_s20  ;;  %p12681_p5 = scmp.lt.s32.totalorder %s12675_s20, %s12675_s20 }
  0x8d   :  { %p12682_p6 = por %p12681_p5, %p12680_p4 }
  0x8f   :  { %p12683_p7 = pnand %p12682_p6, %p12676_p3 }
  0x91   :  { %12686 = shalt.err (!%p12683_p7)
}
  0x92   :  { %115 = dma.hbm_to_vmem [thread:$0]  %s16250_s6, 4096, %s13102_s7, [#allocation13], %s16268_s23, %s16268_s23, %s12886_s19  }
  0x93   :  { %s12895_s30 = smov [#allocation17]   ;;  %s12896_s18 = smov [#allocation18]  }
  0x94   :  { %s133_s0 = sshll.u32 %s12895_s30, 4  ;;  %s147_s3 = sshll.u32 %s12896_s18, 4  ;;  %s134_s0 = int_to_ptr.vmem [resolvable:$true] %s133_s0  ;;  %s13139_s3 = int_to_ptr.vmem [resolvable:$true] %s147_s3 }
  0x95   :  { %s12687_s22 = scalar_lea.hbm %s16252_s8, 256 }
  0x96   :  { %p12688_p8 = scmp.ne.s32.totalorder %s16252_s8, %s12687_s22  ;;  %p12691_p9 = scmp.lt.u32.totalorder %s12687_s22, %s16252_s8 }
  0x98   :  { %p12693_p10 = pnand %p12691_p9, %p12688_p8 }
  0x9a   :  { %12696 = shalt.err (!%p12693_p10)
}
  0x9b   :  { %s12697_s6 = scalar_lea.vmem %s134_s0, 256  ;;  %p12702_p12 = scmp.lt.s32.totalorder %s134_s0, %s134_s0 }
  0x9c   :  { %p12698_p11 = scmp.ne.s32.totalorder %s134_s0, %s12697_s6  ;;  %p12703_p13 = scmp.lt.s32.totalorder %s12697_s6, %s12697_s6 }
  0x9e   :  { %p12704_p0 = por %p12703_p13, %p12702_p12 }
  0xa0   :  { %p12705_p1 = pnand %p12704_p0, %p12698_p11 }
  0xa2   :  { %12708 = shalt.err (!%p12705_p1)
}
  0xa3   :  { %139 = dma.hbm_to_vmem [thread:$0]  %s16252_s8, 256, %s134_s0, [#allocation16], %s16268_s23, %s16268_s23, %s12886_s19  }
  0xa4   :  { %s12709_s5 = scalar_lea.hbm %s16254_s10, 1024 }
  0xa5   :  { %p12710_p2 = scmp.ne.s32.totalorder %s16254_s10, %s12709_s5  ;;  %p12713_p3 = scmp.lt.u32.totalorder %s12709_s5, %s16254_s10 }
  0xa7   :  { %p12715_p4 = pnand %p12713_p3, %p12710_p2 }
  0xa9   :  { %12718 = shalt.err (!%p12715_p4)
}
  0xaa   :  { %s12719_s18 = scalar_lea.vmem %s13139_s3, 1024  ;;  %p12724_p6 = scmp.lt.s32.totalorder %s13139_s3, %s13139_s3 }
  0xab   :  { %p12720_p5 = scmp.ne.s32.totalorder %s13139_s3, %s12719_s18  ;;  %p12725_p7 = scmp.lt.s32.totalorder %s12719_s18, %s12719_s18 }
  0xad   :  { %p12726_p8 = por %p12725_p7, %p12724_p6 }
  0xaf   :  { %p12727_p9 = pnand %p12726_p8, %p12720_p5 }
  0xb1   :  { %12730 = shalt.err (!%p12727_p9)
}
  0xb2   :  { %153 = dma.hbm_to_vmem [thread:$0]  %s16254_s10, 1024, %s13139_s3, [#allocation19], %s16268_s23, %s16268_s23, %s12886_s19  }
  0xb3   :  { %12863 = dma.done.wait [#allocation4], 256  }
  0xb4   :  { %12864 = vsyncadd [#allocation4], 4294967040 }
  0xb5   :  { %12865 = dma.done.wait [#allocation7], 512  }
  0xb6   :  { %12866 = vsyncadd [#allocation7], 4294966784 }
  0xb7   :  { %12867 = dma.done.wait [#allocation10], 1280  }
  0xb8   :  { %12868 = vsyncadd [#allocation10], 4294966016 }
  0xb9   :  { %12869 = dma.done.wait [#allocation13], 6144  }
  0xba   :  { %12870 = vsyncadd [#allocation13], 4294961152 }
  0xbb   :  { %12871 = dma.done.wait [#allocation16], 11008  }
  0xbc   :  { %12872 = vsyncadd [#allocation16], 4294956288 }
  0xbd   :  { %12873 = dma.done.wait [#allocation19], 1024  }
  0xbe   :  { %12874 = vsyncadd [#allocation19], 4294966272  ;;  %v16264_v0 = vmov 0.0   ;;  %v187_v1 = vld [vmem:[#allocation15 + $0x8] sm:$0xff]  ;;  %v194_v2 = vld [vmem:[#allocation15 + $0x40] sm:$0xff]  ;;  %vm270_vm0 = vcmask 785408  }
  0xbf   :  { %341 = vmatprep.mubr.f32.mxu0 %v16264_v0  ;;  %418 = vmatprep.mubr.f32.mxu1 %v16264_v0  ;;  %v189_v3 = vld [vmem:[#allocation15 + $0x18] sm:$0xff]  ;;  %v11514_v4 = vpack.c.bf16 %v194_v2, %v187_v1  ;;  %v196_v5 = vld [vmem:[#allocation15 + $0x50] sm:$0xff]  ;;  %v186_v6 = vld [vmem:[#allocation15] sm:$0xff]  ;;  %vm586_vm1 = vcmask 130048   ;;  %s12898_s10 = smov 32   ;;  %s12899_s3 = smov 64  }
  0xc0   :  { %v193_v7 = vld [vmem:[#allocation15 + $0x38] sm:$0xff]  ;;  %v11538_v8 = vpack.c.bf16 %v196_v5, %v189_v3  ;;  %v188_v10 = vld [vmem:[#allocation15 + $0x10] sm:$0xff]  ;;  %v195_v11 = vld [vmem:[#allocation15 + $0x48] sm:$0xff]  ;;  %vm671_vm2 = vcmask 64512   ;;  %vm907_vm3 = vcmask 261120   ;;  %vm1146_vm4 = vcmask 523264  }
  0xc1   :  { %v11516_v9 = vpack.c.bf16 %v193_v7, %v186_v6  ;;  %v201_v12 = vld [vmem:[#allocation15 + $0x78] sm:$0xff]  ;;  %11515 = vmatprep.subr.bf16.mxu0 %v11514_v4  ;;  %v11540_v13 = vpack.c.bf16 %v195_v11, %v188_v10  ;;  %v208_v14 = vld [vmem:[#allocation15 + $0xb0] sm:$0xff]  ;;  %v203_v15 = vld [vmem:[#allocation15 + $0x88] sm:$0xff]  ;;  %s12900_s7 = smov 96   ;;  %vm12902_vm7 = vmmov 0  }
  0xc2   :  { %v210_v16 = vld [vmem:[#allocation15 + $0xc0] sm:$0xff]  ;;  %11539 = vmatprep.subr.bf16.mxu1 %v11538_v8  ;;  %v11518_v17 = vpack.c.bf16 %v208_v14, %v201_v12  ;;  %v200_v19 = vld [vmem:[#allocation15 + $0x70] sm:$0xff]  ;;  %v207_v20 = vld [vmem:[#allocation15 + $0xa8] sm:$0xff] }
  0xc3   :  { %11517 = vmatpush1.bf16.msra.mxu0 %v11516_v9  ;;  %v11542_v18 = vpack.c.bf16 %v210_v16, %v203_v15  ;;  %v202_v21 = vld [vmem:[#allocation15 + $0x80] sm:$0xff]  ;;  %11541 = vmatpush1.bf16.msra.mxu1 %v11540_v13  ;;  %v11520_v22 = vpack.c.bf16 %v207_v20, %v200_v19  ;;  %v209_v23 = vld [vmem:[#allocation15 + $0xb8] sm:$0xff]  ;;  %v215_v24 = vld [vmem:[#allocation15 + $0xe8] sm:$0xff] }
  0xc4   :  { %v222_v25 = vld [vmem:[#allocation15 + $0x120] sm:$0xff]  ;;  %11519 = vmatprep.subr.bf16.mxu0 %v11518_v17  ;;  %v11544_v26 = vpack.c.bf16 %v209_v23, %v202_v21  ;;  %v217_v28 = vld [vmem:[#allocation15 + $0xf8] sm:$0xff]  ;;  %v224_v29 = vld [vmem:[#allocation15 + $0x130] sm:$0xff] }
  0xc5   :  { %11543 = vmatprep.subr.bf16.mxu1 %v11542_v18  ;;  %v11522_v27 = vpack.c.bf16 %v222_v25, %v215_v24  ;;  %v214_v30 = vld [vmem:[#allocation15 + $0xe0] sm:$0xff]  ;;  %v11546_v31 = vpack.c.bf16 %v224_v29, %v217_v28  ;;  %v221_v32 = vld [vmem:[#allocation15 + $0x118] sm:$0xff]  ;;  %v216_v33 = vld [vmem:[#allocation15 + $0xf0] sm:$0xff] }
  0xc6   :  { %v223_v34 = vld [vmem:[#allocation15 + $0x128] sm:$0xff]  ;;  %v11524_v35 = vpack.c.bf16 %v221_v32, %v214_v30  ;;  %v229_v36 = vld [vmem:[#allocation15 + $0x158] sm:$0xff]  ;;  %v236_v37 = vld [vmem:[#allocation15 + $0x190] sm:$0xff] }
  0xc7   :  { %11521 = vmatpush1.bf16.msra.mxu0 %v11520_v22  ;;  %v231_v38 = vld [vmem:[#allocation15 + $0x168] sm:$0xff]  ;;  %11545 = vmatpush1.bf16.msra.mxu1 %v11544_v26  ;;  %v11548_v39 = vpack.c.bf16 %v223_v34, %v216_v33  ;;  %v11526_v40 = vpack.c.bf16 %v236_v37, %v229_v36  ;;  %v238_v41 = vld [vmem:[#allocation15 + $0x1a0] sm:$0xff]  ;;  %v228_v42 = vld [vmem:[#allocation15 + $0x150] sm:$0xff] }
  0xc8   :  { %11523 = vmatprep.subr.bf16.mxu0 %v11522_v27  ;;  %v235_v43 = vld [vmem:[#allocation15 + $0x188] sm:$0xff]  ;;  %11547 = vmatprep.subr.bf16.mxu1 %v11546_v31  ;;  %v11550_v44 = vpack.c.bf16 %v238_v41, %v231_v38  ;;  %v230_v45 = vld [vmem:[#allocation15 + $0x160] sm:$0xff]  ;;  %v237_v46 = vld [vmem:[#allocation15 + $0x198] sm:$0xff] }
  0xc9   :  { %v243_v47 = vld [vmem:[#allocation15 + $0x1c8] sm:$0xff]  ;;  %v250_v48 = vld [vmem:[#allocation15 + $0x200] sm:$0xff]  ;;  %v245_v49 = vld [vmem:[#allocation15 + $0x1d8] sm:$0xff]  ;;  %v11528_v51 = vpack.c.bf16 %v235_v43, %v228_v42  ;;  %v11552_v52 = vpack.c.bf16 %v237_v46, %v230_v45 }
  0xca   :  { %v252_v50 = vld [vmem:[#allocation15 + $0x210] sm:$0xff]  ;;  %v11530_v53 = vpack.c.bf16 %v250_v48, %v243_v47  ;;  %v242_v54 = vld [vmem:[#allocation15 + $0x1c0] sm:$0xff]  ;;  %v249_v55 = vld [vmem:[#allocation15 + $0x1f8] sm:$0xff] }
  0xcb   :  { %11525 = vmatpush1.bf16.msra.mxu0 %v11524_v35  ;;  %11549 = vmatpush1.bf16.msra.mxu1 %v11548_v39  ;;  %v244_v56 = vld [vmem:[#allocation15 + $0x1d0] sm:$0xff]  ;;  %v11554_v57 = vpack.c.bf16 %v252_v50, %v245_v49  ;;  %v251_v58 = vld [vmem:[#allocation15 + $0x208] sm:$0xff]  ;;  %v257_v59 = vld [vmem:[#allocation15 + $0x238] sm:$0xff]  ;;  %v11532_v63 = vpack.c.bf16 %v249_v55, %v242_v54 }
  0xcc   :  { %11527 = vmatprep.subr.bf16.mxu0 %v11526_v40  ;;  %11551 = vmatprep.subr.bf16.mxu1 %v11550_v44  ;;  %v264_v60 = vld [vmem:[#allocation15 + $0x270] sm:$0xff]  ;;  %v259_v61 = vld [vmem:[#allocation15 + $0x248] sm:$0xff]  ;;  %v266_v62 = vld [vmem:[#allocation15 + $0x280] sm:$0xff]  ;;  %v11556_v1 = vpack.c.bf16 %v251_v58, %v244_v56 }
  0xcd   :  { %v11534_v2 = vpack.c.bf16 %v264_v60, %v257_v59  ;;  %v256_v3 = vld [vmem:[#allocation15 + $0x230] sm:$0xff]  ;;  %v263_v4 = vld [vmem:[#allocation15 + $0x268] sm:$0xff]  ;;  %v11558_v5 = vpack.c.bf16 %v266_v62, %v259_v61  ;;  %v258_v6 = vld [vmem:[#allocation15 + $0x240] sm:$0xff] }
  0xce   :  { %v265_v7 = vld [vmem:[#allocation15 + $0x278] sm:$0xff]  ;;  %v192_v8 = vld [vmem:[#allocation15 + $0x30] sm:$0xff]  ;;  %v199_v9 = vld [vmem:[#allocation15 + $0x68] sm:$0xff]  ;;  %v11536_v10 = vpack.c.bf16 %v263_v4, %v256_v3 }
  0xcf   :  { %11529 = vmatpush1.bf16.msra.mxu0 %v11528_v51  ;;  %11553 = vmatpush1.bf16.msra.mxu1 %v11552_v52  ;;  %v11560_v11 = vpack.c.bf16 %v265_v7, %v258_v6  ;;  %v11586_v12 = vpack.c.bf16 %v199_v9, %v192_v8  ;;  %v206_v13 = vld [vmem:[#allocation15 + $0xa0] sm:$0xff]  ;;  %v213_v14 = vld [vmem:[#allocation15 + $0xd8] sm:$0xff]  ;;  %v13178_v15 = vld [vmem:[#allocation9] sm:$0xff] }
  0xd0   :  { %11531 = vmatprep.subr.bf16.mxu0 %v11530_v53  ;;  %11555 = vmatprep.subr.bf16.mxu1 %v11554_v57  ;;  %v11590_v16 = vpack.c.bf16 %v213_v14, %v206_v13  ;;  %v220_v17 = vld [vmem:[#allocation15 + $0x110] sm:$0xff]  ;;  %v227_v18 = vld [vmem:[#allocation15 + $0x148] sm:$0xff]  ;;  %v13186_v19 = vld [vmem:[#allocation9 + $0x8] sm:$0xff] }
  0xd1   :  { %v11594_v20 = vpack.c.bf16 %v227_v18, %v220_v17  ;;  %v234_v21 = vld [vmem:[#allocation15 + $0x180] sm:$0xff]  ;;  %v241_v22 = vld [vmem:[#allocation15 + $0x1b8] sm:$0xff]  ;;  %v248_v24 = vld [vmem:[#allocation15 + $0x1f0] sm:$0xff] }
  0xd2   :  { %v11598_v23 = vpack.c.bf16 %v241_v22, %v234_v21  ;;  %v255_v25 = vld [vmem:[#allocation15 + $0x228] sm:$0xff]  ;;  %v262_v27 = vld [vmem:[#allocation15 + $0x260] sm:$0xff]  ;;  %v269_v28 = vld [vmem:[#allocation15 + $0x298] sm:$0xff] }
  0xd3   :  { %11533 = vmatpush1.bf16.msra.mxu0 %v11532_v63  ;;  %11557 = vmatpush1.bf16.msra.mxu1 %v11556_v1  ;;  %v11602_v26 = vpack.c.bf16 %v255_v25, %v248_v24  ;;  %v11606_v29 = vpack.c.bf16 %v269_v28, %v262_v27  ;;  %v13195_v30 = vld [vmem:[#allocation3] sm:$0xff]  ;;  %v585_v32 = vld [vmem:[#allocation11 + $0x8] sm:$0xff]  ;;  %v197_v37 = vld [vmem:[#allocation15 + $0x58] sm:$0xff] }
  0xd4   :  { %11535 = vmatprep.subr.bf16.mxu0 %v11534_v2  ;;  %11559 = vmatprep.subr.bf16.mxu1 %v11558_v5  ;;  %v584_v31 = vld [vmem:[#allocation11] sm:$0xff]  ;;  %v191_v33 = vld [vmem:[#allocation15 + $0x28] sm:$0xff]  ;;  %v205_v39 = vld [vmem:[#allocation15 + $0x98] sm:$0xff] }
  0xd5   :  { %v198_v34 = vld [vmem:[#allocation15 + $0x60] sm:$0xff]  ;;  %v212_v40 = vld [vmem:[#allocation15 + $0xd0] sm:$0xff]  ;;  %v211_v43 = vld [vmem:[#allocation15 + $0xc8] sm:$0xff] }
  0xd6   :  { %v11562_v35 = vpack.c.bf16 %v198_v34, %v191_v33  ;;  %v190_v36 = vld [vmem:[#allocation15 + $0x20] sm:$0xff]  ;;  %v204_v41 = vld [vmem:[#allocation15 + $0x90] sm:$0xff]  ;;  %v11566_v42 = vpack.c.bf16 %v212_v40, %v205_v39  ;;  %v219_v45 = vld [vmem:[#allocation15 + $0x108] sm:$0xff] }
  0xd7   :  { %11537 = vmatpush1.bf16.msra.mxu0 %v11536_v10  ;;  %11561 = vmatpush1.bf16.msra.mxu1 %v11560_v11  ;;  %v11564_v38 = vpack.c.bf16 %v197_v37, %v190_v36  ;;  %v11568_v44 = vpack.c.bf16 %v211_v43, %v204_v41  ;;  %v226_v46 = vld [vmem:[#allocation15 + $0x140] sm:$0xff]  ;;  %v225_v49 = vld [vmem:[#allocation15 + $0x138] sm:$0xff]  ;;  %v240_v51 = vld [vmem:[#allocation15 + $0x1b0] sm:$0xff] }
  0xd8   :  { %11587 = vmatprep.subr.bf16.mxu1 %v11586_v12  ;;  %11563 = vmatprep.subr.bf16.mxu0 %v11562_v35  ;;  %v218_v47 = vld [vmem:[#allocation15 + $0x100] sm:$0xff]  ;;  %v11570_v48 = vpack.c.bf16 %v226_v46, %v219_v45  ;;  %v233_v50 = vld [vmem:[#allocation15 + $0x178] sm:$0xff]  ;;  %v232_v54 = vld [vmem:[#allocation15 + $0x170] sm:$0xff] }
  0xd9   :  { %v11572_v52 = vpack.c.bf16 %v225_v49, %v218_v47  ;;  %v11574_v53 = vpack.c.bf16 %v240_v51, %v233_v50  ;;  %v239_v55 = vld [vmem:[#allocation15 + $0x1a8] sm:$0xff]  ;;  %v254_v57 = vld [vmem:[#allocation15 + $0x220] sm:$0xff]  ;;  %v818_v59 = vld [vmem:[#allocation11 + $0x10] sm:$0xff] }
  0xda   :  { %10259 = vmatmul.mubr.msk.f32.vlgmr.msra.gmra.mrb[0].mxu0 %vm270_vm0, %v13178_v15  ;;  %10261 = vmatmul.mubr.msk.f32.vlgmr.msra.gmra.mrb[0].mxu1 %vm270_vm0, %v13178_v15  ;;  %v247_v56 = vld [vmem:[#allocation15 + $0x1e8] sm:$0xff]  ;;  %v11576_v58 = vpack.c.bf16 %v239_v55, %v232_v54  ;;  %v819_v60 = vld [vmem:[#allocation11 + $0x18] sm:$0xff]  ;;  %v246_v62 = vld [vmem:[#allocation15 + $0x1e0] sm:$0xff] }
  0xdb   :  { %347 = vmatprep.mubr.f32.mxu0 %v16264_v0  ;;  %11589 = vmatpush3.bf16.msra.mxu1 %v11586_v12  ;;  %v11578_v61 = vpack.c.bf16 %v254_v57, %v247_v56  ;;  %v253_v63 = vld [vmem:[#allocation15 + $0x218] sm:$0xff]  ;;  %v268_v2 = vld [vmem:[#allocation15 + $0x290] sm:$0xff]  ;;  %v1058_v3 = vld [vmem:[#allocation11 + $0x20] sm:$0xff] }
  0xdc   :  { %424 = vmatprep.mubr.f32.mxu1 %v16264_v0  ;;  %11591 = vmatprep.subr.bf16.mxu1 %v11590_v16  ;;  %v261_v1 = vld [vmem:[#allocation15 + $0x258] sm:$0xff]  ;;  %v1059_v4 = vld [vmem:[#allocation11 + $0x28] sm:$0xff]  ;;  %v11580_v5 = vpack.c.bf16 %v253_v63, %v246_v62  ;;  %v260_v7 = vld [vmem:[#allocation15 + $0x250] sm:$0xff] }
  0xdd   :  { %11565 = vmatpush1.bf16.msra.mxu0 %v11564_v38  ;;  %v11582_v6 = vpack.c.bf16 %v268_v2, %v261_v1  ;;  %v267_v8 = vld [vmem:[#allocation15 + $0x288] sm:$0xff]  ;;  %v1297_v10 = vld [vmem:[#allocation11 + $0x30] sm:$0xff]  ;;  %v1298_v11 = vld [vmem:[#allocation11 + $0x38] sm:$0xff] }
  0xde   :  { %10260 = vmatmul.mubr.msk.f32.gmra.mrb[2].mxu0 %vm270_vm0, %v13186_v19  ;;  %10262 = vmatmul.mubr.msk.f32.gmra.mrb[2].mxu1 %vm270_vm0, %v13186_v19  ;;  %v11584_v9 = vpack.c.bf16 %v267_v8, %v260_v7  ;;  %vm13378_vm5 = vmpackc.low %vm270_vm0, %vm270_vm0 }
  0xdf   :  { %495 = vmatprep.mubr.f32.mxu0 %v16264_v0  ;;  %11593 = vmatpush3.bf16.msra.mxu1 %v11590_v16  ;;  %vm13390_vm6 = vmpackc.low %vm586_vm1, %vm586_vm1 }
  0xe0   :  { %11005 = vmatprep.mubr.msk.f32.mxu1 %vm270_vm0, %v13178_v15  ;;  %11595 = vmatprep.subr.bf16.mxu1 %v11594_v20  ;;  %vm13785_vm8 = vmpackc.low %vm907_vm3, %vm907_vm3 }
  0xe1   :  { %11567 = vmatprep.subr.bf16.mxu0 %v11566_v42  ;;  %vm14643_vm9 = vmpackc.low %vm1146_vm4, %vm1146_vm4 }
  0xe2   :  { %11569 = vmatpush1.bf16.msra.mxu0 %v11568_v44 }
  0xe3   :  { %11597 = vmatpush3.bf16.msra.mxu1 %v11594_v20  ;;  %11571 = vmatprep.subr.bf16.mxu0 %v11570_v48 }
  0xe4   :  { %11599 = vmatprep.subr.bf16.mxu1 %v11598_v23 }
  0xe6   :  { %11573 = vmatpush1.bf16.msra.mxu0 %v11572_v52 }
  0xe7   :  { %11601 = vmatpush3.bf16.msra.mxu1 %v11598_v23  ;;  %11575 = vmatprep.subr.bf16.mxu0 %v11574_v53 }
  0xe8   :  { %11603 = vmatprep.subr.bf16.mxu1 %v11602_v26 }
  0xea   :  { %11577 = vmatpush1.bf16.msra.mxu0 %v11576_v58 }
  0xeb   :  { %11605 = vmatpush3.bf16.msra.mxu1 %v11602_v26  ;;  %11579 = vmatprep.subr.bf16.mxu0 %v11578_v61 }
  0xec   :  { %11607 = vmatprep.subr.bf16.mxu1 %v11606_v29 }
  0xee   :  { %11581 = vmatpush1.bf16.msra.mxu0 %v11580_v5 }
  0xef   :  { %11609 = vmatpush3.bf16.msra.mxu1 %v11606_v29  ;;  %11583 = vmatprep.subr.bf16.mxu0 %v11582_v6 }
  0xf0   :  { %11008 = vmatprep.subr.msk.mxu1 %vm586_vm1, %v13195_v30 }
  0xf2   :  { %11006 = vmatmul.mubr.msk.f32.vlgmr.msra.gmra.mrb[4].mxu1 %vm270_vm0, %v13186_v19  ;;  %11585 = vmatpush1.bf16.msra.mxu0 %v11584_v9 }
  0xf3   :  { %11010 = vmatprep.mubr.msk.f32.mxu1 %vm586_vm1, %v584_v31 }
  0xf5   :  { %10263 = vmatmul.mubr.msk.f32.vlgmr.msra.gmra.mrb[4].mxu0 %vm270_vm0, %v13178_v15 }
  0xf6   :  { %501 = vmatprep.mubr.f32.mxu0 %v16264_v0 }
  0xf8   :  { %11009 = vmatpush3.xpose.msk.msra.mxu1 %vm586_vm1, %v13195_v30 }
  0xf9   :  { %11018 = vmatprep.subr.msk.mxu1 %vm586_vm1, %v13195_v30  ;;  %10264 = vmatmul.mubr.msk.f32.gmra.mrb[6].mxu0 %vm270_vm0, %v13186_v19 }
  0xfb   :  { %11011 = vmatmul.mubr.msk.f32.vlgmr.msra.gmra.mrb[6].mxu1 %vm586_vm1, %v585_v32 }
  0xfc   :  { %11019 = vmatpush3.xpose.msk.msra.mxu1 %vm586_vm1, %v13195_v30  ;;  %11020 = vmatprep.mubr.msk.f32.mxu1 %vm586_vm1, %v818_v59 }
  0xfd   :  { %11028 = vmatprep.subr.msk.mxu1 %vm586_vm1, %v13195_v30 }
  0xff   :  { %11021 = vmatmul.mubr.msk.f32.vlgmr.msra.gmra.mrb[8].mxu1 %vm586_vm1, %v819_v60 }
 0x100   :  { %11029 = vmatpush3.xpose.msk.msra.mxu1 %vm586_vm1, %v13195_v30  ;;  %11030 = vmatprep.mubr.msk.f32.mxu1 %vm586_vm1, %v1058_v3 }
 0x101   :  { %11038 = vmatprep.subr.msk.mxu1 %vm586_vm1, %v13195_v30 }
 0x103   :  { %11031 = vmatmul.mubr.msk.f32.vlgmr.msra.gmra.mrb[10].mxu1 %vm586_vm1, %v1059_v4 }
 0x104   :  { %11039 = vmatpush3.xpose.msk.msra.mxu1 %vm586_vm1, %v13195_v30  ;;  %11040 = vmatprep.mubr.msk.f32.mxu1 %vm586_vm1, %v1297_v10 }
 0x107   :  { %11041 = vmatmul.mubr.msk.f32.vlgmr.msra.gmra.mrb[12].mxu1 %vm586_vm1, %v1298_v11 }
 0x1ad   :  { %v13228_v12 = vpop.f32.mrb[0].mxu0  ;;  %v13230_v13 = vpop.f32.mrb[0].mxu1 }
 0x1ae   :  { %903 = vrot.lane.b32.xlu0 %v13228_v12, %s12898_s10  ;;  %v345_v14 = vpop.f32.mrb[1].mxu0  ;;  %11013 = vmatprep.subr.mxu0 %v13228_v12  ;;  %v13235_v16 = vpop.f32.mrb[1].mxu1 }
 0x1af   :  { %11014 = vmatpush3.msra.mxu0 %v13228_v12 }
 0x1b1   :  { %v13238_v15 = vpop.f32.mrb[2].mxu0  ;;  %v13241_v17 = vpop.f32.mrb[2].mxu1 }
 0x1b2   :  { %905 = vrot.lane.b32.xlu0 %v345_v14, %s12898_s10  ;;  %v13243_v18 = vpop.f32.mrb[3].mxu0  ;;  %v13245_v19 = vpop.f32.mrb[3].mxu1 }
 0x1b6   :  { %1144 = vrot.lane.b32.xlu0 %v13230_v13, %s12899_s3 }
 0x1c5   :  { %v13249_v20 = vpop.f32.mrb[4].mxu1 }
 0x1c6   :  { %v13251_v21 = vpop.f32.mrb[5].mxu1 }
 0x1c7   :  { %1672 = vmatprep.mubr.f32.mxu1 %v13251_v21 }
 0x1c8   :  { %v13256_v24 = vpop.f32.mrb[4].mxu0 }
 0x1c9   :  { %v13258_v25 = vpop.f32.mrb[5].mxu0 }
 0x1cc   :  { %v13260_v27 = vpop.f32.mrb[6].mxu0 }
 0x1cd   :  { %v13262_v28 = vpop.f32.mrb[7].mxu0 }
 0x1ce   :  { %v11012_v22 = vpop.f32.mrb[6].mxu1 }
 0x1cf   :  { %v662_v23 = vpop.f32.mrb[7].mxu1 }
 0x1d0   :  { %11015 = vmatprep.mubr.msk.f32.mxu0 %vm671_vm2, %v662_v23 }
 0x1d1   :  { %11016 = vmatmul.mubr.msk.f32.vlgmr.msra.gmra.mrb[8].mxu0 %vm671_vm2, %v11012_v22 }
 0x1d2   :  { %v11022_v31 = vpop.f32.mrb[8].mxu1 }
 0x1d3   :  { %v892_v32 = vpop.f32.mrb[9].mxu1 }
 0x1d4   :  { %11025 = vmatprep.mubr.msk.f32.mxu0 %vm671_vm2, %v892_v32 }
 0x1d6   :  { %v11032_v38 = vpop.f32.mrb[10].mxu1 }
 0x1d7   :  { %v1132_v39 = vpop.f32.mrb[11].mxu1 }
 0x220   :  { %v904_v26 = vpop.permute.xlu0 %903 }
 0x224   :  { %v906_v29 = vpop.permute.xlu0 %905 }
 0x225   :  { %v13265_v30 = vsel %vm907_vm3, %v904_v26, %v906_v29 }
 0x226   :  { %11023 = vmatprep.subr.mxu0 %v13265_v30 }
 0x227   :  { %11024 = vmatpush3.msra.mxu0 %v13265_v30 }
 0x228   :  { %11026 = vmatmul.mubr.msk.f32.vlgmr.msra.gmra.mrb[10].mxu0 %vm671_vm2, %v11022_v31  ;;  %v1145_v48 = vpop.permute.xlu0 %1144 }
 0x229   :  { %11035 = vmatprep.mubr.msk.f32.mxu0 %vm671_vm2, %v1132_v39 }
 0x2a4   :  { %v11017_v33 = vpop.f32.mrb[8].mxu0 }
 0x2a5   :  { %v744_v34 = vpop.f32.mrb[9].mxu0  ;;  %v754_v35 = vsel %vm270_vm0, %v11017_v33, 0.0 }
 0x2a6   :  { %v753_v36 = vsel %vm270_vm0, %v744_v34, 0.0 }
 0x2a7   :  { %v755_v37 = vadd.f32 %v754_v35, %v753_v36 }
 0x2a9   :  { %756 = vadd.xlane.f32.xlu1 %v755_v37 }
 0x2ba   :  { %1142 = vrot.lane.b32.xlu1 %v345_v14, %s12899_s3 }
 0x2fb   :  { %v13275_v40 = vpop.f32.mrb[10].mxu0 }
 0x2fc   :  { %v992_v41 = vsel %vm270_vm0, %v13275_v40, 0.0  ;;  %v13279_v42 = vpop.f32.mrb[11].mxu0 }
 0x2fd   :  { %v991_v43 = vsel %vm270_vm0, %v13279_v42, 0.0 }
 0x2fe   :  { %v993_v44 = vadd.f32 %v992_v41, %v991_v43 }
 0x300   :  { %994 = vadd.xlane.f32.xlu1 %v993_v44 }
 0x336   :  { %v757_v45 = vpop.xlane.xlu1 %756 }
 0x337   :  { %v758_v46 = vrot.slane %v757_v45, 4 }
 0x339   :  { %v759_v47 = vadd.f32 %v758_v46, %v757_v45  ;;  %v11042_v45 = vpop.f32.mrb[12].mxu1 }
 0x33a   :  { %v1143_v49 = vpop.permute.xlu1 %1142  ;;  %v1371_v46 = vpop.f32.mrb[13].mxu1 }
 0x33b   :  { %v13284_v50 = vsel %vm1146_vm4, %v1143_v49, %v1145_v48  ;;  %v760_v51 = vrot.slane %v759_v47, 2 }
 0x33c   :  { %11033 = vmatprep.subr.mxu0 %v13284_v50 }
 0x33d   :  { %11034 = vmatpush3.msra.mxu0 %v13284_v50  ;;  %v761_v52 = vadd.f32 %v760_v51, %v759_v47 }
 0x33e   :  { %11036 = vmatmul.mubr.msk.f32.vlgmr.msra.gmra.mrb[12].mxu0 %vm671_vm2, %v11032_v38 }
 0x33f   :  { %v762_v53 = vrot.slane %v761_v52, 1  ;;  %11045 = vmatprep.mubr.msk.f32.mxu0 %vm671_vm2, %v1371_v46 }
 0x341   :  { %v763_v54 = vadd.f32 %v762_v53, %v761_v52 }
 0x343   :  { %11845 = vpush %v763_v54 }
 0x374   :  { %s11846_s1 = spop %11845 }
 0x375   :  { %s765_s2 = smul.f32 0.0006510417, %s11846_s1 }
 0x377   :  { %v766_v55 = vstv %s765_s2 }
 0x378   :  { %v13289_v56 = vsub.f32 %v744_v34, %v766_v55  ;;  %v13291_v57 = vsub.f32 %v11017_v33, %v766_v55 }
 0x37a   :  { %v769_v58 = vmul.f32 %v13289_v56, %v13289_v56  ;;  %v770_v59 = vmul.f32 %v13291_v57, %v13291_v57 }
 0x37c   :  { %v771_v60 = vsel %vm270_vm0, %v769_v58, 0.0  ;;  %v772_v61 = vsel %vm270_vm0, %v770_v59, 0.0 }
 0x37d   :  { %v773_v62 = vadd.f32 %v772_v61, %v771_v60 }
 0x37f   :  { %774 = vadd.xlane.f32.xlu0 %v773_v62 }
 0x38d   :  { %v995_v14 = vpop.xlane.xlu1 %994 }
 0x38e   :  { %v996_v22 = vrot.slane %v995_v14, 4 }
 0x390   :  { %v997_v23 = vadd.f32 %v996_v22, %v995_v14 }
 0x392   :  { %v998_v26 = vrot.slane %v997_v23, 2 }
 0x394   :  { %v999_v31 = vadd.f32 %v998_v26, %v997_v23 }
 0x396   :  { %v1000_v32 = vrot.slane %v999_v31, 1 }
 0x398   :  { %v1001_v34 = vadd.f32 %v1000_v32, %v999_v31 }
 0x40c   :  { %v775_v63 = vpop.xlane.xlu0 %774 }
 0x40d   :  { %v776_v1 = vrot.slane %v775_v63, 4 }
 0x40f   :  { %v777_v2 = vadd.f32 %v776_v1, %v775_v63 }
 0x411   :  { %v778_v3 = vrot.slane %v777_v2, 2  ;;  %v13299_v7 = vpop.f32.mrb[12].mxu0 }
 0x412   :  { %v1231_v8 = vsel %vm270_vm0, %v13299_v7, 0.0  ;;  %v13303_v9 = vpop.f32.mrb[13].mxu0 }
 0x413   :  { %v779_v4 = vadd.f32 %v778_v3, %v777_v2  ;;  %v1230_v10 = vsel %vm270_vm0, %v13303_v9, 0.0 }
 0x414   :  { %v1232_v11 = vadd.f32 %v1231_v8, %v1230_v10 }
 0x415   :  { %v780_v5 = vrot.slane %v779_v4, 1 }
 0x416   :  { %1233 = vadd.xlane.f32.xlu1 %v1232_v11 }
 0x417   :  { %v781_v6 = vadd.f32 %v780_v5, %v779_v4 }
 0x419   :  { %11847 = vpush %v781_v6 }
 0x44a   :  { %s11848_s22 = spop %11847 }
 0x44b   :  { %s783_s17 = smul.f32 0.0006510417, %s11848_s22 }
 0x44d   :  { %s784_s21 = sadd.f32 1e-05, %s783_s17 }
 0x44f   :  { %v785_v29 = vstv %s784_s21 }
 0x450   :  { %12015 = vrsqrt.f32 %v785_v29 }
 0x45a   :  { %v12016_v33 = vpop.eup %12015 }
 0x45b   :  { %11849 = vpush %v12016_v33 }
 0x45c   :  { %11851 = vpush %v1001_v34 }
 0x48c   :  { %s13307_s26 = spop %11849 }
 0x48d   :  { %s11852_s24 = spop %11851  ;;  %v788_v32 = vstv %s13307_s26 }
 0x48e   :  { %s1003_s6 = smul.f32 0.0006510417, %s11852_s24  ;;  %v789_v33 = vmul.f32 %v788_v32, %v13289_v56 }
 0x490   :  { %v1004_v35 = vstv %s1003_s6 }
 0x491   :  { %v1005_v36 = vsub.f32 %v13279_v42, %v1004_v35  ;;  %v1006_v37 = vsub.f32 %v13275_v40, %v1004_v35  ;;  %v13340_v35 = vmul.f32 %v788_v32, %v13291_v57 }
 0x493   :  { %v1007_v38 = vmul.f32 %v1005_v36, %v1005_v36  ;;  %v1008_v39 = vmul.f32 %v1006_v37, %v1006_v37 }
 0x495   :  { %v1009_v41 = vsel %vm270_vm0, %v1007_v38, 0.0  ;;  %v1010_v43 = vsel %vm270_vm0, %v1008_v39, 0.0  ;;  %v791_v38 = vsel %vm270_vm0, %v789_v33, -inf }
 0x496   :  { %v1011_v44 = vadd.f32 %v1010_v43, %v1009_v41 }
 0x498   :  { %1012 = vadd.xlane.f32.xlu0 %v1011_v44 }
 0x4a3   :  { %v1234_v54 = vpop.xlane.xlu1 %1233 }
 0x4ae   :  { %1380 = vrot.lane.b32.xlu0 %v13230_v13, %s12900_s7  ;;  %v1235_v13 = vrot.slane %v1234_v54, 4 }
 0x4b0   :  { %v1236_v55 = vadd.f32 %v1235_v13, %v1234_v54 }
 0x4b2   :  { %v1237_v58 = vrot.slane %v1236_v55, 2 }
 0x4b4   :  { %v1238_v60 = vadd.f32 %v1237_v58, %v1236_v55 }
 0x4b6   :  { %v1239_v61 = vrot.slane %v1238_v60, 1 }
 0x4b8   :  { %v1240_v62 = vadd.f32 %v1239_v61, %v1238_v60 }
 0x525   :  { %v1013_v47 = vpop.xlane.xlu0 %1012 }
 0x526   :  { %v1014_v42 = vrot.slane %v1013_v47, 4 }
 0x528   :  { %v1015_v48 = vadd.f32 %v1014_v42, %v1013_v47 }
 0x529   :  { %v13316_v40 = vpop.permute.xlu0 %1380 }
 0x52a   :  { %11043 = vmatprep.subr.mxu0 %v13316_v40  ;;  %v1016_v49 = vrot.slane %v1015_v48, 2 }
 0x52b   :  { %11044 = vmatpush3.msra.mxu0 %v13316_v40 }
 0x52c   :  { %11046 = vmatmul.mubr.msk.f32.vlgmr.msra.gmra.mrb[14].mxu0 %vm671_vm2, %v11042_v45  ;;  %v1017_v51 = vadd.f32 %v1016_v49, %v1015_v48 }
 0x52d   :  { %1602 = vmatprep.mubr.f32.mxu0 %v13256_v24 }
 0x52e   :  { %v1018_v52 = vrot.slane %v1017_v51, 1 }
 0x530   :  { %v1019_v53 = vadd.f32 %v1018_v52, %v1017_v51 }
 0x532   :  { %11853 = vpush %v1019_v53 }
 0x563   :  { %s11854_s25 = spop %11853 }
 0x564   :  { %s1021_s27 = smul.f32 0.0006510417, %s11854_s25 }
 0x566   :  { %s1022_s29 = sadd.f32 1e-05, %s1021_s27 }
 0x568   :  { %v1023_v59 = vstv %s1022_s29 }
 0x569   :  { %12017 = vrsqrt.f32 %v1023_v59 }
 0x573   :  { %v12018_v63 = vpop.eup %12017 }
 0x574   :  { %11855 = vpush %v12018_v63 }
 0x575   :  { %11857 = vpush %v1240_v62 }
 0x5a5   :  { %s11856_s5 = spop %11855 }
 0x5a6   :  { %s11858_s20 = spop %11857  ;;  %v1026_v14 = vstv %s11856_s5 }
 0x5a7   :  { %s1242_s4 = smul.f32 0.0006510417, %s11858_s20  ;;  %v1027_v26 = vmul.f32 %v1026_v14, %v1005_v36  ;;  %v13332_v29 = vmul.f32 %v1026_v14, %v1006_v37  ;;  %v794_v36 = vsel %vm270_vm0, %v13340_v35, -inf }
 0x5a9   :  { %v1243_v1 = vstv %s1242_s4  ;;  %v1029_v31 = vsel %vm270_vm0, %v1027_v26, -inf  ;;  %v1032_v34 = vsel %vm270_vm0, %v13332_v29, -inf }
 0x5aa   :  { %v1244_v2 = vsub.f32 %v13303_v9, %v1243_v1  ;;  %v13324_v3 = vsub.f32 %v13299_v7, %v1243_v1 }
 0x5ac   :  { %v1246_v4 = vmul.f32 %v1244_v2, %v1244_v2  ;;  %v1247_v5 = vmul.f32 %v13324_v3, %v13324_v3 }
 0x5ae   :  { %v1248_v6 = vsel %vm270_vm0, %v1246_v4, 0.0  ;;  %v1249_v8 = vsel %vm270_vm0, %v1247_v5, 0.0 }
 0x5af   :  { %v1250_v10 = vadd.f32 %v1249_v8, %v1248_v6 }
 0x5b1   :  { %1251 = vadd.xlane.f32.xlu1 %v1250_v10 }
 0x5ff   :  { %v11047_v11 = vpop.f32.mrb[14].mxu0 }
 0x600   :  { %v1465_v22 = vsel %vm270_vm0, %v11047_v11, 0.0  ;;  %v1455_v23 = vpop.f32.mrb[15].mxu0 }
 0x601   :  { %v1464_v9 = vsel %vm270_vm0, %v1455_v23, 0.0 }
 0x602   :  { %v1466_v7 = vadd.f32 %v1465_v22, %v1464_v9 }
 0x604   :  { %1467 = vadd.xlane.f32.xlu1 %v1466_v7 }
 0x608   :  { %1030 = vmax.xlane.f32.xlu1 %v1029_v31 }
 0x60c   :  { %1033 = vmax.xlane.f32.xlu1 %v1032_v34 }
 0x610   :  { %792 = vmax.xlane.f32.xlu1 %v791_v38 }
 0x614   :  { %795 = vmax.xlane.f32.xlu1 %v794_v36 }
 0x63e   :  { %v1252_v37 = vpop.xlane.xlu1 %1251 }
 0x63f   :  { %v1253_v39 = vrot.slane %v1252_v37, 4 }
 0x641   :  { %v1254_v41 = vadd.f32 %v1253_v39, %v1252_v37 }
 0x643   :  { %v1255_v43 = vrot.slane %v1254_v41, 2 }
 0x645   :  { %v1256_v44 = vadd.f32 %v1255_v43, %v1254_v41 }
 0x647   :  { %v1257_v56 = vrot.slane %v1256_v44, 1 }
 0x649   :  { %v1258_v45 = vadd.f32 %v1257_v56, %v1256_v44 }
 0x64b   :  { %11859 = vpush %v1258_v45 }
 0x67c   :  { %s11860_s28 = spop %11859 }
 0x67d   :  { %s1260_s30 = smul.f32 0.0006510417, %s11860_s28 }
 0x67f   :  { %s1261_s18 = sadd.f32 1e-05, %s1260_s30 }
 0x681   :  { %v1262_v57 = vstv %s1261_s18 }
 0x682   :  { %12019 = vrsqrt.f32 %v1262_v57 }
 0x68c   :  { %v12020_v46 = vpop.eup %12019 }
 0x68d   :  { %11861 = vpush %v12020_v46 }
 0x691   :  { %v1468_v47 = vpop.xlane.xlu1 %1467 }
 0x692   :  { %v1469_v42 = vrot.slane %v1468_v47, 4 }
 0x694   :  { %v1470_v48 = vadd.f32 %v1469_v42, %v1468_v47 }
 0x695   :  { %v1031_v54 = vpop.xlane.xlu1 %1030 }
 0x696   :  { %v1471_v49 = vrot.slane %v1470_v48, 2  ;;  %v1035_v60 = vsub.f32 %v1027_v26, %v1031_v54 }
 0x698   :  { %v1472_v51 = vadd.f32 %v1471_v49, %v1470_v48  ;;  %v1037_v62 = vmul.f32 1.442695, %v1035_v60 }
 0x699   :  { %v1034_v59 = vpop.xlane.xlu1 %1033 }
 0x69a   :  { %v1473_v52 = vrot.slane %v1472_v51, 1  ;;  %12021 = vpow2.f32 %v1037_v62  ;;  %v1036_v41 = vsub.f32 %v13332_v29, %v1034_v59 }
 0x69c   :  { %v1474_v53 = vadd.f32 %v1473_v52, %v1472_v51  ;;  %v1039_v44 = vmul.f32 1.442695, %v1036_v41 }
 0x69d   :  { %v793_v61 = vpop.xlane.xlu1 %792 }
 0x69e   :  { %11863 = vpush %v1474_v53  ;;  %v797_v63 = vsub.f32 %v789_v33, %v793_v61 }
 0x6a0   :  { %v799_v1 = vmul.f32 1.442695, %v797_v63 }
 0x6a1   :  { %v796_v43 = vpop.xlane.xlu1 %795 }
 0x6a2   :  { %12023 = vpow2.f32 %v799_v1  ;;  %v798_v56 = vsub.f32 %v13340_v35, %v796_v43 }
 0x6a4   :  { %v13354_v9 = vpop.eup %12021  ;;  %v801_v46 = vmul.f32 1.442695, %v798_v56 }
 0x6a5   :  { %v1041_v7 = vsel %vm270_vm0, %v13354_v9, 0.0 }
 0x6ac   :  { %v13358_v26 = vpop.eup %12023 }
 0x6be   :  { %s13345_s8 = spop %11861 }
 0x6bf   :  { %v1265_v13 = vstv %s13345_s8 }
 0x6c0   :  { %v13348_v55 = vmul.f32 %v1265_v13, %v1244_v2  ;;  %v1267_v48 = vmul.f32 %v1265_v13, %v13324_v3 }
 0x6c2   :  { %v1268_v58 = vsel %vm270_vm0, %v13348_v55, -inf  ;;  %v1271_v29 = vsel %vm270_vm0, %v1267_v48, -inf }
 0x6c3   :  { %1269 = vmax.xlane.f32.xlu1 %v1268_v58 }
 0x6cf   :  { %s11864_s0 = spop %11863 }
 0x6d0   :  { %s1476_s1 = smul.f32 0.0006510417, %s11864_s0 }
 0x6d2   :  { %v1477_v4 = vstv %s1476_s1 }
 0x6d3   :  { %v1478_v5 = vsub.f32 %v1455_v23, %v1477_v4  ;;  %v1479_v6 = vsub.f32 %v11047_v11, %v1477_v4  ;;  %v803_v11 = vsel %vm270_vm0, %v13358_v26, 0.0 }
 0x6d5   :  { %v1480_v8 = vmul.f32 %v1478_v5, %v1478_v5  ;;  %v1481_v2 = vmul.f32 %v1479_v6, %v1479_v6 }
 0x6d7   :  { %v1482_v10 = vsel %vm270_vm0, %v1480_v8, 0.0  ;;  %v1483_v14 = vsel %vm270_vm0, %v1481_v2, 0.0 }
 0x6d8   :  { %v1484_v22 = vadd.f32 %v1483_v14, %v1482_v10 }
 0x6da   :  { %1485 = vadd.xlane.f32.xlu0 %v1484_v22 }
 0x6de   :  { %1042 = vadd.xlane.f32.xlu0 %v1041_v7 }
 0x6e2   :  { %804 = vadd.xlane.f32.xlu0 %v803_v11 }
 0x750   :  { %v1270_v54 = vpop.xlane.xlu1 %1269 }
 0x751   :  { %v1274_v58 = vsub.f32 %v13348_v55, %v1270_v54 }
 0x753   :  { %v1276_v3 = vmul.f32 1.442695, %v1274_v58 }
 0x767   :  { %v1486_v23 = vpop.xlane.xlu0 %1485 }
 0x768   :  { %v1487_v31 = vrot.slane %v1486_v23, 4 }
 0x76a   :  { %v1488_v32 = vadd.f32 %v1487_v31, %v1486_v23 }
 0x76b   :  { %v1043_v63 = vpop.xlane.xlu0 %1042 }
 0x76c   :  { %v1489_v33 = vrot.slane %v1488_v32, 2 }
 0x76e   :  { %v1490_v34 = vadd.f32 %v1489_v33, %v1488_v32 }
 0x76f   :  { %v805_v8 = vpop.xlane.xlu0 %804 }
 0x770   :  { %v1491_v38 = vrot.slane %v1490_v34, 1 }
 0x772   :  { %v1492_v36 = vadd.f32 %v1491_v38, %v1490_v34 }
 0x774   :  { %11865 = vpush %v1492_v36 }
 0x7a5   :  { %s11866_s2 = spop %11865 }
 0x7a6   :  { %s1494_s22 = smul.f32 0.0006510417, %s11866_s2 }
 0x7a8   :  { %s1495_s17 = sadd.f32 1e-05, %s1494_s22 }
 0x7aa   :  { %v1496_v37 = vstv %s1495_s17 }
 0x7ab   :  { %12025 = vrsqrt.f32 %v1496_v37 }
 0x7ac   :  { %12027 = vpow2.f32 %v1039_v44 }
 0x7ad   :  { %12029 = vpow2.f32 %v801_v46  ;;  %v1680_v46 = vld [vmem:[#allocation17 + $0x8] sm:$0xff] }
 0x7b5   :  { %v12026_v39 = vpop.eup %12025 }
 0x7b6   :  { %11867 = vpush %v12026_v39  ;;  %v12028_v51 = vpop.eup %12027 }
 0x7b7   :  { %v1044_v35 = vsel %vm270_vm0, %v12028_v51, 0.0  ;;  %v12030_v52 = vpop.eup %12029 }
 0x7b8   :  { %v806_v53 = vsel %vm270_vm0, %v12030_v52, 0.0 }
 0x7e7   :  { %s11868_s21 = spop %11867 }
 0x7e8   :  { %v1499_v45 = vstv %s11868_s21 }
 0x7e9   :  { %v1500_v57 = vmul.f32 %v1499_v45, %v1478_v5  ;;  %v1501_v47 = vmul.f32 %v1499_v45, %v1479_v6 }
 0x7eb   :  { %v1502_v42 = vsel %vm270_vm0, %v1500_v57, -inf  ;;  %v1505_v49 = vsel %vm270_vm0, %v1501_v47, -inf }
 0x7ec   :  { %1503 = vmax.xlane.f32.xlu1 %v1502_v42 }
 0x7f0   :  { %1506 = vmax.xlane.f32.xlu1 %v1505_v49 }
 0x7f4   :  { %1272 = vmax.xlane.f32.xlu1 %v1271_v29 }
 0x7f8   :  { %1045 = vadd.xlane.f32.xlu1 %v1044_v35 }
 0x7fc   :  { %807 = vadd.xlane.f32.xlu1 %v806_v53 }
 0x879   :  { %v1504_v59 = vpop.xlane.xlu1 %1503 }
 0x87a   :  { %v1508_v60 = vsub.f32 %v1500_v57, %v1504_v59 }
 0x87c   :  { %v1510_v13 = vmul.f32 1.442695, %v1508_v60 }
 0x87d   :  { %v1507_v61 = vpop.xlane.xlu1 %1506 }
 0x87e   :  { %12031 = vpow2.f32 %v1510_v13  ;;  %v1509_v62 = vsub.f32 %v1501_v47, %v1507_v61 }
 0x87f   :  { %12033 = vpow2.f32 %v1276_v3 }
 0x880   :  { %v1512_v1 = vmul.f32 1.442695, %v1509_v62 }
 0x881   :  { %v1273_v4 = vpop.xlane.xlu1 %1272 }
 0x882   :  { %12035 = vpow2.f32 %v1512_v1  ;;  %v1275_v5 = vsub.f32 %v1267_v48, %v1273_v4 }
 0x883   :  { %12037 = vrcp.f32 %v1043_v63 }
 0x884   :  { %v1278_v6 = vmul.f32 1.442695, %v1275_v5 }
 0x885   :  { %v1046_v2 = vpop.xlane.xlu1 %1045 }
 0x886   :  { %12039 = vpow2.f32 %v1278_v6 }
 0x887   :  { %12041 = vrcp.f32 %v1046_v2 }
 0x888   :  { %v12032_v55 = vpop.eup %12031  ;;  %12043 = vrcp.f32 %v805_v8 }
 0x889   :  { %v808_v10 = vpop.xlane.xlu1 %807  ;;  %v1514_v14 = vsel %vm270_vm0, %v12032_v55, 0.0  ;;  %v12034_v22 = vpop.eup %12033 }
 0x88a   :  { %12045 = vrcp.f32 %v808_v10  ;;  %1515 = vadd.xlane.f32.xlu0 %v1514_v14  ;;  %v1280_v11 = vsel %vm270_vm0, %v12034_v22, 0.0  ;;  %v1765_v10 = vld [vmem:[#allocation6] sm:$0xff] }
 0x88c   :  { %v12036_v7 = vpop.eup %12035 }
 0x88d   :  { %v1517_v23 = vsel %vm270_vm0, %v12036_v7, 0.0  ;;  %v12038_v31 = vpop.eup %12037 }
 0x88e   :  { %1281 = vadd.xlane.f32.xlu0 %v1280_v11  ;;  %1518 = vadd.xlane.f32.xlu1 %v1517_v23  ;;  %v1048_v36 = vmul.f32 %v12038_v31, %v13354_v9  ;;  %v1679_v9 = vld [vmem:[#allocation17] sm:$0xff]  ;;  %v1767_v31 = vld [vmem:[#allocation12 + $0x8] sm:$0xff] }
 0x88f   :  { %v11623_v42 = vpack.c.bf16 %v1680_v46, %v1679_v9  ;;  %v1766_v23 = vld [vmem:[#allocation12] sm:$0xff]  ;;  %v2688_v9 = vld [vmem:[#allocation12 + $0x70] sm:$0xff]  ;;  %v2689_v46 = vld [vmem:[#allocation12 + $0x78] sm:$0xff] }
 0x890   :  { %v12040_v32 = vpop.eup %12039 }
 0x891   :  { %v12042_v33 = vpop.eup %12041  ;;  %v1283_v34 = vsel %vm270_vm0, %v12040_v32, 0.0 }
 0x892   :  { %v12044_v38 = vpop.eup %12043  ;;  %1284 = vadd.xlane.f32.xlu1 %v1283_v34  ;;  %v1050_v37 = vmul.f32 %v12042_v33, %v12028_v51  ;;  %v1769_v33 = vld [vmem:[#allocation12 + $0x18] sm:$0xff]  ;;  %v2072_v34 = vld [vmem:[#allocation12 + $0x20] sm:$0xff] }
 0x893   :  { %v810_v44 = vmul.f32 %v12044_v38, %v13358_v26  ;;  %v12901_v26 = vmov 0.0|0.0   ;;  %v2073_v38 = vld [vmem:[#allocation12 + $0x28] sm:$0xff] }
 0x894   :  { %v12046_v41 = vpop.eup %12045  ;;  %v11610_v43 = vpack.c.bf16 %v1050_v37, %v1048_v36 }
 0x895   :  { %v812_v56 = vmul.f32 %v12046_v41, %v12030_v52  ;;  %v1051_v54 = vadd.f32 %v1048_v36, %v810_v44  ;;  %v2074_v36 = vld [vmem:[#allocation12 + $0x30] sm:$0xff]  ;;  %v2379_v41 = vld [vmem:[#allocation12 + $0x40] sm:$0xff] }
 0x896   :  { %11612 = vmatprep.subr.msk.bf16.mxu0 %vm13378_vm5, %v11610_v43  ;;  %v2380_v43 = vld [vmem:[#allocation12 + $0x48] sm:$0xff] }
 0x897   :  { %v1052_v45 = vadd.f32 %v1050_v37, %v812_v56  ;;  %v11613_v57 = vpack.c.bf16 %v812_v56, %v810_v44  ;;  %v2075_v37 = vld [vmem:[#allocation12 + $0x38] sm:$0xff]  ;;  %v2381_v44 = vld [vmem:[#allocation12 + $0x50] sm:$0xff] }
 0x898   :  { %v2382_v56 = vld [vmem:[#allocation12 + $0x58] sm:$0xff] }
 0x899   :  { %11615 = vmatpush1.bf16.xpose.msk.msra.mxu0 %vm13378_vm5, %v11613_v57  ;;  %v2687_v57 = vld [vmem:[#allocation12 + $0x68] sm:$0xff] }
 0x89a   :  { %11622 = vmatprep.subr.bf16.mxu0 %v12901_v26 }
 0x8a0   :  { %1603 = vmatmul.mubr.f32.vlgmr.msra.gmra.mrb[16].mxu0 %v13235_v16 }
 0x8a1   :  { %11625 = vmatpush3.bf16.xpose.msk.msra.mxu0 %vm13390_vm6, %v11623_v42  ;;  %11052 = vmatprep.mubr.msk.f32.mxu0 %vm12902_vm7, %v16264_v0 }
 0x8a2   :  { %11055 = vmatprep.subr.msk.mxu0 %vm907_vm3, %v1765_v10 }
 0x917   :  { %v1516_v48 = vpop.xlane.xlu0 %1515 }
 0x918   :  { %12047 = vrcp.f32 %v1516_v48 }
 0x91b   :  { %v1282_v49 = vpop.xlane.xlu0 %1281  ;;  %v1519_v29 = vpop.xlane.xlu1 %1518 }
 0x91c   :  { %12049 = vrcp.f32 %v1282_v49 }
 0x91d   :  { %12051 = vrcp.f32 %v1519_v29 }
 0x91f   :  { %v1285_v51 = vpop.xlane.xlu1 %1284 }
 0x920   :  { %12053 = vrcp.f32 %v1285_v51 }
 0x922   :  { %v12048_v35 = vpop.eup %12047 }
 0x923   :  { %v1521_v59 = vmul.f32 %v12048_v35, %v12032_v55 }
 0x926   :  { %v12050_v52 = vpop.eup %12049 }
 0x927   :  { %v12052_v53 = vpop.eup %12051  ;;  %v1287_v58 = vmul.f32 %v12050_v52, %v12034_v22 }
 0x928   :  { %v1523_v60 = vmul.f32 %v12052_v53, %v12036_v7 }
 0x929   :  { %v1290_v3 = vadd.f32 %v1287_v58, %v1051_v54 }
 0x92a   :  { %v12054_v13 = vpop.eup %12053  ;;  %v11616_v61 = vpack.c.bf16 %v1523_v60, %v1521_v59 }
 0x92b   :  { %v1289_v62 = vmul.f32 %v12054_v13, %v12040_v32  ;;  %v1524_v63 = vadd.f32 %v1521_v59, %v1290_v3  ;;  %v1768_v32 = vld [vmem:[#allocation12 + $0x10] sm:$0xff] }
 0x92c   :  { %11618 = vmatprep.subr.msk.bf16.mxu1 %vm13378_vm5, %v11616_v61 }
 0x92d   :  { %v1291_v1 = vadd.f32 %v1289_v62, %v1052_v45  ;;  %v1761_v4 = vmul.f32 0.25, %v1524_v63  ;;  %v11619_v5 = vpack.c.bf16 %v1289_v62, %v1287_v58  ;;  %v2686_v45 = vld [vmem:[#allocation12 + $0x60] sm:$0xff] }
 0x92f   :  { %v1525_v6 = vadd.f32 %v1523_v60, %v1291_v1  ;;  %1763 = vst.msk [vmem:[#allocation24] sm:$0xff] %vm270_vm0, %v1761_v4  ;;  %11621 = vmatpush1.bf16.xpose.msk.msra.mxu1 %vm13378_vm5, %v11619_v5 }
 0x930   :  { %11063 = vmatprep.subr.mxu1 %v13228_v12 }
 0x931   :  { %v1762_v8 = vmul.f32 0.25, %v1525_v6 }
 0x933   :  { %1764 = vst.msk [vmem:[#allocation24 + $0x8] sm:$0xff] %vm270_vm0, %v1762_v8 }
 0x936   :  { %1673 = vmatmul.mubr.f32.vlgmr.msra.gmra.mrb[14].mxu1 %v13258_v25 }
 0x937   :  { %11064 = vmatpush3.msra.mxu1 %v13228_v12 }
 0x938   :  { %11079 = vmatprep.subr.mxu1 %v13265_v30 }
 0x973   :  { %v1604_v2 = vpop.f32.mrb[16].mxu0 }
 0x974   :  { %v1606_v55 = vpop.f32.mrb[17].mxu0 }
 0xa09   :  { %v1674_v14 = vpop.f32.mrb[14].mxu1 }
 0xa0a   :  { %v1675_v22 = vadd.f32 %v1674_v14, %v1604_v2  ;;  %v1676_v7 = vpop.f32.mrb[15].mxu1 }
 0xa0c   :  { %v1678_v11 = vmul.f32 0.25, %v1675_v22 }
 0xa0e   :  { %11053 = vmatmul.mubr.msk.f32.vlgmr.msra.gmra.mrb[18].mxu0 %vm586_vm1, %v1678_v11 }
 0xa0f   :  { %11056 = vmatpush3.xpose.msk.msra.mxu0 %vm907_vm3, %v1765_v10  ;;  %11057 = vmatprep.mubr.msk.f32.mxu0 %vm907_vm3, %v1766_v23 }
 0xa10   :  { %11071 = vmatprep.subr.msk.mxu0 %vm907_vm3, %v1765_v10 }
 0xa12   :  { %11058 = vmatmul.mubr.msk.f32.vlgmr.msra.gmra.mrb[20].mxu0 %vm907_vm3, %v1767_v31 }
 0xa13   :  { %11060 = vmatprep.mubr.msk.f32.mxu0 %vm907_vm3, %v1768_v32  ;;  %11072 = vmatpush3.xpose.msk.msra.mxu0 %vm907_vm3, %v1765_v10 }
 0xa14   :  { %11087 = vmatprep.subr.msk.mxu0 %vm907_vm3, %v1765_v10 }
 0xa16   :  { %11061 = vmatmul.mubr.msk.f32.gmra.mrb[22].mxu0 %vm907_vm3, %v1769_v33 }
 0xa17   :  { %11073 = vmatprep.mubr.msk.f32.mxu0 %vm907_vm3, %v2072_v34 }
 0xa1a   :  { %11074 = vmatmul.mubr.msk.f32.vlgmr.msra.gmra.mrb[24].mxu0 %vm907_vm3, %v2073_v38 }
 0xa1b   :  { %11076 = vmatprep.mubr.msk.f32.mxu0 %vm907_vm3, %v2074_v36  ;;  %11088 = vmatpush3.xpose.msk.msra.mxu0 %vm907_vm3, %v1765_v10 }
 0xa1c   :  { %11103 = vmatprep.subr.msk.mxu0 %vm907_vm3, %v1765_v10 }
 0xa1e   :  { %11077 = vmatmul.mubr.msk.f32.gmra.mrb[26].mxu0 %vm907_vm3, %v2075_v37 }
 0xa1f   :  { %11089 = vmatprep.mubr.msk.f32.mxu0 %vm907_vm3, %v2379_v41 }
 0xa22   :  { %11090 = vmatmul.mubr.msk.f32.vlgmr.msra.gmra.mrb[28].mxu0 %vm907_vm3, %v2380_v43 }
 0xa23   :  { %11092 = vmatprep.mubr.msk.f32.mxu0 %vm907_vm3, %v2381_v44  ;;  %11104 = vmatpush3.xpose.msk.msra.mxu0 %vm907_vm3, %v1765_v10 }
 0xa26   :  { %11093 = vmatmul.mubr.msk.f32.gmra.mrb[30].mxu0 %vm907_vm3, %v2382_v56 }
 0xa27   :  { %11105 = vmatprep.mubr.msk.f32.mxu0 %vm907_vm3, %v2686_v45 }
 0xa2a   :  { %11106 = vmatmul.mubr.msk.f32.vlgmr.msra.gmra.mrb[32].mxu0 %vm907_vm3, %v2687_v57 }
 0xa2b   :  { %11108 = vmatprep.mubr.msk.f32.mxu0 %vm907_vm3, %v2688_v9 }
 0xa2e   :  { %11109 = vmatmul.mubr.msk.f32.gmra.mrb[34].mxu0 %vm907_vm3, %v2689_v46 }
 0xa2f   :  { %3072 = vmatprep.mubr.f32.mxu0 %v13256_v24 }
 0xae1   :  { %v1756_v42 = vpop.f32.mrb[18].mxu0 }
 0xae2   :  { %1760 = vst.msk [vmem:[#allocation20] sm:$0xff] %vm586_vm1, %v1756_v42  ;;  %v11054_v48 = vpop.f32.mrb[19].mxu0 }
 0xae5   :  { %v11059_v49 = vpop.f32.mrb[20].mxu0 }
 0xae6   :  { %v1851_v29 = vpop.f32.mrb[21].mxu0 }
 0xae7   :  { %11065 = vmatprep.mubr.msk.f32.mxu1 %vm671_vm2, %v1851_v29 }
 0xae8   :  { %11066 = vmatmul.mubr.msk.f32.vlgmr.msra.gmra.mrb[16].mxu1 %vm671_vm2, %v11059_v49 }
 0xae9   :  { %11080 = vmatpush3.msra.mxu1 %v13265_v30  ;;  %v11062_v51 = vpop.f32.mrb[22].mxu0 }
 0xaea   :  { %11095 = vmatprep.subr.mxu1 %v13284_v50  ;;  %v1861_v35 = vpop.f32.mrb[23].mxu0 }
 0xaeb   :  { %11068 = vmatprep.mubr.msk.f32.mxu1 %vm671_vm2, %v1861_v35 }
 0xaec   :  { %11069 = vmatmul.mubr.msk.f32.gmra.mrb[18].mxu1 %vm671_vm2, %v11062_v51 }
 0xaed   :  { %v11075_v52 = vpop.f32.mrb[24].mxu0 }
 0xaee   :  { %v2154_v53 = vpop.f32.mrb[25].mxu0 }
 0xaef   :  { %11081 = vmatprep.mubr.msk.f32.mxu1 %vm671_vm2, %v2154_v53 }
 0xaf0   :  { %11082 = vmatmul.mubr.msk.f32.vlgmr.msra.gmra.mrb[20].mxu1 %vm671_vm2, %v11075_v52 }
 0xaf1   :  { %11096 = vmatpush3.msra.mxu1 %v13284_v50  ;;  %v11078_v54 = vpop.f32.mrb[26].mxu0 }
 0xaf2   :  { %11111 = vmatprep.subr.mxu1 %v13316_v40  ;;  %v2164_v58 = vpop.f32.mrb[27].mxu0 }
 0xaf3   :  { %11084 = vmatprep.mubr.msk.f32.mxu1 %vm671_vm2, %v2164_v58 }
 0xaf4   :  { %11085 = vmatmul.mubr.msk.f32.gmra.mrb[22].mxu1 %vm671_vm2, %v11078_v54 }
 0xaf5   :  { %v11091_v59 = vpop.f32.mrb[28].mxu0 }
 0xaf6   :  { %v2461_v60 = vpop.f32.mrb[29].mxu0 }
 0xaf7   :  { %11097 = vmatprep.mubr.msk.f32.mxu1 %vm671_vm2, %v2461_v60 }
 0xaf8   :  { %11098 = vmatmul.mubr.msk.f32.vlgmr.msra.gmra.mrb[24].mxu1 %vm671_vm2, %v11091_v59 }
 0xaf9   :  { %11112 = vmatpush3.msra.mxu1 %v13316_v40  ;;  %v11094_v10 = vpop.f32.mrb[30].mxu0 }
 0xafa   :  { %11650 = vmatprep.subr.bf16.mxu1 %v12901_v26  ;;  %v2471_v7 = vpop.f32.mrb[31].mxu0 }
 0xafb   :  { %11100 = vmatprep.mubr.msk.f32.mxu1 %vm671_vm2, %v2471_v7 }
 0xafc   :  { %11101 = vmatmul.mubr.msk.f32.gmra.mrb[26].mxu1 %vm671_vm2, %v11094_v10 }
 0xbbb   :  { %v11067_v3 = vpop.f32.mrb[16].mxu1 }
 0xbbc   :  { %v1968_v13 = vsel %vm270_vm0, %v11067_v3, 0.0  ;;  %v1948_v61 = vpop.f32.mrb[17].mxu1 }
 0xbbd   :  { %v1967_v62 = vsel %vm270_vm0, %v1948_v61, 0.0 }
 0xbbe   :  { %v1969_v63 = vadd.f32 %v1968_v13, %v1967_v62 }
 0xbbf   :  { %v11070_v1 = vpop.f32.mrb[18].mxu1 }
 0xbc0   :  { %v1958_v4 = vpop.f32.mrb[19].mxu1  ;;  %v1972_v8 = vsel %vm270_vm0, %v11070_v1, 0.0 }
 0xbc1   :  { %v1970_v5 = vsel %vm270_vm0, %v1958_v4, 0.0 }
 0xbc2   :  { %v1971_v6 = vadd.f32 %v1970_v5, %v1969_v63 }
 0xbc3   :  { %v13456_v55 = vpop.f32.mrb[20].mxu1 }
 0xbc4   :  { %v1973_v2 = vadd.f32 %v1972_v8, %v1971_v6  ;;  %v2271_v14 = vsel %vm270_vm0, %v13456_v55, 0.0  ;;  %v13460_v22 = vpop.f32.mrb[21].mxu1  ;;  %v11107_v8 = vpop.f32.mrb[32].mxu0 }
 0xbc5   :  { %v2270_v11 = vsel %vm270_vm0, %v13460_v22, 0.0  ;;  %v2768_v10 = vpop.f32.mrb[33].mxu0 }
 0xbc6   :  { %1974 = vadd.xlane.f32.xlu0 %v1973_v2  ;;  %v2272_v31 = vadd.f32 %v2271_v14, %v2270_v11  ;;  %11113 = vmatprep.mubr.msk.f32.mxu1 %vm671_vm2, %v2768_v10 }
 0xbc7   :  { %v13464_v23 = vpop.f32.mrb[22].mxu1  ;;  %11114 = vmatmul.mubr.msk.f32.vlgmr.msra.gmra.mrb[28].mxu1 %vm671_vm2, %v11107_v8 }
 0xbc8   :  { %v13467_v32 = vpop.f32.mrb[23].mxu1  ;;  %v2275_v33 = vsel %vm270_vm0, %v13464_v23, 0.0 }
 0xbc9   :  { %v2273_v34 = vsel %vm270_vm0, %v13467_v32, 0.0 }
 0xbca   :  { %v2274_v38 = vadd.f32 %v2273_v34, %v2272_v31  ;;  %v11110_v31 = vpop.f32.mrb[34].mxu0 }
 0xbcb   :  { %v13494_v2 = vpop.f32.mrb[24].mxu1 }
 0xbcc   :  { %v2276_v36 = vadd.f32 %v2275_v33, %v2274_v38  ;;  %v2578_v14 = vsel %vm270_vm0, %v13494_v2, 0.0  ;;  %v13498_v7 = vpop.f32.mrb[25].mxu1  ;;  %v2778_v38 = vpop.f32.mrb[35].mxu0 }
 0xbcd   :  { %v2577_v11 = vsel %vm270_vm0, %v13498_v7, 0.0  ;;  %11116 = vmatprep.mubr.msk.f32.mxu1 %vm671_vm2, %v2778_v38 }
 0xbce   :  { %2277 = vadd.xlane.f32.xlu0 %v2276_v36  ;;  %v2579_v34 = vadd.f32 %v2578_v14, %v2577_v11  ;;  %11117 = vmatmul.mubr.msk.f32.gmra.mrb[30].mxu1 %vm671_vm2, %v11110_v31 }
 0xbcf   :  { %v13503_v33 = vpop.f32.mrb[26].mxu1  ;;  %11127 = vmatprep.mubr.msk.f32.mxu1 %vm12902_vm7, %v16264_v0 }
 0xbd0   :  { %v13506_v36 = vpop.f32.mrb[27].mxu1 }
 0xc53   :  { %v1975_v37 = vpop.xlane.xlu0 %1974 }
 0xc54   :  { %v1976_v41 = vrot.slane %v1975_v37, 4 }
 0xc56   :  { %v1977_v43 = vadd.f32 %v1976_v41, %v1975_v37  ;;  %v2582_v37 = vsel %vm270_vm0, %v13503_v33, 0.0  ;;  %v2580_v41 = vsel %vm270_vm0, %v13506_v36, 0.0 }
 0xc58   :  { %v1978_v44 = vrot.slane %v1977_v43, 2 }
 0xc5a   :  { %v1979_v56 = vadd.f32 %v1978_v44, %v1977_v43  ;;  %v2581_v43 = vadd.f32 %v2580_v41, %v2579_v34 }
 0xc5c   :  { %v1980_v45 = vrot.slane %v1979_v56, 1  ;;  %v2583_v44 = vadd.f32 %v2582_v37, %v2581_v43 }
 0xc5e   :  { %v1981_v57 = vadd.f32 %v1980_v45, %v1979_v56  ;;  %2584 = vadd.xlane.f32.xlu0 %v2583_v44  ;;  %v2278_v56 = vpop.xlane.xlu0 %2277 }
 0xc5f   :  { %v2279_v45 = vrot.slane %v2278_v56, 4 }
 0xc60   :  { %11869 = vpush %v1981_v57 }
 0xc61   :  { %v2280_v57 = vadd.f32 %v2279_v45, %v2278_v56 }
 0xc91   :  { %s11870_s26 = spop %11869 }
 0xc92   :  { %s1983_s24 = smul.f32 0.00032552084, %s11870_s26 }
 0xc94   :  { %v1984_v9 = vstv %s1983_s24 }
 0xc95   :  { %v13474_v46 = vsub.f32 %v1948_v61, %v1984_v9  ;;  %v13476_v42 = vsub.f32 %v11067_v3, %v1984_v9  ;;  %v13478_v48 = vsub.f32 %v1958_v4, %v1984_v9  ;;  %v13480_v49 = vsub.f32 %v11070_v1, %v1984_v9 }
 0xc96   :  { %v2281_v9 = vrot.slane %v2280_v57, 2 }
 0xc97   :  { %v1989_v29 = vmul.f32 %v13474_v46, %v13474_v46  ;;  %v1990_v51 = vmul.f32 %v13476_v42, %v13476_v42  ;;  %v1991_v35 = vmul.f32 %v13478_v48, %v13478_v48  ;;  %v1992_v52 = vmul.f32 %v13480_v49, %v13480_v49 }
 0xc99   :  { %v1993_v53 = vsel %vm270_vm0, %v1989_v29, 0.0  ;;  %v1994_v54 = vsel %vm270_vm0, %v1990_v51, 0.0  ;;  %v1996_v59 = vsel %vm270_vm0, %v1991_v35, 0.0  ;;  %v1998_v3 = vsel %vm270_vm0, %v1992_v52, 0.0 }
 0xc9a   :  { %v1995_v58 = vadd.f32 %v1994_v54, %v1993_v53  ;;  %v2282_v51 = vadd.f32 %v2281_v9, %v2280_v57 }
 0xc9c   :  { %v1997_v60 = vadd.f32 %v1996_v59, %v1995_v58  ;;  %v2283_v35 = vrot.slane %v2282_v51, 1 }
 0xc9e   :  { %v1999_v13 = vadd.f32 %v1998_v3, %v1997_v60  ;;  %v2284_v53 = vadd.f32 %v2283_v35, %v2282_v51 }
 0xca0   :  { %2000 = vadd.xlane.f32.xlu1 %v1999_v13 }
 0xceb   :  { %v2585_v35 = vpop.xlane.xlu0 %2584 }
 0xd2d   :  { %v2001_v61 = vpop.xlane.xlu1 %2000 }
 0xd2e   :  { %v2002_v62 = vrot.slane %v2001_v61, 4 }
 0xd30   :  { %v2003_v63 = vadd.f32 %v2002_v62, %v2001_v61 }
 0xd32   :  { %v2004_v1 = vrot.slane %v2003_v63, 2 }
 0xd34   :  { %v2005_v4 = vadd.f32 %v2004_v1, %v2003_v63 }
 0xd36   :  { %v2006_v5 = vrot.slane %v2005_v4, 1 }
 0xd38   :  { %v2007_v6 = vadd.f32 %v2006_v5, %v2005_v4 }
 0xd3a   :  { %11871 = vpush %v2007_v6  ;;  %v13538_v6 = vpop.f32.mrb[28].mxu1 }
 0xd3b   :  { %v2885_v8 = vsel %vm270_vm0, %v13538_v6, 0.0  ;;  %v13542_v10 = vpop.f32.mrb[29].mxu1 }
 0xd3c   :  { %v2884_v14 = vsel %vm270_vm0, %v13542_v10, 0.0  ;;  %v13546_v11 = vpop.f32.mrb[30].mxu1 }
 0xd3d   :  { %v2886_v31 = vadd.f32 %v2885_v8, %v2884_v14  ;;  %v13548_v34 = vpop.f32.mrb[31].mxu1  ;;  %v2889_v41 = vsel %vm270_vm0, %v13546_v11, 0.0 }
 0xd3e   :  { %v2887_v38 = vsel %vm270_vm0, %v13548_v34, 0.0 }
 0xd3f   :  { %v2888_v37 = vadd.f32 %v2887_v38, %v2886_v31 }
 0xd41   :  { %v2890_v44 = vadd.f32 %v2889_v41, %v2888_v37 }
 0xd43   :  { %2891 = vadd.xlane.f32.xlu0 %v2890_v44 }
 0xd6b   :  { %s11872_s6 = spop %11871 }
 0xd6c   :  { %s2009_s25 = smul.f32 0.00032552084, %s11872_s6 }
 0xd6e   :  { %s2010_s27 = sadd.f32 1e-05, %s2009_s25 }
 0xd70   :  { %v2011_v29 = vstv %s2010_s27 }
 0xd71   :  { %12055 = vrsqrt.f32 %v2011_v29 }
 0xd7b   :  { %v12056_v52 = vpop.eup %12055 }
 0xd7c   :  { %11873 = vpush %v12056_v52  ;;  %v2586_v52 = vrot.slane %v2585_v35, 4 }
 0xd7d   :  { %11875 = vpush %v2284_v53 }
 0xd7e   :  { %v2587_v53 = vadd.f32 %v2586_v52, %v2585_v35 }
 0xdad   :  { %s13516_s29 = spop %11873 }
 0xdae   :  { %s11876_s5 = spop %11875 }
 0xdaf   :  { %s2286_s20 = smul.f32 0.00032552084, %s11876_s5 }
 0xdb1   :  { %v2287_v54 = vstv %s2286_s20 }
 0xdb2   :  { %v2288_v58 = vsub.f32 %v13460_v22, %v2287_v54  ;;  %v13520_v59 = vsub.f32 %v13456_v55, %v2287_v54  ;;  %v13523_v60 = vsub.f32 %v13467_v32, %v2287_v54  ;;  %v13526_v3 = vsub.f32 %v13464_v23, %v2287_v54 }
 0xdb3   :  { %v2588_v54 = vrot.slane %v2587_v53, 2 }
 0xdb4   :  { %v2292_v13 = vmul.f32 %v2288_v58, %v2288_v58  ;;  %v2293_v61 = vmul.f32 %v13520_v59, %v13520_v59  ;;  %v2294_v62 = vmul.f32 %v13523_v60, %v13523_v60  ;;  %v2295_v63 = vmul.f32 %v13526_v3, %v13526_v3 }
 0xdb6   :  { %v2296_v22 = vsel %vm270_vm0, %v2292_v13, 0.0  ;;  %v2297_v55 = vsel %vm270_vm0, %v2293_v61, 0.0  ;;  %v2299_v32 = vsel %vm270_vm0, %v2294_v62, 0.0  ;;  %v2301_v23 = vsel %vm270_vm0, %v2295_v63, 0.0 }
 0xdb7   :  { %v2298_v1 = vadd.f32 %v2297_v55, %v2296_v22  ;;  %v2589_v61 = vadd.f32 %v2588_v54, %v2587_v53  ;;  %v13555_v55 = vstv %s13516_s29 }
 0xdb9   :  { %v2300_v4 = vadd.f32 %v2299_v32, %v2298_v1  ;;  %v2590_v62 = vrot.slane %v2589_v61, 1 }
 0xdbb   :  { %v2302_v5 = vadd.f32 %v2301_v23, %v2300_v4  ;;  %v2591_v22 = vadd.f32 %v2590_v62, %v2589_v61 }
 0xdbd   :  { %2303 = vadd.xlane.f32.xlu1 %v2302_v5  ;;  %v13566_v5 = vmul.f32 %v13555_v55, %v13474_v46 }
 0xdd0   :  { %v2892_v62 = vpop.xlane.xlu0 %2891 }
 0xe4a   :  { %v2304_v43 = vpop.xlane.xlu1 %2303 }
 0xe4b   :  { %v2305_v56 = vrot.slane %v2304_v43, 4 }
 0xe4d   :  { %v2306_v45 = vadd.f32 %v2305_v56, %v2304_v43 }
 0xe4f   :  { %v2307_v57 = vrot.slane %v2306_v45, 2 }
 0xe51   :  { %v2308_v9 = vadd.f32 %v2307_v57, %v2306_v45  ;;  %v13601_v57 = vmul.f32 %v13555_v55, %v13478_v48  ;;  %v2893_v48 = vrot.slane %v2892_v62, 4 }
 0xe53   :  { %v2309_v29 = vrot.slane %v2308_v9, 1 }
 0xe55   :  { %v2310_v51 = vadd.f32 %v2309_v29, %v2308_v9  ;;  %v2025_v29 = vsel %vm270_vm0, %v13601_v57, -inf }
 0xe57   :  { %11877 = vpush %v2310_v51 }
 0xe88   :  { %s11878_s4 = spop %11877 }
 0xe89   :  { %s2312_s28 = smul.f32 0.00032552084, %s11878_s4 }
 0xe8b   :  { %s2313_s30 = sadd.f32 1e-05, %s2312_s28 }
 0xe8d   :  { %v2314_v13 = vstv %s2313_s30 }
 0xe8e   :  { %12057 = vrsqrt.f32 %v2314_v13 }
 0xe98   :  { %v12058_v63 = vpop.eup %12057 }
 0xe99   :  { %11879 = vpush %v12058_v63  ;;  %v2894_v63 = vadd.f32 %v2893_v48, %v2892_v62 }
 0xe9a   :  { %11881 = vpush %v2591_v22 }
 0xe9b   :  { %v2895_v22 = vrot.slane %v2894_v63, 2 }
 0xeca   :  { %s11880_s18 = spop %11879 }
 0xecb   :  { %v13557_v1 = vstv %s11880_s18  ;;  %s11882_s8 = spop %11881 }
 0xecc   :  { %s2593_s0 = smul.f32 0.00032552084, %s11882_s8  ;;  %v13560_v32 = vmul.f32 %v13557_v1, %v2288_v58 }
 0xece   :  { %v2594_v4 = vstv %s2593_s0  ;;  %v2322_v23 = vsel %vm270_vm0, %v13560_v32, -inf }
 0xecf   :  { %v13569_v8 = vsub.f32 %v13498_v7, %v2594_v4  ;;  %v13572_v14 = vsub.f32 %v13494_v2, %v2594_v4  ;;  %v13575_v31 = vsub.f32 %v13506_v36, %v2594_v4  ;;  %v13578_v58 = vsub.f32 %v13503_v33, %v2594_v4  ;;  %2323 = vmax.xlane.f32.xlu0 %v2322_v23 }
 0xed0   :  { %v2019_v2 = vsel %vm270_vm0, %v13566_v5, -inf  ;;  %v13590_v36 = vmul.f32 %v13557_v1, %v13523_v60  ;;  %v2896_v23 = vadd.f32 %v2895_v22, %v2894_v63 }
 0xed1   :  { %v2599_v38 = vmul.f32 %v13569_v8, %v13569_v8  ;;  %v2600_v46 = vmul.f32 %v13572_v14, %v13572_v14  ;;  %v2601_v7 = vmul.f32 %v13575_v31, %v13575_v31  ;;  %v2602_v33 = vmul.f32 %v13578_v58, %v13578_v58 }
 0xed2   :  { %v2328_v56 = vsel %vm270_vm0, %v13590_v36, -inf }
 0xed3   :  { %2020 = vmax.xlane.f32.xlu0 %v2019_v2  ;;  %v2603_v37 = vsel %vm270_vm0, %v2599_v38, 0.0  ;;  %v2604_v41 = vsel %vm270_vm0, %v2600_v46, 0.0  ;;  %v2606_v44 = vsel %vm270_vm0, %v2601_v7, 0.0  ;;  %v2608_v60 = vsel %vm270_vm0, %v2602_v33, 0.0 }
 0xed4   :  { %v2605_v43 = vadd.f32 %v2604_v41, %v2603_v37  ;;  %v2897_v38 = vrot.slane %v2896_v23, 1 }
 0xed6   :  { %v2607_v45 = vadd.f32 %v2606_v44, %v2605_v43  ;;  %v2898_v7 = vadd.f32 %v2897_v38, %v2896_v23 }
 0xed7   :  { %2329 = vmax.xlane.f32.xlu0 %v2328_v56 }
 0xed8   :  { %v2609_v9 = vadd.f32 %v2608_v60, %v2607_v45 }
 0xeda   :  { %2610 = vadd.xlane.f32.xlu1 %v2609_v9 }
 0xedb   :  { %2026 = vmax.xlane.f32.xlu0 %v2025_v29 }
 0xf67   :  { %v2611_v51 = vpop.xlane.xlu1 %2610 }
 0xf68   :  { %v2612_v35 = vrot.slane %v2611_v51, 4 }
 0xf6a   :  { %v2613_v52 = vadd.f32 %v2612_v35, %v2611_v51  ;;  %v2319_v35 = vmul.f32 %v13557_v1, %v13520_v59  ;;  %v13638_v59 = vmul.f32 %v13555_v55, %v13480_v49 }
 0xf6c   :  { %v2614_v53 = vrot.slane %v2613_v52, 2  ;;  %v2028_v62 = vsel %vm270_vm0, %v13638_v59, -inf }
 0xf6e   :  { %v2615_v54 = vadd.f32 %v2614_v53, %v2613_v52  ;;  %v2325_v52 = vsel %vm270_vm0, %v2319_v35, -inf  ;;  %v2016_v53 = vmul.f32 %v13555_v55, %v13476_v42  ;;  %v2324_v55 = vpop.xlane.xlu0 %2323 }
 0xf70   :  { %v2616_v13 = vrot.slane %v2615_v54, 1 }
 0xf72   :  { %v2617_v61 = vadd.f32 %v2616_v13, %v2615_v54  ;;  %v2022_v54 = vsel %vm270_vm0, %v2016_v53, -inf  ;;  %v13632_v13 = vmul.f32 %v13557_v1, %v13526_v3 }
 0xf74   :  { %11883 = vpush %v2617_v61  ;;  %v2331_v61 = vsel %vm270_vm0, %v13632_v13, -inf }
 0xfa5   :  { %s11884_s1 = spop %11883 }
 0xfa6   :  { %s2619_s2 = smul.f32 0.00032552084, %s11884_s1 }
 0xfa8   :  { %s2620_s22 = sadd.f32 1e-05, %s2619_s2 }
 0xfaa   :  { %v2621_v4 = vstv %s2620_s22 }
 0xfab   :  { %12059 = vrsqrt.f32 %v2621_v4 }
 0xfb5   :  { %v12060_v46 = vpop.eup %12059 }
 0xfb6   :  { %11885 = vpush %v12060_v46  ;;  %v2021_v46 = vpop.xlane.xlu0 %2020 }
 0xfb7   :  { %11887 = vpush %v2898_v7 }
 0xfe7   :  { %s13606_s17 = spop %11885 }
 0xfe8   :  { %s11888_s21 = spop %11887 }
 0xfe9   :  { %s2900_s26 = smul.f32 0.00032552084, %s11888_s21 }
 0xfeb   :  { %v2901_v2 = vstv %s2900_s26 }
 0xfec   :  { %v2902_v33 = vsub.f32 %v13542_v10, %v2901_v2  ;;  %v2903_v37 = vsub.f32 %v13538_v6, %v2901_v2  ;;  %v13611_v41 = vsub.f32 %v13548_v34, %v2901_v2  ;;  %v13614_v43 = vsub.f32 %v13546_v11, %v2901_v2 }
 0xfed   :  { %v2334_v2 = vsub.f32 %v13560_v32, %v2324_v55 }
 0xfee   :  { %v2906_v44 = vmul.f32 %v2902_v33, %v2902_v33  ;;  %v2907_v56 = vmul.f32 %v2903_v37, %v2903_v37  ;;  %v2908_v45 = vmul.f32 %v13611_v41, %v13611_v41  ;;  %v2909_v60 = vmul.f32 %v13614_v43, %v13614_v43 }
 0xff0   :  { %v2910_v9 = vsel %vm270_vm0, %v2906_v44, 0.0  ;;  %v2911_v10 = vsel %vm270_vm0, %v2907_v56, 0.0  ;;  %v2913_v6 = vsel %vm270_vm0, %v2908_v45, 0.0  ;;  %v2915_v51 = vsel %vm270_vm0, %v2909_v60, 0.0  ;;  %v2330_v56 = vpop.xlane.xlu0 %2329 }
 0xff1   :  { %v2912_v29 = vadd.f32 %v2911_v10, %v2910_v9  ;;  %v2624_v45 = vstv %s13606_s17  ;;  %v2338_v9 = vmul.f32 1.442695, %v2334_v2  ;;  %v2031_v10 = vsub.f32 %v13566_v5, %v2021_v46 }
 0xff3   :  { %v2914_v34 = vadd.f32 %v2913_v6, %v2912_v29  ;;  %v2035_v5 = vmul.f32 1.442695, %v2031_v10 }
 0xff5   :  { %v2916_v11 = vadd.f32 %v2915_v51, %v2914_v34 }
 0xff7   :  { %2917 = vadd.xlane.f32.xlu1 %v2916_v11 }
 0xffb   :  { %2326 = vmax.xlane.f32.xlu1 %v2325_v52 }
 0xfff   :  { %2023 = vmax.xlane.f32.xlu1 %v2022_v54  ;;  %v13657_v54 = vmul.f32 %v2624_v45, %v13569_v8 }
0x1003   :  { %2332 = vmax.xlane.f32.xlu1 %v2331_v61 }
0x1007   :  { %2029 = vmax.xlane.f32.xlu1 %v2028_v62 }
0x1084   :  { %v2918_v42 = vpop.xlane.xlu1 %2917 }
0x1085   :  { %v2919_v48 = vrot.slane %v2918_v42, 4 }
0x1087   :  { %v2920_v63 = vadd.f32 %v2919_v48, %v2918_v42 }
0x1088   :  { %v2327_v38 = vpop.xlane.xlu1 %2326 }
0x1089   :  { %v2921_v22 = vrot.slane %v2920_v63, 2  ;;  %v2335_v44 = vsub.f32 %v2319_v35, %v2327_v38  ;;  %v13654_v35 = vmul.f32 %v2624_v45, %v13572_v14  ;;  %v2629_v14 = vsel %vm270_vm0, %v13657_v54, -inf }
0x108b   :  { %v2922_v4 = vadd.f32 %v2921_v22, %v2920_v63  ;;  %v2340_v51 = vmul.f32 1.442695, %v2335_v44  ;;  %v2632_v42 = vsel %vm270_vm0, %v13654_v35, -inf }
0x108c   :  { %v2024_v7 = vpop.xlane.xlu1 %2023 }
0x108d   :  { %v2923_v3 = vrot.slane %v2922_v4, 1  ;;  %v2032_v11 = vsub.f32 %v2016_v53, %v2024_v7 }
0x108f   :  { %v2924_v1 = vadd.f32 %v2923_v3, %v2922_v4  ;;  %v2037_v53 = vmul.f32 1.442695, %v2032_v11  ;;  %v13678_v3 = vmul.f32 %v2624_v45, %v13578_v58 }
0x1090   :  { %v2333_v29 = vpop.xlane.xlu1 %2332 }
0x1091   :  { %11889 = vpush %v2924_v1  ;;  %v2337_v61 = vsub.f32 %v13632_v13, %v2333_v29 }
0x1093   :  { %v2344_v13 = vmul.f32 1.442695, %v2337_v61 }
0x1094   :  { %v2030_v62 = vpop.xlane.xlu1 %2029 }
0x1095   :  { %v2034_v22 = vsub.f32 %v13638_v59, %v2030_v62  ;;  %v2638_v59 = vsel %vm270_vm0, %v13678_v3, -inf }
0x1097   :  { %v2041_v1 = vmul.f32 1.442695, %v2034_v22 }
0x10c2   :  { %s11890_s24 = spop %11889 }
0x10c3   :  { %s2926_s6 = smul.f32 0.00032552084, %s11890_s24 }
0x10c5   :  { %s2927_s25 = sadd.f32 1e-05, %s2926_s6 }
0x10c7   :  { %v2928_v23 = vstv %s2927_s25 }
0x10c8   :  { %12061 = vrsqrt.f32 %v2928_v23 }
0x10c9   :  { %12063 = vpow2.f32 %v2338_v9 }
0x10ca   :  { %12065 = vpow2.f32 %v2340_v51 }
0x10cb   :  { %12067 = vpow2.f32 %v2035_v5 }
0x10cc   :  { %12069 = vpow2.f32 %v2037_v53 }
0x10d2   :  { %v12062_v49 = vpop.eup %12061 }
0x10d3   :  { %11891 = vpush %v12062_v49  ;;  %v13683_v23 = vpop.eup %12063 }
0x10d4   :  { %v13689_v55 = vpop.eup %12065  ;;  %v2346_v38 = vsel %vm270_vm0, %v13683_v23, 0.0 }
0x10d5   :  { %v2349_v58 = vsel %vm270_vm0, %v13689_v55, 0.0 }
0x1104   :  { %s11892_s27 = spop %11891 }
0x1105   :  { %v2931_v60 = vstv %s11892_s27 }
0x1106   :  { %v13645_v6 = vmul.f32 %v2931_v60, %v2903_v37  ;;  %v13647_v34 = vmul.f32 %v2931_v60, %v2902_v33  ;;  %v2336_v33 = vsub.f32 %v13590_v36, %v2330_v56  ;;  %v2027_v37 = vpop.xlane.xlu0 %2026  ;;  %v13666_v8 = vmul.f32 %v2931_v60, %v13614_v43 }
0x1107   :  { %v13669_v48 = vmul.f32 %v2931_v60, %v13611_v41  ;;  %v2033_v63 = vsub.f32 %v13601_v57, %v2027_v37  ;;  %v13681_v41 = vmul.f32 %v2624_v45, %v13575_v31  ;;  %v13691_v31 = vpop.eup %12067 }
0x1108   :  { %v2939_v52 = vsel %vm270_vm0, %v13645_v6, -inf  ;;  %v2936_v32 = vsel %vm270_vm0, %v13647_v34, -inf  ;;  %v2342_v36 = vmul.f32 1.442695, %v2336_v33  ;;  %v2945_v4 = vsel %vm270_vm0, %v13666_v8, -inf  ;;  %v13697_v46 = vpop.eup %12069 }
0x1109   :  { %2940 = vmax.xlane.f32.xlu1 %v2939_v52  ;;  %2937 = vmax.xlane.f32.xlu0 %v2936_v32  ;;  %v2942_v43 = vsel %vm270_vm0, %v13669_v48, -inf  ;;  %v2039_v57 = vmul.f32 1.442695, %v2033_v63  ;;  %v2635_v49 = vsel %vm270_vm0, %v13681_v41, -inf  ;;  %v2046_v2 = vsel %vm270_vm0, %v13697_v46, 0.0 }
0x110a   :  { %12071 = vpow2.f32 %v2342_v36  ;;  %v2043_v44 = vsel %vm270_vm0, %v13691_v31, 0.0 }
0x110b   :  { %12073 = vpow2.f32 %v2344_v13 }
0x110c   :  { %12075 = vpow2.f32 %v2039_v57 }
0x110d   :  { %2633 = vmax.xlane.f32.xlu1 %v2632_v42  ;;  %2630 = vmax.xlane.f32.xlu0 %v2629_v14  ;;  %12077 = vpow2.f32 %v2041_v1 }
0x1111   :  { %2946 = vmax.xlane.f32.xlu1 %v2945_v4  ;;  %2943 = vmax.xlane.f32.xlu0 %v2942_v43 }
0x1114   :  { %v13699_v7 = vpop.eup %12071 }
0x1115   :  { %2639 = vmax.xlane.f32.xlu1 %v2638_v59  ;;  %2636 = vmax.xlane.f32.xlu0 %v2635_v49  ;;  %v13705_v56 = vpop.eup %12073  ;;  %v2352_v9 = vsel %vm270_vm0, %v13699_v7, 0.0 }
0x1116   :  { %v13707_v45 = vpop.eup %12075  ;;  %v2355_v60 = vsel %vm270_vm0, %v13705_v56, 0.0 }
0x1117   :  { %v13713_v10 = vpop.eup %12077  ;;  %v2049_v51 = vsel %vm270_vm0, %v13707_v45, 0.0 }
0x1118   :  { %v2052_v29 = vsel %vm270_vm0, %v13713_v10, 0.0 }
0x1119   :  { %2350 = vadd.xlane.f32.xlu1 %v2349_v58  ;;  %2347 = vadd.xlane.f32.xlu0 %v2346_v38 }
0x111d   :  { %2047 = vadd.xlane.f32.xlu1 %v2046_v2  ;;  %2044 = vadd.xlane.f32.xlu0 %v2043_v44 }
0x1121   :  { %2356 = vadd.xlane.f32.xlu1 %v2355_v60  ;;  %2353 = vadd.xlane.f32.xlu0 %v2352_v9 }
0x1125   :  { %2053 = vadd.xlane.f32.xlu1 %v2052_v29  ;;  %2050 = vadd.xlane.f32.xlu0 %v2049_v51 }
0x1196   :  { %v2941_v11 = vpop.xlane.xlu1 %2940  ;;  %v2938_v52 = vpop.xlane.xlu0 %2937 }
0x1197   :  { %v2949_v32 = vsub.f32 %v13645_v6, %v2941_v11  ;;  %v2948_v5 = vsub.f32 %v13647_v34, %v2938_v52 }
0x1199   :  { %v2954_v33 = vmul.f32 1.442695, %v2949_v32  ;;  %v2952_v37 = vmul.f32 1.442695, %v2948_v5 }
0x119a   :  { %v2634_v53 = vpop.xlane.xlu1 %2633  ;;  %v2631_v61 = vpop.xlane.xlu0 %2630 }
0x119b   :  { %12079 = vpow2.f32 %v2954_v33  ;;  %v2642_v62 = vsub.f32 %v13654_v35, %v2634_v53  ;;  %v2641_v42 = vsub.f32 %v13657_v54, %v2631_v61 }
0x119c   :  { %12081 = vpow2.f32 %v2952_v37 }
0x119d   :  { %v2647_v14 = vmul.f32 1.442695, %v2642_v62  ;;  %v2645_v36 = vmul.f32 1.442695, %v2641_v42 }
0x119e   :  { %v2947_v63 = vpop.xlane.xlu1 %2946  ;;  %v2944_v13 = vpop.xlane.xlu0 %2943 }
0x119f   :  { %12083 = vpow2.f32 %v2647_v14  ;;  %v2951_v22 = vsub.f32 %v13666_v8, %v2947_v63  ;;  %v2950_v6 = vsub.f32 %v13669_v48, %v2944_v13 }
0x11a0   :  { %12085 = vpow2.f32 %v2645_v36 }
0x11a1   :  { %v2958_v34 = vmul.f32 1.442695, %v2951_v22  ;;  %v2956_v4 = vmul.f32 1.442695, %v2950_v6 }
0x11a2   :  { %v2640_v43 = vpop.xlane.xlu1 %2639  ;;  %v2637_v57 = vpop.xlane.xlu0 %2636 }
0x11a3   :  { %12087 = vpow2.f32 %v2958_v34  ;;  %v2644_v35 = vsub.f32 %v13678_v3, %v2640_v43  ;;  %v2643_v54 = vsub.f32 %v13681_v41, %v2637_v57 }
0x11a4   :  { %12089 = vpow2.f32 %v2956_v4 }
0x11a5   :  { %v13727_v1 = vpop.eup %12079  ;;  %v2651_v59 = vmul.f32 1.442695, %v2644_v35  ;;  %v2649_v49 = vmul.f32 1.442695, %v2643_v54 }
0x11a6   :  { %v13729_v58 = vpop.eup %12081  ;;  %v2351_v8 = vpop.xlane.xlu1 %2350  ;;  %v2963_v48 = vsel %vm270_vm0, %v13727_v1, 0.0 }
0x11a7   :  { %v2348_v38 = vpop.xlane.xlu0 %2347  ;;  %12091 = vpow2.f32 %v2651_v59  ;;  %2964 = vadd.xlane.f32.xlu1 %v2963_v48  ;;  %v2960_v2 = vsel %vm270_vm0, %v13729_v58, 0.0 }
0x11a8   :  { %12093 = vpow2.f32 %v2649_v49  ;;  %2961 = vadd.xlane.f32.xlu0 %v2960_v2 }
0x11a9   :  { %v13735_v3 = vpop.eup %12083  ;;  %12095 = vrcp.f32 %v2351_v8 }
0x11aa   :  { %v13737_v41 = vpop.eup %12085  ;;  %12097 = vrcp.f32 %v2348_v38  ;;  %v2048_v44 = vpop.xlane.xlu1 %2047  ;;  %v2656_v9 = vsel %vm270_vm0, %v13735_v3, 0.0 }
0x11ab   :  { %v2045_v60 = vpop.xlane.xlu0 %2044  ;;  %12099 = vrcp.f32 %v2048_v44  ;;  %2657 = vadd.xlane.f32.xlu1 %v2656_v9  ;;  %v2653_v29 = vsel %vm270_vm0, %v13737_v41, 0.0 }
0x11ac   :  { %12101 = vrcp.f32 %v2045_v60  ;;  %2654 = vadd.xlane.f32.xlu0 %v2653_v29  ;;  %v3151_v29 = vld [vmem:[%s16253_s9 + $0x10] sm:$0xff] }
0x11ad   :  { %v13743_v51 = vpop.eup %12087 }
0x11ae   :  { %v13745_v11 = vpop.eup %12089  ;;  %v2357_v52 = vpop.xlane.xlu1 %2356  ;;  %v2969_v5 = vsel %vm270_vm0, %v13743_v51, 0.0 }
0x11af   :  { %v2354_v32 = vpop.xlane.xlu0 %2353  ;;  %12103 = vrcp.f32 %v2357_v52  ;;  %2970 = vadd.xlane.f32.xlu1 %v2969_v5  ;;  %v2966_v33 = vsel %vm270_vm0, %v13745_v11, 0.0  ;;  %v3152_v52 = vld [vmem:[%s16253_s9 + $0x18] sm:$0xff] }
0x11b0   :  { %12105 = vrcp.f32 %v2354_v32  ;;  %2967 = vadd.xlane.f32.xlu0 %v2966_v33  ;;  %v11655_v32 = vpack.c.bf16 %v3152_v52, %v3151_v29 }
0x11b1   :  { %v13751_v37 = vpop.eup %12091 }
0x11b2   :  { %v13753_v53 = vpop.eup %12093  ;;  %v2054_v61 = vpop.xlane.xlu1 %2053  ;;  %v2662_v42 = vsel %vm270_vm0, %v13751_v37, 0.0 }
0x11b3   :  { %v2051_v62 = vpop.xlane.xlu0 %2050  ;;  %v12096_v14 = vpop.eup %12095  ;;  %12107 = vrcp.f32 %v2054_v61  ;;  %2663 = vadd.xlane.f32.xlu1 %v2662_v42  ;;  %v2659_v36 = vsel %vm270_vm0, %v13753_v53, 0.0 }
0x11b4   :  { %v12098_v63 = vpop.eup %12097  ;;  %12109 = vrcp.f32 %v2051_v62  ;;  %2660 = vadd.xlane.f32.xlu0 %v2659_v36  ;;  %v2361_v13 = vmul.f32 %v12096_v14, %v13689_v55 }
0x11b5   :  { %v12100_v22 = vpop.eup %12099  ;;  %v2359_v6 = vmul.f32 %v12098_v63, %v13683_v23 }
0x11b6   :  { %v12102_v34 = vpop.eup %12101  ;;  %v2058_v4 = vmul.f32 %v12100_v22, %v13697_v46 }
0x11b7   :  { %v2056_v43 = vmul.f32 %v12102_v34, %v13691_v31  ;;  %v11626_v57 = vpack.c.bf16 %v2361_v13, %v2359_v6 }
0x11b8   :  { %v2367_v35 = vadd.f32 %v2361_v13, %v2058_v4 }
0x11b9   :  { %v12104_v54 = vpop.eup %12103  ;;  %v2366_v59 = vadd.f32 %v2359_v6, %v2056_v43  ;;  %11628 = vmatprep.subr.msk.bf16.mxu0 %vm13378_vm5, %v11626_v57  ;;  %v11629_v49 = vpack.c.bf16 %v2058_v4, %v2056_v43 }
0x11ba   :  { %v12106_v8 = vpop.eup %12105  ;;  %v2365_v38 = vmul.f32 %v12104_v54, %v13705_v56  ;;  %v3150_v56 = vld [vmem:[%s16253_s9 + $0x8] sm:$0xff] }
0x11bb   :  { %11631 = vmatpush1.bf16.xpose.msk.msra.mxu0 %vm13378_vm5, %v11629_v49  ;;  %v2363_v23 = vmul.f32 %v12106_v8, %v13699_v7  ;;  %v3149_v7 = vld [vmem:[%s16253_s9] sm:$0xff] }
0x11bd   :  { %v12108_v55 = vpop.eup %12107  ;;  %v11632_v46 = vpack.c.bf16 %v2365_v38, %v2363_v23 }
0x11be   :  { %v12110_v48 = vpop.eup %12109  ;;  %v2062_v31 = vmul.f32 %v12108_v55, %v13713_v10  ;;  %v11651_v10 = vpack.c.bf16 %v3150_v56, %v3149_v7 }
0x11bf   :  { %v2060_v2 = vmul.f32 %v12110_v48, %v13707_v45  ;;  %11634 = vmatprep.subr.msk.bf16.mxu0 %vm13378_vm5, %v11632_v46 }
0x11c0   :  { %v2369_v44 = vadd.f32 %v2365_v38, %v2062_v31  ;;  %11653 = vmatpush3.bf16.xpose.msk.msra.mxu1 %vm13785_vm8, %v11651_v10 }
0x11c1   :  { %v2368_v60 = vadd.f32 %v2363_v23, %v2060_v2  ;;  %v11635_v9 = vpack.c.bf16 %v2062_v31, %v2060_v2  ;;  %11654 = vmatprep.subr.bf16.mxu1 %v12901_v26 }
0x11c3   :  { %11637 = vmatpush1.bf16.xpose.msk.msra.mxu0 %vm13378_vm5, %v11635_v9 }
0x11c8   :  { %11657 = vmatpush3.bf16.xpose.msk.msra.mxu1 %vm13785_vm8, %v11655_v32 }
0x11ca   :  { %3073 = vmatmul.mubr.f32.vlgmr.msra.gmra.mrb[36].mxu0 %v13235_v16 }
0x11cb   :  { %3142 = vmatprep.mubr.f32.mxu0 %v13251_v21 }
0x1234   :  { %v2965_v5 = vpop.xlane.xlu1 %2964 }
0x1235   :  { %12111 = vrcp.f32 %v2965_v5  ;;  %v2962_v33 = vpop.xlane.xlu0 %2961  ;;  %v3248_v5 = vld [vmem:[#allocation14] sm:$0xff] }
0x1236   :  { %12113 = vrcp.f32 %v2962_v33  ;;  %v3249_v33 = vld [vmem:[#allocation14 + $0x8] sm:$0xff] }
0x1238   :  { %v2658_v61 = vpop.xlane.xlu1 %2657 }
0x1239   :  { %12115 = vrcp.f32 %v2658_v61  ;;  %v2655_v62 = vpop.xlane.xlu0 %2654  ;;  %v3250_v61 = vld [vmem:[#allocation14 + $0x10] sm:$0xff] }
0x123a   :  { %12117 = vrcp.f32 %v2655_v62  ;;  %v3252_v62 = vld [vmem:[#allocation14 + $0x20] sm:$0xff] }
0x123c   :  { %v2971_v42 = vpop.xlane.xlu1 %2970 }
0x123d   :  { %12119 = vrcp.f32 %v2971_v42  ;;  %v2968_v14 = vpop.xlane.xlu0 %2967  ;;  %v3253_v42 = vld [vmem:[#allocation14 + $0x28] sm:$0xff] }
0x123e   :  { %12121 = vrcp.f32 %v2968_v14  ;;  %v3254_v14 = vld [vmem:[#allocation14 + $0x30] sm:$0xff] }
0x123f   :  { %v12112_v36 = vpop.eup %12111 }
0x1240   :  { %v12114_v63 = vpop.eup %12113  ;;  %v2664_v13 = vpop.xlane.xlu1 %2663  ;;  %v2975_v22 = vmul.f32 %v12112_v36, %v13727_v1  ;;  %v3255_v36 = vld [vmem:[#allocation14 + $0x38] sm:$0xff] }
0x1241   :  { %12123 = vrcp.f32 %v2664_v13  ;;  %v2661_v6 = vpop.xlane.xlu0 %2660  ;;  %v2973_v34 = vmul.f32 %v12114_v63, %v13729_v58  ;;  %v3702_v63 = vld [vmem:[#allocation14 + $0x40] sm:$0xff]  ;;  %v3703_v13 = vld [vmem:[#allocation14 + $0x48] sm:$0xff] }
0x1242   :  { %12125 = vrcp.f32 %v2661_v6  ;;  %v3705_v6 = vld [vmem:[#allocation14 + $0x58] sm:$0xff] }
0x1243   :  { %v12116_v4 = vpop.eup %12115  ;;  %v11638_v43 = vpack.c.bf16 %v2975_v22, %v2973_v34 }
0x1244   :  { %v12118_v57 = vpop.eup %12117  ;;  %v2668_v54 = vmul.f32 %v12116_v4, %v13735_v3  ;;  %v3707_v4 = vld [vmem:[#allocation14 + $0x68] sm:$0xff] }
0x1245   :  { %v2666_v49 = vmul.f32 %v12118_v57, %v13737_v41  ;;  %11640 = vmatprep.subr.msk.bf16.mxu0 %vm13378_vm5, %v11638_v43  ;;  %v3708_v43 = vld [vmem:[#allocation14 + $0x70] sm:$0xff]  ;;  %v3709_v57 = vld [vmem:[#allocation14 + $0x78] sm:$0xff] }
0x1246   :  { %v2674_v8 = vadd.f32 %v2668_v54, %v2367_v35 }
0x1247   :  { %v12120_v38 = vpop.eup %12119  ;;  %v2673_v23 = vadd.f32 %v2666_v49, %v2366_v59  ;;  %v11641_v55 = vpack.c.bf16 %v2668_v54, %v2666_v49  ;;  %v4161_v54 = vld [vmem:[#allocation14 + $0x80] sm:$0xff]  ;;  %v4162_v49 = vld [vmem:[#allocation14 + $0x88] sm:$0xff] }
0x1248   :  { %v12122_v1 = vpop.eup %12121  ;;  %v2981_v46 = vadd.f32 %v2975_v22, %v2674_v8  ;;  %v2979_v48 = vmul.f32 %v12120_v38, %v13743_v51  ;;  %v3704_v22 = vld [vmem:[#allocation14 + $0x50] sm:$0xff]  ;;  %v4164_v38 = vld [vmem:[#allocation14 + $0x98] sm:$0xff] }
0x1249   :  { %v2980_v58 = vadd.f32 %v2973_v34, %v2673_v23  ;;  %11643 = vmatpush1.bf16.xpose.msk.msra.mxu0 %vm13378_vm5, %v11641_v55  ;;  %v2977_v31 = vmul.f32 %v12122_v1, %v13745_v11  ;;  %v3706_v34 = vld [vmem:[#allocation14 + $0x60] sm:$0xff]  ;;  %v4163_v8 = vld [vmem:[#allocation14 + $0x90] sm:$0xff]  ;;  %v4166_v55 = vld [vmem:[#allocation14 + $0xa8] sm:$0xff] }
0x124a   :  { %v3240_v3 = vmul.f32 0.25, %v2981_v46  ;;  %v4165_v23 = vld [vmem:[#allocation14 + $0xa0] sm:$0xff]  ;;  %v4167_v1 = vld [vmem:[#allocation14 + $0xb0] sm:$0xff]  ;;  %v4168_v46 = vld [vmem:[#allocation14 + $0xb8] sm:$0xff] }
0x124b   :  { %v12124_v2 = vpop.eup %12123  ;;  %v3239_v41 = vmul.f32 0.25, %v2980_v58  ;;  %v11644_v9 = vpack.c.bf16 %v2979_v48, %v2977_v31  ;;  %v4621_v58 = vld [vmem:[#allocation14 + $0xc8] sm:$0xff] }
0x124c   :  { %v12126_v7 = vpop.eup %12125  ;;  %v2672_v35 = vmul.f32 %v12124_v2, %v13751_v37  ;;  %3244 = vst.msk [vmem:[#allocation26 + $0x8] sm:$0xff] %vm270_vm0, %v3240_v3  ;;  %v4623_v3 = vld [vmem:[#allocation14 + $0xd8] sm:$0xff]  ;;  %v4624_v2 = vld [vmem:[#allocation14 + $0xe0] sm:$0xff] }
0x124d   :  { %v2670_v59 = vmul.f32 %v12126_v7, %v13753_v53  ;;  %3243 = vst.msk [vmem:[#allocation26] sm:$0xff] %vm270_vm0, %v3239_v41  ;;  %11646 = vmatprep.subr.msk.bf16.mxu0 %vm13378_vm5, %v11644_v9  ;;  %v3247_v53 = vld [vmem:[#allocation8] sm:$0xff]  ;;  %v4625_v41 = vld [vmem:[#allocation14 + $0xe8] sm:$0xff]  ;;  %v4626_v9 = vld [vmem:[#allocation14 + $0xf0] sm:$0xff] }
0x124e   :  { %v2676_v51 = vadd.f32 %v2672_v35, %v2369_v44  ;;  %11130 = vmatprep.subr.msk.mxu1 %vm1146_vm4, %v3247_v53  ;;  %v4627_v7 = vld [vmem:[#allocation14 + $0xf8] sm:$0xff] }
0x124f   :  { %v2675_v56 = vadd.f32 %v2670_v59, %v2368_v60  ;;  %v11647_v10 = vpack.c.bf16 %v2672_v35, %v2670_v59 }
0x1250   :  { %v2983_v11 = vadd.f32 %v2979_v48, %v2676_v51  ;;  %v4620_v48 = vld [vmem:[#allocation14 + $0xc0] sm:$0xff] }
0x1251   :  { %v2982_v29 = vadd.f32 %v2977_v31, %v2675_v56  ;;  %11649 = vmatpush1.bf16.xpose.msk.msra.mxu0 %vm13378_vm5, %v11647_v10  ;;  %v4622_v31 = vld [vmem:[#allocation14 + $0xd0] sm:$0xff] }
0x1252   :  { %v3242_v52 = vmul.f32 0.25, %v2983_v11  ;;  %11144 = vmatprep.subr.mxu0 %v13228_v12 }
0x1253   :  { %v3241_v37 = vmul.f32 0.25, %v2982_v29 }
0x1254   :  { %3246 = vst.msk [vmem:[#allocation26 + $0x18] sm:$0xff] %vm270_vm0, %v3242_v52 }
0x1255   :  { %3245 = vst.msk [vmem:[#allocation26 + $0x10] sm:$0xff] %vm270_vm0, %v3241_v37 }
0x1258   :  { %3143 = vmatmul.mubr.f32.vlgmr.msra.gmra.mrb[36].mxu0 %v13258_v25 }
0x1259   :  { %11145 = vmatpush3.msra.mxu0 %v13228_v12  ;;  %v3251_v12 = vld [vmem:[#allocation14 + $0x18] sm:$0xff] }
0x125a   :  { %11172 = vmatprep.subr.mxu0 %v13265_v30 }
0x132b   :  { %v3144_v44 = vpop.f32.mrb[36].mxu0 }
0x132c   :  { %v3148_v60 = vmul.f32 0.25, %v3144_v44  ;;  %v3146_v32 = vpop.f32.mrb[37].mxu0 }
0x132e   :  { %11128 = vmatmul.mubr.msk.f32.vlgmr.msra.gmra.mrb[32].mxu1 %vm907_vm3, %v3148_v60 }
0x132f   :  { %11131 = vmatpush3.xpose.msk.msra.mxu1 %vm1146_vm4, %v3247_v53  ;;  %11132 = vmatprep.mubr.msk.f32.mxu1 %vm1146_vm4, %v3248_v5 }
0x1330   :  { %11158 = vmatprep.subr.msk.mxu1 %vm1146_vm4, %v3247_v53 }
0x1332   :  { %11133 = vmatmul.mubr.msk.f32.vlgmr.msra.gmra.mrb[34].mxu1 %vm1146_vm4, %v3249_v33 }
0x1333   :  { %11135 = vmatprep.mubr.msk.f32.mxu1 %vm1146_vm4, %v3250_v61  ;;  %11159 = vmatpush3.xpose.msk.msra.mxu1 %vm1146_vm4, %v3247_v53 }
0x1334   :  { %11186 = vmatprep.subr.msk.mxu1 %vm1146_vm4, %v3247_v53 }
0x1336   :  { %11136 = vmatmul.mubr.msk.f32.gmra.mrb[36].mxu1 %vm1146_vm4, %v3251_v12 }
0x1337   :  { %11138 = vmatprep.mubr.msk.f32.mxu1 %vm1146_vm4, %v3252_v62 }
0x133a   :  { %11139 = vmatmul.mubr.msk.f32.gmra.mrb[38].mxu1 %vm1146_vm4, %v3253_v42 }
0x133b   :  { %11141 = vmatprep.mubr.msk.f32.mxu1 %vm1146_vm4, %v3254_v14 }
0x133e   :  { %11142 = vmatmul.mubr.msk.f32.gmra.mrb[40].mxu1 %vm1146_vm4, %v3255_v36 }
0x133f   :  { %11160 = vmatprep.mubr.msk.f32.mxu1 %vm1146_vm4, %v3702_v63 }
0x1342   :  { %11161 = vmatmul.mubr.msk.f32.vlgmr.msra.gmra.mrb[42].mxu1 %vm1146_vm4, %v3703_v13 }
0x1343   :  { %11163 = vmatprep.mubr.msk.f32.mxu1 %vm1146_vm4, %v3704_v22  ;;  %11187 = vmatpush3.xpose.msk.msra.mxu1 %vm1146_vm4, %v3247_v53 }
0x1344   :  { %11214 = vmatprep.subr.msk.mxu1 %vm1146_vm4, %v3247_v53 }
0x1346   :  { %11164 = vmatmul.mubr.msk.f32.gmra.mrb[44].mxu1 %vm1146_vm4, %v3705_v6 }
0x1347   :  { %11166 = vmatprep.mubr.msk.f32.mxu1 %vm1146_vm4, %v3706_v34 }
0x134a   :  { %11167 = vmatmul.mubr.msk.f32.gmra.mrb[46].mxu1 %vm1146_vm4, %v3707_v4 }
0x134b   :  { %11169 = vmatprep.mubr.msk.f32.mxu1 %vm1146_vm4, %v3708_v43 }
0x134e   :  { %11170 = vmatmul.mubr.msk.f32.gmra.mrb[48].mxu1 %vm1146_vm4, %v3709_v57 }
0x134f   :  { %11188 = vmatprep.mubr.msk.f32.mxu1 %vm1146_vm4, %v4161_v54 }
0x1352   :  { %11189 = vmatmul.mubr.msk.f32.vlgmr.msra.gmra.mrb[50].mxu1 %vm1146_vm4, %v4162_v49 }
0x1353   :  { %11191 = vmatprep.mubr.msk.f32.mxu1 %vm1146_vm4, %v4163_v8  ;;  %11215 = vmatpush3.xpose.msk.msra.mxu1 %vm1146_vm4, %v3247_v53 }
0x1356   :  { %11192 = vmatmul.mubr.msk.f32.gmra.mrb[52].mxu1 %vm1146_vm4, %v4164_v38 }
0x1357   :  { %11194 = vmatprep.mubr.msk.f32.mxu1 %vm1146_vm4, %v4165_v23 }
0x135a   :  { %11195 = vmatmul.mubr.msk.f32.gmra.mrb[54].mxu1 %vm1146_vm4, %v4166_v55 }
0x135b   :  { %11197 = vmatprep.mubr.msk.f32.mxu1 %vm1146_vm4, %v4167_v1 }
0x135e   :  { %11198 = vmatmul.mubr.msk.f32.gmra.mrb[56].mxu1 %vm1146_vm4, %v4168_v46 }
0x135f   :  { %11216 = vmatprep.mubr.msk.f32.mxu1 %vm1146_vm4, %v4620_v48 }
0x1362   :  { %11217 = vmatmul.mubr.msk.f32.vlgmr.msra.gmra.mrb[58].mxu1 %vm1146_vm4, %v4621_v58 }
0x1363   :  { %11219 = vmatprep.mubr.msk.f32.mxu1 %vm1146_vm4, %v4622_v31 }
0x1366   :  { %11220 = vmatmul.mubr.msk.f32.gmra.mrb[60].mxu1 %vm1146_vm4, %v4623_v3 }
0x1367   :  { %11222 = vmatprep.mubr.msk.f32.mxu1 %vm1146_vm4, %v4624_v2 }
0x136a   :  { %11223 = vmatmul.mubr.msk.f32.gmra.mrb[62].mxu1 %vm1146_vm4, %v4625_v41 }
0x136b   :  { %11225 = vmatprep.mubr.msk.f32.mxu1 %vm1146_vm4, %v4626_v9 }
0x136e   :  { %11226 = vmatmul.mubr.msk.f32.gmra.mrb[64].mxu1 %vm1146_vm4, %v4627_v7 }
0x136f   :  { %5174 = vmatprep.mubr.f32.mxu1 %v13256_v24 }
0x1401   :  { %v3234_v35 = vpop.f32.mrb[32].mxu1 }
0x1402   :  { %3238 = vst.msk [vmem:[#allocation21] sm:$0xff] %vm907_vm3, %v3234_v35  ;;  %v11129_v59 = vpop.f32.mrb[33].mxu1 }
0x1405   :  { %v11134_v51 = vpop.f32.mrb[34].mxu1 }
0x1406   :  { %v3349_v56 = vpop.f32.mrb[35].mxu1 }
0x1407   :  { %11146 = vmatprep.mubr.msk.f32.mxu0 %vm671_vm2, %v3349_v56 }
0x1408   :  { %11147 = vmatmul.mubr.msk.f32.vlgmr.msra.gmra.mrb[38].mxu0 %vm671_vm2, %v11134_v51 }
0x1409   :  { %11173 = vmatpush3.msra.mxu0 %v13265_v30  ;;  %v11137_v10 = vpop.f32.mrb[36].mxu1 }
0x140a   :  { %11200 = vmatprep.subr.mxu0 %v13284_v50  ;;  %v3359_v11 = vpop.f32.mrb[37].mxu1 }
0x140b   :  { %11149 = vmatprep.mubr.msk.f32.mxu0 %vm671_vm2, %v3359_v11 }
0x140c   :  { %11150 = vmatmul.mubr.msk.f32.gmra.mrb[40].mxu0 %vm671_vm2, %v11137_v10 }
0x140d   :  { %v11140_v24 = vpop.f32.mrb[38].mxu1 }
0x140e   :  { %v3369_v29 = vpop.f32.mrb[39].mxu1 }
0x140f   :  { %11152 = vmatprep.mubr.msk.f32.mxu0 %vm671_vm2, %v3369_v29 }
0x1410   :  { %11153 = vmatmul.mubr.msk.f32.gmra.mrb[42].mxu0 %vm671_vm2, %v11140_v24 }
0x1411   :  { %v11143_v52 = vpop.f32.mrb[40].mxu1 }
0x1412   :  { %v3379_v37 = vpop.f32.mrb[41].mxu1 }
0x1413   :  { %11155 = vmatprep.mubr.msk.f32.mxu0 %vm671_vm2, %v3379_v37 }
0x1414   :  { %11156 = vmatmul.mubr.msk.f32.gmra.mrb[44].mxu0 %vm671_vm2, %v11143_v52 }
0x1415   :  { %v11162_v30 = vpop.f32.mrb[42].mxu1 }
0x1416   :  { %v3800_v53 = vpop.f32.mrb[43].mxu1 }
0x1417   :  { %11174 = vmatprep.mubr.msk.f32.mxu0 %vm671_vm2, %v3800_v53 }
0x1418   :  { %11175 = vmatmul.mubr.msk.f32.vlgmr.msra.gmra.mrb[46].mxu0 %vm671_vm2, %v11162_v30 }
0x1419   :  { %11201 = vmatpush3.msra.mxu0 %v13284_v50  ;;  %v11165_v44 = vpop.f32.mrb[44].mxu1 }
0x141a   :  { %11228 = vmatprep.subr.mxu0 %v13316_v40  ;;  %v3810_v60 = vpop.f32.mrb[45].mxu1 }
0x141b   :  { %11177 = vmatprep.mubr.msk.f32.mxu0 %vm671_vm2, %v3810_v60 }
0x141c   :  { %11178 = vmatmul.mubr.msk.f32.gmra.mrb[48].mxu0 %vm671_vm2, %v11165_v44 }
0x141d   :  { %v11168_v32 = vpop.f32.mrb[46].mxu1 }
0x141e   :  { %v3820_v5 = vpop.f32.mrb[47].mxu1 }
0x141f   :  { %11180 = vmatprep.mubr.msk.f32.mxu0 %vm671_vm2, %v3820_v5 }
0x1420   :  { %11181 = vmatmul.mubr.msk.f32.gmra.mrb[50].mxu0 %vm671_vm2, %v11168_v32 }
0x1421   :  { %v11171_v33 = vpop.f32.mrb[48].mxu1 }
0x1422   :  { %v3830_v61 = vpop.f32.mrb[49].mxu1 }
0x1423   :  { %11183 = vmatprep.mubr.msk.f32.mxu0 %vm671_vm2, %v3830_v61 }
0x1424   :  { %11184 = vmatmul.mubr.msk.f32.gmra.mrb[52].mxu0 %vm671_vm2, %v11171_v33 }
0x1425   :  { %v11190_v50 = vpop.f32.mrb[50].mxu1 }
0x1426   :  { %v4259_v12 = vpop.f32.mrb[51].mxu1 }
0x1427   :  { %11202 = vmatprep.mubr.msk.f32.mxu0 %vm671_vm2, %v4259_v12 }
0x1428   :  { %11203 = vmatmul.mubr.msk.f32.vlgmr.msra.gmra.mrb[54].mxu0 %vm671_vm2, %v11190_v50 }
0x1429   :  { %11229 = vmatpush3.msra.mxu0 %v13316_v40  ;;  %v11193_v3 = vpop.f32.mrb[52].mxu1 }
0x142a   :  { %11706 = vmatprep.subr.bf16.mxu0 %v12901_v26  ;;  %v4269_v9 = vpop.f32.mrb[53].mxu1 }
0x142b   :  { %11205 = vmatprep.mubr.msk.f32.mxu0 %vm671_vm2, %v4269_v9 }
0x142c   :  { %11206 = vmatmul.mubr.msk.f32.gmra.mrb[56].mxu0 %vm671_vm2, %v11193_v3 }
0x142d   :  { %v11196_v59 = vpop.f32.mrb[54].mxu1 }
0x142e   :  { %v4279_v10 = vpop.f32.mrb[55].mxu1 }
0x142f   :  { %11208 = vmatprep.mubr.msk.f32.mxu0 %vm671_vm2, %v4279_v10 }
0x1430   :  { %11209 = vmatmul.mubr.msk.f32.gmra.mrb[58].mxu0 %vm671_vm2, %v11196_v59 }
0x1431   :  { %v11199_v52 = vpop.f32.mrb[56].mxu1 }
0x1432   :  { %v4289_v53 = vpop.f32.mrb[57].mxu1 }
0x1433   :  { %11211 = vmatprep.mubr.msk.f32.mxu0 %vm671_vm2, %v4289_v53 }
0x1434   :  { %11212 = vmatmul.mubr.msk.f32.gmra.mrb[60].mxu0 %vm671_vm2, %v11199_v52 }
0x14db   :  { %v13891_v62 = vpop.f32.mrb[38].mxu0 }
0x14dc   :  { %v3518_v42 = vsel %vm270_vm0, %v13891_v62, 0.0  ;;  %v13895_v14 = vpop.f32.mrb[39].mxu0 }
0x14dd   :  { %v3517_v36 = vsel %vm270_vm0, %v13895_v14, 0.0 }
0x14de   :  { %v3519_v63 = vadd.f32 %v3518_v42, %v3517_v36 }
0x14df   :  { %v13899_v13 = vpop.f32.mrb[40].mxu0 }
0x14e0   :  { %v13901_v22 = vpop.f32.mrb[41].mxu0  ;;  %v3522_v34 = vsel %vm270_vm0, %v13899_v13, 0.0 }
0x14e1   :  { %v3520_v40 = vsel %vm270_vm0, %v13901_v22, 0.0 }
0x14e2   :  { %v3521_v6 = vadd.f32 %v3520_v40, %v3519_v63 }
0x14e3   :  { %v13907_v4 = vpop.f32.mrb[42].mxu0 }
0x14e4   :  { %v13909_v43 = vpop.f32.mrb[43].mxu0  ;;  %v3523_v57 = vadd.f32 %v3522_v34, %v3521_v6  ;;  %v3526_v8 = vsel %vm270_vm0, %v13907_v4, 0.0 }
0x14e5   :  { %v3524_v54 = vsel %vm270_vm0, %v13909_v43, 0.0 }
0x14e6   :  { %v3525_v49 = vadd.f32 %v3524_v54, %v3523_v57 }
0x14e7   :  { %v13915_v38 = vpop.f32.mrb[44].mxu0 }
0x14e8   :  { %v13917_v23 = vpop.f32.mrb[45].mxu0  ;;  %v3527_v55 = vadd.f32 %v3526_v8, %v3525_v49  ;;  %v3530_v48 = vsel %vm270_vm0, %v13915_v38, 0.0 }
0x14e9   :  { %v3528_v1 = vsel %vm270_vm0, %v13917_v23, 0.0 }
0x14ea   :  { %v3529_v46 = vadd.f32 %v3528_v1, %v3527_v55 }
0x14eb   :  { %v13923_v31 = vpop.f32.mrb[46].mxu0 }
0x14ec   :  { %v3531_v58 = vadd.f32 %v3530_v48, %v3529_v46  ;;  %v3969_v2 = vsel %vm270_vm0, %v13923_v31, 0.0  ;;  %v13927_v41 = vpop.f32.mrb[47].mxu0 }
0x14ed   :  { %v3968_v7 = vsel %vm270_vm0, %v13927_v41, 0.0 }
0x14ee   :  { %3532 = vadd.xlane.f32.xlu0 %v3531_v58  ;;  %v3970_v51 = vadd.f32 %v3969_v2, %v3968_v7 }
0x14ef   :  { %v13931_v35 = vpop.f32.mrb[48].mxu0 }
0x14f0   :  { %v13934_v56 = vpop.f32.mrb[49].mxu0  ;;  %v3973_v11 = vsel %vm270_vm0, %v13931_v35, 0.0 }
0x14f1   :  { %v3971_v24 = vsel %vm270_vm0, %v13934_v56, 0.0 }
0x14f2   :  { %v3972_v37 = vadd.f32 %v3971_v24, %v3970_v51 }
0x14f3   :  { %v13941_v29 = vpop.f32.mrb[50].mxu0 }
0x14f4   :  { %v13944_v30 = vpop.f32.mrb[51].mxu0  ;;  %v3974_v32 = vadd.f32 %v3973_v11, %v3972_v37  ;;  %v3977_v33 = vsel %vm270_vm0, %v13941_v29, 0.0 }
0x14f5   :  { %v3975_v44 = vsel %vm270_vm0, %v13944_v30, 0.0 }
0x14f6   :  { %v3976_v61 = vadd.f32 %v3975_v44, %v3974_v32 }
0x14f7   :  { %v13948_v60 = vpop.f32.mrb[52].mxu0 }
0x14f8   :  { %v13950_v5 = vpop.f32.mrb[53].mxu0  ;;  %v3978_v12 = vadd.f32 %v3977_v33, %v3976_v61  ;;  %v3981_v42 = vsel %vm270_vm0, %v13948_v60, 0.0 }
0x14f9   :  { %v3979_v50 = vsel %vm270_vm0, %v13950_v5, 0.0 }
0x14fa   :  { %v3980_v36 = vadd.f32 %v3979_v50, %v3978_v12 }
0x14fc   :  { %v3982_v63 = vadd.f32 %v3981_v42, %v3980_v36 }
0x14fe   :  { %3983 = vadd.xlane.f32.xlu0 %v3982_v63 }
0x157b   :  { %v3533_v40 = vpop.xlane.xlu0 %3532 }
0x157c   :  { %v3534_v6 = vrot.slane %v3533_v40, 4 }
0x157e   :  { %v3535_v34 = vadd.f32 %v3534_v6, %v3533_v40 }
0x1580   :  { %v3536_v57 = vrot.slane %v3535_v34, 2 }
0x1582   :  { %v3537_v54 = vadd.f32 %v3536_v57, %v3535_v34 }
0x1584   :  { %v3538_v49 = vrot.slane %v3537_v54, 1 }
0x1586   :  { %v3539_v8 = vadd.f32 %v3538_v49, %v3537_v54  ;;  %v11218_v49 = vpop.f32.mrb[58].mxu1 }
0x1588   :  { %11893 = vpush %v3539_v8  ;;  %v14009_v8 = vpop.f32.mrb[54].mxu0 }
0x15b9   :  { %s11894_s0 = spop %11893 }
0x15ba   :  { %s3541_s1 = smul.f32 0.00016276042, %s11894_s0 }
0x15bc   :  { %v3542_v55 = vstv %s3541_s1 }
0x15bd   :  { %v13962_v1 = vsub.f32 %v13895_v14, %v3542_v55  ;;  %v13965_v46 = vsub.f32 %v13891_v62, %v3542_v55  ;;  %v13968_v48 = vsub.f32 %v13901_v22, %v3542_v55  ;;  %v13971_v58 = vsub.f32 %v13899_v13, %v3542_v55 }
0x15be   :  { %v13974_v3 = vsub.f32 %v13909_v43, %v3542_v55  ;;  %v13983_v62 = vsub.f32 %v13907_v4, %v3542_v55  ;;  %v13990_v59 = vsub.f32 %v13917_v23, %v3542_v55  ;;  %v13996_v4 = vsub.f32 %v13915_v38, %v3542_v55  ;;  %v4718_v55 = vpop.f32.mrb[59].mxu1 }
0x15bf   :  { %v3551_v2 = vmul.f32 %v13962_v1, %v13962_v1  ;;  %v3552_v9 = vmul.f32 %v13965_v46, %v13965_v46  ;;  %v3553_v14 = vmul.f32 %v13968_v48, %v13968_v48  ;;  %v3554_v22 = vmul.f32 %v13971_v58, %v13971_v58  ;;  %11230 = vmatprep.mubr.msk.f32.mxu0 %vm671_vm2, %v4718_v55 }
0x15c0   :  { %v3555_v51 = vmul.f32 %v13974_v3, %v13974_v3  ;;  %v3556_v24 = vmul.f32 %v13983_v62, %v13983_v62  ;;  %v3557_v53 = vmul.f32 %v13990_v59, %v13990_v59  ;;  %v3558_v32 = vmul.f32 %v13996_v4, %v13996_v4  ;;  %11231 = vmatmul.mubr.msk.f32.vlgmr.msra.gmra.mrb[62].mxu0 %vm671_vm2, %v11218_v49 }
0x15c1   :  { %v3559_v13 = vsel %vm270_vm0, %v3551_v2, 0.0  ;;  %v3560_v43 = vsel %vm270_vm0, %v3552_v9, 0.0  ;;  %v3562_v10 = vsel %vm270_vm0, %v3553_v14, 0.0  ;;  %v3564_v52 = vsel %vm270_vm0, %v3554_v22, 0.0  ;;  %v14013_v9 = vpop.f32.mrb[55].mxu0  ;;  %v11221_v22 = vpop.f32.mrb[60].mxu1 }
0x15c2   :  { %v3561_v7 = vadd.f32 %v3560_v43, %v3559_v13  ;;  %v3566_v23 = vsel %vm270_vm0, %v3555_v51, 0.0  ;;  %v3568_v33 = vsel %vm270_vm0, %v3556_v24, 0.0  ;;  %v3570_v38 = vsel %vm270_vm0, %v3557_v53, 0.0  ;;  %v14018_v13 = vpop.f32.mrb[56].mxu0 }
0x15c3   :  { %v3572_v12 = vsel %vm270_vm0, %v3558_v32, 0.0  ;;  %v4428_v2 = vsel %vm270_vm0, %v14009_v8, 0.0  ;;  %v4427_v14 = vsel %vm270_vm0, %v14013_v9, 0.0  ;;  %v14021_v51 = vpop.f32.mrb[57].mxu0 }
0x15c4   :  { %v3563_v11 = vadd.f32 %v3562_v10, %v3561_v7  ;;  %v4429_v43 = vadd.f32 %v4428_v2, %v4427_v14  ;;  %v4728_v7 = vpop.f32.mrb[61].mxu1  ;;  %v4432_v10 = vsel %vm270_vm0, %v14018_v13, 0.0 }
0x15c5   :  { %11233 = vmatprep.mubr.msk.f32.mxu0 %vm671_vm2, %v4728_v7  ;;  %v11224_v24 = vpop.f32.mrb[62].mxu1 }
0x15c6   :  { %v3565_v37 = vadd.f32 %v3564_v52, %v3563_v11  ;;  %v4430_v11 = vsel %vm270_vm0, %v14021_v51, 0.0  ;;  %v14028_v52 = vpop.f32.mrb[58].mxu0  ;;  %v4738_v53 = vpop.f32.mrb[63].mxu1  ;;  %11234 = vmatmul.mubr.msk.f32.gmra.mrb[64].mxu0 %vm671_vm2, %v11221_v22 }
0x15c7   :  { %v11227_v32 = vpop.f32.mrb[64].mxu1  ;;  %11236 = vmatprep.mubr.msk.f32.mxu0 %vm671_vm2, %v4738_v53 }
0x15c8   :  { %v3567_v44 = vadd.f32 %v3566_v23, %v3565_v37  ;;  %v4431_v37 = vadd.f32 %v4430_v11, %v4429_v43  ;;  %v14030_v23 = vpop.f32.mrb[59].mxu0 }
0x15ca   :  { %v3569_v61 = vadd.f32 %v3568_v33, %v3567_v44  ;;  %v4434_v44 = vsel %vm270_vm0, %v14030_v23, 0.0  ;;  %v14034_v33 = vpop.f32.mrb[60].mxu0  ;;  %11237 = vmatmul.mubr.msk.f32.gmra.mrb[66].mxu0 %vm671_vm2, %v11224_v24 }
0x15cc   :  { %v3571_v50 = vadd.f32 %v3570_v38, %v3569_v61  ;;  %v4433_v61 = vadd.f32 %v4432_v10, %v4431_v37  ;;  %v4748_v38 = vpop.f32.mrb[65].mxu1 }
0x15cd   :  { %11239 = vmatprep.mubr.msk.f32.mxu0 %vm671_vm2, %v4748_v38 }
0x15ce   :  { %v3573_v42 = vadd.f32 %v3572_v12, %v3571_v50  ;;  %v14037_v50 = vpop.f32.mrb[61].mxu0  ;;  %v4436_v12 = vsel %vm270_vm0, %v14028_v52, 0.0  ;;  %11240 = vmatmul.mubr.msk.f32.gmra.mrb[68].mxu0 %vm671_vm2, %v11227_v32 }
0x15cf   :  { %11258 = vmatprep.mubr.msk.f32.mxu0 %vm12902_vm7, %v16264_v0 }
0x15d0   :  { %3574 = vadd.xlane.f32.xlu1 %v3573_v42  ;;  %v4435_v42 = vadd.f32 %v4434_v44, %v4433_v61 }
0x165d   :  { %v3575_v36 = vpop.xlane.xlu1 %3574 }
0x165e   :  { %v3576_v63 = vrot.slane %v3575_v36, 4 }
0x1660   :  { %v3577_v40 = vadd.f32 %v3576_v63, %v3575_v36  ;;  %v4438_v36 = vsel %vm270_vm0, %v14037_v50, 0.0  ;;  %v4437_v63 = vadd.f32 %v4436_v12, %v4435_v42 }
0x1662   :  { %v3578_v6 = vrot.slane %v3577_v40, 2 }
0x1664   :  { %v3579_v34 = vadd.f32 %v3578_v6, %v3577_v40  ;;  %v4440_v40 = vsel %vm270_vm0, %v14034_v33, 0.0  ;;  %v4439_v6 = vadd.f32 %v4438_v36, %v4437_v63 }
0x1666   :  { %v3580_v57 = vrot.slane %v3579_v34, 1 }
0x1668   :  { %v3581_v54 = vadd.f32 %v3580_v57, %v3579_v34  ;;  %v4441_v34 = vadd.f32 %v4440_v40, %v4439_v6  ;;  %v3984_v57 = vpop.xlane.xlu0 %3983 }
0x166a   :  { %11895 = vpush %v3581_v54  ;;  %4442 = vadd.xlane.f32.xlu0 %v4441_v34  ;;  %v3985_v54 = vrot.slane %v3984_v57, 4 }
0x166c   :  { %v3986_v49 = vadd.f32 %v3985_v54, %v3984_v57 }
0x166e   :  { %v3987_v55 = vrot.slane %v3986_v49, 2 }
0x1670   :  { %v3988_v14 = vadd.f32 %v3987_v55, %v3986_v49 }
0x1672   :  { %v3989_v22 = vrot.slane %v3988_v14, 1 }
0x1674   :  { %v3990_v7 = vadd.f32 %v3989_v22, %v3988_v14 }
0x169b   :  { %s11896_s2 = spop %11895 }
0x169c   :  { %s3583_s22 = smul.f32 0.00016276042, %s11896_s2 }
0x169e   :  { %s3584_s17 = sadd.f32 1e-05, %s3583_s22 }
0x16a0   :  { %v3585_v2 = vstv %s3584_s17 }
0x16a1   :  { %12127 = vrsqrt.f32 %v3585_v2 }
0x16ab   :  { %v12128_v43 = vpop.eup %12127 }
0x16ac   :  { %11897 = vpush %v12128_v43 }
0x16ad   :  { %11899 = vpush %v3990_v7  ;;  %v14101_v7 = vpop.f32.mrb[62].mxu0 }
0x16dd   :  { %s14051_s21 = spop %11897 }
0x16de   :  { %s11900_s26 = spop %11899 }
0x16df   :  { %s3992_s24 = smul.f32 0.00016276042, %s11900_s26 }
0x16e1   :  { %v3993_v10 = vstv %s3992_s24 }
0x16e2   :  { %v14054_v11 = vsub.f32 %v13927_v41, %v3993_v10  ;;  %v14057_v24 = vsub.f32 %v13923_v31, %v3993_v10  ;;  %v14060_v37 = vsub.f32 %v13934_v56, %v3993_v10  ;;  %v14063_v53 = vsub.f32 %v13931_v35, %v3993_v10 }
0x16e3   :  { %v14066_v44 = vsub.f32 %v13944_v30, %v3993_v10  ;;  %v14075_v31 = vsub.f32 %v13941_v29, %v3993_v10  ;;  %v14082_v12 = vsub.f32 %v13950_v5, %v3993_v10  ;;  %v14088_v29 = vsub.f32 %v13948_v60, %v3993_v10 }
0x16e4   :  { %v4002_v32 = vmul.f32 %v14054_v11, %v14054_v11  ;;  %v4003_v61 = vmul.f32 %v14057_v24, %v14057_v24  ;;  %v4004_v41 = vmul.f32 %v14060_v37, %v14060_v37  ;;  %v4005_v56 = vmul.f32 %v14063_v53, %v14063_v53 }
0x16e5   :  { %v4006_v42 = vmul.f32 %v14066_v44, %v14066_v44  ;;  %v4007_v40 = vmul.f32 %v14075_v31, %v14075_v31  ;;  %v4008_v57 = vmul.f32 %v14082_v12, %v14082_v12  ;;  %v4009_v49 = vmul.f32 %v14088_v29, %v14088_v29 }
0x16e6   :  { %v4010_v35 = vsel %vm270_vm0, %v4002_v32, 0.0  ;;  %v4011_v30 = vsel %vm270_vm0, %v4003_v61, 0.0  ;;  %v4013_v36 = vsel %vm270_vm0, %v4004_v41, 0.0  ;;  %v4015_v6 = vsel %vm270_vm0, %v4005_v56, 0.0  ;;  %v14105_v32 = vpop.f32.mrb[63].mxu0 }
0x16e7   :  { %v4012_v38 = vadd.f32 %v4011_v30, %v4010_v35  ;;  %v4017_v5 = vsel %vm270_vm0, %v4006_v42, 0.0  ;;  %v4019_v55 = vsel %vm270_vm0, %v4007_v40, 0.0  ;;  %v4021_v60 = vsel %vm270_vm0, %v4008_v57, 0.0  ;;  %v14109_v41 = vpop.f32.mrb[64].mxu0 }
0x16e8   :  { %v4023_v22 = vsel %vm270_vm0, %v4009_v49, 0.0  ;;  %v4887_v10 = vsel %vm270_vm0, %v14101_v7, 0.0  ;;  %v4886_v61 = vsel %vm270_vm0, %v14105_v32, 0.0  ;;  %v14111_v35 = vpop.f32.mrb[65].mxu0  ;;  %v4891_v30 = vsel %vm270_vm0, %v14109_v41, 0.0 }
0x16e9   :  { %v4014_v63 = vadd.f32 %v4013_v36, %v4012_v38  ;;  %v4888_v56 = vadd.f32 %v4887_v10, %v4886_v61  ;;  %v4889_v38 = vsel %vm270_vm0, %v14111_v35, 0.0  ;;  %v14117_v42 = vpop.f32.mrb[66].mxu0 }
0x16eb   :  { %v4016_v34 = vadd.f32 %v4015_v6, %v4014_v63  ;;  %v4890_v36 = vadd.f32 %v4889_v38, %v4888_v56  ;;  %v14119_v63 = vpop.f32.mrb[67].mxu0 }
0x16ec   :  { %v4893_v40 = vsel %vm270_vm0, %v14119_v63, 0.0  ;;  %v14123_v6 = vpop.f32.mrb[68].mxu0 }
0x16ed   :  { %v4018_v54 = vadd.f32 %v4017_v5, %v4016_v34  ;;  %v4892_v34 = vadd.f32 %v4891_v30, %v4890_v36  ;;  %v14125_v57 = vpop.f32.mrb[69].mxu0  ;;  %v4895_v5 = vsel %vm270_vm0, %v14117_v42, 0.0 }
0x16ee   :  { %v4897_v49 = vsel %vm270_vm0, %v14125_v57, 0.0 }
0x16ef   :  { %v4020_v2 = vadd.f32 %v4019_v55, %v4018_v54  ;;  %v4894_v54 = vadd.f32 %v4893_v40, %v4892_v34 }
0x16f1   :  { %v4022_v14 = vadd.f32 %v4021_v60, %v4020_v2  ;;  %v4896_v55 = vadd.f32 %v4895_v5, %v4894_v54  ;;  %v4899_v60 = vsel %vm270_vm0, %v14123_v6, 0.0 }
0x16f3   :  { %v4024_v43 = vadd.f32 %v4023_v22, %v4022_v14  ;;  %v4898_v2 = vadd.f32 %v4897_v49, %v4896_v55 }
0x16f5   :  { %4025 = vadd.xlane.f32.xlu1 %v4024_v43  ;;  %v4900_v43 = vadd.f32 %v4899_v60, %v4898_v2 }
0x16f7   :  { %4901 = vadd.xlane.f32.xlu0 %v4900_v43  ;;  %v4443_v36 = vpop.xlane.xlu0 %4442 }
0x16f8   :  { %v4444_v40 = vrot.slane %v4443_v36, 4 }
0x16fa   :  { %v4445_v34 = vadd.f32 %v4444_v40, %v4443_v36 }
0x16fc   :  { %v4446_v5 = vrot.slane %v4445_v34, 2 }
0x16fe   :  { %v4447_v49 = vadd.f32 %v4446_v5, %v4445_v34 }
0x1700   :  { %v4448_v55 = vrot.slane %v4447_v49, 1 }
0x1702   :  { %v4449_v60 = vadd.f32 %v4448_v55, %v4447_v49 }
0x1782   :  { %v4026_v14 = vpop.xlane.xlu1 %4025 }
0x1783   :  { %v4027_v22 = vrot.slane %v4026_v14, 4 }
0x1785   :  { %v4028_v10 = vadd.f32 %v4027_v22, %v4026_v14  ;;  %v14134_v14 = vstv %s14051_s21 }
0x1787   :  { %v4029_v61 = vrot.slane %v4028_v10, 2 }
0x1789   :  { %v4030_v56 = vadd.f32 %v4029_v61, %v4028_v10 }
0x178b   :  { %v4031_v30 = vrot.slane %v4030_v56, 1 }
0x178d   :  { %v4032_v38 = vadd.f32 %v4031_v30, %v4030_v56  ;;  %v14146_v56 = vmul.f32 %v14134_v14, %v13962_v1 }
0x178f   :  { %11901 = vpush %v4032_v38  ;;  %v3597_v34 = vsel %vm270_vm0, %v14146_v56, -inf }
0x17c0   :  { %s11902_s6 = spop %11901 }
0x17c1   :  { %s4034_s25 = smul.f32 0.00016276042, %s11902_s6 }
0x17c3   :  { %s4035_s27 = sadd.f32 1e-05, %s4034_s25 }
0x17c5   :  { %v4036_v54 = vstv %s4035_s27 }
0x17c6   :  { %12129 = vrsqrt.f32 %v4036_v54 }
0x17d0   :  { %v12130_v2 = vpop.eup %12129 }
0x17d1   :  { %11903 = vpush %v12130_v2 }
0x17d2   :  { %11905 = vpush %v4449_v60  ;;  %v14192_v60 = vmul.f32 %v14134_v14, %v13968_v48 }
0x17d4   :  { %v3603_v48 = vsel %vm270_vm0, %v14192_v60, -inf }
0x1802   :  { %s11904_s29 = spop %11903 }
0x1803   :  { %v14136_v22 = vstv %s11904_s29  ;;  %s11906_s5 = spop %11905 }
0x1804   :  { %s4451_s20 = smul.f32 0.00016276042, %s11906_s5  ;;  %v14140_v43 = vmul.f32 %v14136_v22, %v14054_v11 }
0x1806   :  { %v4452_v10 = vstv %s4451_s20  ;;  %v4048_v61 = vsel %vm270_vm0, %v14140_v43, -inf }
0x1807   :  { %v14149_v30 = vsub.f32 %v14013_v9, %v4452_v10  ;;  %v14152_v38 = vsub.f32 %v14009_v8, %v4452_v10  ;;  %4049 = vmax.xlane.f32.xlu0 %v4048_v61  ;;  %v14155_v36 = vsub.f32 %v14021_v51, %v4452_v10  ;;  %v14158_v11 = vsub.f32 %v14018_v13, %v4452_v10 }
0x1808   :  { %v14161_v40 = vsub.f32 %v14030_v23, %v4452_v10  ;;  %v14173_v51 = vmul.f32 %v14136_v22, %v14060_v37  ;;  %v14176_v13 = vsub.f32 %v14028_v52, %v4452_v10  ;;  %v14183_v55 = vsub.f32 %v14037_v50, %v4452_v10 }
0x1809   :  { %v4461_v1 = vmul.f32 %v14149_v30, %v14149_v30  ;;  %v4462_v9 = vmul.f32 %v14152_v38, %v14152_v38  ;;  %v4463_v8 = vmul.f32 %v14155_v36, %v14155_v36  ;;  %v4464_v23 = vmul.f32 %v14158_v11, %v14158_v11 }
0x180a   :  { %v4465_v2 = vmul.f32 %v14161_v40, %v14161_v40  ;;  %v4054_v52 = vsel %vm270_vm0, %v14173_v51, -inf  ;;  %v4466_v50 = vmul.f32 %v14176_v13, %v14176_v13 }
0x180b   :  { %3598 = vmax.xlane.f32.xlu0 %v3597_v34  ;;  %v4469_v5 = vsel %vm270_vm0, %v4461_v1, 0.0  ;;  %v4470_v54 = vsel %vm270_vm0, %v4462_v9, 0.0  ;;  %v4472_v37 = vsel %vm270_vm0, %v4463_v8, 0.0  ;;  %v14195_v1 = vsub.f32 %v14034_v33, %v4452_v10 }
0x180c   :  { %v4471_v49 = vadd.f32 %v4470_v54, %v4469_v5  ;;  %v4474_v9 = vsel %vm270_vm0, %v4464_v23, 0.0  ;;  %v4467_v8 = vmul.f32 %v14183_v55, %v14183_v55  ;;  %v4476_v5 = vsel %vm270_vm0, %v4465_v2, 0.0 }
0x180d   :  { %v14207_v54 = vmul.f32 %v14136_v22, %v14066_v44  ;;  %v4468_v10 = vmul.f32 %v14195_v1, %v14195_v1  ;;  %v4478_v23 = vsel %vm270_vm0, %v4466_v50, 0.0  ;;  %v14224_v50 = vmul.f32 %v14136_v22, %v14082_v12 }
0x180e   :  { %v4473_v61 = vadd.f32 %v4472_v37, %v4471_v49  ;;  %v4480_v37 = vsel %vm270_vm0, %v4467_v8, 0.0 }
0x180f   :  { %4055 = vmax.xlane.f32.xlu0 %v4054_v52  ;;  %v4060_v2 = vsel %vm270_vm0, %v14207_v54, -inf  ;;  %v4482_v44 = vsel %vm270_vm0, %v4468_v10, 0.0  ;;  %v4066_v8 = vsel %vm270_vm0, %v14224_v50, -inf }
0x1810   :  { %v4475_v34 = vadd.f32 %v4474_v9, %v4473_v61  ;;  %v14217_v61 = vmul.f32 %v14134_v14, %v13974_v3  ;;  %v14230_v3 = vmul.f32 %v14134_v14, %v13990_v59 }
0x1812   :  { %v4477_v33 = vadd.f32 %v4476_v5, %v4475_v34  ;;  %v3609_v34 = vsel %vm270_vm0, %v14217_v61, -inf  ;;  %v3615_v5 = vsel %vm270_vm0, %v14230_v3, -inf }
0x1813   :  { %3604 = vmax.xlane.f32.xlu0 %v3603_v48 }
0x1814   :  { %v4479_v49 = vadd.f32 %v4478_v23, %v4477_v33 }
0x1816   :  { %v4481_v52 = vadd.f32 %v4480_v37, %v4479_v49 }
0x1817   :  { %4061 = vmax.xlane.f32.xlu0 %v4060_v2  ;;  %v4902_v2 = vpop.xlane.xlu0 %4901 }
0x1818   :  { %v4483_v9 = vadd.f32 %v4482_v44, %v4481_v52  ;;  %v4903_v52 = vrot.slane %v4902_v2, 4 }
0x181a   :  { %4484 = vadd.xlane.f32.xlu1 %v4483_v9  ;;  %v4904_v44 = vadd.f32 %v4903_v52, %v4902_v2 }
0x181b   :  { %3610 = vmax.xlane.f32.xlu0 %v3609_v34 }
0x181c   :  { %v4905_v59 = vrot.slane %v4904_v44, 2 }
0x181e   :  { %v4906_v34 = vadd.f32 %v4905_v59, %v4904_v44 }
0x181f   :  { %4067 = vmax.xlane.f32.xlu0 %v4066_v8 }
0x1820   :  { %v4907_v8 = vrot.slane %v4906_v34, 1 }
0x1822   :  { %v4908_v0 = vadd.f32 %v4907_v8, %v4906_v34 }
0x1823   :  { %3616 = vmax.xlane.f32.xlu0 %v3615_v5 }
0x18a7   :  { %v4485_v48 = vpop.xlane.xlu1 %4484 }
0x18a8   :  { %v4486_v33 = vrot.slane %v4485_v48, 4 }
0x18aa   :  { %v4487_v10 = vadd.f32 %v4486_v33, %v4485_v48 }
0x18ac   :  { %v4488_v23 = vrot.slane %v4487_v10, 2 }
0x18ae   :  { %v4489_v49 = vadd.f32 %v4488_v23, %v4487_v10 }
0x18b0   :  { %v4490_v12 = vrot.slane %v4489_v49, 1 }
0x18b2   :  { %v4491_v37 = vadd.f32 %v4490_v12, %v4489_v49 }
0x18b4   :  { %11907 = vpush %v4491_v37 }
0x18e5   :  { %s11908_s4 = spop %11907 }
0x18e6   :  { %s4493_s28 = smul.f32 0.00016276042, %s11908_s4 }
0x18e8   :  { %s4494_s30 = sadd.f32 1e-05, %s4493_s28 }
0x18ea   :  { %v4495_v9 = vstv %s4494_s30 }
0x18eb   :  { %12131 = vrsqrt.f32 %v4495_v9 }
0x18f5   :  { %v12132_v5 = vpop.eup %12131 }
0x18f6   :  { %11909 = vpush %v12132_v5 }
0x18f7   :  { %11911 = vpush %v4908_v0 }
0x1927   :  { %s14234_s18 = spop %11909 }
0x1928   :  { %s11912_s8 = spop %11911 }
0x1929   :  { %s4910_s0 = smul.f32 0.00016276042, %s11912_s8 }
0x192b   :  { %v4911_v48 = vstv %s4910_s0 }
0x192c   :  { %v14237_v33 = vsub.f32 %v14105_v32, %v4911_v48  ;;  %v14240_v10 = vsub.f32 %v14101_v7, %v4911_v48  ;;  %v14243_v23 = vsub.f32 %v14111_v35, %v4911_v48  ;;  %v14246_v49 = vsub.f32 %v14109_v41, %v4911_v48 }
0x192d   :  { %v14249_v12 = vsub.f32 %v14119_v63, %v4911_v48  ;;  %v14258_v7 = vsub.f32 %v14117_v42, %v4911_v48  ;;  %v14265_v52 = vsub.f32 %v14125_v57, %v4911_v48  ;;  %v14271_v42 = vsub.f32 %v14123_v6, %v4911_v48 }
0x192e   :  { %v4920_v0 = vmul.f32 %v14237_v33, %v14237_v33  ;;  %v4921_v37 = vmul.f32 %v14240_v10, %v14240_v10  ;;  %v4922_v32 = vmul.f32 %v14243_v23, %v14243_v23  ;;  %v4923_v35 = vmul.f32 %v14246_v49, %v14246_v49 }
0x192f   :  { %v4924_v44 = vmul.f32 %v14249_v12, %v14249_v12  ;;  %v4925_v34 = vmul.f32 %v14258_v7, %v14258_v7 }
0x1930   :  { %v4928_v41 = vsel %vm270_vm0, %v4920_v0, 0.0  ;;  %v4929_v63 = vsel %vm270_vm0, %v4921_v37, 0.0  ;;  %v4931_v59 = vsel %vm270_vm0, %v4922_v32, 0.0  ;;  %v4933_v8 = vsel %vm270_vm0, %v4923_v35, 0.0 }
0x1931   :  { %v4930_v2 = vadd.f32 %v4929_v63, %v4928_v41  ;;  %v4926_v0 = vmul.f32 %v14265_v52, %v14265_v52  ;;  %v4935_v57 = vsel %vm270_vm0, %v4924_v44, 0.0  ;;  %v4927_v41 = vmul.f32 %v14271_v42, %v14271_v42 }
0x1932   :  { %v4937_v32 = vsel %vm270_vm0, %v4925_v34, 0.0  ;;  %v14286_v35 = vmul.f32 %v14136_v22, %v14057_v24 }
0x1933   :  { %v4932_v9 = vadd.f32 %v4931_v59, %v4930_v2  ;;  %v4939_v6 = vsel %vm270_vm0, %v4926_v0, 0.0  ;;  %v4941_v2 = vsel %vm270_vm0, %v4927_v41, 0.0  ;;  %v14310_v0 = vmul.f32 %v14136_v22, %v14075_v31 }
0x1934   :  { %v4051_v44 = vsel %vm270_vm0, %v14286_v35, -inf  ;;  %v14328_v41 = vmul.f32 %v14134_v14, %v13996_v4 }
0x1935   :  { %v4934_v5 = vadd.f32 %v4933_v8, %v4932_v9  ;;  %v14292_v9 = vmul.f32 %v14134_v14, %v13965_v46  ;;  %v14298_v8 = vmul.f32 %v14136_v22, %v14063_v53  ;;  %v4063_v53 = vsel %vm270_vm0, %v14310_v0, -inf }
0x1937   :  { %v4936_v37 = vadd.f32 %v4935_v57, %v4934_v5  ;;  %v3600_v34 = vsel %vm270_vm0, %v14292_v9, -inf  ;;  %v4057_v24 = vsel %vm270_vm0, %v14298_v8, -inf  ;;  %v14304_v5 = vmul.f32 %v14134_v14, %v13971_v58 }
0x1938   :  { %v14316_v57 = vmul.f32 %v14134_v14, %v13983_v62  ;;  %v3618_v62 = vsel %vm270_vm0, %v14328_v41, -inf  ;;  %v4050_v14 = vpop.xlane.xlu0 %4049 }
0x1939   :  { %v4938_v63 = vadd.f32 %v4937_v32, %v4936_v37  ;;  %v3606_v46 = vsel %vm270_vm0, %v14304_v5, -inf  ;;  %v14322_v37 = vmul.f32 %v14136_v22, %v14088_v29 }
0x193a   :  { %v3612_v58 = vsel %vm270_vm0, %v14316_v57, -inf }
0x193b   :  { %v4940_v48 = vadd.f32 %v4939_v6, %v4938_v63  ;;  %v4069_v31 = vsel %vm270_vm0, %v14322_v37, -inf }
0x193d   :  { %v4942_v59 = vadd.f32 %v4941_v2, %v4940_v48 }
0x193f   :  { %4943 = vadd.xlane.f32.xlu1 %v4942_v59 }
0x1943   :  { %4052 = vmax.xlane.f32.xlu1 %v4051_v44 }
0x1947   :  { %3601 = vmax.xlane.f32.xlu1 %v3600_v34  ;;  %v14333_v34 = vstv %s14234_s18 }
0x194b   :  { %4058 = vmax.xlane.f32.xlu1 %v4057_v24 }
0x194f   :  { %3607 = vmax.xlane.f32.xlu1 %v3606_v46 }
0x1953   :  { %4064 = vmax.xlane.f32.xlu1 %v4063_v53 }
0x1957   :  { %3613 = vmax.xlane.f32.xlu1 %v3612_v58  ;;  %v3599_v58 = vpop.xlane.xlu0 %3598 }
0x195b   :  { %4070 = vmax.xlane.f32.xlu1 %v4069_v31 }
0x195f   :  { %3619 = vmax.xlane.f32.xlu1 %v3618_v62 }
0x19cc   :  { %v4944_v32 = vpop.xlane.xlu1 %4943 }
0x19cd   :  { %v4945_v63 = vrot.slane %v4944_v32, 4 }
0x19cf   :  { %v4946_v6 = vadd.f32 %v4945_v63, %v4944_v32  ;;  %v14347_v63 = vmul.f32 %v14333_v34, %v14152_v38  ;;  %v4056_v38 = vpop.xlane.xlu0 %4055 }
0x19d0   :  { %v4053_v44 = vpop.xlane.xlu1 %4052 }
0x19d1   :  { %v4947_v48 = vrot.slane %v4946_v6, 2 }
0x19d3   :  { %v4948_v29 = vadd.f32 %v4947_v48, %v4946_v6  ;;  %v14351_v6 = vmul.f32 %v14333_v34, %v14149_v30 }
0x19d4   :  { %v3602_v31 = vpop.xlane.xlu1 %3601 }
0x19d5   :  { %v4949_v22 = vrot.slane %v4948_v29, 1 }
0x19d7   :  { %v4950_v2 = vadd.f32 %v4949_v22, %v4948_v29 }
0x19d8   :  { %v4059_v22 = vpop.xlane.xlu1 %4058 }
0x19d9   :  { %11913 = vpush %v4950_v2 }
0x1a0a   :  { %s11914_s1 = spop %11913 }
0x1a0b   :  { %s4952_s2 = smul.f32 0.00016276042, %s11914_s1 }
0x1a0d   :  { %s4953_s22 = sadd.f32 1e-05, %s4952_s2 }
0x1a0f   :  { %v4954_v59 = vstv %s4953_s22 }
0x1a10   :  { %12133 = vrsqrt.f32 %v4954_v59  ;;  %v14369_v59 = vmul.f32 %v14333_v34, %v14158_v11 }
0x1a1a   :  { %v12134_v4 = vpop.eup %12133 }
0x1a1b   :  { %11915 = vpush %v12134_v4  ;;  %v3605_v4 = vpop.xlane.xlu0 %3604 }
0x1a4c   :  { %s11916_s17 = spop %11915 }
0x1a4d   :  { %v4957_v24 = vstv %s11916_s17 }
0x1a4e   :  { %v14336_v46 = vmul.f32 %v4957_v24, %v14240_v10  ;;  %v14339_v53 = vmul.f32 %v4957_v24, %v14237_v33  ;;  %v4510_v33 = vsel %vm270_vm0, %v14347_v63, -inf  ;;  %v4507_v10 = vsel %vm270_vm0, %v14351_v6, -inf }
0x1a4f   :  { %v14358_v48 = vmul.f32 %v4957_v24, %v14246_v49  ;;  %v14361_v29 = vmul.f32 %v4957_v24, %v14243_v23  ;;  %v14373_v49 = vmul.f32 %v14333_v34, %v14155_v36  ;;  %v4072_v23 = vsub.f32 %v14140_v43, %v4050_v14 }
0x1a50   :  { %v4969_v62 = vsel %vm270_vm0, %v14336_v46, -inf  ;;  %v4966_v32 = vsel %vm270_vm0, %v14339_v53, -inf  ;;  %v14382_v11 = vmul.f32 %v4957_v24, %v14258_v7  ;;  %v14385_v36 = vmul.f32 %v4957_v24, %v14249_v12 }
0x1a51   :  { %4970 = vmax.xlane.f32.xlu1 %v4969_v62  ;;  %4967 = vmax.xlane.f32.xlu0 %v4966_v32  ;;  %v4975_v30 = vsel %vm270_vm0, %v14358_v48, -inf  ;;  %v4972_v2 = vsel %vm270_vm0, %v14361_v29, -inf  ;;  %v4073_v62 = vsub.f32 %v14286_v35, %v4053_v44  ;;  %v3608_v32 = vpop.xlane.xlu1 %3607  ;;  %v3621_v43 = vsub.f32 %v14146_v56, %v3599_v58 }
0x1a52   :  { %v3622_v35 = vsub.f32 %v14292_v9, %v3602_v31  ;;  %v4981_v44 = vsel %vm270_vm0, %v14382_v11, -inf  ;;  %v14395_v7 = vmul.f32 %v14333_v34, %v14176_v13  ;;  %v14399_v12 = vmul.f32 %v14333_v34, %v14161_v40 }
0x1a53   :  { %v4082_v14 = vmul.f32 1.442695, %v4073_v62  ;;  %v3629_v56 = vmul.f32 1.442695, %v3621_v43  ;;  %v4074_v9 = vsub.f32 %v14173_v51, %v4056_v38  ;;  %v4075_v62 = vsub.f32 %v14298_v8, %v4059_v22 }
0x1a54   :  { %v3631_v31 = vmul.f32 1.442695, %v3622_v35  ;;  %v4522_v13 = vsel %vm270_vm0, %v14395_v7, -inf  ;;  %v14408_v40 = vmul.f32 %v4957_v24, %v14271_v42  ;;  %v3623_v38 = vsub.f32 %v14192_v60, %v3605_v4 }
0x1a55   :  { %4511 = vmax.xlane.f32.xlu1 %v4510_v33  ;;  %4508 = vmax.xlane.f32.xlu0 %v4507_v10  ;;  %v4516_v33 = vsel %vm270_vm0, %v14369_v59, -inf  ;;  %v4513_v10 = vsel %vm270_vm0, %v14373_v49, -inf  ;;  %v4065_v58 = vpop.xlane.xlu1 %4064  ;;  %v4084_v51 = vmul.f32 1.442695, %v4074_v9  ;;  %v4086_v8 = vmul.f32 1.442695, %v4075_v62 }
0x1a56   :  { %v3624_v22 = vsub.f32 %v14304_v5, %v3608_v32  ;;  %v3633_v60 = vmul.f32 1.442695, %v3623_v38  ;;  %v4077_v32 = vsub.f32 %v14310_v0, %v4065_v58 }
0x1a58   :  { %v3635_v4 = vmul.f32 1.442695, %v3624_v22  ;;  %v4090_v0 = vmul.f32 1.442695, %v4077_v32 }
0x1a59   :  { %4976 = vmax.xlane.f32.xlu1 %v4975_v30  ;;  %4973 = vmax.xlane.f32.xlu0 %v4972_v2  ;;  %v4080_v30 = vmul.f32 1.442695, %v4072_v23  ;;  %v4978_v2 = vsel %vm270_vm0, %v14385_v36, -inf  ;;  %v4062_v23 = vpop.xlane.xlu0 %4061  ;;  %v3614_v43 = vpop.xlane.xlu1 %3613 }
0x1a5a   :  { %v4076_v5 = vsub.f32 %v14207_v54, %v4062_v23 }
0x1a5b   :  { %12135 = vpow2.f32 %v4080_v30 }
0x1a5c   :  { %12137 = vpow2.f32 %v4082_v14  ;;  %v4987_v14 = vsel %vm270_vm0, %v14408_v40, -inf }
0x1a5d   :  { %4517 = vmax.xlane.f32.xlu1 %v4516_v33  ;;  %4514 = vmax.xlane.f32.xlu0 %v4513_v10  ;;  %v4519_v33 = vsel %vm270_vm0, %v14399_v12, -inf  ;;  %v14411_v10 = vmul.f32 %v4957_v24, %v14265_v52  ;;  %12139 = vpow2.f32 %v3629_v56  ;;  %v3611_v30 = vpop.xlane.xlu0 %3610  ;;  %v14421_v52 = vmul.f32 %v14333_v34, %v14195_v1  ;;  %v4071_v23 = vpop.xlane.xlu1 %4070 }
0x1a5e   :  { %12141 = vpow2.f32 %v3631_v31  ;;  %v14425_v24 = vmul.f32 %v14333_v34, %v14183_v55  ;;  %v3625_v54 = vsub.f32 %v14217_v61, %v3611_v30  ;;  %v3626_v56 = vsub.f32 %v14316_v57, %v3614_v43 }
0x1a5f   :  { %v4984_v42 = vsel %vm270_vm0, %v14411_v10, -inf  ;;  %12143 = vpow2.f32 %v4084_v51  ;;  %v4528_v1 = vsel %vm270_vm0, %v14421_v52, -inf  ;;  %v4079_v57 = vsub.f32 %v14322_v37, %v4071_v23 }
0x1a60   :  { %12145 = vpow2.f32 %v4086_v8  ;;  %v3639_v51 = vmul.f32 1.442695, %v3626_v56 }
0x1a61   :  { %4982 = vmax.xlane.f32.xlu1 %v4981_v44  ;;  %4979 = vmax.xlane.f32.xlu0 %v4978_v2  ;;  %v4525_v44 = vsel %vm270_vm0, %v14425_v24, -inf  ;;  %v4068_v34 = vpop.xlane.xlu0 %4067  ;;  %12147 = vpow2.f32 %v3633_v60  ;;  %v4088_v2 = vmul.f32 1.442695, %v4076_v5  ;;  %v3620_v30 = vpop.xlane.xlu1 %3619 }
0x1a62   :  { %12149 = vpow2.f32 %v3635_v4  ;;  %v4078_v61 = vsub.f32 %v14224_v50, %v4068_v34  ;;  %v3628_v37 = vsub.f32 %v14328_v41, %v3620_v30 }
0x1a63   :  { %12151 = vpow2.f32 %v4088_v2 }
0x1a64   :  { %12153 = vpow2.f32 %v4090_v0  ;;  %v4092_v50 = vmul.f32 1.442695, %v4078_v61 }
0x1a65   :  { %4523 = vmax.xlane.f32.xlu1 %v4522_v13  ;;  %4520 = vmax.xlane.f32.xlu0 %v4519_v33  ;;  %v14429_v35 = vpop.eup %12135  ;;  %v3637_v13 = vmul.f32 1.442695, %v3625_v54  ;;  %v3617_v33 = vpop.xlane.xlu0 %3616 }
0x1a66   :  { %v14435_v55 = vpop.eup %12137  ;;  %v4096_v31 = vsel %vm270_vm0, %v14429_v35, 0.0 }
0x1a67   :  { %v14439_v9 = vpop.eup %12139  ;;  %v4099_v58 = vsel %vm270_vm0, %v14435_v55, 0.0  ;;  %12155 = vpow2.f32 %v3637_v13 }
0x1a68   :  { %v14445_v62 = vpop.eup %12141  ;;  %v3645_v22 = vsel %vm270_vm0, %v14439_v9, 0.0  ;;  %12157 = vpow2.f32 %v3639_v51 }
0x1a69   :  { %4988 = vmax.xlane.f32.xlu1 %v4987_v14  ;;  %4985 = vmax.xlane.f32.xlu0 %v4984_v42  ;;  %v14449_v38 = vpop.eup %12143  ;;  %v3648_v8 = vsel %vm270_vm0, %v14445_v62, 0.0  ;;  %v3627_v14 = vsub.f32 %v14230_v3, %v3617_v33  ;;  %v4094_v42 = vmul.f32 1.442695, %v4079_v57  ;;  %12159 = vpow2.f32 %v4092_v50 }
0x1a6a   :  { %v14455_v43 = vpop.eup %12145  ;;  %v4102_v4 = vsel %vm270_vm0, %v14449_v38, 0.0  ;;  %v3643_v3 = vmul.f32 1.442695, %v3628_v37 }
0x1a6b   :  { %v14459_v60 = vpop.eup %12147  ;;  %v4105_v5 = vsel %vm270_vm0, %v14455_v43, 0.0  ;;  %12161 = vpow2.f32 %v4094_v42 }
0x1a6c   :  { %v14465_v32 = vpop.eup %12149  ;;  %v3651_v34 = vsel %vm270_vm0, %v14459_v60, 0.0 }
0x1a6d   :  { %4529 = vmax.xlane.f32.xlu1 %v4528_v1  ;;  %4526 = vmax.xlane.f32.xlu0 %v4525_v44  ;;  %v3641_v1 = vmul.f32 1.442695, %v3627_v14  ;;  %v14467_v44 = vpop.eup %12151  ;;  %v3654_v41 = vsel %vm270_vm0, %v14465_v32, 0.0 }
0x1a6e   :  { %v14473_v2 = vpop.eup %12153  ;;  %v4108_v0 = vsel %vm270_vm0, %v14467_v44, 0.0 }
0x1a6f   :  { %12163 = vpow2.f32 %v3641_v1  ;;  %v4111_v23 = vsel %vm270_vm0, %v14473_v2, 0.0 }
0x1a70   :  { %12165 = vpow2.f32 %v3643_v3 }
0x1a71   :  { %4100 = vadd.xlane.f32.xlu1 %v4099_v58  ;;  %4097 = vadd.xlane.f32.xlu0 %v4096_v31  ;;  %v14475_v54 = vpop.eup %12155 }
0x1a72   :  { %v14481_v56 = vpop.eup %12157  ;;  %v3657_v13 = vsel %vm270_vm0, %v14475_v54, 0.0 }
0x1a73   :  { %v14483_v58 = vpop.eup %12159  ;;  %v3660_v31 = vsel %vm270_vm0, %v14481_v56, 0.0 }
0x1a74   :  { %v4114_v57 = vsel %vm270_vm0, %v14483_v58, 0.0 }
0x1a75   :  { %3649 = vadd.xlane.f32.xlu1 %v3648_v8  ;;  %3646 = vadd.xlane.f32.xlu0 %v3645_v22  ;;  %v14489_v61 = vpop.eup %12161 }
0x1a76   :  { %v4117_v51 = vsel %vm270_vm0, %v14489_v61, 0.0 }
0x1a79   :  { %4106 = vadd.xlane.f32.xlu1 %v4105_v5  ;;  %4103 = vadd.xlane.f32.xlu0 %v4102_v4  ;;  %v14491_v33 = vpop.eup %12163 }
0x1a7a   :  { %v14497_v30 = vpop.eup %12165  ;;  %v3663_v22 = vsel %vm270_vm0, %v14491_v33, 0.0 }
0x1a7b   :  { %v3666_v8 = vsel %vm270_vm0, %v14497_v30, 0.0 }
0x1a7d   :  { %3655 = vadd.xlane.f32.xlu1 %v3654_v41  ;;  %3652 = vadd.xlane.f32.xlu0 %v3651_v34 }
0x1a81   :  { %4112 = vadd.xlane.f32.xlu1 %v4111_v23  ;;  %4109 = vadd.xlane.f32.xlu0 %v4108_v0 }
0x1a85   :  { %3661 = vadd.xlane.f32.xlu1 %v3660_v31  ;;  %3658 = vadd.xlane.f32.xlu0 %v3657_v13 }
0x1a89   :  { %4118 = vadd.xlane.f32.xlu1 %v4117_v51  ;;  %4115 = vadd.xlane.f32.xlu0 %v4114_v57 }
0x1a8d   :  { %3667 = vadd.xlane.f32.xlu1 %v3666_v8  ;;  %3664 = vadd.xlane.f32.xlu0 %v3663_v22 }
0x1ade   :  { %v4971_v50 = vpop.xlane.xlu1 %4970  ;;  %v4968_v14 = vpop.xlane.xlu0 %4967 }
0x1adf   :  { %v4991_v42 = vsub.f32 %v14336_v46, %v4971_v50  ;;  %v4990_v37 = vsub.f32 %v14339_v53, %v4968_v14 }
0x1ae1   :  { %v5000_v5 = vmul.f32 1.442695, %v4991_v42  ;;  %v4998_v4 = vmul.f32 1.442695, %v4990_v37 }
0x1ae2   :  { %v4512_v1 = vpop.xlane.xlu1 %4511  ;;  %v4509_v3 = vpop.xlane.xlu0 %4508 }
0x1ae3   :  { %12167 = vpow2.f32 %v5000_v5  ;;  %v4532_v41 = vsub.f32 %v14347_v63, %v4512_v1  ;;  %v4531_v34 = vsub.f32 %v14351_v6, %v4509_v3 }
0x1ae4   :  { %12169 = vpow2.f32 %v4998_v4 }
0x1ae5   :  { %v4541_v23 = vmul.f32 1.442695, %v4532_v41  ;;  %v4539_v0 = vmul.f32 1.442695, %v4531_v34 }
0x1ae6   :  { %v4977_v31 = vpop.xlane.xlu1 %4976  ;;  %v4974_v13 = vpop.xlane.xlu0 %4973 }
0x1ae7   :  { %12171 = vpow2.f32 %v4541_v23  ;;  %v4993_v51 = vsub.f32 %v14358_v48, %v4977_v31  ;;  %v4992_v46 = vsub.f32 %v14361_v29, %v4974_v13 }
0x1ae8   :  { %12173 = vpow2.f32 %v4539_v0 }
0x1ae9   :  { %v5004_v53 = vmul.f32 1.442695, %v4993_v51  ;;  %v5002_v57 = vmul.f32 1.442695, %v4992_v46 }
0x1aea   :  { %v4518_v8 = vpop.xlane.xlu1 %4517  ;;  %v4515_v22 = vpop.xlane.xlu0 %4514 }
0x1aeb   :  { %12175 = vpow2.f32 %v5004_v53  ;;  %v4534_v63 = vsub.f32 %v14369_v59, %v4518_v8  ;;  %v4533_v6 = vsub.f32 %v14373_v49, %v4515_v22 }
0x1aec   :  { %12177 = vpow2.f32 %v5002_v57 }
0x1aed   :  { %v14511_v50 = vpop.eup %12167  ;;  %v4545_v14 = vmul.f32 1.442695, %v4534_v63  ;;  %v4543_v42 = vmul.f32 1.442695, %v4533_v6 }
0x1aee   :  { %v14513_v37 = vpop.eup %12169  ;;  %v4983_v48 = vpop.xlane.xlu1 %4982  ;;  %v5017_v29 = vsel %vm270_vm0, %v14511_v50, 0.0 }
0x1aef   :  { %v4980_v5 = vpop.xlane.xlu0 %4979  ;;  %12179 = vpow2.f32 %v4545_v14  ;;  %v4995_v4 = vsub.f32 %v14382_v11, %v4983_v48  ;;  %5018 = vadd.xlane.f32.xlu1 %v5017_v29  ;;  %v5014_v59 = vsel %vm270_vm0, %v14513_v37, 0.0 }
0x1af0   :  { %v4994_v1 = vsub.f32 %v14385_v36, %v4980_v5  ;;  %12181 = vpow2.f32 %v4543_v42  ;;  %5015 = vadd.xlane.f32.xlu0 %v5014_v59 }
0x1af1   :  { %v14521_v49 = vpop.eup %12171  ;;  %v5008_v3 = vmul.f32 1.442695, %v4995_v4 }
0x1af2   :  { %v5006_v41 = vmul.f32 1.442695, %v4994_v1  ;;  %v14523_v34 = vpop.eup %12173  ;;  %v4524_v23 = vpop.xlane.xlu1 %4523  ;;  %v4558_v31 = vsel %vm270_vm0, %v14521_v49, 0.0 }
0x1af3   :  { %v4521_v0 = vpop.xlane.xlu0 %4520  ;;  %12183 = vpow2.f32 %v5008_v3  ;;  %v4536_v11 = vsub.f32 %v14395_v7, %v4524_v23  ;;  %4559 = vadd.xlane.f32.xlu1 %v4558_v31  ;;  %v4555_v13 = vsel %vm270_vm0, %v14523_v34, 0.0 }
0x1af4   :  { %v4535_v36 = vsub.f32 %v14399_v12, %v4521_v0  ;;  %12185 = vpow2.f32 %v5006_v41  ;;  %4556 = vadd.xlane.f32.xlu0 %v4555_v13 }
0x1af5   :  { %v14531_v51 = vpop.eup %12175  ;;  %v4549_v46 = vmul.f32 1.442695, %v4536_v11 }
0x1af6   :  { %v4547_v53 = vmul.f32 1.442695, %v4535_v36  ;;  %v14533_v57 = vpop.eup %12177  ;;  %v4989_v8 = vpop.xlane.xlu1 %4988  ;;  %v5023_v63 = vsel %vm270_vm0, %v14531_v51, 0.0 }
0x1af7   :  { %v4986_v22 = vpop.xlane.xlu0 %4985  ;;  %12187 = vpow2.f32 %v4549_v46  ;;  %v4997_v7 = vsub.f32 %v14408_v40, %v4989_v8  ;;  %5024 = vadd.xlane.f32.xlu1 %v5023_v63  ;;  %v5020_v6 = vsel %vm270_vm0, %v14533_v57, 0.0 }
0x1af8   :  { %v4996_v12 = vsub.f32 %v14411_v10, %v4986_v22  ;;  %12189 = vpow2.f32 %v4547_v53  ;;  %5021 = vadd.xlane.f32.xlu0 %v5020_v6 }
0x1af9   :  { %v14541_v14 = vpop.eup %12179  ;;  %v5012_v42 = vmul.f32 1.442695, %v4997_v7 }
0x1afa   :  { %v5010_v48 = vmul.f32 1.442695, %v4996_v12  ;;  %v14543_v5 = vpop.eup %12181  ;;  %v4530_v29 = vpop.xlane.xlu1 %4529  ;;  %v4564_v1 = vsel %vm270_vm0, %v14541_v14, 0.0 }
0x1afb   :  { %v4527_v4 = vpop.xlane.xlu0 %4526  ;;  %12191 = vpow2.f32 %v5012_v42  ;;  %v4538_v40 = vsub.f32 %v14421_v52, %v4530_v29  ;;  %4565 = vadd.xlane.f32.xlu1 %v4564_v1  ;;  %v4561_v59 = vsel %vm270_vm0, %v14543_v5, 0.0 }
0x1afc   :  { %v4537_v10 = vsub.f32 %v14425_v24, %v4527_v4  ;;  %12193 = vpow2.f32 %v5010_v48  ;;  %4562 = vadd.xlane.f32.xlu0 %v4561_v59 }
0x1afd   :  { %v14551_v3 = vpop.eup %12183  ;;  %v4553_v41 = vmul.f32 1.442695, %v4538_v40 }
0x1afe   :  { %v4551_v23 = vmul.f32 1.442695, %v4537_v10  ;;  %v14553_v0 = vpop.eup %12185  ;;  %v4101_v31 = vpop.xlane.xlu1 %4100  ;;  %v5029_v36 = vsel %vm270_vm0, %v14551_v3, 0.0 }
0x1aff   :  { %v4098_v11 = vpop.xlane.xlu0 %4097  ;;  %12195 = vpow2.f32 %v4553_v41  ;;  %5030 = vadd.xlane.f32.xlu1 %v5029_v36  ;;  %v5026_v52 = vsel %vm270_vm0, %v14553_v0, 0.0 }
0x1b00   :  { %12197 = vpow2.f32 %v4551_v23  ;;  %5027 = vadd.xlane.f32.xlu0 %v5026_v52 }
0x1b01   :  { %v14559_v24 = vpop.eup %12187  ;;  %12199 = vrcp.f32 %v4101_v31 }
0x1b02   :  { %v14561_v13 = vpop.eup %12189  ;;  %12201 = vrcp.f32 %v4098_v11  ;;  %v3650_v46 = vpop.xlane.xlu1 %3649  ;;  %v4570_v8 = vsel %vm270_vm0, %v14559_v24, 0.0 }
0x1b03   :  { %v3647_v53 = vpop.xlane.xlu0 %3646  ;;  %12203 = vrcp.f32 %v3650_v46  ;;  %4571 = vadd.xlane.f32.xlu1 %v4570_v8  ;;  %v4567_v22 = vsel %vm270_vm0, %v14561_v13, 0.0 }
0x1b04   :  { %12205 = vrcp.f32 %v3647_v53  ;;  %4568 = vadd.xlane.f32.xlu0 %v4567_v22 }
0x1b05   :  { %v14567_v63 = vpop.eup %12191 }
0x1b06   :  { %v14569_v7 = vpop.eup %12193  ;;  %v4107_v12 = vpop.xlane.xlu1 %4106  ;;  %v5035_v42 = vsel %vm270_vm0, %v14567_v63, 0.0 }
0x1b07   :  { %v4104_v6 = vpop.xlane.xlu0 %4103  ;;  %12207 = vrcp.f32 %v4107_v12  ;;  %5036 = vadd.xlane.f32.xlu1 %v5035_v42  ;;  %v5032_v48 = vsel %vm270_vm0, %v14569_v7, 0.0 }
0x1b08   :  { %12209 = vrcp.f32 %v4104_v6  ;;  %5033 = vadd.xlane.f32.xlu0 %v5032_v48 }
0x1b09   :  { %v14575_v29 = vpop.eup %12195 }
0x1b0a   :  { %v14577_v4 = vpop.eup %12197  ;;  %v3656_v1 = vpop.xlane.xlu1 %3655  ;;  %v4576_v10 = vsel %vm270_vm0, %v14575_v29, 0.0 }
0x1b0b   :  { %v3653_v40 = vpop.xlane.xlu0 %3652  ;;  %v12200_v59 = vpop.eup %12199  ;;  %12211 = vrcp.f32 %v3656_v1  ;;  %4577 = vadd.xlane.f32.xlu1 %v4576_v10  ;;  %v4573_v41 = vsel %vm270_vm0, %v14577_v4, 0.0 }
0x1b0c   :  { %v12202_v23 = vpop.eup %12201  ;;  %12213 = vrcp.f32 %v3653_v40  ;;  %4574 = vadd.xlane.f32.xlu0 %v4573_v41  ;;  %v4123_v31 = vmul.f32 %v12200_v59, %v14435_v55 }
0x1b0d   :  { %v12204_v11 = vpop.eup %12203  ;;  %v4121_v36 = vmul.f32 %v12202_v23, %v14429_v35 }
0x1b0e   :  { %v12206_v52 = vpop.eup %12205  ;;  %v3672_v46 = vmul.f32 %v12204_v11, %v14445_v62  ;;  %v4113_v53 = vpop.xlane.xlu1 %4112 }
0x1b0f   :  { %v4110_v8 = vpop.xlane.xlu0 %4109  ;;  %v3670_v22 = vmul.f32 %v12206_v52, %v14439_v9  ;;  %12215 = vrcp.f32 %v4113_v53  ;;  %v11658_v12 = vpack.c.bf16 %v4123_v31, %v4121_v36 }
0x1b10   :  { %v14587_v6 = vadd.f32 %v4123_v31, %v3672_v46  ;;  %12217 = vrcp.f32 %v4110_v8 }
0x1b11   :  { %v12208_v42 = vpop.eup %12207  ;;  %v14589_v48 = vadd.f32 %v4121_v36, %v3670_v22  ;;  %11660 = vmatprep.subr.msk.bf16.mxu1 %vm13378_vm5, %v11658_v12  ;;  %v11661_v55 = vpack.c.bf16 %v3672_v46, %v3670_v22 }
0x1b12   :  { %v12210_v35 = vpop.eup %12209  ;;  %v3662_v1 = vpop.xlane.xlu1 %3661  ;;  %v4127_v62 = vmul.f32 %v12208_v42, %v14455_v43 }
0x1b13   :  { %v3659_v40 = vpop.xlane.xlu0 %3658  ;;  %12219 = vrcp.f32 %v3662_v1  ;;  %11663 = vmatpush1.bf16.xpose.msk.msra.mxu1 %vm13378_vm5, %v11661_v55  ;;  %v4125_v9 = vmul.f32 %v12210_v35, %v14449_v38 }
0x1b14   :  { %12221 = vrcp.f32 %v3659_v40 }
0x1b15   :  { %v12212_v10 = vpop.eup %12211  ;;  %v11664_v59 = vpack.c.bf16 %v4127_v62, %v4125_v9 }
0x1b16   :  { %v12214_v41 = vpop.eup %12213  ;;  %v3676_v23 = vmul.f32 %v12212_v10, %v14465_v32  ;;  %v4119_v31 = vpop.xlane.xlu1 %4118 }
0x1b17   :  { %v4116_v11 = vpop.xlane.xlu0 %4115  ;;  %v3674_v36 = vmul.f32 %v12214_v41, %v14459_v60  ;;  %12223 = vrcp.f32 %v4119_v31  ;;  %11666 = vmatprep.subr.msk.bf16.mxu1 %vm13378_vm5, %v11664_v59 }
0x1b18   :  { %v14601_v43 = vadd.f32 %v4127_v62, %v3676_v23  ;;  %12225 = vrcp.f32 %v4116_v11 }
0x1b19   :  { %v12216_v52 = vpop.eup %12215  ;;  %v14603_v46 = vadd.f32 %v4125_v9, %v3674_v36  ;;  %v11667_v38 = vpack.c.bf16 %v3676_v23, %v3674_v36 }
0x1b1a   :  { %v12218_v53 = vpop.eup %12217  ;;  %v3668_v8 = vpop.xlane.xlu1 %3667  ;;  %v4131_v32 = vmul.f32 %v12216_v52, %v14473_v2  ;;  %v5253_v52 = vld [vmem:[#allocation18 + $0x10] sm:$0xff] }
0x1b1b   :  { %v3665_v22 = vpop.xlane.xlu0 %3664  ;;  %12227 = vrcp.f32 %v3668_v8  ;;  %11669 = vmatpush1.bf16.xpose.msk.msra.mxu1 %vm13378_vm5, %v11667_v38  ;;  %v4129_v60 = vmul.f32 %v12218_v53, %v14467_v44  ;;  %v5254_v38 = vld [vmem:[#allocation18 + $0x18] sm:$0xff] }
0x1b1c   :  { %12229 = vrcp.f32 %v3665_v22  ;;  %5693 = vrot.lane.b32.xlu1 %v13243_v18, %s12898_s10  ;;  %v11711_v53 = vpack.c.bf16 %v5254_v38, %v5253_v52  ;;  %v5257_v22 = vld [vmem:[#allocation18 + $0x30] sm:$0xff] }
0x1b1d   :  { %v12220_v12 = vpop.eup %12219  ;;  %v11670_v42 = vpack.c.bf16 %v4131_v32, %v4129_v60 }
0x1b1e   :  { %v12222_v55 = vpop.eup %12221  ;;  %v3680_v35 = vmul.f32 %v12220_v12, %v14481_v56  ;;  %v14656_v12 = vld [vmem:[#allocation3 + $0x8] sm:$0xff] }
0x1b1f   :  { %v3678_v1 = vmul.f32 %v12222_v55, %v14475_v54  ;;  %11672 = vmatprep.subr.msk.bf16.mxu1 %vm13378_vm5, %v11670_v42 }
0x1b20   :  { %v14615_v2 = vadd.f32 %v4131_v32, %v3680_v35  ;;  %v5258_v32 = vld [vmem:[#allocation18 + $0x38] sm:$0xff] }
0x1b21   :  { %v12224_v40 = vpop.eup %12223  ;;  %v14617_v62 = vadd.f32 %v4129_v60, %v3678_v1  ;;  %v11673_v44 = vpack.c.bf16 %v3680_v35, %v3678_v1  ;;  %v11719_v60 = vpack.c.bf16 %v5258_v32, %v5257_v22 }
0x1b22   :  { %v12226_v9 = vpop.eup %12225  ;;  %5691 = vrot.lane.b32.xlu0 %v13238_v15, %s12898_s10  ;;  %v4135_v10 = vmul.f32 %v12224_v40, %v14489_v61 }
0x1b23   :  { %11675 = vmatpush1.bf16.xpose.msk.msra.mxu1 %vm13378_vm5, %v11673_v44  ;;  %v4133_v54 = vmul.f32 %v12226_v9, %v14483_v58  ;;  %v5252_v58 = vld [vmem:[#allocation18 + $0x8] sm:$0xff] }
0x1b25   :  { %v12228_v56 = vpop.eup %12227  ;;  %v11676_v59 = vpack.c.bf16 %v4135_v10, %v4133_v54 }
0x1b26   :  { %v12230_v41 = vpop.eup %12229  ;;  %v3684_v23 = vmul.f32 %v12228_v56, %v14497_v30  ;;  %5928 = vrot.lane.b32.xlu0 %v13243_v18, %s12899_s3  ;;  %v5251_v18 = vld [vmem:[#allocation18] sm:$0xff] }
0x1b27   :  { %v3682_v31 = vmul.f32 %v12230_v41, %v14491_v33  ;;  %11678 = vmatprep.subr.msk.bf16.mxu1 %vm13378_vm5, %v11676_v59  ;;  %v11707_v30 = vpack.c.bf16 %v5252_v58, %v5251_v18 }
0x1b28   :  { %v14631_v11 = vadd.f32 %v4135_v10, %v3684_v23 }
0x1b29   :  { %v14633_v61 = vadd.f32 %v4133_v54, %v3682_v31  ;;  %v11679_v36 = vpack.c.bf16 %v3684_v23, %v3682_v31  ;;  %11709 = vmatpush3.bf16.xpose.msk.msra.mxu0 %vm14643_vm9, %v11707_v30 }
0x1b2a   :  { %5930 = vrot.lane.b32.xlu0 %v13241_v17, %s12899_s3  ;;  %11710 = vmatprep.subr.bf16.mxu0 %v12901_v26 }
0x1b2b   :  { %11681 = vmatpush1.bf16.xpose.msk.msra.mxu1 %vm13378_vm5, %v11679_v36 }
0x1b31   :  { %11713 = vmatpush3.bf16.xpose.msk.msra.mxu0 %vm14643_vm9, %v11711_v53 }
0x1b32   :  { %5175 = vmatmul.mubr.f32.vlgmr.msra.gmra.mrb[66].mxu1 %v13235_v16  ;;  %11714 = vmatprep.subr.bf16.mxu0 %v12901_v26  ;;  %v5255_v16 = vld [vmem:[#allocation18 + $0x20] sm:$0xff] }
0x1b33   :  { %5244 = vmatprep.mubr.f32.mxu1 %v13251_v21  ;;  %v5256_v21 = vld [vmem:[#allocation18 + $0x28] sm:$0xff] }
0x1b34   :  { %v11715_v8 = vpack.c.bf16 %v5256_v21, %v5255_v16 }
0x1b39   :  { %11717 = vmatpush3.bf16.xpose.msk.msra.mxu0 %vm14643_vm9, %v11715_v8 }
0x1b3a   :  { %11718 = vmatprep.subr.bf16.mxu0 %v12901_v26 }
0x1b41   :  { %11721 = vmatpush3.bf16.xpose.msk.msra.mxu0 %vm14643_vm9, %v11719_v60 }
0x1b42   :  { %11261 = vmatprep.subr.msk.mxu0 %vm586_vm1, %v14656_v12 }
0x1b7c   :  { %v5019_v42 = vpop.xlane.xlu1 %5018 }
0x1b7d   :  { %12231 = vrcp.f32 %v5019_v42  ;;  %v5016_v55 = vpop.xlane.xlu0 %5015 }
0x1b7e   :  { %12233 = vrcp.f32 %v5016_v55 }
0x1b80   :  { %v4560_v35 = vpop.xlane.xlu1 %4559 }
0x1b81   :  { %12235 = vrcp.f32 %v4560_v35  ;;  %v4557_v1 = vpop.xlane.xlu0 %4556 }
0x1b82   :  { %12237 = vrcp.f32 %v4557_v1 }
0x1b84   :  { %v5025_v40 = vpop.xlane.xlu1 %5024 }
0x1b85   :  { %12239 = vrcp.f32 %v5025_v40  ;;  %v5022_v44 = vpop.xlane.xlu0 %5021 }
0x1b86   :  { %12241 = vrcp.f32 %v5022_v44 }
0x1b87   :  { %v12232_v9 = vpop.eup %12231 }
0x1b88   :  { %v12234_v10 = vpop.eup %12233  ;;  %v4566_v54 = vpop.xlane.xlu1 %4565  ;;  %v5041_v56 = vmul.f32 %v12232_v9, %v14511_v50 }
0x1b89   :  { %12243 = vrcp.f32 %v4566_v54  ;;  %v4563_v59 = vpop.xlane.xlu0 %4562  ;;  %v5039_v41 = vmul.f32 %v12234_v10, %v14513_v37 }
0x1b8a   :  { %12245 = vrcp.f32 %v4563_v59 }
0x1b8b   :  { %v12236_v23 = vpop.eup %12235  ;;  %v11682_v31 = vpack.c.bf16 %v5041_v56, %v5039_v41 }
0x1b8c   :  { %v12238_v36 = vpop.eup %12237  ;;  %v4582_v18 = vmul.f32 %v12236_v23, %v14521_v49  ;;  %v5031_v58 = vpop.xlane.xlu1 %5030 }
0x1b8d   :  { %v4580_v30 = vmul.f32 %v12238_v36, %v14523_v34  ;;  %12247 = vrcp.f32 %v5031_v58  ;;  %11684 = vmatprep.subr.msk.bf16.mxu1 %vm13378_vm5, %v11682_v31  ;;  %v5028_v52 = vpop.xlane.xlu0 %5027 }
0x1b8e   :  { %v4596_v50 = vadd.f32 %v4582_v18, %v14587_v6  ;;  %12249 = vrcp.f32 %v5028_v52 }
0x1b8f   :  { %v12240_v38 = vpop.eup %12239  ;;  %v4595_v37 = vadd.f32 %v4580_v30, %v14589_v48  ;;  %v11685_v53 = vpack.c.bf16 %v4582_v18, %v4580_v30 }
0x1b90   :  { %v12242_v16 = vpop.eup %12241  ;;  %v5055_v21 = vadd.f32 %v5041_v56, %v4596_v50  ;;  %v4572_v8 = vpop.xlane.xlu1 %4571  ;;  %v5045_v49 = vmul.f32 %v12240_v38, %v14531_v51 }
0x1b91   :  { %v5054_v22 = vadd.f32 %v5039_v41, %v4595_v37  ;;  %12251 = vrcp.f32 %v4572_v8  ;;  %11687 = vmatpush1.bf16.xpose.msk.msra.mxu1 %vm13378_vm5, %v11685_v53  ;;  %v4569_v34 = vpop.xlane.xlu0 %4568  ;;  %v5043_v32 = vmul.f32 %v12242_v16, %v14533_v57 }
0x1b92   :  { %v5358_v60 = vmul.f32 0.25, %v5055_v21  ;;  %12253 = vrcp.f32 %v4569_v34 }
0x1b93   :  { %v12244_v6 = vpop.eup %12243  ;;  %v5357_v42 = vmul.f32 0.25, %v5054_v22  ;;  %v11688_v55 = vpack.c.bf16 %v5045_v49, %v5043_v32 }
0x1b94   :  { %v12246_v48 = vpop.eup %12245  ;;  %v4586_v35 = vmul.f32 %v12244_v6, %v14541_v14  ;;  %5366 = vst.msk [vmem:[#allocation27 + $0x8] sm:$0xff] %vm270_vm0, %v5358_v60  ;;  %v5037_v1 = vpop.xlane.xlu1 %5036  ;;  %v6081_v6 = vld [vmem:[#allocation11 + $0x30] sm:$0xff] }
0x1b95   :  { %v4584_v51 = vmul.f32 %v12246_v48, %v14543_v5  ;;  %5365 = vst.msk [vmem:[#allocation27] sm:$0xff] %vm270_vm0, %v5357_v42  ;;  %12255 = vrcp.f32 %v5037_v1  ;;  %11690 = vmatprep.subr.msk.bf16.mxu1 %vm13378_vm5, %v11688_v55  ;;  %v5034_v57 = vpop.xlane.xlu0 %5033  ;;  %v5375_v48 = vld [vmem:[#allocation11] sm:$0xff] }
0x1b96   :  { %v4598_v40 = vadd.f32 %v4586_v35, %v14601_v43  ;;  %12257 = vrcp.f32 %v5034_v57 }
0x1b97   :  { %v12248_v44 = vpop.eup %12247  ;;  %v4597_v9 = vadd.f32 %v4584_v51, %v14603_v46  ;;  %v11691_v10 = vpack.c.bf16 %v4586_v35, %v4584_v51 }
0x1b98   :  { %v12250_v14 = vpop.eup %12249  ;;  %v5057_v54 = vadd.f32 %v5045_v49, %v4598_v40  ;;  %v4578_v56 = vpop.xlane.xlu1 %4577  ;;  %v5049_v59 = vmul.f32 %v12248_v44, %v14551_v3 }
0x1b99   :  { %v5056_v5 = vadd.f32 %v5043_v32, %v4597_v9  ;;  %12259 = vrcp.f32 %v4578_v56  ;;  %11693 = vmatpush1.bf16.xpose.msk.msra.mxu1 %vm13378_vm5, %v11691_v10  ;;  %v4575_v41 = vpop.xlane.xlu0 %4574  ;;  %v5047_v23 = vmul.f32 %v12250_v14, %v14553_v0  ;;  %v5606_v9 = vld [vmem:[#allocation11 + $0x10] sm:$0xff]  ;;  %v5607_v14 = vld [vmem:[#allocation11 + $0x18] sm:$0xff] }
0x1b9a   :  { %v5360_v31 = vmul.f32 0.25, %v5057_v54  ;;  %12261 = vrcp.f32 %v4575_v41 }
0x1b9b   :  { %v12252_v43 = vpop.eup %12251  ;;  %v5359_v36 = vmul.f32 0.25, %v5056_v5  ;;  %v11694_v18 = vpack.c.bf16 %v5049_v59, %v5047_v23 }
0x1b9c   :  { %v12254_v46 = vpop.eup %12253  ;;  %v4590_v58 = vmul.f32 %v12252_v43, %v14559_v24  ;;  %5368 = vst.msk [vmem:[#allocation27 + $0x18] sm:$0xff] %vm270_vm0, %v5360_v31  ;;  %v5694_v51 = vpop.permute.xlu1 %5693 }
0x1b9d   :  { %v4588_v3 = vmul.f32 %v12254_v46, %v14561_v13  ;;  %5367 = vst.msk [vmem:[#allocation27 + $0x10] sm:$0xff] %vm270_vm0, %v5359_v36  ;;  %11696 = vmatprep.subr.msk.bf16.mxu1 %vm13378_vm5, %v11694_v18  ;;  %v5692_v40 = vpop.permute.xlu0 %5691  ;;  %v5844_v18 = vld [vmem:[#allocation11 + $0x20] sm:$0xff] }
0x1b9e   :  { %v4600_v30 = vadd.f32 %v4590_v58, %v14615_v2  ;;  %v14731_v10 = vsel %vm907_vm3, %v5692_v40, %v5694_v51 }
0x1b9f   :  { %v12256_v0 = vpop.eup %12255  ;;  %v4599_v52 = vadd.f32 %v4588_v3, %v14617_v62  ;;  %v11697_v50 = vpack.c.bf16 %v4590_v58, %v4588_v3  ;;  %v5845_v58 = vld [vmem:[#allocation11 + $0x28] sm:$0xff] }
0x1ba0   :  { %v12258_v38 = vpop.eup %12257  ;;  %v5059_v37 = vadd.f32 %v5049_v59, %v4600_v30  ;;  %v5053_v53 = vmul.f32 %v12256_v0, %v14567_v63 }
0x1ba1   :  { %v5058_v24 = vadd.f32 %v5047_v23, %v4599_v52  ;;  %11699 = vmatpush1.bf16.xpose.msk.msra.mxu1 %vm13378_vm5, %v11697_v50  ;;  %v5051_v13 = vmul.f32 %v12258_v38, %v14569_v7  ;;  %v5929_v54 = vpop.permute.xlu0 %5928 }
0x1ba2   :  { %v5362_v16 = vmul.f32 0.25, %v5059_v37 }
0x1ba3   :  { %v12260_v21 = vpop.eup %12259  ;;  %v5361_v8 = vmul.f32 0.25, %v5058_v24  ;;  %v11700_v49 = vpack.c.bf16 %v5053_v53, %v5051_v13 }
0x1ba4   :  { %v12262_v22 = vpop.eup %12261  ;;  %v4594_v2 = vmul.f32 %v12260_v21, %v14575_v29  ;;  %5370 = vst.msk [vmem:[#allocation27 + $0x28] sm:$0xff] %vm270_vm0, %v5362_v16 }
0x1ba5   :  { %v4592_v62 = vmul.f32 %v12262_v22, %v14577_v4  ;;  %5369 = vst.msk [vmem:[#allocation27 + $0x20] sm:$0xff] %vm270_vm0, %v5361_v8  ;;  %11702 = vmatprep.subr.msk.bf16.mxu1 %vm13378_vm5, %v11700_v49  ;;  %v5931_v43 = vpop.permute.xlu0 %5930 }
0x1ba6   :  { %v4602_v63 = vadd.f32 %v4594_v2, %v14631_v11  ;;  %v6082_v11 = vld [vmem:[#allocation11 + $0x38] sm:$0xff]  ;;  %v14746_v46 = vsel %vm1146_vm4, %v5929_v54, %v5931_v43 }
0x1ba7   :  { %v4601_v7 = vadd.f32 %v4592_v62, %v14633_v61  ;;  %v11703_v34 = vpack.c.bf16 %v4594_v2, %v4592_v62 }
0x1ba8   :  { %v5061_v32 = vadd.f32 %v5053_v53, %v4602_v63 }
0x1ba9   :  { %v5060_v60 = vadd.f32 %v5051_v13, %v4601_v7  ;;  %11705 = vmatpush1.bf16.xpose.msk.msra.mxu1 %vm13378_vm5, %v11703_v34 }
0x1baa   :  { %v5364_v29 = vmul.f32 0.25, %v5061_v32  ;;  %11291 = vmatprep.subr.msk.mxu1 %vm586_vm1, %v14656_v12 }
0x1bab   :  { %v5363_v4 = vmul.f32 0.25, %v5060_v60 }
0x1bac   :  { %5372 = vst.msk [vmem:[#allocation27 + $0x38] sm:$0xff] %vm270_vm0, %v5364_v29 }
0x1bad   :  { %5371 = vst.msk [vmem:[#allocation27 + $0x30] sm:$0xff] %vm270_vm0, %v5363_v4 }
0x1bb0   :  { %5245 = vmatmul.mubr.f32.vlgmr.msra.gmra.mrb[66].mxu1 %v13258_v25  ;;  %v5376_v25 = vld [vmem:[#allocation11 + $0x8] sm:$0xff] }
0x1bb1   :  { %11292 = vmatpush3.xpose.msk.msra.mxu1 %vm586_vm1, %v14656_v12  ;;  %11293 = vmatprep.mubr.msk.f32.mxu1 %vm586_vm1, %v6081_v6 }
0x1bb4   :  { %11294 = vmatmul.mubr.msk.f32.vlgmr.msra.gmra.mrb[68].mxu1 %vm586_vm1, %v6082_v11 }
0x1bb5   :  { %6386 = vmatprep.mubr.f32.mxu1 %v13260_v27 }
0x1c83   :  { %v5246_v61 = vpop.f32.mrb[66].mxu1 }
0x1c84   :  { %v5250_v42 = vmul.f32 0.25, %v5246_v61  ;;  %v5248_v55 = vpop.f32.mrb[67].mxu1 }
0x1c86   :  { %11259 = vmatmul.mubr.msk.f32.vlgmr.msra.gmra.mrb[70].mxu0 %vm1146_vm4, %v5250_v42 }
0x1c87   :  { %11262 = vmatpush3.xpose.msk.msra.mxu0 %vm586_vm1, %v14656_v12  ;;  %11263 = vmatprep.mubr.msk.f32.mxu0 %vm586_vm1, %v5375_v48  ;;  %v11295_v48 = vpop.f32.mrb[68].mxu1 }
0x1c88   :  { %11266 = vmatprep.subr.mxu0 %v13238_v15 }
0x1c8a   :  { %11264 = vmatmul.mubr.msk.f32.vlgmr.msra.gmra.mrb[72].mxu0 %vm586_vm1, %v5376_v25  ;;  %v6155_v25 = vpop.f32.mrb[69].mxu1 }
0x1c8b   :  { %11267 = vmatpush3.msra.mxu0 %v13238_v15 }
0x1c8c   :  { %11271 = vmatprep.subr.msk.mxu0 %vm586_vm1, %v14656_v12 }
0x1d59   :  { %v5352_v35 = vpop.f32.mrb[70].mxu0 }
0x1d5a   :  { %5356 = vst.msk [vmem:[#allocation23] sm:$0xff] %vm1146_vm4, %v5352_v35  ;;  %v11260_v1 = vpop.f32.mrb[71].mxu0 }
0x1d5d   :  { %v11265_v57 = vpop.f32.mrb[72].mxu0 }
0x1d5e   :  { %v5452_v44 = vpop.f32.mrb[73].mxu0 }
0x1d5f   :  { %11268 = vmatprep.mubr.msk.f32.mxu0 %vm671_vm2, %v5452_v44 }
0x1d60   :  { %11269 = vmatmul.mubr.msk.f32.vlgmr.msra.gmra.mrb[74].mxu0 %vm671_vm2, %v11265_v57 }
0x1d61   :  { %11272 = vmatpush3.xpose.msk.msra.mxu0 %vm586_vm1, %v14656_v12  ;;  %11273 = vmatprep.mubr.msk.f32.mxu0 %vm586_vm1, %v5606_v9 }
0x1d62   :  { %11276 = vmatprep.subr.mxu0 %v14731_v10 }
0x1d64   :  { %11274 = vmatmul.mubr.msk.f32.vlgmr.msra.gmra.mrb[76].mxu0 %vm586_vm1, %v5607_v14 }
0x1d65   :  { %11277 = vmatpush3.msra.mxu0 %v14731_v10 }
0x1d66   :  { %11281 = vmatprep.subr.msk.mxu0 %vm586_vm1, %v14656_v12 }
0x1e33   :  { %v11270_v56 = vpop.f32.mrb[74].mxu0 }
0x1e34   :  { %v5543_v59 = vsel %vm270_vm0, %v11270_v56, 0.0  ;;  %v5533_v5 = vpop.f32.mrb[75].mxu0 }
0x1e35   :  { %v5542_v41 = vsel %vm270_vm0, %v5533_v5, 0.0 }
0x1e36   :  { %v5544_v23 = vadd.f32 %v5543_v59, %v5542_v41 }
0x1e37   :  { %v11275_v31 = vpop.f32.mrb[76].mxu0 }
0x1e38   :  { %v5680_v36 = vpop.f32.mrb[77].mxu0  ;;  %5545 = vadd.xlane.f32.xlu1 %v5544_v23 }
0x1e39   :  { %11278 = vmatprep.mubr.msk.f32.mxu0 %vm671_vm2, %v5680_v36 }
0x1e3a   :  { %11279 = vmatmul.mubr.msk.f32.vlgmr.msra.gmra.mrb[78].mxu0 %vm671_vm2, %v11275_v31 }
0x1e3b   :  { %11282 = vmatpush3.xpose.msk.msra.mxu0 %vm586_vm1, %v14656_v12  ;;  %11283 = vmatprep.mubr.msk.f32.mxu0 %vm586_vm1, %v5844_v18 }
0x1e3c   :  { %11286 = vmatprep.subr.mxu0 %v14746_v46 }
0x1e3e   :  { %11284 = vmatmul.mubr.msk.f32.vlgmr.msra.gmra.mrb[80].mxu0 %vm586_vm1, %v5845_v58 }
0x1e3f   :  { %11287 = vmatpush3.msra.mxu0 %v14746_v46 }
0x1ec5   :  { %v5546_v3 = vpop.xlane.xlu1 %5545 }
0x1ec6   :  { %v5547_v30 = vrot.slane %v5546_v3, 4 }
0x1ec8   :  { %v5548_v0 = vadd.f32 %v5547_v30, %v5546_v3 }
0x1eca   :  { %v5549_v52 = vrot.slane %v5548_v0, 2 }
0x1ecc   :  { %v5550_v50 = vadd.f32 %v5549_v52, %v5548_v0 }
0x1ece   :  { %v5551_v38 = vrot.slane %v5550_v50, 1 }
0x1ed0   :  { %v5552_v37 = vadd.f32 %v5551_v38, %v5550_v50 }
0x1ed2   :  { %11917 = vpush %v5552_v37 }
0x1f03   :  { %s11918_s10 = spop %11917 }
0x1f04   :  { %s5554_s3 = smul.f32 0.0006510417, %s11918_s10 }
0x1f06   :  { %v5555_v12 = vstv %s5554_s3 }
0x1f07   :  { %v5556_v53 = vsub.f32 %v5533_v5, %v5555_v12  ;;  %v14754_v24 = vsub.f32 %v11270_v56, %v5555_v12 }
0x1f09   :  { %v5558_v13 = vmul.f32 %v5556_v53, %v5556_v53  ;;  %v5559_v16 = vmul.f32 %v14754_v24, %v14754_v24 }
0x1f0b   :  { %v5560_v21 = vsel %vm270_vm0, %v5558_v13, 0.0  ;;  %v5561_v8 = vsel %vm270_vm0, %v5559_v16, 0.0 }
0x1f0c   :  { %v5562_v49 = vadd.f32 %v5561_v8, %v5560_v21 }
0x1f0d   :  { %v11280_v22 = vpop.f32.mrb[78].mxu0 }
0x1f0e   :  { %5563 = vadd.xlane.f32.xlu0 %v5562_v49  ;;  %v5779_v2 = vsel %vm270_vm0, %v11280_v22, 0.0  ;;  %v5769_v62 = vpop.f32.mrb[79].mxu0 }
0x1f0f   :  { %v5778_v63 = vsel %vm270_vm0, %v5769_v62, 0.0 }
0x1f10   :  { %v5780_v7 = vadd.f32 %v5779_v2, %v5778_v63 }
0x1f11   :  { %v11285_v34 = vpop.f32.mrb[80].mxu0 }
0x1f12   :  { %5781 = vadd.xlane.f32.xlu1 %v5780_v7  ;;  %v5918_v32 = vpop.f32.mrb[81].mxu0 }
0x1f13   :  { %11288 = vmatprep.mubr.msk.f32.mxu0 %vm671_vm2, %v5918_v32 }
0x1f14   :  { %11289 = vmatmul.mubr.msk.f32.vlgmr.msra.gmra.mrb[82].mxu0 %vm671_vm2, %v11285_v34 }
0x1f15   :  { %11298 = vmatprep.mubr.msk.f32.mxu0 %vm671_vm2, %v6155_v25 }
0x1f24   :  { %6164 = vrot.lane.b32.xlu0 %v13241_v17, %s12900_s7  ;;  %v16277_v17 = vmov 0.0  }
0x1f9b   :  { %v5564_v60 = vpop.xlane.xlu0 %5563 }
0x1f9c   :  { %v5565_v29 = vrot.slane %v5564_v60, 4 }
0x1f9e   :  { %v5566_v4 = vadd.f32 %v5565_v29, %v5564_v60 }
0x1f9f   :  { %v14766_v6 = vpop.permute.xlu0 %6164  ;;  %v5782_v35 = vpop.xlane.xlu1 %5781 }
0x1fa0   :  { %11296 = vmatprep.subr.mxu0 %v14766_v6  ;;  %v5567_v11 = vrot.slane %v5566_v4, 2  ;;  %v5783_v1 = vrot.slane %v5782_v35, 4 }
0x1fa1   :  { %11297 = vmatpush3.msra.mxu0 %v14766_v6 }
0x1fa2   :  { %v5568_v61 = vadd.f32 %v5567_v11, %v5566_v4  ;;  %11734 = vmatprep.subr.bf16.mxu0 %v12901_v26  ;;  %11299 = vmatmul.mubr.msk.f32.vlgmr.msra.gmra.mrb[84].mxu0 %vm671_vm2, %v11295_v48  ;;  %v5784_v51 = vadd.f32 %v5783_v1, %v5782_v35 }
0x1fa3   :  { %11305 = vmatprep.mubr.msk.f32.mxu0 %vm12902_vm7, %v16277_v17 }
0x1fa4   :  { %v5569_v42 = vrot.slane %v5568_v61, 1  ;;  %v5785_v57 = vrot.slane %v5784_v51, 2 }
0x1fa6   :  { %v5570_v55 = vadd.f32 %v5569_v42, %v5568_v61  ;;  %v5786_v44 = vadd.f32 %v5785_v57, %v5784_v51 }
0x1fa8   :  { %11919 = vpush %v5570_v55  ;;  %v5787_v9 = vrot.slane %v5786_v44, 1 }
0x1faa   :  { %v5788_v5 = vadd.f32 %v5787_v9, %v5786_v44 }
0x1fd9   :  { %s11920_s7 = spop %11919 }
0x1fda   :  { %s5572_s21 = smul.f32 0.0006510417, %s11920_s7 }
0x1fdc   :  { %s5573_s26 = sadd.f32 1e-05, %s5572_s21 }
0x1fde   :  { %v5574_v40 = vstv %s5573_s26 }
0x1fdf   :  { %12263 = vrsqrt.f32 %v5574_v40 }
0x1fe7   :  { %v14775_v14 = vpop.f32.mrb[82].mxu0 }
0x1fe8   :  { %v6016_v54 = vsel %vm270_vm0, %v14775_v14, 0.0  ;;  %v14779_v56 = vpop.f32.mrb[83].mxu0 }
0x1fe9   :  { %v12264_v59 = vpop.eup %12263  ;;  %v6015_v41 = vsel %vm270_vm0, %v14779_v56, 0.0 }
0x1fea   :  { %11921 = vpush %v12264_v59  ;;  %v6017_v23 = vadd.f32 %v6016_v54, %v6015_v41 }
0x1feb   :  { %11923 = vpush %v5788_v5 }
0x201b   :  { %s14783_s24 = spop %11921 }
0x201c   :  { %v5577_v31 = vstv %s14783_s24  ;;  %s11924_s6 = spop %11923 }
0x201d   :  { %v5578_v43 = vmul.f32 %v5577_v31, %v5556_v53  ;;  %s5790_s25 = smul.f32 0.0006510417, %s11924_s6 }
0x201f   :  { %v5791_v36 = vstv %s5790_s25  ;;  %v5580_v18 = vsel %vm270_vm0, %v5578_v43, -inf }
0x2020   :  { %v14789_v58 = vsub.f32 %v5769_v62, %v5791_v36  ;;  %v14791_v3 = vsub.f32 %v11280_v22, %v5791_v36  ;;  %5581 = vmax.xlane.f32.xlu0 %v5580_v18 }
0x2022   :  { %v5794_v30 = vmul.f32 %v14789_v58, %v14789_v58  ;;  %v5795_v0 = vmul.f32 %v14791_v3, %v14791_v3 }
0x2024   :  { %v5796_v52 = vsel %vm270_vm0, %v5794_v30, 0.0  ;;  %v5797_v50 = vsel %vm270_vm0, %v5795_v0, 0.0 }
0x2025   :  { %v5798_v38 = vadd.f32 %v5797_v50, %v5796_v52 }
0x2027   :  { %5799 = vadd.xlane.f32.xlu1 %v5798_v38 }
0x202b   :  { %6018 = vadd.xlane.f32.xlu1 %v6017_v23 }
0x2075   :  { %v11300_v7 = vpop.f32.mrb[84].mxu0 }
0x2076   :  { %v6249_v34 = vsel %vm270_vm0, %v11300_v7, 0.0  ;;  %v6239_v32 = vpop.f32.mrb[85].mxu0 }
0x2077   :  { %v6248_v60 = vsel %vm270_vm0, %v6239_v32, 0.0 }
0x2078   :  { %v6250_v29 = vadd.f32 %v6249_v34, %v6248_v60 }
0x20ad   :  { %v5582_v37 = vpop.xlane.xlu0 %5581 }
0x20ae   :  { %v5586_v12 = vsub.f32 %v5578_v43, %v5582_v37 }
0x20b0   :  { %v5588_v53 = vmul.f32 1.442695, %v5586_v12 }
0x20b2   :  { %12265 = vpow2.f32 %v5588_v53 }
0x20b4   :  { %v5800_v13 = vpop.xlane.xlu1 %5799 }
0x20b5   :  { %v5801_v16 = vrot.slane %v5800_v13, 4 }
0x20b7   :  { %v5802_v21 = vadd.f32 %v5801_v16, %v5800_v13 }
0x20b8   :  { %v6019_v4 = vpop.xlane.xlu1 %6018 }
0x20b9   :  { %v5803_v8 = vrot.slane %v5802_v21, 2  ;;  %v6020_v11 = vrot.slane %v6019_v4, 4 }
0x20bb   :  { %v5804_v49 = vadd.f32 %v5803_v8, %v5802_v21  ;;  %v6021_v61 = vadd.f32 %v6020_v11, %v6019_v4 }
0x20bc   :  { %v14799_v22 = vpop.eup %12265 }
0x20bd   :  { %v5592_v2 = vsel %vm270_vm0, %v14799_v22, 0.0  ;;  %v5805_v62 = vrot.slane %v5804_v49, 1  ;;  %v6022_v42 = vrot.slane %v6021_v61, 2 }
0x20be   :  { %5593 = vadd.xlane.f32.xlu0 %v5592_v2 }
0x20bf   :  { %v5806_v63 = vadd.f32 %v5805_v62, %v5804_v49  ;;  %v6023_v48 = vadd.f32 %v6022_v42, %v6021_v61 }
0x20c1   :  { %11925 = vpush %v5806_v63  ;;  %v6024_v25 = vrot.slane %v6023_v48, 1 }
0x20c3   :  { %v6025_v1 = vadd.f32 %v6024_v25, %v6023_v48 }
0x20f2   :  { %s11926_s27 = spop %11925 }
0x20f3   :  { %s5808_s29 = smul.f32 0.0006510417, %s11926_s27 }
0x20f5   :  { %s5809_s5 = sadd.f32 1e-05, %s5808_s29 }
0x20f7   :  { %v5810_v55 = vstv %s5809_s5 }
0x20f8   :  { %12267 = vrsqrt.f32 %v5810_v55 }
0x2102   :  { %v12268_v35 = vpop.eup %12267 }
0x2103   :  { %11927 = vpush %v12268_v35 }
0x2104   :  { %11929 = vpush %v6025_v1 }
0x2134   :  { %s14805_s20 = spop %11927 }
0x2135   :  { %s11930_s4 = spop %11929  ;;  %v5813_v62 = vstv %s14805_s20 }
0x2136   :  { %s6027_s28 = smul.f32 0.0006510417, %s11930_s4  ;;  %v5815_v4 = vmul.f32 %v5813_v62, %v14791_v3 }
0x2138   :  { %v6028_v51 = vstv %s6027_s28 }
0x2139   :  { %v6029_v57 = vsub.f32 %v14779_v56, %v6028_v51  ;;  %v14809_v40 = vsub.f32 %v14775_v14, %v6028_v51 }
0x213b   :  { %v6031_v44 = vmul.f32 %v6029_v57, %v6029_v57  ;;  %v6032_v9 = vmul.f32 %v14809_v40, %v14809_v40 }
0x213d   :  { %v6033_v54 = vsel %vm270_vm0, %v6031_v44, 0.0  ;;  %v6034_v59 = vsel %vm270_vm0, %v6032_v9, 0.0 }
0x213e   :  { %v6035_v5 = vadd.f32 %v6034_v59, %v6033_v54 }
0x2140   :  { %6036 = vadd.xlane.f32.xlu1 %v6035_v5 }
0x2144   :  { %6251 = vadd.xlane.f32.xlu1 %v6250_v29  ;;  %v5814_v29 = vmul.f32 %v5813_v62, %v14789_v58 }
0x2146   :  { %v5816_v11 = vsel %vm270_vm0, %v5814_v29, -inf }
0x21cd   :  { %v6037_v41 = vpop.xlane.xlu1 %6036 }
0x21ce   :  { %v6038_v23 = vrot.slane %v6037_v41, 4 }
0x21d0   :  { %v6039_v43 = vadd.f32 %v6038_v23, %v6037_v41 }
0x21d1   :  { %v6252_v14 = vpop.xlane.xlu1 %6251 }
0x21d2   :  { %v6040_v36 = vrot.slane %v6039_v43, 2  ;;  %v6253_v0 = vrot.slane %v6252_v14, 4 }
0x21d4   :  { %v6041_v18 = vadd.f32 %v6040_v36, %v6039_v43  ;;  %v6254_v52 = vadd.f32 %v6253_v0, %v6252_v14 }
0x21d6   :  { %v6042_v56 = vrot.slane %v6041_v18, 1  ;;  %v6255_v50 = vrot.slane %v6254_v52, 2 }
0x21d8   :  { %v6043_v30 = vadd.f32 %v6042_v56, %v6041_v18  ;;  %v6256_v37 = vadd.f32 %v6255_v50, %v6254_v52 }
0x21da   :  { %11931 = vpush %v6043_v30  ;;  %v6257_v12 = vrot.slane %v6256_v37, 1 }
0x21dc   :  { %v6258_v13 = vadd.f32 %v6257_v12, %v6256_v37 }
0x220b   :  { %s11932_s30 = spop %11931 }
0x220c   :  { %s6045_s18 = smul.f32 0.0006510417, %s11932_s30 }
0x220e   :  { %s6046_s8 = sadd.f32 1e-05, %s6045_s18 }
0x2210   :  { %v6047_v38 = vstv %s6046_s8 }
0x2211   :  { %12269 = vrsqrt.f32 %v6047_v38 }
0x221b   :  { %v12270_v53 = vpop.eup %12269 }
0x221c   :  { %11933 = vpush %v12270_v53 }
0x221d   :  { %11935 = vpush %v6258_v13 }
0x224d   :  { %s14815_s0 = spop %11933 }
0x224e   :  { %s11936_s1 = spop %11935  ;;  %v6050_v61 = vstv %s14815_s0 }
0x224f   :  { %s6260_s2 = smul.f32 0.0006510417, %s11936_s1  ;;  %v6051_v42 = vmul.f32 %v6050_v61, %v6029_v57  ;;  %v6052_v0 = vmul.f32 %v6050_v61, %v14809_v40 }
0x2251   :  { %v6261_v16 = vstv %s6260_s2  ;;  %v6053_v48 = vsel %vm270_vm0, %v6051_v42, -inf  ;;  %v6056_v50 = vsel %vm270_vm0, %v6052_v0, -inf }
0x2252   :  { %v6262_v21 = vsub.f32 %v6239_v32, %v6261_v16  ;;  %v6263_v8 = vsub.f32 %v11300_v7, %v6261_v16  ;;  %v5579_v32 = vmul.f32 %v5577_v31, %v14754_v24  ;;  %v5819_v7 = vsel %vm270_vm0, %v5815_v4, -inf }
0x2254   :  { %v6264_v49 = vmul.f32 %v6262_v21, %v6262_v21  ;;  %v6265_v2 = vmul.f32 %v6263_v8, %v6263_v8  ;;  %v5583_v55 = vsel %vm270_vm0, %v5579_v32, -inf }
0x2256   :  { %v6266_v63 = vsel %vm270_vm0, %v6264_v49, 0.0  ;;  %v6267_v34 = vsel %vm270_vm0, %v6265_v2, 0.0 }
0x2257   :  { %v6268_v60 = vadd.f32 %v6267_v34, %v6266_v63 }
0x2259   :  { %6269 = vadd.xlane.f32.xlu1 %v6268_v60 }
0x225d   :  { %5817 = vmax.xlane.f32.xlu1 %v5816_v11 }
0x2261   :  { %5820 = vmax.xlane.f32.xlu1 %v5819_v7 }
0x2265   :  { %5584 = vmax.xlane.f32.xlu1 %v5583_v55 }
0x2269   :  { %6054 = vmax.xlane.f32.xlu1 %v6053_v48 }
0x22e6   :  { %v6270_v58 = vpop.xlane.xlu1 %6269 }
0x22e7   :  { %v6271_v25 = vrot.slane %v6270_v58, 4 }
0x22e9   :  { %v6272_v3 = vadd.f32 %v6271_v25, %v6270_v58 }
0x22ea   :  { %v5818_v57 = vpop.xlane.xlu1 %5817 }
0x22eb   :  { %v6273_v35 = vrot.slane %v6272_v3, 2  ;;  %v5822_v54 = vsub.f32 %v5814_v29, %v5818_v57 }
0x22ed   :  { %v6274_v1 = vadd.f32 %v6273_v35, %v6272_v3  ;;  %v5824_v59 = vmul.f32 1.442695, %v5822_v54 }
0x22ee   :  { %v5821_v9 = vpop.xlane.xlu1 %5820 }
0x22ef   :  { %v6275_v51 = vrot.slane %v6274_v1, 1  ;;  %v5823_v5 = vsub.f32 %v5815_v4, %v5821_v9  ;;  %v5594_v4 = vpop.xlane.xlu0 %5593 }
0x22f1   :  { %v6276_v44 = vadd.f32 %v6275_v51, %v6274_v1  ;;  %v5826_v36 = vmul.f32 1.442695, %v5823_v5 }
0x22f2   :  { %v5585_v41 = vpop.xlane.xlu1 %5584 }
0x22f3   :  { %11937 = vpush %v6276_v44  ;;  %v5587_v18 = vsub.f32 %v5579_v32, %v5585_v41 }
0x22f5   :  { %v5590_v14 = vmul.f32 1.442695, %v5587_v18  ;;  %v6464_v18 = vld [vmem:[#allocation17 + $0x8] sm:$0xff] }
0x22f6   :  { %v6055_v40 = vpop.xlane.xlu1 %6054 }
0x2324   :  { %s11938_s22 = spop %11937 }
0x2325   :  { %s6278_s17 = smul.f32 0.0006510417, %s11938_s22 }
0x2327   :  { %s6279_s10 = sadd.f32 1e-05, %s6278_s17 }
0x2329   :  { %v6280_v24 = vstv %s6279_s10 }
0x232a   :  { %12271 = vrsqrt.f32 %v6280_v24 }
0x232b   :  { %12273 = vpow2.f32 %v5824_v59 }
0x232c   :  { %12275 = vpow2.f32 %v5826_v36 }
0x232d   :  { %12277 = vpow2.f32 %v5590_v14 }
0x2334   :  { %v12272_v31 = vpop.eup %12271 }
0x2335   :  { %11939 = vpush %v12272_v31  ;;  %v12274_v38 = vpop.eup %12273 }
0x2336   :  { %v5828_v37 = vsel %vm270_vm0, %v12274_v38, 0.0  ;;  %v12276_v12 = vpop.eup %12275 }
0x2337   :  { %v5831_v53 = vsel %vm270_vm0, %v12276_v12, 0.0  ;;  %v12278_v13 = vpop.eup %12277 }
0x2338   :  { %v5595_v16 = vsel %vm270_vm0, %v12278_v13, 0.0 }
0x2366   :  { %s11940_s3 = spop %11939 }
0x2367   :  { %v6283_v23 = vstv %s11940_s3 }
0x2368   :  { %v6284_v43 = vmul.f32 %v6283_v23, %v6262_v21  ;;  %v6285_v56 = vmul.f32 %v6283_v23, %v6263_v8  ;;  %v6059_v21 = vsub.f32 %v6051_v42, %v6055_v40 }
0x236a   :  { %v6286_v30 = vsel %vm270_vm0, %v6284_v43, -inf  ;;  %v6289_v52 = vsel %vm270_vm0, %v6285_v56, -inf  ;;  %v6061_v2 = vmul.f32 1.442695, %v6059_v21 }
0x236b   :  { %6287 = vmax.xlane.f32.xlu1 %v6286_v30 }
0x236f   :  { %6290 = vmax.xlane.f32.xlu1 %v6289_v52 }
0x2373   :  { %6057 = vmax.xlane.f32.xlu1 %v6056_v50 }
0x2377   :  { %5829 = vadd.xlane.f32.xlu1 %v5828_v37 }
0x237b   :  { %5832 = vadd.xlane.f32.xlu1 %v5831_v53 }
0x237f   :  { %5596 = vadd.xlane.f32.xlu1 %v5595_v16 }
0x23f8   :  { %v6288_v8 = vpop.xlane.xlu1 %6287 }
0x23f9   :  { %v6292_v49 = vsub.f32 %v6284_v43, %v6288_v8 }
0x23fb   :  { %v6294_v62 = vmul.f32 1.442695, %v6292_v49 }
0x23fc   :  { %v6291_v63 = vpop.xlane.xlu1 %6290 }
0x23fd   :  { %12279 = vpow2.f32 %v6294_v62  ;;  %v6293_v34 = vsub.f32 %v6285_v56, %v6291_v63 }
0x23fe   :  { %12281 = vpow2.f32 %v6061_v2 }
0x23ff   :  { %v6296_v60 = vmul.f32 1.442695, %v6293_v34 }
0x2400   :  { %v6058_v29 = vpop.xlane.xlu1 %6057 }
0x2401   :  { %12283 = vpow2.f32 %v6296_v60  ;;  %v6060_v11 = vsub.f32 %v6052_v0, %v6058_v29  ;;  %v6552_v60 = vld [vmem:[#allocation6 + $0x8] sm:$0xff] }
0x2402   :  { %12285 = vrcp.f32 %v5594_v4 }
0x2403   :  { %v6063_v32 = vmul.f32 1.442695, %v6060_v11 }
0x2404   :  { %v5830_v7 = vpop.xlane.xlu1 %5829 }
0x2405   :  { %12287 = vpow2.f32 %v6063_v32  ;;  %v6553_v32 = vld [vmem:[#allocation12] sm:$0xff] }
0x2406   :  { %12289 = vrcp.f32 %v5830_v7  ;;  %v6554_v7 = vld [vmem:[#allocation12 + $0x8] sm:$0xff] }
0x2407   :  { %v12280_v61 = vpop.eup %12279 }
0x2408   :  { %v5833_v42 = vpop.xlane.xlu1 %5832  ;;  %v6298_v55 = vsel %vm270_vm0, %v12280_v61, 0.0  ;;  %v12282_v48 = vpop.eup %12281 }
0x2409   :  { %12291 = vrcp.f32 %v5833_v42  ;;  %6299 = vadd.xlane.f32.xlu0 %v6298_v55  ;;  %v6065_v35 = vsel %vm270_vm0, %v12282_v48, 0.0  ;;  %v6556_v42 = vld [vmem:[#allocation12 + $0x18] sm:$0xff]  ;;  %v6858_v55 = vld [vmem:[#allocation12 + $0x20] sm:$0xff] }
0x240b   :  { %v12284_v58 = vpop.eup %12283 }
0x240c   :  { %v5597_v25 = vpop.xlane.xlu1 %5596  ;;  %v6301_v3 = vsel %vm270_vm0, %v12284_v58, 0.0  ;;  %v12286_v1 = vpop.eup %12285 }
0x240d   :  { %12293 = vrcp.f32 %v5597_v25  ;;  %6302 = vadd.xlane.f32.xlu1 %v6301_v3  ;;  %6066 = vadd.xlane.f32.xlu0 %v6065_v35  ;;  %v5599_v31 = vmul.f32 %v12286_v1, %v14799_v22  ;;  %v6463_v22 = vld [vmem:[#allocation17] sm:$0xff]  ;;  %v6861_v25 = vld [vmem:[#allocation12 + $0x38] sm:$0xff]  ;;  %v7165_v35 = vld [vmem:[#allocation12 + $0x48] sm:$0xff] }
0x240e   :  { %v11735_v56 = vpack.c.bf16 %v6464_v18, %v6463_v22  ;;  %v7164_v3 = vld [vmem:[#allocation12 + $0x40] sm:$0xff]  ;;  %v7166_v1 = vld [vmem:[#allocation12 + $0x50] sm:$0xff] }
0x240f   :  { %v12288_v51 = vpop.eup %12287 }
0x2410   :  { %v12290_v44 = vpop.eup %12289  ;;  %v6068_v24 = vsel %vm270_vm0, %v12288_v51, 0.0  ;;  %11737 = vmatpush3.bf16.xpose.msk.msra.mxu0 %vm13390_vm6, %v11735_v56 }
0x2411   :  { %6069 = vadd.xlane.f32.xlu1 %v6068_v24  ;;  %v5835_v57 = vmul.f32 %v12290_v44, %v12274_v38  ;;  %11308 = vmatprep.subr.msk.mxu0 %vm907_vm3, %v6552_v60  ;;  %v7470_v44 = vld [vmem:[#allocation12 + $0x60] sm:$0xff]  ;;  %v7471_v24 = vld [vmem:[#allocation12 + $0x68] sm:$0xff] }
0x2413   :  { %v12292_v9 = vpop.eup %12291  ;;  %v5838_v54 = vadd.f32 %v5835_v57, %v5599_v31 }
0x2414   :  { %v5837_v59 = vmul.f32 %v12292_v9, %v12276_v12 }
0x2416   :  { %v11722_v5 = vpack.c.bf16 %v5837_v59, %v5835_v57  ;;  %v7473_v57 = vld [vmem:[#allocation12 + $0x78] sm:$0xff] }
0x2417   :  { %v12294_v41 = vpop.eup %12293 }
0x2418   :  { %v5601_v23 = vmul.f32 %v12294_v41, %v12278_v13  ;;  %11724 = vmatprep.subr.msk.bf16.mxu1 %vm13378_vm5, %v11722_v5 }
0x241a   :  { %v5839_v43 = vadd.f32 %v5837_v59, %v5601_v23  ;;  %v11725_v36 = vpack.c.bf16 %v5601_v23, %v5599_v31  ;;  %v7472_v31 = vld [vmem:[#allocation12 + $0x70] sm:$0xff] }
0x241c   :  { %11727 = vmatpush1.bf16.xpose.msk.msra.mxu1 %vm13378_vm5, %v11725_v36 }
0x2423   :  { %6387 = vmatmul.mubr.f32.vlgmr.msra.gmra.mrb[70].mxu1 %v13245_v19 }
0x2424   :  { %6456 = vmatprep.mubr.f32.mxu1 %v13249_v20 }
0x2496   :  { %v6300_v30 = vpop.xlane.xlu0 %6299 }
0x2497   :  { %12295 = vrcp.f32 %v6300_v30 }
0x249a   :  { %v6303_v14 = vpop.xlane.xlu1 %6302  ;;  %v6067_v0 = vpop.xlane.xlu0 %6066 }
0x249b   :  { %12297 = vrcp.f32 %v6303_v14 }
0x249c   :  { %12299 = vrcp.f32 %v6067_v0 }
0x249e   :  { %v6070_v52 = vpop.xlane.xlu1 %6069 }
0x249f   :  { %12301 = vrcp.f32 %v6070_v52 }
0x24a1   :  { %v12296_v50 = vpop.eup %12295 }
0x24a2   :  { %v6305_v12 = vmul.f32 %v12296_v50, %v12280_v61  ;;  %v6555_v61 = vld [vmem:[#allocation12 + $0x10] sm:$0xff] }
0x24a5   :  { %v12298_v38 = vpop.eup %12297 }
0x24a6   :  { %v12300_v37 = vpop.eup %12299  ;;  %v6307_v53 = vmul.f32 %v12298_v38, %v12284_v58  ;;  %v6860_v58 = vld [vmem:[#allocation12 + $0x30] sm:$0xff] }
0x24a7   :  { %v6072_v13 = vmul.f32 %v12300_v37, %v12282_v48  ;;  %v6859_v48 = vld [vmem:[#allocation12 + $0x28] sm:$0xff] }
0x24a8   :  { %v11728_v16 = vpack.c.bf16 %v6307_v53, %v6305_v12 }
0x24a9   :  { %v12302_v40 = vpop.eup %12301  ;;  %v6075_v21 = vadd.f32 %v6072_v13, %v5838_v54 }
0x24aa   :  { %v6074_v8 = vmul.f32 %v12302_v40, %v12288_v51  ;;  %11730 = vmatprep.subr.msk.bf16.mxu1 %vm13378_vm5, %v11728_v16  ;;  %v7167_v51 = vld [vmem:[#allocation12 + $0x58] sm:$0xff] }
0x24ab   :  { %v6308_v47 = vadd.f32 %v6305_v12, %v6075_v21 }
0x24ac   :  { %v6076_v49 = vadd.f32 %v6074_v8, %v5839_v43  ;;  %v11731_v2 = vpack.c.bf16 %v6074_v8, %v6072_v13 }
0x24ad   :  { %v6546_v62 = vmul.f32 0.25, %v6308_v47 }
0x24ae   :  { %v6309_v63 = vadd.f32 %v6307_v53, %v6076_v49  ;;  %11733 = vmatpush1.bf16.xpose.msk.msra.mxu1 %vm13378_vm5, %v11731_v2 }
0x24af   :  { %6549 = vst.msk [vmem:[#allocation24 + $0x10] sm:$0xff] %vm270_vm0, %v6546_v62  ;;  %11316 = vmatprep.subr.mxu1 %v13238_v15 }
0x24b0   :  { %v6547_v34 = vmul.f32 0.25, %v6309_v63 }
0x24b2   :  { %6550 = vst.msk [vmem:[#allocation24 + $0x18] sm:$0xff] %vm270_vm0, %v6547_v34 }
0x24b5   :  { %6457 = vmatmul.mubr.f32.vlgmr.msra.gmra.mrb[70].mxu1 %v13262_v28 }
0x24b6   :  { %11317 = vmatpush3.msra.mxu1 %v13238_v15 }
0x24b7   :  { %11332 = vmatprep.subr.mxu1 %v14731_v10 }
0x2588   :  { %v6458_v29 = vpop.f32.mrb[70].mxu1 }
0x2589   :  { %v6462_v4 = vmul.f32 0.25, %v6458_v29  ;;  %v6460_v11 = vpop.f32.mrb[71].mxu1 }
0x258b   :  { %11306 = vmatmul.mubr.msk.f32.vlgmr.msra.gmra.mrb[86].mxu0 %vm586_vm1, %v6462_v4 }
0x258c   :  { %11309 = vmatpush3.xpose.msk.msra.mxu0 %vm907_vm3, %v6552_v60  ;;  %11310 = vmatprep.mubr.msk.f32.mxu0 %vm907_vm3, %v6553_v32 }
0x258d   :  { %11324 = vmatprep.subr.msk.mxu0 %vm907_vm3, %v6552_v60 }
0x258f   :  { %11311 = vmatmul.mubr.msk.f32.vlgmr.msra.gmra.mrb[88].mxu0 %vm907_vm3, %v6554_v7 }
0x2590   :  { %11313 = vmatprep.mubr.msk.f32.mxu0 %vm907_vm3, %v6555_v61  ;;  %11325 = vmatpush3.xpose.msk.msra.mxu0 %vm907_vm3, %v6552_v60 }
0x2591   :  { %11340 = vmatprep.subr.msk.mxu0 %vm907_vm3, %v6552_v60 }
0x2593   :  { %11314 = vmatmul.mubr.msk.f32.gmra.mrb[90].mxu0 %vm907_vm3, %v6556_v42 }
0x2594   :  { %11326 = vmatprep.mubr.msk.f32.mxu0 %vm907_vm3, %v6858_v55 }
0x2597   :  { %11327 = vmatmul.mubr.msk.f32.vlgmr.msra.gmra.mrb[92].mxu0 %vm907_vm3, %v6859_v48 }
0x2598   :  { %11329 = vmatprep.mubr.msk.f32.mxu0 %vm907_vm3, %v6860_v58  ;;  %11341 = vmatpush3.xpose.msk.msra.mxu0 %vm907_vm3, %v6552_v60 }
0x2599   :  { %11356 = vmatprep.subr.msk.mxu0 %vm907_vm3, %v6552_v60 }
0x259b   :  { %11330 = vmatmul.mubr.msk.f32.gmra.mrb[94].mxu0 %vm907_vm3, %v6861_v25 }
0x259c   :  { %11342 = vmatprep.mubr.msk.f32.mxu0 %vm907_vm3, %v7164_v3 }
0x259f   :  { %11343 = vmatmul.mubr.msk.f32.vlgmr.msra.gmra.mrb[96].mxu0 %vm907_vm3, %v7165_v35 }
0x25a0   :  { %11345 = vmatprep.mubr.msk.f32.mxu0 %vm907_vm3, %v7166_v1  ;;  %11357 = vmatpush3.xpose.msk.msra.mxu0 %vm907_vm3, %v6552_v60 }
0x25a3   :  { %11346 = vmatmul.mubr.msk.f32.gmra.mrb[98].mxu0 %vm907_vm3, %v7167_v51 }
0x25a4   :  { %11358 = vmatprep.mubr.msk.f32.mxu0 %vm907_vm3, %v7470_v44 }
0x25a7   :  { %11359 = vmatmul.mubr.msk.f32.vlgmr.msra.gmra.mrb[100].mxu0 %vm907_vm3, %v7471_v24 }
0x25a8   :  { %11361 = vmatprep.mubr.msk.f32.mxu0 %vm907_vm3, %v7472_v31 }
0x25ab   :  { %11362 = vmatmul.mubr.msk.f32.gmra.mrb[102].mxu0 %vm907_vm3, %v7473_v57 }
0x25ac   :  { %7856 = vmatprep.mubr.f32.mxu0 %v13260_v27 }
0x265e   :  { %v6540_v9 = vpop.f32.mrb[86].mxu0 }
0x265f   :  { %6545 = vst.msk [vmem:[#allocation20 + $0x8] sm:$0xff] %vm586_vm1, %v6540_v9  ;;  %v11307_v54 = vpop.f32.mrb[87].mxu0 }
0x2662   :  { %v11312_v59 = vpop.f32.mrb[88].mxu0 }
0x2663   :  { %v6638_v5 = vpop.f32.mrb[89].mxu0 }
0x2664   :  { %11318 = vmatprep.mubr.msk.f32.mxu1 %vm671_vm2, %v6638_v5 }
0x2665   :  { %11319 = vmatmul.mubr.msk.f32.vlgmr.msra.gmra.mrb[72].mxu1 %vm671_vm2, %v11312_v59 }
0x2666   :  { %11333 = vmatpush3.msra.mxu1 %v14731_v10  ;;  %v11315_v41 = vpop.f32.mrb[90].mxu0 }
0x2667   :  { %11348 = vmatprep.subr.mxu1 %v14746_v46  ;;  %v6648_v23 = vpop.f32.mrb[91].mxu0 }
0x2668   :  { %11321 = vmatprep.mubr.msk.f32.mxu1 %vm671_vm2, %v6648_v23 }
0x2669   :  { %11322 = vmatmul.mubr.msk.f32.gmra.mrb[74].mxu1 %vm671_vm2, %v11315_v41 }
0x266a   :  { %v11328_v43 = vpop.f32.mrb[92].mxu0 }
0x266b   :  { %v6940_v36 = vpop.f32.mrb[93].mxu0 }
0x266c   :  { %11334 = vmatprep.mubr.msk.f32.mxu1 %vm671_vm2, %v6940_v36 }
0x266d   :  { %11335 = vmatmul.mubr.msk.f32.vlgmr.msra.gmra.mrb[76].mxu1 %vm671_vm2, %v11328_v43 }
0x266e   :  { %11349 = vmatpush3.msra.mxu1 %v14746_v46  ;;  %v11331_v22 = vpop.f32.mrb[94].mxu0 }
0x266f   :  { %11364 = vmatprep.subr.mxu1 %v14766_v6  ;;  %v6950_v18 = vpop.f32.mrb[95].mxu0 }
0x2670   :  { %11337 = vmatprep.mubr.msk.f32.mxu1 %vm671_vm2, %v6950_v18 }
0x2671   :  { %11338 = vmatmul.mubr.msk.f32.gmra.mrb[78].mxu1 %vm671_vm2, %v11331_v22 }
0x2672   :  { %v11344_v56 = vpop.f32.mrb[96].mxu0 }
0x2673   :  { %v7246_v30 = vpop.f32.mrb[97].mxu0 }
0x2674   :  { %11350 = vmatprep.mubr.msk.f32.mxu1 %vm671_vm2, %v7246_v30 }
0x2675   :  { %11351 = vmatmul.mubr.msk.f32.vlgmr.msra.gmra.mrb[80].mxu1 %vm671_vm2, %v11344_v56 }
0x2676   :  { %11365 = vmatpush3.msra.mxu1 %v14766_v6  ;;  %v11347_v8 = vpop.f32.mrb[98].mxu0 }
0x2677   :  { %11762 = vmatprep.subr.bf16.mxu1 %v12901_v26  ;;  %v7256_v2 = vpop.f32.mrb[99].mxu0 }
0x2678   :  { %11353 = vmatprep.mubr.msk.f32.mxu1 %vm671_vm2, %v7256_v2 }
0x2679   :  { %11354 = vmatmul.mubr.msk.f32.gmra.mrb[82].mxu1 %vm671_vm2, %v11347_v8 }
0x2738   :  { %v11320_v14 = vpop.f32.mrb[72].mxu1 }
0x2739   :  { %v6755_v0 = vsel %vm270_vm0, %v11320_v14, 0.0  ;;  %v6735_v52 = vpop.f32.mrb[73].mxu1 }
0x273a   :  { %v6754_v50 = vsel %vm270_vm0, %v6735_v52, 0.0 }
0x273b   :  { %v6756_v38 = vadd.f32 %v6755_v0, %v6754_v50  ;;  %v11360_v50 = vpop.f32.mrb[100].mxu0 }
0x273c   :  { %v11323_v37 = vpop.f32.mrb[74].mxu1 }
0x273d   :  { %v6745_v12 = vpop.f32.mrb[75].mxu1  ;;  %v6759_v16 = vsel %vm270_vm0, %v11323_v37, 0.0 }
0x273e   :  { %v6757_v53 = vsel %vm270_vm0, %v6745_v12, 0.0 }
0x273f   :  { %v6758_v13 = vadd.f32 %v6757_v53, %v6756_v38 }
0x2740   :  { %v14907_v21 = vpop.f32.mrb[76].mxu1 }
0x2741   :  { %v6760_v40 = vadd.f32 %v6759_v16, %v6758_v13  ;;  %v7057_v47 = vsel %vm270_vm0, %v14907_v21, 0.0  ;;  %v14911_v49 = vpop.f32.mrb[77].mxu1 }
0x2742   :  { %v7056_v62 = vsel %vm270_vm0, %v14911_v49, 0.0 }
0x2743   :  { %6761 = vadd.xlane.f32.xlu0 %v6760_v40  ;;  %v7058_v34 = vadd.f32 %v7057_v47, %v7056_v62 }
0x2744   :  { %v14915_v63 = vpop.f32.mrb[78].mxu1 }
0x2745   :  { %v14918_v60 = vpop.f32.mrb[79].mxu1  ;;  %v7061_v29 = vsel %vm270_vm0, %v14915_v63, 0.0 }
0x2746   :  { %v7059_v4 = vsel %vm270_vm0, %v14918_v60, 0.0 }
0x2747   :  { %v7060_v11 = vadd.f32 %v7059_v4, %v7058_v34 }
0x2748   :  { %v14945_v38 = vpop.f32.mrb[80].mxu1 }
0x2749   :  { %v7062_v32 = vadd.f32 %v7061_v29, %v7060_v11  ;;  %v14949_v53 = vpop.f32.mrb[81].mxu1 }
0x274a   :  { %v7362_v16 = vsel %vm270_vm0, %v14949_v53, 0.0 }
0x274b   :  { %7063 = vadd.xlane.f32.xlu0 %v7062_v32 }
0x274c   :  { %v14954_v40 = vpop.f32.mrb[82].mxu1 }
0x274d   :  { %v14957_v2 = vpop.f32.mrb[83].mxu1  ;;  %v7367_v62 = vsel %vm270_vm0, %v14954_v40, 0.0 }
0x274e   :  { %v7365_v34 = vsel %vm270_vm0, %v14957_v2, 0.0 }
0x27d0   :  { %v6762_v7 = vpop.xlane.xlu0 %6761 }
0x27d1   :  { %v6763_v61 = vrot.slane %v6762_v7, 4 }
0x27d3   :  { %v6764_v42 = vadd.f32 %v6763_v61, %v6762_v7 }
0x27d5   :  { %v6765_v55 = vrot.slane %v6764_v42, 2 }
0x27d7   :  { %v6766_v48 = vadd.f32 %v6765_v55, %v6764_v42 }
0x27d8   :  { %v7064_v11 = vpop.xlane.xlu0 %7063 }
0x27d9   :  { %v6767_v58 = vrot.slane %v6766_v48, 1  ;;  %v7065_v32 = vrot.slane %v7064_v11, 4 }
0x27db   :  { %v6768_v25 = vadd.f32 %v6767_v58, %v6766_v48  ;;  %v7066_v7 = vadd.f32 %v7065_v32, %v7064_v11 }
0x27dd   :  { %11941 = vpush %v6768_v25  ;;  %v7067_v61 = vrot.slane %v7066_v7, 2 }
0x27df   :  { %v7068_v55 = vadd.f32 %v7067_v61, %v7066_v7 }
0x27e1   :  { %v7069_v48 = vrot.slane %v7068_v55, 1 }
0x27e3   :  { %v7070_v25 = vadd.f32 %v7069_v48, %v7068_v55 }
0x280e   :  { %s11942_s7 = spop %11941 }
0x280f   :  { %s6770_s21 = smul.f32 0.00032552084, %s11942_s7 }
0x2811   :  { %v6771_v3 = vstv %s6770_s21 }
0x2812   :  { %v14925_v35 = vsub.f32 %v6735_v52, %v6771_v3  ;;  %v14927_v1 = vsub.f32 %v11320_v14, %v6771_v3  ;;  %v14929_v51 = vsub.f32 %v6745_v12, %v6771_v3  ;;  %v14931_v44 = vsub.f32 %v11323_v37, %v6771_v3  ;;  %v7552_v37 = vpop.f32.mrb[101].mxu0 }
0x2813   :  { %v7363_v12 = vsel %vm270_vm0, %v14945_v38, 0.0  ;;  %11366 = vmatprep.mubr.msk.f32.mxu1 %vm671_vm2, %v7552_v37  ;;  %v11363_v13 = vpop.f32.mrb[102].mxu0 }
0x2814   :  { %v6776_v24 = vmul.f32 %v14925_v35, %v14925_v35  ;;  %v6777_v31 = vmul.f32 %v14927_v1, %v14927_v1  ;;  %v6778_v57 = vmul.f32 %v14929_v51, %v14929_v51  ;;  %v6779_v9 = vmul.f32 %v14931_v44, %v14931_v44  ;;  %11367 = vmatmul.mubr.msk.f32.vlgmr.msra.gmra.mrb[84].mxu1 %vm671_vm2, %v11360_v50  ;;  %v7562_v47 = vpop.f32.mrb[103].mxu0 }
0x2815   :  { %v7364_v8 = vadd.f32 %v7363_v12, %v7362_v16  ;;  %11369 = vmatprep.mubr.msk.f32.mxu1 %vm671_vm2, %v7562_v47 }
0x2816   :  { %v6780_v54 = vsel %vm270_vm0, %v6776_v24, 0.0  ;;  %v6781_v59 = vsel %vm270_vm0, %v6777_v31, 0.0  ;;  %v6783_v41 = vsel %vm270_vm0, %v6778_v57, 0.0  ;;  %v6785_v43 = vsel %vm270_vm0, %v6779_v9, 0.0 }
0x2817   :  { %v6782_v5 = vadd.f32 %v6781_v59, %v6780_v54  ;;  %v7366_v29 = vadd.f32 %v7365_v34, %v7364_v8 }
0x2818   :  { %11370 = vmatmul.mubr.msk.f32.gmra.mrb[86].mxu1 %vm671_vm2, %v11363_v13 }
0x2819   :  { %v6784_v23 = vadd.f32 %v6783_v41, %v6782_v5  ;;  %v7368_v4 = vadd.f32 %v7367_v62, %v7366_v29  ;;  %11380 = vmatprep.mubr.msk.f32.mxu1 %vm12902_vm7, %v16277_v17 }
0x281b   :  { %v6786_v36 = vadd.f32 %v6785_v43, %v6784_v23  ;;  %7369 = vadd.xlane.f32.xlu0 %v7368_v4 }
0x281d   :  { %6787 = vadd.xlane.f32.xlu1 %v6786_v36 }
0x28a8   :  { %v7370_v11 = vpop.xlane.xlu0 %7369 }
0x28a9   :  { %v7371_v32 = vrot.slane %v7370_v11, 4 }
0x28aa   :  { %v6788_v22 = vpop.xlane.xlu1 %6787 }
0x28ab   :  { %v6789_v18 = vrot.slane %v6788_v22, 4  ;;  %v7372_v7 = vadd.f32 %v7371_v32, %v7370_v11 }
0x28ad   :  { %v6790_v56 = vadd.f32 %v6789_v18, %v6788_v22  ;;  %v7373_v61 = vrot.slane %v7372_v7, 2 }
0x28af   :  { %v6791_v30 = vrot.slane %v6790_v56, 2  ;;  %v7374_v55 = vadd.f32 %v7373_v61, %v7372_v7 }
0x28b1   :  { %v6792_v14 = vadd.f32 %v6791_v30, %v6790_v56  ;;  %v7375_v48 = vrot.slane %v7374_v55, 1 }
0x28b3   :  { %v6793_v0 = vrot.slane %v6792_v14, 1 }
0x28b5   :  { %v6794_v52 = vadd.f32 %v6793_v0, %v6792_v14 }
0x28b7   :  { %11943 = vpush %v6794_v52 }
0x28e7   :  { %v14989_v22 = vpop.f32.mrb[84].mxu1 }
0x28e8   :  { %s11944_s26 = spop %11943  ;;  %v7669_v18 = vsel %vm270_vm0, %v14989_v22, 0.0  ;;  %v14993_v56 = vpop.f32.mrb[85].mxu1 }
0x28e9   :  { %s6796_s24 = smul.f32 0.00032552084, %s11944_s26  ;;  %v7668_v30 = vsel %vm270_vm0, %v14993_v56, 0.0 }
0x28ea   :  { %v7670_v0 = vadd.f32 %v7669_v18, %v7668_v30 }
0x28eb   :  { %s6797_s6 = sadd.f32 1e-05, %s6796_s24  ;;  %v14997_v14 = vpop.f32.mrb[86].mxu1 }
0x28ec   :  { %v14999_v52 = vpop.f32.mrb[87].mxu1  ;;  %v7673_v12 = vsel %vm270_vm0, %v14997_v14, 0.0 }
0x28ed   :  { %v6798_v42 = vstv %s6797_s6  ;;  %v7671_v50 = vsel %vm270_vm0, %v14999_v52, 0.0 }
0x28ee   :  { %12303 = vrsqrt.f32 %v6798_v42  ;;  %v7672_v37 = vadd.f32 %v7671_v50, %v7670_v0 }
0x28f0   :  { %v7674_v8 = vadd.f32 %v7673_v12, %v7672_v37 }
0x28f2   :  { %7675 = vadd.xlane.f32.xlu0 %v7674_v8 }
0x28f8   :  { %v12304_v58 = vpop.eup %12303 }
0x28f9   :  { %11945 = vpush %v12304_v58 }
0x28fa   :  { %11947 = vpush %v7070_v25  ;;  %v7376_v25 = vadd.f32 %v7375_v48, %v7374_v55 }
0x292a   :  { %s14967_s25 = spop %11945 }
0x292b   :  { %s11948_s27 = spop %11947 }
0x292c   :  { %s7072_s29 = smul.f32 0.00032552084, %s11948_s27 }
0x292e   :  { %v7073_v3 = vstv %s7072_s29 }
0x292f   :  { %v7074_v24 = vsub.f32 %v14911_v49, %v7073_v3  ;;  %v14971_v31 = vsub.f32 %v14907_v21, %v7073_v3  ;;  %v14974_v57 = vsub.f32 %v14918_v60, %v7073_v3  ;;  %v14977_v9 = vsub.f32 %v14915_v63, %v7073_v3 }
0x2930   :  { %v15006_v3 = vstv %s14967_s25 }
0x2931   :  { %v7078_v54 = vmul.f32 %v7074_v24, %v7074_v24  ;;  %v7079_v59 = vmul.f32 %v14971_v31, %v14971_v31  ;;  %v7080_v5 = vmul.f32 %v14974_v57, %v14974_v57  ;;  %v7081_v41 = vmul.f32 %v14977_v9, %v14977_v9 }
0x2932   :  { %v15052_v37 = vmul.f32 %v15006_v3, %v14929_v51 }
0x2933   :  { %v7082_v49 = vsel %vm270_vm0, %v7078_v54, 0.0  ;;  %v7083_v21 = vsel %vm270_vm0, %v7079_v59, 0.0  ;;  %v7085_v60 = vsel %vm270_vm0, %v7080_v5, 0.0  ;;  %v7087_v63 = vsel %vm270_vm0, %v7081_v41, 0.0 }
0x2934   :  { %v7084_v23 = vadd.f32 %v7083_v21, %v7082_v49  ;;  %v15017_v49 = vmul.f32 %v15006_v3, %v14925_v35 }
0x2936   :  { %v7086_v43 = vadd.f32 %v7085_v60, %v7084_v23 }
0x2938   :  { %v7088_v36 = vadd.f32 %v7087_v63, %v7086_v43 }
0x293a   :  { %7089 = vadd.xlane.f32.xlu1 %v7088_v36 }
0x297f   :  { %v7676_v11 = vpop.xlane.xlu0 %7675 }
0x2980   :  { %v7677_v51 = vrot.slane %v7676_v11, 4 }
0x2982   :  { %v7678_v32 = vadd.f32 %v7677_v51, %v7676_v11 }
0x2984   :  { %v7679_v7 = vrot.slane %v7678_v32, 2 }
0x29c7   :  { %v7090_v13 = vpop.xlane.xlu1 %7089 }
0x29c8   :  { %v7091_v16 = vrot.slane %v7090_v13, 4 }
0x29ca   :  { %v7092_v47 = vadd.f32 %v7091_v16, %v7090_v13  ;;  %v6812_v13 = vsel %vm270_vm0, %v15052_v37, -inf }
0x29cc   :  { %v7093_v62 = vrot.slane %v7092_v47, 2 }
0x29ce   :  { %v7094_v34 = vadd.f32 %v7093_v62, %v7092_v47 }
0x29d0   :  { %v7095_v29 = vrot.slane %v7094_v34, 1 }
0x29d2   :  { %v7096_v4 = vadd.f32 %v7095_v29, %v7094_v34 }
0x29d4   :  { %11949 = vpush %v7096_v4 }
0x2a05   :  { %s11950_s5 = spop %11949 }
0x2a06   :  { %s7098_s20 = smul.f32 0.00032552084, %s11950_s5 }
0x2a08   :  { %s7099_s4 = sadd.f32 1e-05, %s7098_s20 }
0x2a0a   :  { %v7100_v42 = vstv %s7099_s4 }
0x2a0b   :  { %12305 = vrsqrt.f32 %v7100_v42  ;;  %v7680_v42 = vadd.f32 %v7679_v7, %v7678_v32 }
0x2a0d   :  { %v7681_v55 = vrot.slane %v7680_v42, 1 }
0x2a15   :  { %v12306_v58 = vpop.eup %12305 }
0x2a16   :  { %11951 = vpush %v12306_v58  ;;  %v7682_v58 = vadd.f32 %v7681_v55, %v7680_v42 }
0x2a17   :  { %11953 = vpush %v7376_v25 }
0x2a47   :  { %s11952_s28 = spop %11951 }
0x2a48   :  { %v15008_v54 = vstv %s11952_s28  ;;  %s11954_s30 = spop %11953 }
0x2a49   :  { %s7378_s18 = smul.f32 0.00032552084, %s11954_s30  ;;  %v15011_v59 = vmul.f32 %v15008_v54, %v7074_v24 }
0x2a4b   :  { %v7379_v5 = vstv %s7378_s18  ;;  %v7108_v41 = vsel %vm270_vm0, %v15011_v59, -inf }
0x2a4c   :  { %v15020_v21 = vsub.f32 %v14949_v53, %v7379_v5  ;;  %v15023_v23 = vsub.f32 %v14945_v38, %v7379_v5  ;;  %v15026_v60 = vsub.f32 %v14957_v2, %v7379_v5  ;;  %v15029_v24 = vsub.f32 %v14954_v40, %v7379_v5  ;;  %7109 = vmax.xlane.f32.xlu0 %v7108_v41 }
0x2a4d   :  { %v6806_v38 = vsel %vm270_vm0, %v15017_v49, -inf  ;;  %v15041_v2 = vmul.f32 %v15008_v54, %v14974_v57 }
0x2a4e   :  { %v7384_v43 = vmul.f32 %v15020_v21, %v15020_v21  ;;  %v7385_v35 = vmul.f32 %v15023_v23, %v15023_v23  ;;  %v7386_v53 = vmul.f32 %v15026_v60, %v15026_v60  ;;  %v7387_v40 = vmul.f32 %v15029_v24, %v15029_v24 }
0x2a4f   :  { %v7114_v0 = vsel %vm270_vm0, %v15041_v2, -inf }
0x2a50   :  { %6807 = vmax.xlane.f32.xlu0 %v6806_v38  ;;  %v7388_v63 = vsel %vm270_vm0, %v7384_v43, 0.0  ;;  %v7389_v36 = vsel %vm270_vm0, %v7385_v35, 0.0  ;;  %v7391_v30 = vsel %vm270_vm0, %v7386_v53, 0.0  ;;  %v7393_v57 = vsel %vm270_vm0, %v7387_v40, 0.0 }
0x2a51   :  { %v7390_v18 = vadd.f32 %v7389_v36, %v7388_v63 }
0x2a53   :  { %v7392_v50 = vadd.f32 %v7391_v30, %v7390_v18 }
0x2a54   :  { %7115 = vmax.xlane.f32.xlu0 %v7114_v0  ;;  %v7105_v0 = vmul.f32 %v15008_v54, %v14971_v31  ;;  %v15089_v31 = vmul.f32 %v15006_v3, %v14931_v44 }
0x2a55   :  { %v7394_v12 = vadd.f32 %v7393_v57, %v7392_v50  ;;  %v6803_v57 = vmul.f32 %v15006_v3, %v14927_v1 }
0x2a56   :  { %v7111_v50 = vsel %vm270_vm0, %v7105_v0, -inf }
0x2a57   :  { %7395 = vadd.xlane.f32.xlu1 %v7394_v12  ;;  %v6809_v12 = vsel %vm270_vm0, %v6803_v57, -inf }
0x2a58   :  { %6813 = vmax.xlane.f32.xlu0 %v6812_v13  ;;  %v15083_v13 = vmul.f32 %v15008_v54, %v14977_v9 }
0x2ad9   :  { %v7110_v3 = vpop.xlane.xlu0 %7109 }
0x2ada   :  { %v7120_v7 = vsub.f32 %v15011_v59, %v7110_v3 }
0x2add   :  { %v6808_v51 = vpop.xlane.xlu0 %6807 }
0x2ae1   :  { %v7116_v42 = vpop.xlane.xlu0 %7115 }
0x2ae4   :  { %v7396_v16 = vpop.xlane.xlu1 %7395 }
0x2ae5   :  { %v7397_v8 = vrot.slane %v7396_v16, 4 }
0x2ae7   :  { %v7398_v47 = vadd.f32 %v7397_v8, %v7396_v16  ;;  %v7117_v16 = vsel %vm270_vm0, %v15083_v13, -inf  ;;  %v6815_v8 = vsel %vm270_vm0, %v15089_v31, -inf }
0x2ae9   :  { %v7399_v62 = vrot.slane %v7398_v47, 2 }
0x2aeb   :  { %v7400_v34 = vadd.f32 %v7399_v62, %v7398_v47 }
0x2aed   :  { %v7401_v29 = vrot.slane %v7400_v34, 1 }
0x2aef   :  { %v7402_v4 = vadd.f32 %v7401_v29, %v7400_v34 }
0x2af1   :  { %11955 = vpush %v7402_v4 }
0x2b22   :  { %s11956_s8 = spop %11955 }
0x2b23   :  { %s7404_s0 = smul.f32 0.00032552084, %s11956_s8 }
0x2b25   :  { %s7405_s1 = sadd.f32 1e-05, %s7404_s0 }
0x2b27   :  { %v7406_v61 = vstv %s7405_s1 }
0x2b28   :  { %12307 = vrsqrt.f32 %v7406_v61 }
0x2b32   :  { %v12308_v48 = vpop.eup %12307 }
0x2b33   :  { %11957 = vpush %v12308_v48 }
0x2b34   :  { %11959 = vpush %v7682_v58  ;;  %v7124_v58 = vmul.f32 1.442695, %v7120_v7 }
0x2b64   :  { %s15057_s2 = spop %11957 }
0x2b65   :  { %s11960_s22 = spop %11959  ;;  %v7409_v55 = vstv %s15057_s2 }
0x2b66   :  { %s7684_s17 = smul.f32 0.00032552084, %s11960_s22 }
0x2b68   :  { %v7685_v25 = vstv %s7684_s17 }
0x2b69   :  { %v7686_v5 = vsub.f32 %v14993_v56, %v7685_v25  ;;  %v7687_v41 = vsub.f32 %v14989_v22, %v7685_v25  ;;  %v15062_v43 = vsub.f32 %v14999_v52, %v7685_v25  ;;  %v15065_v35 = vsub.f32 %v14997_v14, %v7685_v25 }
0x2b6a   :  { %v6818_v25 = vsub.f32 %v15017_v49, %v6808_v51 }
0x2b6b   :  { %v7690_v53 = vmul.f32 %v7686_v5, %v7686_v5  ;;  %v7691_v38 = vmul.f32 %v7687_v41, %v7687_v41  ;;  %v7692_v40 = vmul.f32 %v15062_v43, %v15062_v43  ;;  %v7693_v63 = vmul.f32 %v15065_v35, %v15065_v35 }
0x2b6c   :  { %v6822_v49 = vmul.f32 1.442695, %v6818_v25 }
0x2b6d   :  { %v7694_v36 = vsel %vm270_vm0, %v7690_v53, 0.0  ;;  %v7695_v56 = vsel %vm270_vm0, %v7691_v38, 0.0  ;;  %v7697_v22 = vsel %vm270_vm0, %v7692_v40, 0.0  ;;  %v7699_v30 = vsel %vm270_vm0, %v7693_v63, 0.0 }
0x2b6e   :  { %v7696_v18 = vadd.f32 %v7695_v56, %v7694_v36 }
0x2b70   :  { %v7698_v52 = vadd.f32 %v7697_v22, %v7696_v18  ;;  %v15105_v18 = vmul.f32 %v7409_v55, %v15023_v23  ;;  %v15108_v22 = vmul.f32 %v7409_v55, %v15020_v21 }
0x2b72   :  { %v7700_v14 = vadd.f32 %v7699_v30, %v7698_v52  ;;  %v7414_v23 = vsel %vm270_vm0, %v15108_v22, -inf }
0x2b74   :  { %7701 = vadd.xlane.f32.xlu1 %v7700_v14 }
0x2b78   :  { %7112 = vmax.xlane.f32.xlu1 %v7111_v50 }
0x2b7c   :  { %6810 = vmax.xlane.f32.xlu1 %v6809_v12 }
0x2b80   :  { %7118 = vmax.xlane.f32.xlu1 %v7117_v16 }
0x2b84   :  { %6816 = vmax.xlane.f32.xlu1 %v6815_v8  ;;  %v15129_v8 = vmul.f32 %v7409_v55, %v15029_v24 }
0x2c01   :  { %v7702_v1 = vpop.xlane.xlu1 %7701 }
0x2c02   :  { %v7703_v47 = vrot.slane %v7702_v1, 4 }
0x2c04   :  { %v7704_v62 = vadd.f32 %v7703_v47, %v7702_v1 }
0x2c05   :  { %v7113_v11 = vpop.xlane.xlu1 %7112 }
0x2c06   :  { %v7705_v34 = vrot.slane %v7704_v62, 2  ;;  %v7121_v61 = vsub.f32 %v7105_v0, %v7113_v11  ;;  %v7417_v0 = vsel %vm270_vm0, %v15105_v18, -inf }
0x2c08   :  { %v7706_v29 = vadd.f32 %v7705_v34, %v7704_v62  ;;  %v7126_v63 = vmul.f32 1.442695, %v7121_v61 }
0x2c09   :  { %v6811_v32 = vpop.xlane.xlu1 %6810 }
0x2c0a   :  { %v7707_v9 = vrot.slane %v7706_v29, 1  ;;  %v6819_v36 = vsub.f32 %v6803_v57, %v6811_v32 }
0x2c0c   :  { %v7708_v54 = vadd.f32 %v7707_v9, %v7706_v29  ;;  %v6824_v52 = vmul.f32 1.442695, %v6819_v36 }
0x2c0d   :  { %v7119_v53 = vpop.xlane.xlu1 %7118 }
0x2c0e   :  { %11961 = vpush %v7708_v54  ;;  %v7123_v30 = vsub.f32 %v15083_v13, %v7119_v53 }
0x2c10   :  { %v7130_v12 = vmul.f32 1.442695, %v7123_v30 }
0x2c11   :  { %v6817_v14 = vpop.xlane.xlu1 %6816 }
0x2c12   :  { %v6821_v13 = vsub.f32 %v15089_v31, %v6817_v14  ;;  %v7423_v31 = vsel %vm270_vm0, %v15129_v8, -inf }
0x2c14   :  { %v6828_v1 = vmul.f32 1.442695, %v6821_v13 }
0x2c3f   :  { %s11962_s10 = spop %11961 }
0x2c40   :  { %s7710_s3 = smul.f32 0.00032552084, %s11962_s10 }
0x2c42   :  { %s7711_s7 = sadd.f32 1e-05, %s7710_s3 }
0x2c44   :  { %v7712_v4 = vstv %s7711_s7 }
0x2c45   :  { %12309 = vrsqrt.f32 %v7712_v4 }
0x2c46   :  { %12311 = vpow2.f32 %v7124_v58 }
0x2c47   :  { %12313 = vpow2.f32 %v7126_v63 }
0x2c48   :  { %12315 = vpow2.f32 %v6822_v49 }
0x2c49   :  { %12317 = vpow2.f32 %v6824_v52 }
0x2c4f   :  { %v12310_v44 = vpop.eup %12309 }
0x2c50   :  { %11963 = vpush %v12310_v44  ;;  %v15134_v47 = vpop.eup %12311 }
0x2c51   :  { %v15140_v34 = vpop.eup %12313  ;;  %v7132_v29 = vsel %vm270_vm0, %v15134_v47, 0.0 }
0x2c52   :  { %v7135_v24 = vsel %vm270_vm0, %v15140_v34, 0.0 }
0x2c81   :  { %s11964_s21 = spop %11963 }
0x2c82   :  { %v7715_v48 = vstv %s11964_s21 }
0x2c83   :  { %v15096_v38 = vmul.f32 %v7715_v48, %v7687_v41  ;;  %v15098_v40 = vmul.f32 %v7715_v48, %v7686_v5  ;;  %v7122_v5 = vsub.f32 %v15041_v2, %v7116_v42  ;;  %v6814_v41 = vpop.xlane.xlu0 %6813  ;;  %v15117_v21 = vmul.f32 %v7715_v48, %v15065_v35 }
0x2c84   :  { %v15120_v50 = vmul.f32 %v7715_v48, %v15062_v43  ;;  %v6820_v57 = vsub.f32 %v15052_v37, %v6814_v41  ;;  %v15132_v43 = vmul.f32 %v7409_v55, %v15026_v60  ;;  %v15142_v60 = vpop.eup %12315 }
0x2c85   :  { %v7723_v56 = vsel %vm270_vm0, %v15096_v38, -inf  ;;  %v7720_v59 = vsel %vm270_vm0, %v15098_v40, -inf  ;;  %v7128_v2 = vmul.f32 1.442695, %v7122_v5  ;;  %v7729_v16 = vsel %vm270_vm0, %v15117_v21, -inf  ;;  %v15148_v9 = vpop.eup %12317 }
0x2c86   :  { %7724 = vmax.xlane.f32.xlu1 %v7723_v56  ;;  %7721 = vmax.xlane.f32.xlu0 %v7720_v59  ;;  %v7726_v35 = vsel %vm270_vm0, %v15120_v50, -inf  ;;  %v6826_v37 = vmul.f32 1.442695, %v6820_v57  ;;  %v7420_v62 = vsel %vm270_vm0, %v15132_v43, -inf  ;;  %v6833_v4 = vsel %vm270_vm0, %v15148_v9, 0.0 }
0x2c87   :  { %12319 = vpow2.f32 %v7128_v2  ;;  %v6830_v44 = vsel %vm270_vm0, %v15142_v60, 0.0 }
0x2c88   :  { %12321 = vpow2.f32 %v7130_v12 }
0x2c89   :  { %12323 = vpow2.f32 %v6826_v37 }
0x2c8a   :  { %7418 = vmax.xlane.f32.xlu1 %v7417_v0  ;;  %7415 = vmax.xlane.f32.xlu0 %v7414_v23  ;;  %12325 = vpow2.f32 %v6828_v1 }
0x2c8e   :  { %7730 = vmax.xlane.f32.xlu1 %v7729_v16  ;;  %7727 = vmax.xlane.f32.xlu0 %v7726_v35 }
0x2c91   :  { %v15150_v54 = vpop.eup %12319 }
0x2c92   :  { %7424 = vmax.xlane.f32.xlu1 %v7423_v31  ;;  %7421 = vmax.xlane.f32.xlu0 %v7420_v62  ;;  %v15156_v3 = vpop.eup %12321  ;;  %v7138_v32 = vsel %vm270_vm0, %v15150_v54, 0.0 }
0x2c93   :  { %v15158_v11 = vpop.eup %12323  ;;  %v7141_v51 = vsel %vm270_vm0, %v15156_v3, 0.0 }
0x2c94   :  { %v15164_v7 = vpop.eup %12325  ;;  %v6836_v42 = vsel %vm270_vm0, %v15158_v11, 0.0 }
0x2c95   :  { %v6839_v61 = vsel %vm270_vm0, %v15164_v7, 0.0 }
0x2c96   :  { %7136 = vadd.xlane.f32.xlu1 %v7135_v24  ;;  %7133 = vadd.xlane.f32.xlu0 %v7132_v29 }
0x2c9a   :  { %6834 = vadd.xlane.f32.xlu1 %v6833_v4  ;;  %6831 = vadd.xlane.f32.xlu0 %v6830_v44 }
0x2c9e   :  { %7142 = vadd.xlane.f32.xlu1 %v7141_v51  ;;  %7139 = vadd.xlane.f32.xlu0 %v7138_v32 }
0x2ca2   :  { %6840 = vadd.xlane.f32.xlu1 %v6839_v61  ;;  %6837 = vadd.xlane.f32.xlu0 %v6836_v42 }
0x2d13   :  { %v7725_v55 = vpop.xlane.xlu1 %7724  ;;  %v7722_v48 = vpop.xlane.xlu0 %7721 }
0x2d14   :  { %v7733_v58 = vsub.f32 %v15096_v38, %v7725_v55  ;;  %v7732_v25 = vsub.f32 %v15098_v40, %v7722_v48 }
0x2d16   :  { %v7738_v53 = vmul.f32 1.442695, %v7733_v58  ;;  %v7736_v63 = vmul.f32 1.442695, %v7732_v25 }
0x2d17   :  { %v7419_v36 = vpop.xlane.xlu1 %7418  ;;  %v7416_v56 = vpop.xlane.xlu0 %7415 }
0x2d18   :  { %12327 = vpow2.f32 %v7738_v53  ;;  %v7427_v59 = vsub.f32 %v15105_v18, %v7419_v36  ;;  %v7426_v49 = vsub.f32 %v15108_v22, %v7416_v56 }
0x2d19   :  { %12329 = vpow2.f32 %v7736_v63 }
0x2d1a   :  { %v7432_v5 = vmul.f32 1.442695, %v7427_v59  ;;  %v7430_v41 = vmul.f32 1.442695, %v7426_v49 }
0x2d1b   :  { %v7731_v52 = vpop.xlane.xlu1 %7730  ;;  %v7728_v30 = vpop.xlane.xlu0 %7727 }
0x2d1c   :  { %12331 = vpow2.f32 %v7432_v5  ;;  %v7735_v14 = vsub.f32 %v15117_v21, %v7731_v52  ;;  %v7734_v38 = vsub.f32 %v15120_v50, %v7728_v30 }
0x2d1d   :  { %12333 = vpow2.f32 %v7430_v41 }
0x2d1e   :  { %v7742_v40 = vmul.f32 1.442695, %v7735_v14  ;;  %v7740_v0 = vmul.f32 1.442695, %v7734_v38 }
0x2d1f   :  { %v7425_v23 = vpop.xlane.xlu1 %7424  ;;  %v7422_v2 = vpop.xlane.xlu0 %7421 }
0x2d20   :  { %12335 = vpow2.f32 %v7742_v40  ;;  %v7429_v18 = vsub.f32 %v15129_v8, %v7425_v23  ;;  %v7428_v22 = vsub.f32 %v15132_v43, %v7422_v2 }
0x2d21   :  { %12337 = vpow2.f32 %v7740_v0 }
0x2d22   :  { %v15178_v57 = vpop.eup %12327  ;;  %v7436_v12 = vmul.f32 1.442695, %v7429_v18  ;;  %v7434_v13 = vmul.f32 1.442695, %v7428_v22 }
0x2d23   :  { %v15180_v16 = vpop.eup %12329  ;;  %v7137_v21 = vpop.xlane.xlu1 %7136  ;;  %v7747_v50 = vsel %vm270_vm0, %v15178_v57, 0.0 }
0x2d24   :  { %v7134_v35 = vpop.xlane.xlu0 %7133  ;;  %12339 = vpow2.f32 %v7436_v12  ;;  %7748 = vadd.xlane.f32.xlu1 %v7747_v50  ;;  %v7744_v37 = vsel %vm270_vm0, %v15180_v16, 0.0 }
0x2d25   :  { %12341 = vpow2.f32 %v7434_v13  ;;  %7745 = vadd.xlane.f32.xlu0 %v7744_v37 }
0x2d26   :  { %v15186_v8 = vpop.eup %12331  ;;  %12343 = vrcp.f32 %v7137_v21 }
0x2d27   :  { %v15188_v43 = vpop.eup %12333  ;;  %12345 = vrcp.f32 %v7134_v35  ;;  %v6835_v1 = vpop.xlane.xlu1 %6834  ;;  %v7441_v62 = vsel %vm270_vm0, %v15186_v8, 0.0  ;;  %v7936_v35 = vld [vmem:[%s16253_s9 + $0x18] sm:$0xff] }
0x2d28   :  { %v6832_v31 = vpop.xlane.xlu0 %6831  ;;  %12347 = vrcp.f32 %v6835_v1  ;;  %7442 = vadd.xlane.f32.xlu1 %v7441_v62  ;;  %v7438_v24 = vsel %vm270_vm0, %v15188_v43, 0.0 }
0x2d29   :  { %12349 = vrcp.f32 %v6832_v31  ;;  %7439 = vadd.xlane.f32.xlu0 %v7438_v24 }
0x2d2a   :  { %v15194_v29 = vpop.eup %12335 }
0x2d2b   :  { %v15196_v4 = vpop.eup %12337  ;;  %v7143_v44 = vpop.xlane.xlu1 %7142  ;;  %v7753_v32 = vsel %vm270_vm0, %v15194_v29, 0.0 }
0x2d2c   :  { %v7140_v51 = vpop.xlane.xlu0 %7139  ;;  %12351 = vrcp.f32 %v7143_v44  ;;  %7754 = vadd.xlane.f32.xlu1 %v7753_v32  ;;  %v7750_v61 = vsel %vm270_vm0, %v15196_v4, 0.0 }
0x2d2d   :  { %12353 = vrcp.f32 %v7140_v51  ;;  %7751 = vadd.xlane.f32.xlu0 %v7750_v61 }
0x2d2e   :  { %v15202_v42 = vpop.eup %12339 }
0x2d2f   :  { %v15204_v55 = vpop.eup %12341  ;;  %v6841_v48 = vpop.xlane.xlu1 %6840  ;;  %v7447_v25 = vsel %vm270_vm0, %v15202_v42, 0.0 }
0x2d30   :  { %v6838_v58 = vpop.xlane.xlu0 %6837  ;;  %v12344_v53 = vpop.eup %12343  ;;  %12355 = vrcp.f32 %v6841_v48  ;;  %7448 = vadd.xlane.f32.xlu1 %v7447_v25  ;;  %v7444_v63 = vsel %vm270_vm0, %v15204_v55, 0.0 }
0x2d31   :  { %v12346_v36 = vpop.eup %12345  ;;  %12357 = vrcp.f32 %v6838_v58  ;;  %7445 = vadd.xlane.f32.xlu0 %v7444_v63  ;;  %v7147_v56 = vmul.f32 %v12344_v53, %v15140_v34 }
0x2d32   :  { %v12348_v59 = vpop.eup %12347  ;;  %v7145_v49 = vmul.f32 %v12346_v36, %v15134_v47 }
0x2d33   :  { %v12350_v5 = vpop.eup %12349  ;;  %v6845_v41 = vmul.f32 %v12348_v59, %v15148_v9 }
0x2d34   :  { %v6843_v52 = vmul.f32 %v12350_v5, %v15142_v60  ;;  %v11738_v30 = vpack.c.bf16 %v7147_v56, %v7145_v49 }
0x2d35   :  { %v7153_v14 = vadd.f32 %v7147_v56, %v6845_v41 }
0x2d36   :  { %v12352_v38 = vpop.eup %12351  ;;  %v7152_v40 = vadd.f32 %v7145_v49, %v6843_v52  ;;  %11740 = vmatprep.subr.msk.bf16.mxu0 %vm13378_vm5, %v11738_v30  ;;  %v11741_v0 = vpack.c.bf16 %v6845_v41, %v6843_v52 }
0x2d37   :  { %v12354_v23 = vpop.eup %12353  ;;  %v7151_v2 = vmul.f32 %v12352_v38, %v15156_v3  ;;  %v7934_v3 = vld [vmem:[%s16253_s9 + $0x8] sm:$0xff] }
0x2d38   :  { %11743 = vmatpush1.bf16.xpose.msk.msra.mxu0 %vm13378_vm5, %v11741_v0  ;;  %v7149_v47 = vmul.f32 %v12354_v23, %v15150_v54  ;;  %v7933_v54 = vld [vmem:[%s16253_s9] sm:$0xff] }
0x2d3a   :  { %v12356_v34 = vpop.eup %12355  ;;  %v11744_v9 = vpack.c.bf16 %v7151_v2, %v7149_v47 }
0x2d3b   :  { %v12358_v18 = vpop.eup %12357  ;;  %v6849_v60 = vmul.f32 %v12356_v34, %v15164_v7  ;;  %v7935_v7 = vld [vmem:[%s16253_s9 + $0x10] sm:$0xff] }
0x2d3c   :  { %v6847_v22 = vmul.f32 %v12358_v18, %v15158_v11  ;;  %11746 = vmatprep.subr.msk.bf16.mxu0 %vm13378_vm5, %v11744_v9  ;;  %v11763_v11 = vpack.c.bf16 %v7934_v3, %v7933_v54  ;;  %v11767_v50 = vpack.c.bf16 %v7936_v35, %v7935_v7  ;;  %v8037_v54 = vld [vmem:[#allocation14 + $0x10] sm:$0xff]  ;;  %v8039_v3 = vld [vmem:[#allocation14 + $0x20] sm:$0xff]  ;;  %v8042_v35 = vld [vmem:[#allocation14 + $0x38] sm:$0xff] }
0x2d3d   :  { %v7155_v12 = vadd.f32 %v7151_v2, %v6849_v60  ;;  %v8041_v7 = vld [vmem:[#allocation14 + $0x30] sm:$0xff] }
0x2d3e   :  { %v7154_v13 = vadd.f32 %v7149_v47, %v6847_v22  ;;  %v11747_v21 = vpack.c.bf16 %v6849_v60, %v6847_v22  ;;  %11765 = vmatpush3.bf16.xpose.msk.msra.mxu1 %vm13785_vm8, %v11763_v11  ;;  %v8040_v11 = vld [vmem:[#allocation14 + $0x28] sm:$0xff] }
0x2d3f   :  { %11766 = vmatprep.subr.bf16.mxu1 %v12901_v26 }
0x2d40   :  { %11749 = vmatpush1.bf16.xpose.msk.msra.mxu0 %vm13378_vm5, %v11747_v21  ;;  %v8036_v21 = vld [vmem:[#allocation14 + $0x8] sm:$0xff] }
0x2d46   :  { %11769 = vmatpush3.bf16.xpose.msk.msra.mxu1 %vm13785_vm8, %v11767_v50  ;;  %v8488_v50 = vld [vmem:[#allocation14 + $0x40] sm:$0xff] }
0x2d47   :  { %7857 = vmatmul.mubr.f32.vlgmr.msra.gmra.mrb[104].mxu0 %v13245_v19 }
0x2d48   :  { %7926 = vmatprep.mubr.f32.mxu0 %v13249_v20 }
0x2db1   :  { %v7749_v37 = vpop.xlane.xlu1 %7748 }
0x2db2   :  { %12359 = vrcp.f32 %v7749_v37  ;;  %v7746_v1 = vpop.xlane.xlu0 %7745  ;;  %v8489_v37 = vld [vmem:[#allocation14 + $0x48] sm:$0xff] }
0x2db3   :  { %12361 = vrcp.f32 %v7746_v1  ;;  %v8490_v1 = vld [vmem:[#allocation14 + $0x50] sm:$0xff] }
0x2db5   :  { %v7443_v31 = vpop.xlane.xlu1 %7442 }
0x2db6   :  { %12363 = vrcp.f32 %v7443_v31  ;;  %v7440_v62 = vpop.xlane.xlu0 %7439  ;;  %v8491_v31 = vld [vmem:[#allocation14 + $0x58] sm:$0xff] }
0x2db7   :  { %12365 = vrcp.f32 %v7440_v62  ;;  %v8492_v62 = vld [vmem:[#allocation14 + $0x60] sm:$0xff] }
0x2db9   :  { %v7755_v24 = vpop.xlane.xlu1 %7754 }
0x2dba   :  { %12367 = vrcp.f32 %v7755_v24  ;;  %v7752_v44 = vpop.xlane.xlu0 %7751  ;;  %v8493_v24 = vld [vmem:[#allocation14 + $0x68] sm:$0xff] }
0x2dbb   :  { %12369 = vrcp.f32 %v7752_v44  ;;  %v8494_v44 = vld [vmem:[#allocation14 + $0x70] sm:$0xff] }
0x2dbc   :  { %v12360_v51 = vpop.eup %12359 }
0x2dbd   :  { %v12362_v32 = vpop.eup %12361  ;;  %v7449_v61 = vpop.xlane.xlu1 %7448  ;;  %v7759_v48 = vmul.f32 %v12360_v51, %v15178_v57  ;;  %v8495_v51 = vld [vmem:[#allocation14 + $0x78] sm:$0xff] }
0x2dbe   :  { %12371 = vrcp.f32 %v7449_v61  ;;  %v7446_v45 = vpop.xlane.xlu0 %7445  ;;  %v7757_v58 = vmul.f32 %v12362_v32, %v15180_v16  ;;  %v8946_v32 = vld [vmem:[#allocation14 + $0x80] sm:$0xff]  ;;  %v8947_v61 = vld [vmem:[#allocation14 + $0x88] sm:$0xff] }
0x2dbf   :  { %12373 = vrcp.f32 %v7446_v45  ;;  %v8949_v45 = vld [vmem:[#allocation14 + $0x98] sm:$0xff] }
0x2dc0   :  { %v12364_v25 = vpop.eup %12363  ;;  %v11750_v53 = vpack.c.bf16 %v7759_v48, %v7757_v58 }
0x2dc1   :  { %v12366_v63 = vpop.eup %12365  ;;  %v7453_v36 = vmul.f32 %v12364_v25, %v15186_v8  ;;  %v8951_v25 = vld [vmem:[#allocation14 + $0xa8] sm:$0xff] }
0x2dc2   :  { %v7451_v56 = vmul.f32 %v12366_v63, %v15188_v43  ;;  %11752 = vmatprep.subr.msk.bf16.mxu0 %vm13378_vm5, %v11750_v53  ;;  %v8952_v53 = vld [vmem:[#allocation14 + $0xb0] sm:$0xff]  ;;  %v8953_v63 = vld [vmem:[#allocation14 + $0xb8] sm:$0xff] }
0x2dc3   :  { %v7459_v59 = vadd.f32 %v7453_v36, %v7153_v14 }
0x2dc4   :  { %v12368_v49 = vpop.eup %12367  ;;  %v7458_v5 = vadd.f32 %v7451_v56, %v7152_v40  ;;  %v11753_v41 = vpack.c.bf16 %v7453_v36, %v7451_v56  ;;  %v9404_v36 = vld [vmem:[#allocation14 + $0xc0] sm:$0xff]  ;;  %v9405_v56 = vld [vmem:[#allocation14 + $0xc8] sm:$0xff] }
0x2dc5   :  { %v12370_v57 = vpop.eup %12369  ;;  %v7765_v52 = vadd.f32 %v7759_v48, %v7459_v59  ;;  %v7763_v30 = vmul.f32 %v12368_v49, %v15194_v29  ;;  %v8948_v48 = vld [vmem:[#allocation14 + $0x90] sm:$0xff]  ;;  %v9407_v49 = vld [vmem:[#allocation14 + $0xd8] sm:$0xff] }
0x2dc6   :  { %v7764_v16 = vadd.f32 %v7757_v58, %v7458_v5  ;;  %11755 = vmatpush1.bf16.xpose.msk.msra.mxu0 %vm13378_vm5, %v11753_v41  ;;  %v7761_v38 = vmul.f32 %v12370_v57, %v15196_v4  ;;  %v8950_v58 = vld [vmem:[#allocation14 + $0xa0] sm:$0xff]  ;;  %v9406_v59 = vld [vmem:[#allocation14 + $0xd0] sm:$0xff]  ;;  %v9409_v41 = vld [vmem:[#allocation14 + $0xe8] sm:$0xff] }
0x2dc7   :  { %v8025_v8 = vmul.f32 0.25, %v7765_v52  ;;  %v9408_v5 = vld [vmem:[#allocation14 + $0xe0] sm:$0xff]  ;;  %v9410_v57 = vld [vmem:[#allocation14 + $0xf0] sm:$0xff]  ;;  %v9411_v52 = vld [vmem:[#allocation14 + $0xf8] sm:$0xff] }
0x2dc8   :  { %v12372_v0 = vpop.eup %12371  ;;  %v8024_v43 = vmul.f32 0.25, %v7764_v16  ;;  %v11756_v23 = vpack.c.bf16 %v7763_v30, %v7761_v38 }
0x2dc9   :  { %v12374_v2 = vpop.eup %12373  ;;  %v7457_v14 = vmul.f32 %v12372_v0, %v15202_v42  ;;  %8030 = vst.msk [vmem:[#allocation26 + $0x28] sm:$0xff] %vm270_vm0, %v8025_v8 }
0x2dca   :  { %v7455_v40 = vmul.f32 %v12374_v2, %v15204_v55  ;;  %8029 = vst.msk [vmem:[#allocation26 + $0x20] sm:$0xff] %vm270_vm0, %v8024_v43  ;;  %11758 = vmatprep.subr.msk.bf16.mxu0 %vm13378_vm5, %v11756_v23  ;;  %v8034_v55 = vld [vmem:[#allocation8 + $0x8] sm:$0xff] }
0x2dcb   :  { %v7461_v29 = vadd.f32 %v7457_v14, %v7155_v12  ;;  %11383 = vmatprep.subr.msk.mxu1 %vm1146_vm4, %v8034_v55 }
0x2dcc   :  { %v7460_v47 = vadd.f32 %v7455_v40, %v7154_v13  ;;  %v11759_v34 = vpack.c.bf16 %v7457_v14, %v7455_v40  ;;  %v8035_v13 = vld [vmem:[#allocation14] sm:$0xff] }
0x2dcd   :  { %v7767_v4 = vadd.f32 %v7763_v30, %v7461_v29 }
0x2dce   :  { %v7766_v9 = vadd.f32 %v7761_v38, %v7460_v47  ;;  %11761 = vmatpush1.bf16.xpose.msk.msra.mxu0 %vm13378_vm5, %v11759_v34 }
0x2dcf   :  { %v8027_v18 = vmul.f32 0.25, %v7767_v4  ;;  %11397 = vmatprep.subr.mxu0 %v13238_v15 }
0x2dd0   :  { %v8026_v42 = vmul.f32 0.25, %v7766_v9 }
0x2dd1   :  { %8032 = vst.msk [vmem:[#allocation26 + $0x38] sm:$0xff] %vm270_vm0, %v8027_v18 }
0x2dd2   :  { %8031 = vst.msk [vmem:[#allocation26 + $0x30] sm:$0xff] %vm270_vm0, %v8026_v42 }
0x2dd5   :  { %7927 = vmatmul.mubr.f32.vlgmr.msra.gmra.mrb[104].mxu0 %v13262_v28 }
0x2dd6   :  { %11398 = vmatpush3.msra.mxu0 %v13238_v15  ;;  %v8038_v15 = vld [vmem:[#allocation14 + $0x18] sm:$0xff] }
0x2dd7   :  { %11425 = vmatprep.subr.mxu0 %v14731_v10 }
0x2ea8   :  { %v7928_v60 = vpop.f32.mrb[104].mxu0 }
0x2ea9   :  { %v7932_v22 = vmul.f32 0.25, %v7928_v60  ;;  %v7930_v12 = vpop.f32.mrb[105].mxu0 }
0x2eab   :  { %11381 = vmatmul.mubr.msk.f32.vlgmr.msra.gmra.mrb[88].mxu1 %vm907_vm3, %v7932_v22 }
0x2eac   :  { %11384 = vmatpush3.xpose.msk.msra.mxu1 %vm1146_vm4, %v8034_v55  ;;  %11385 = vmatprep.mubr.msk.f32.mxu1 %vm1146_vm4, %v8035_v13 }
0x2ead   :  { %11411 = vmatprep.subr.msk.mxu1 %vm1146_vm4, %v8034_v55 }
0x2eaf   :  { %11386 = vmatmul.mubr.msk.f32.vlgmr.msra.gmra.mrb[90].mxu1 %vm1146_vm4, %v8036_v21 }
0x2eb0   :  { %11388 = vmatprep.mubr.msk.f32.mxu1 %vm1146_vm4, %v8037_v54  ;;  %11412 = vmatpush3.xpose.msk.msra.mxu1 %vm1146_vm4, %v8034_v55 }
0x2eb1   :  { %11439 = vmatprep.subr.msk.mxu1 %vm1146_vm4, %v8034_v55 }
0x2eb3   :  { %11389 = vmatmul.mubr.msk.f32.gmra.mrb[92].mxu1 %vm1146_vm4, %v8038_v15 }
0x2eb4   :  { %11391 = vmatprep.mubr.msk.f32.mxu1 %vm1146_vm4, %v8039_v3 }
0x2eb7   :  { %11392 = vmatmul.mubr.msk.f32.gmra.mrb[94].mxu1 %vm1146_vm4, %v8040_v11 }
0x2eb8   :  { %11394 = vmatprep.mubr.msk.f32.mxu1 %vm1146_vm4, %v8041_v7 }
0x2ebb   :  { %11395 = vmatmul.mubr.msk.f32.gmra.mrb[96].mxu1 %vm1146_vm4, %v8042_v35 }
0x2ebc   :  { %11413 = vmatprep.mubr.msk.f32.mxu1 %vm1146_vm4, %v8488_v50 }
0x2ebf   :  { %11414 = vmatmul.mubr.msk.f32.vlgmr.msra.gmra.mrb[98].mxu1 %vm1146_vm4, %v8489_v37 }
0x2ec0   :  { %11416 = vmatprep.mubr.msk.f32.mxu1 %vm1146_vm4, %v8490_v1  ;;  %11440 = vmatpush3.xpose.msk.msra.mxu1 %vm1146_vm4, %v8034_v55 }
0x2ec1   :  { %11467 = vmatprep.subr.msk.mxu1 %vm1146_vm4, %v8034_v55 }
0x2ec3   :  { %11417 = vmatmul.mubr.msk.f32.gmra.mrb[100].mxu1 %vm1146_vm4, %v8491_v31 }
0x2ec4   :  { %11419 = vmatprep.mubr.msk.f32.mxu1 %vm1146_vm4, %v8492_v62 }
0x2ec7   :  { %11420 = vmatmul.mubr.msk.f32.gmra.mrb[102].mxu1 %vm1146_vm4, %v8493_v24 }
0x2ec8   :  { %11422 = vmatprep.mubr.msk.f32.mxu1 %vm1146_vm4, %v8494_v44 }
0x2ecb   :  { %11423 = vmatmul.mubr.msk.f32.gmra.mrb[104].mxu1 %vm1146_vm4, %v8495_v51 }
0x2ecc   :  { %11441 = vmatprep.mubr.msk.f32.mxu1 %vm1146_vm4, %v8946_v32 }
0x2ecf   :  { %11442 = vmatmul.mubr.msk.f32.vlgmr.msra.gmra.mrb[106].mxu1 %vm1146_vm4, %v8947_v61 }
0x2ed0   :  { %11444 = vmatprep.mubr.msk.f32.mxu1 %vm1146_vm4, %v8948_v48  ;;  %11468 = vmatpush3.xpose.msk.msra.mxu1 %vm1146_vm4, %v8034_v55 }
0x2ed3   :  { %11445 = vmatmul.mubr.msk.f32.gmra.mrb[108].mxu1 %vm1146_vm4, %v8949_v45 }
0x2ed4   :  { %11447 = vmatprep.mubr.msk.f32.mxu1 %vm1146_vm4, %v8950_v58 }
0x2ed7   :  { %11448 = vmatmul.mubr.msk.f32.gmra.mrb[110].mxu1 %vm1146_vm4, %v8951_v25 }
0x2ed8   :  { %11450 = vmatprep.mubr.msk.f32.mxu1 %vm1146_vm4, %v8952_v53 }
0x2edb   :  { %11451 = vmatmul.mubr.msk.f32.gmra.mrb[112].mxu1 %vm1146_vm4, %v8953_v63 }
0x2edc   :  { %11469 = vmatprep.mubr.msk.f32.mxu1 %vm1146_vm4, %v9404_v36 }
0x2edf   :  { %11470 = vmatmul.mubr.msk.f32.vlgmr.msra.gmra.mrb[114].mxu1 %vm1146_vm4, %v9405_v56 }
0x2ee0   :  { %11472 = vmatprep.mubr.msk.f32.mxu1 %vm1146_vm4, %v9406_v59 }
0x2ee3   :  { %11473 = vmatmul.mubr.msk.f32.gmra.mrb[116].mxu1 %vm1146_vm4, %v9407_v49 }
0x2ee4   :  { %11475 = vmatprep.mubr.msk.f32.mxu1 %vm1146_vm4, %v9408_v5 }
0x2ee7   :  { %11476 = vmatmul.mubr.msk.f32.gmra.mrb[118].mxu1 %vm1146_vm4, %v9409_v41 }
0x2ee8   :  { %11478 = vmatprep.mubr.msk.f32.mxu1 %vm1146_vm4, %v9410_v57 }
0x2eeb   :  { %11479 = vmatmul.mubr.msk.f32.gmra.mrb[120].mxu1 %vm1146_vm4, %v9411_v52 }
0x2eec   :  { %9958 = vmatprep.mubr.f32.mxu1 %v13260_v27 }
0x2f7e   :  { %v8018_v30 = vpop.f32.mrb[88].mxu1 }
0x2f7f   :  { %8023 = vst.msk [vmem:[#allocation21 + $0x8] sm:$0xff] %vm907_vm3, %v8018_v30  ;;  %v11382_v16 = vpop.f32.mrb[89].mxu1 }
0x2f82   :  { %v11387_v38 = vpop.f32.mrb[90].mxu1 }
0x2f83   :  { %v8136_v8 = vpop.f32.mrb[91].mxu1 }
0x2f84   :  { %11399 = vmatprep.mubr.msk.f32.mxu0 %vm671_vm2, %v8136_v8 }
0x2f85   :  { %11400 = vmatmul.mubr.msk.f32.vlgmr.msra.gmra.mrb[106].mxu0 %vm671_vm2, %v11387_v38 }
0x2f86   :  { %11426 = vmatpush3.msra.mxu0 %v14731_v10  ;;  %v11390_v0 = vpop.f32.mrb[92].mxu1 }
0x2f87   :  { %11453 = vmatprep.subr.mxu0 %v14746_v46  ;;  %v8146_v43 = vpop.f32.mrb[93].mxu1 }
0x2f88   :  { %11402 = vmatprep.mubr.msk.f32.mxu0 %vm671_vm2, %v8146_v43 }
0x2f89   :  { %11403 = vmatmul.mubr.msk.f32.gmra.mrb[108].mxu0 %vm671_vm2, %v11390_v0 }
0x2f8a   :  { %v11393_v27 = vpop.f32.mrb[94].mxu1 }
0x2f8b   :  { %v8156_v23 = vpop.f32.mrb[95].mxu1 }
0x2f8c   :  { %11405 = vmatprep.mubr.msk.f32.mxu0 %vm671_vm2, %v8156_v23 }
0x2f8d   :  { %11406 = vmatmul.mubr.msk.f32.gmra.mrb[110].mxu0 %vm671_vm2, %v11393_v27 }
0x2f8e   :  { %v11396_v2 = vpop.f32.mrb[96].mxu1 }
0x2f8f   :  { %v8166_v14 = vpop.f32.mrb[97].mxu1 }
0x2f90   :  { %11408 = vmatprep.mubr.msk.f32.mxu0 %vm671_vm2, %v8166_v14 }
0x2f91   :  { %11409 = vmatmul.mubr.msk.f32.gmra.mrb[112].mxu0 %vm671_vm2, %v11396_v2 }
0x2f92   :  { %v11415_v10 = vpop.f32.mrb[98].mxu1 }
0x2f93   :  { %v8586_v40 = vpop.f32.mrb[99].mxu1 }
0x2f94   :  { %11427 = vmatprep.mubr.msk.f32.mxu0 %vm671_vm2, %v8586_v40 }
0x2f95   :  { %11428 = vmatmul.mubr.msk.f32.vlgmr.msra.gmra.mrb[114].mxu0 %vm671_vm2, %v11415_v10 }
0x2f96   :  { %11454 = vmatpush3.msra.mxu0 %v14746_v46  ;;  %v11418_v29 = vpop.f32.mrb[100].mxu1 }
0x2f97   :  { %11481 = vmatprep.subr.mxu0 %v14766_v6  ;;  %v8596_v47 = vpop.f32.mrb[101].mxu1 }
0x2f98   :  { %11430 = vmatprep.mubr.msk.f32.mxu0 %vm671_vm2, %v8596_v47 }
0x2f99   :  { %11431 = vmatmul.mubr.msk.f32.gmra.mrb[116].mxu0 %vm671_vm2, %v11418_v29 }
0x2f9a   :  { %v11421_v34 = vpop.f32.mrb[102].mxu1 }
0x2f9b   :  { %v8606_v4 = vpop.f32.mrb[103].mxu1 }
0x2f9c   :  { %11433 = vmatprep.mubr.msk.f32.mxu0 %vm671_vm2, %v8606_v4 }
0x2f9d   :  { %11434 = vmatmul.mubr.msk.f32.gmra.mrb[118].mxu0 %vm671_vm2, %v11421_v34 }
0x2f9e   :  { %v11424_v9 = vpop.f32.mrb[104].mxu1 }
0x2f9f   :  { %v8616_v18 = vpop.f32.mrb[105].mxu1 }
0x2fa0   :  { %11436 = vmatprep.mubr.msk.f32.mxu0 %vm671_vm2, %v8616_v18 }
0x2fa1   :  { %11437 = vmatmul.mubr.msk.f32.gmra.mrb[120].mxu0 %vm671_vm2, %v11424_v9 }
0x2fa2   :  { %v11443_v46 = vpop.f32.mrb[106].mxu1 }
0x2fa3   :  { %v9044_v42 = vpop.f32.mrb[107].mxu1 }
0x2fa4   :  { %11455 = vmatprep.mubr.msk.f32.mxu0 %vm671_vm2, %v9044_v42 }
0x2fa5   :  { %11456 = vmatmul.mubr.msk.f32.vlgmr.msra.gmra.mrb[122].mxu0 %vm671_vm2, %v11443_v46 }
0x2fa6   :  { %11482 = vmatpush3.msra.mxu0 %v14766_v6  ;;  %v11446_v45 = vpop.f32.mrb[108].mxu1 }
0x2fa7   :  { %11818 = vmatprep.subr.bf16.mxu0 %v12901_v26  ;;  %v9054_v53 = vpop.f32.mrb[109].mxu1 }
0x2fa8   :  { %11458 = vmatprep.mubr.msk.f32.mxu0 %vm671_vm2, %v9054_v53 }
0x2fa9   :  { %11459 = vmatmul.mubr.msk.f32.gmra.mrb[124].mxu0 %vm671_vm2, %v11446_v45 }
0x2faa   :  { %v11449_v56 = vpop.f32.mrb[110].mxu1 }
0x2fab   :  { %v9064_v5 = vpop.f32.mrb[111].mxu1 }
0x2fac   :  { %11461 = vmatprep.mubr.msk.f32.mxu0 %vm671_vm2, %v9064_v5 }
0x2fad   :  { %11462 = vmatmul.mubr.msk.f32.gmra.mrb[126].mxu0 %vm671_vm2, %v11449_v56 }
0x2fae   :  { %v11452_v30 = vpop.f32.mrb[112].mxu1 }
0x2faf   :  { %v9074_v8 = vpop.f32.mrb[113].mxu1 }
0x2fb0   :  { %11464 = vmatprep.mubr.msk.f32.mxu0 %vm671_vm2, %v9074_v8 }
0x2fb1   :  { %11465 = vmatmul.mubr.msk.f32.gmra.mrb[128].mxu0 %vm671_vm2, %v11452_v30 }
0x3058   :  { %v15336_v55 = vpop.f32.mrb[106].mxu0 }
0x3059   :  { %v8305_v60 = vsel %vm270_vm0, %v15336_v55, 0.0  ;;  %v15340_v22 = vpop.f32.mrb[107].mxu0 }
0x305a   :  { %v8304_v12 = vsel %vm270_vm0, %v15340_v22, 0.0 }
0x305b   :  { %v8306_v13 = vadd.f32 %v8305_v60, %v8304_v12 }
0x305c   :  { %v15344_v21 = vpop.f32.mrb[108].mxu0 }
0x305d   :  { %v15346_v54 = vpop.f32.mrb[109].mxu0  ;;  %v8309_v3 = vsel %vm270_vm0, %v15344_v21, 0.0 }
0x305e   :  { %v8307_v6 = vsel %vm270_vm0, %v15346_v54, 0.0 }
0x305f   :  { %v8308_v15 = vadd.f32 %v8307_v6, %v8306_v13 }
0x3060   :  { %v15352_v11 = vpop.f32.mrb[110].mxu0 }
0x3061   :  { %v15354_v7 = vpop.f32.mrb[111].mxu0  ;;  %v8310_v35 = vadd.f32 %v8309_v3, %v8308_v15  ;;  %v8313_v1 = vsel %vm270_vm0, %v15352_v11, 0.0 }
0x3062   :  { %v8311_v50 = vsel %vm270_vm0, %v15354_v7, 0.0 }
0x3063   :  { %v8312_v37 = vadd.f32 %v8311_v50, %v8310_v35 }
0x3064   :  { %v15360_v31 = vpop.f32.mrb[112].mxu0 }
0x3065   :  { %v15362_v62 = vpop.f32.mrb[113].mxu0  ;;  %v8314_v24 = vadd.f32 %v8313_v1, %v8312_v37  ;;  %v8317_v32 = vsel %vm270_vm0, %v15360_v31, 0.0 }
0x3066   :  { %v8315_v44 = vsel %vm270_vm0, %v15362_v62, 0.0 }
0x3067   :  { %v8316_v51 = vadd.f32 %v8315_v44, %v8314_v24 }
0x3068   :  { %v15368_v48 = vpop.f32.mrb[114].mxu0 }
0x3069   :  { %v8318_v61 = vadd.f32 %v8317_v32, %v8316_v51  ;;  %v8755_v58 = vsel %vm270_vm0, %v15368_v48, 0.0  ;;  %v15372_v25 = vpop.f32.mrb[115].mxu0 }
0x306a   :  { %v8754_v63 = vsel %vm270_vm0, %v15372_v25, 0.0 }
0x306b   :  { %8319 = vadd.xlane.f32.xlu0 %v8318_v61  ;;  %v8756_v59 = vadd.f32 %v8755_v58, %v8754_v63 }
0x306c   :  { %v15376_v36 = vpop.f32.mrb[116].mxu0 }
0x306d   :  { %v15379_v49 = vpop.f32.mrb[117].mxu0  ;;  %v8759_v41 = vsel %vm270_vm0, %v15376_v36, 0.0 }
0x306e   :  { %v8757_v57 = vsel %vm270_vm0, %v15379_v49, 0.0 }
0x306f   :  { %v8758_v16 = vadd.f32 %v8757_v57, %v8756_v59 }
0x3070   :  { %v15386_v52 = vpop.f32.mrb[118].mxu0 }
0x3071   :  { %v15389_v38 = vpop.f32.mrb[119].mxu0  ;;  %v8760_v27 = vadd.f32 %v8759_v41, %v8758_v16  ;;  %v8763_v2 = vsel %vm270_vm0, %v15386_v52, 0.0 }
0x3072   :  { %v8761_v0 = vsel %vm270_vm0, %v15389_v38, 0.0 }
0x3073   :  { %v8762_v14 = vadd.f32 %v8761_v0, %v8760_v27 }
0x3074   :  { %v15393_v43 = vpop.f32.mrb[120].mxu0 }
0x3075   :  { %v15395_v23 = vpop.f32.mrb[121].mxu0  ;;  %v8764_v40 = vadd.f32 %v8763_v2, %v8762_v14  ;;  %v8767_v29 = vsel %vm270_vm0, %v15393_v43, 0.0 }
0x3076   :  { %v8765_v10 = vsel %vm270_vm0, %v15395_v23, 0.0 }
0x3077   :  { %v8766_v47 = vadd.f32 %v8765_v10, %v8764_v40 }
0x3079   :  { %v8768_v34 = vadd.f32 %v8767_v29, %v8766_v47  ;;  %v11471_v29 = vpop.f32.mrb[114].mxu1  ;;  %v15454_v47 = vpop.f32.mrb[122].mxu0 }
0x307b   :  { %8769 = vadd.xlane.f32.xlu0 %v8768_v34  ;;  %v9502_v34 = vpop.f32.mrb[115].mxu1 }
0x307c   :  { %11483 = vmatprep.mubr.msk.f32.mxu0 %vm671_vm2, %v9502_v34 }
0x307d   :  { %11484 = vmatmul.mubr.msk.f32.vlgmr.msra.gmra.mrb[130].mxu0 %vm671_vm2, %v11471_v29 }
0x30f8   :  { %v8320_v4 = vpop.xlane.xlu0 %8319 }
0x30f9   :  { %v8321_v9 = vrot.slane %v8320_v4, 4 }
0x30fb   :  { %v8322_v18 = vadd.f32 %v8321_v9, %v8320_v4  ;;  %v9213_v4 = vsel %vm270_vm0, %v15454_v47, 0.0  ;;  %v15458_v9 = vpop.f32.mrb[123].mxu0 }
0x30fd   :  { %v8323_v46 = vrot.slane %v8322_v18, 2 }
0x30ff   :  { %v8324_v42 = vadd.f32 %v8323_v46, %v8322_v18  ;;  %v11474_v18 = vpop.f32.mrb[116].mxu1  ;;  %v9212_v46 = vsel %vm270_vm0, %v15458_v9, 0.0 }
0x3101   :  { %v8325_v60 = vrot.slane %v8324_v42, 1 }
0x3103   :  { %v8326_v12 = vadd.f32 %v8325_v60, %v8324_v42  ;;  %v15463_v42 = vpop.f32.mrb[124].mxu0  ;;  %v9214_v60 = vadd.f32 %v9213_v4, %v9212_v46 }
0x3105   :  { %11965 = vpush %v8326_v12  ;;  %v9512_v12 = vpop.f32.mrb[117].mxu1 }
0x3106   :  { %11486 = vmatprep.mubr.msk.f32.mxu0 %vm671_vm2, %v9512_v12 }
0x3107   :  { %11487 = vmatmul.mubr.msk.f32.gmra.mrb[132].mxu0 %vm671_vm2, %v11474_v18 }
0x3136   :  { %s11966_s9 = spop %11965 }
0x3137   :  { %s8328_s4 = smul.f32 0.00016276042, %s11966_s9 }
0x3139   :  { %v8329_v13 = vstv %s8328_s4  ;;  %s12903_s4 = smov [#allocation21]  }
0x313a   :  { %v15407_v6 = vsub.f32 %v15340_v22, %v8329_v13  ;;  %v15410_v15 = vsub.f32 %v15336_v55, %v8329_v13  ;;  %v15413_v3 = vsub.f32 %v15346_v54, %v8329_v13  ;;  %v15416_v35 = vsub.f32 %v15344_v21, %v8329_v13 }
0x313b   :  { %v15419_v50 = vsub.f32 %v15354_v7, %v8329_v13  ;;  %v15428_v55 = vsub.f32 %v15352_v11, %v8329_v13  ;;  %v15435_v44 = vsub.f32 %v15362_v62, %v8329_v13  ;;  %v15441_v11 = vsub.f32 %v15360_v31, %v8329_v13  ;;  %v15466_v13 = vpop.f32.mrb[125].mxu0 }
0x313c   :  { %v8338_v37 = vmul.f32 %v15407_v6, %v15407_v6  ;;  %v8339_v1 = vmul.f32 %v15410_v15, %v15410_v15  ;;  %v8340_v22 = vmul.f32 %v15413_v3, %v15413_v3  ;;  %v8341_v54 = vmul.f32 %v15416_v35, %v15416_v35 }
0x313d   :  { %v8342_v51 = vmul.f32 %v15419_v50, %v15419_v50  ;;  %v8343_v45 = vmul.f32 %v15428_v55, %v15428_v55  ;;  %v8344_v63 = vmul.f32 %v15435_v44, %v15435_v44  ;;  %v8345_v59 = vmul.f32 %v15441_v11, %v15441_v11 }
0x313e   :  { %v8346_v21 = vsel %vm270_vm0, %v8338_v37, 0.0  ;;  %v8347_v7 = vsel %vm270_vm0, %v8339_v1, 0.0  ;;  %v8349_v32 = vsel %vm270_vm0, %v8340_v22, 0.0  ;;  %v8351_v58 = vsel %vm270_vm0, %v8341_v54, 0.0  ;;  %v11477_v22 = vpop.f32.mrb[118].mxu1  ;;  %v15473_v54 = vpop.f32.mrb[126].mxu0 }
0x313f   :  { %v8348_v24 = vadd.f32 %v8347_v7, %v8346_v21  ;;  %v8353_v62 = vsel %vm270_vm0, %v8342_v51, 0.0  ;;  %v8355_v5 = vsel %vm270_vm0, %v8343_v45, 0.0  ;;  %v8357_v31 = vsel %vm270_vm0, %v8344_v63, 0.0  ;;  %v9522_v7 = vpop.f32.mrb[119].mxu1 }
0x3140   :  { %v8359_v30 = vsel %vm270_vm0, %v8345_v59, 0.0  ;;  %v9217_v37 = vsel %vm270_vm0, %v15463_v42, 0.0  ;;  %v9215_v1 = vsel %vm270_vm0, %v15466_v13, 0.0  ;;  %v9221_v63 = vsel %vm270_vm0, %v15473_v54, 0.0  ;;  %11489 = vmatprep.mubr.msk.f32.mxu0 %vm671_vm2, %v9522_v7 }
0x3141   :  { %v8350_v61 = vadd.f32 %v8349_v32, %v8348_v24  ;;  %v9216_v21 = vadd.f32 %v9215_v1, %v9214_v60  ;;  %v15475_v24 = vpop.f32.mrb[127].mxu0  ;;  %v11480_v32 = vpop.f32.mrb[120].mxu1  ;;  %11490 = vmatmul.mubr.msk.f32.gmra.mrb[134].mxu0 %vm671_vm2, %v11477_v22 }
0x3142   :  { %v9219_v51 = vsel %vm270_vm0, %v15475_v24, 0.0 }
0x3143   :  { %v8352_v53 = vadd.f32 %v8351_v58, %v8350_v61  ;;  %v15479_v61 = vpop.f32.mrb[128].mxu0  ;;  %v9218_v45 = vadd.f32 %v9217_v37, %v9216_v21  ;;  %v9532_v58 = vpop.f32.mrb[121].mxu1 }
0x3144   :  { %11492 = vmatprep.mubr.msk.f32.mxu0 %vm671_vm2, %v9532_v58 }
0x3145   :  { %v8354_v56 = vadd.f32 %v8353_v62, %v8352_v53  ;;  %v15482_v53 = vpop.f32.mrb[129].mxu0  ;;  %v9220_v62 = vadd.f32 %v9219_v51, %v9218_v45  ;;  %11493 = vmatmul.mubr.msk.f32.gmra.mrb[136].mxu0 %vm671_vm2, %v11480_v32 }
0x3146   :  { %11511 = vmatprep.mubr.msk.f32.mxu0 %vm12902_vm7, %v16277_v17 }
0x3147   :  { %v8356_v41 = vadd.f32 %v8355_v5, %v8354_v56  ;;  %v9223_v56 = vsel %vm270_vm0, %v15482_v53, 0.0  ;;  %v9222_v59 = vadd.f32 %v9221_v63, %v9220_v62  ;;  %v9225_v5 = vsel %vm270_vm0, %v15479_v61, 0.0 }
0x3149   :  { %v8358_v57 = vadd.f32 %v8357_v31, %v8356_v41  ;;  %v9224_v41 = vadd.f32 %v9223_v56, %v9222_v59 }
0x314b   :  { %v8360_v16 = vadd.f32 %v8359_v30, %v8358_v57  ;;  %v9226_v31 = vadd.f32 %v9225_v5, %v9224_v41  ;;  %v8770_v57 = vpop.xlane.xlu0 %8769 }
0x314c   :  { %v8771_v30 = vrot.slane %v8770_v57, 4 }
0x314d   :  { %8361 = vadd.xlane.f32.xlu1 %v8360_v16  ;;  %9227 = vadd.xlane.f32.xlu0 %v9226_v31 }
0x314e   :  { %v8772_v16 = vadd.f32 %v8771_v30, %v8770_v57 }
0x3150   :  { %v15546_v31 = vpop.f32.mrb[130].mxu0 }
0x3151   :  { %v9671_v57 = vsel %vm270_vm0, %v15546_v31, 0.0  ;;  %v15550_v30 = vpop.f32.mrb[131].mxu0 }
0x31da   :  { %v8362_v8 = vpop.xlane.xlu1 %8361 }
0x31db   :  { %v8363_v0 = vrot.slane %v8362_v8, 4 }
0x31dd   :  { %v8364_v27 = vadd.f32 %v8363_v0, %v8362_v8  ;;  %v8773_v8 = vrot.slane %v8772_v16, 2 }
0x31df   :  { %v8365_v2 = vrot.slane %v8364_v27, 2 }
0x31e1   :  { %v8366_v14 = vadd.f32 %v8365_v2, %v8364_v27  ;;  %v8774_v27 = vadd.f32 %v8773_v8, %v8772_v16  ;;  %v9670_v16 = vsel %vm270_vm0, %v15550_v30, 0.0  ;;  %v15554_v8 = vpop.f32.mrb[132].mxu0 }
0x31e3   :  { %v8367_v10 = vrot.slane %v8366_v14, 1  ;;  %v8775_v2 = vrot.slane %v8774_v27, 1 }
0x31e5   :  { %v8368_v40 = vadd.f32 %v8367_v10, %v8366_v14  ;;  %v8776_v10 = vadd.f32 %v8775_v2, %v8774_v27  ;;  %v15556_v27 = vpop.f32.mrb[133].mxu0  ;;  %v9675_v2 = vsel %vm270_vm0, %v15554_v8, 0.0 }
0x31e7   :  { %11967 = vpush %v8368_v40 }
0x3218   :  { %s11968_s28 = spop %11967 }
0x3219   :  { %s8370_s30 = smul.f32 0.00016276042, %s11968_s28  ;;  %s10176_s28 = sshll.u32 %s12903_s4, 4  ;;  %s10177_s28 = int_to_ptr.vmem [resolvable:$true] %s10176_s28 }
0x321a   :  { %p12736_p11 = scmp.lt.s32.totalorder %s10177_s28, %s10177_s28 }
0x321b   :  { %s8371_s18 = sadd.f32 1e-05, %s8370_s30  ;;  %s12904_s30 = smov [#allocation24]  }
0x321d   :  { %v8372_v0 = vstv %s8371_s18  ;;  %s10200_s18 = sshll.u32 %s12904_s30, 4  ;;  %s16139_s18 = int_to_ptr.vmem [resolvable:$true] %s10200_s18 }
0x321e   :  { %12375 = vrsqrt.f32 %v8372_v0  ;;  %v9672_v0 = vadd.f32 %v9671_v57, %v9670_v16 }
0x3228   :  { %v12376_v14 = vpop.eup %12375 }
0x3229   :  { %11969 = vpush %v12376_v14  ;;  %v9673_v14 = vsel %vm270_vm0, %v15556_v27, 0.0 }
0x322a   :  { %11971 = vpush %v8776_v10  ;;  %v15562_v10 = vpop.f32.mrb[134].mxu0 }
0x325a   :  { %s15496_s8 = spop %11969 }
0x325b   :  { %s11972_s0 = spop %11971 }
0x325c   :  { %s8778_s1 = smul.f32 0.00016276042, %s11972_s0 }
0x325e   :  { %v8779_v17 = vstv %s8778_s1 }
0x325f   :  { %v15499_v40 = vsub.f32 %v15372_v25, %v8779_v17  ;;  %v15502_v29 = vsub.f32 %v15368_v48, %v8779_v17  ;;  %v15505_v34 = vsub.f32 %v15379_v49, %v8779_v17  ;;  %v15508_v4 = vsub.f32 %v15376_v36, %v8779_v17 }
0x3260   :  { %v15511_v18 = vsub.f32 %v15389_v38, %v8779_v17  ;;  %v15520_v48 = vsub.f32 %v15386_v52, %v8779_v17  ;;  %v15527_v37 = vsub.f32 %v15395_v23, %v8779_v17  ;;  %v15533_v52 = vsub.f32 %v15393_v43, %v8779_v17 }
0x3261   :  { %v8788_v46 = vmul.f32 %v15499_v40, %v15499_v40  ;;  %v8789_v60 = vmul.f32 %v15502_v29, %v15502_v29  ;;  %v8790_v25 = vmul.f32 %v15505_v34, %v15505_v34  ;;  %v8791_v49 = vmul.f32 %v15508_v4, %v15508_v4 }
0x3262   :  { %v8792_v1 = vmul.f32 %v15511_v18, %v15511_v18  ;;  %v8793_v7 = vmul.f32 %v15520_v48, %v15520_v48  ;;  %v8794_v45 = vmul.f32 %v15527_v37, %v15527_v37  ;;  %v8795_v63 = vmul.f32 %v15533_v52, %v15533_v52 }
0x3263   :  { %v8796_v36 = vsel %vm270_vm0, %v8788_v46, 0.0  ;;  %v8797_v38 = vsel %vm270_vm0, %v8789_v60, 0.0  ;;  %v8799_v22 = vsel %vm270_vm0, %v8790_v25, 0.0  ;;  %v8801_v51 = vsel %vm270_vm0, %v8791_v49, 0.0  ;;  %v15564_v46 = vpop.f32.mrb[135].mxu0 }
0x3264   :  { %v8798_v12 = vadd.f32 %v8797_v38, %v8796_v36  ;;  %v8803_v23 = vsel %vm270_vm0, %v8792_v1, 0.0  ;;  %v8805_v62 = vsel %vm270_vm0, %v8793_v7, 0.0  ;;  %v8807_v43 = vsel %vm270_vm0, %v8794_v45, 0.0  ;;  %v15568_v25 = vpop.f32.mrb[136].mxu0 }
0x3265   :  { %v8809_v5 = vsel %vm270_vm0, %v8795_v63, 0.0  ;;  %v9674_v17 = vadd.f32 %v9673_v14, %v9672_v0  ;;  %v9677_v60 = vsel %vm270_vm0, %v15564_v46, 0.0  ;;  %v15570_v36 = vpop.f32.mrb[137].mxu0  ;;  %v9679_v38 = vsel %vm270_vm0, %v15562_v10, 0.0 }
0x3266   :  { %v8800_v21 = vadd.f32 %v8799_v22, %v8798_v12  ;;  %v9681_v1 = vsel %vm270_vm0, %v15570_v36, 0.0  ;;  %v9683_v7 = vsel %vm270_vm0, %v15568_v25, 0.0 }
0x3267   :  { %v9676_v49 = vadd.f32 %v9675_v2, %v9674_v17  ;;  %v15579_v17 = vstv %s15496_s8  ;;  %s12731_s8 = scalar_lea.vmem %s10177_s28, 256 }
0x3268   :  { %v8802_v32 = vadd.f32 %v8801_v51, %v8800_v21  ;;  %p12732_p10 = scmp.ne.s32.totalorder %s10177_s28, %s12731_s8  ;;  %p12737_p12 = scmp.lt.s32.totalorder %s12731_s8, %s12731_s8 }
0x3269   :  { %v9678_v12 = vadd.f32 %v9677_v60, %v9676_v49 }
0x326a   :  { %v8804_v58 = vadd.f32 %v8803_v23, %v8802_v32  ;;  %p12738_p13 = por %p12737_p12, %p12736_p11 }
0x326b   :  { %v9680_v22 = vadd.f32 %v9679_v38, %v9678_v12 }
0x326c   :  { %v8806_v56 = vadd.f32 %v8805_v62, %v8804_v58  ;;  %p12739_p0 = pnand %p12738_p13, %p12732_p10 }
0x326d   :  { %v9682_v21 = vadd.f32 %v9681_v1, %v9680_v22  ;;  %v15591_v1 = vmul.f32 %v15579_v17, %v15407_v6 }
0x326e   :  { %v8808_v59 = vadd.f32 %v8807_v43, %v8806_v56  ;;  %v9228_v43 = vpop.xlane.xlu0 %9227 }
0x326f   :  { %v9684_v45 = vadd.f32 %v9683_v7, %v9682_v21 }
0x3270   :  { %v8810_v41 = vadd.f32 %v8809_v5, %v8808_v59  ;;  %v9229_v59 = vrot.slane %v9228_v43, 4 }
0x3271   :  { %9685 = vadd.xlane.f32.xlu0 %v9684_v45 }
0x3272   :  { %8811 = vadd.xlane.f32.xlu1 %v8810_v41  ;;  %v9230_v5 = vadd.f32 %v9229_v59, %v9228_v43 }
0x3274   :  { %v9231_v41 = vrot.slane %v9230_v5, 2 }
0x3276   :  { %v9232_v16 = vadd.f32 %v9231_v41, %v9230_v5 }
0x3278   :  { %v9233_v0 = vrot.slane %v9232_v16, 1 }
0x327a   :  { %v9234_v14 = vadd.f32 %v9233_v0, %v9232_v16 }
0x32ff   :  { %v8812_v51 = vpop.xlane.xlu1 %8811 }
0x3300   :  { %v8813_v32 = vrot.slane %v8812_v51, 4 }
0x3302   :  { %v8814_v23 = vadd.f32 %v8813_v32, %v8812_v51 }
0x3304   :  { %v8815_v58 = vrot.slane %v8814_v23, 2 }
0x3306   :  { %v8816_v63 = vadd.f32 %v8815_v58, %v8814_v23 }
0x3308   :  { %v8817_v62 = vrot.slane %v8816_v63, 1 }
0x330a   :  { %v8818_v56 = vadd.f32 %v8817_v62, %v8816_v63 }
0x330c   :  { %11973 = vpush %v8818_v56  ;;  %v15637_v56 = vmul.f32 %v15579_v17, %v15413_v3 }
0x330e   :  { %v8390_v3 = vsel %vm270_vm0, %v15637_v56, -inf }
0x333d   :  { %s11974_s2 = spop %11973 }
0x333e   :  { %s8820_s22 = smul.f32 0.00016276042, %s11974_s2 }
0x3340   :  { %s8821_s17 = sadd.f32 1e-05, %s8820_s22 }
0x3342   :  { %v8822_v57 = vstv %s8821_s17 }
0x3343   :  { %12377 = vrsqrt.f32 %v8822_v57 }
0x334d   :  { %v12378_v2 = vpop.eup %12377 }
0x334e   :  { %11975 = vpush %v12378_v2 }
0x334f   :  { %11977 = vpush %v9234_v14 }
0x337f   :  { %s11976_s10 = spop %11975 }
0x3380   :  { %v15581_v60 = vstv %s11976_s10  ;;  %s11978_s3 = spop %11977 }
0x3381   :  { %s9236_s7 = smul.f32 0.00016276042, %s11978_s3  ;;  %v15585_v49 = vmul.f32 %v15581_v60, %v15499_v40  ;;  %v15618_v32 = vmul.f32 %v15581_v60, %v15505_v34  ;;  %v15652_v0 = vmul.f32 %v15581_v60, %v15511_v18 }
0x3383   :  { %v9237_v38 = vstv %s9236_s7  ;;  %v8834_v12 = vsel %vm270_vm0, %v15585_v49, -inf }
0x3384   :  { %v15594_v22 = vsub.f32 %v15458_v9, %v9237_v38  ;;  %v15597_v21 = vsub.f32 %v15454_v47, %v9237_v38  ;;  %v15600_v7 = vsub.f32 %v15466_v13, %v9237_v38  ;;  %8835 = vmax.xlane.f32.xlu0 %v8834_v12  ;;  %v15603_v40 = vsub.f32 %v15463_v42, %v9237_v38 }
0x3385   :  { %v15606_v51 = vsub.f32 %v15475_v24, %v9237_v38  ;;  %v8384_v13 = vsel %vm270_vm0, %v15591_v1, -inf  ;;  %v15621_v42 = vsub.f32 %v15473_v54, %v9237_v38  ;;  %v15628_v63 = vsub.f32 %v15482_v53, %v9237_v38 }
0x3386   :  { %v9246_v6 = vmul.f32 %v15594_v22, %v15594_v22  ;;  %v9247_v9 = vmul.f32 %v15597_v21, %v15597_v21  ;;  %v9248_v47 = vmul.f32 %v15600_v7, %v15600_v7  ;;  %v9249_v24 = vmul.f32 %v15603_v40, %v15603_v40 }
0x3387   :  { %v9250_v62 = vmul.f32 %v15606_v51, %v15606_v51  ;;  %v8840_v54 = vsel %vm270_vm0, %v15618_v32, -inf  ;;  %v15640_v59 = vsub.f32 %v15479_v61, %v9237_v38  ;;  %v9251_v53 = vmul.f32 %v15621_v42, %v15621_v42 }
0x3388   :  { %8385 = vmax.xlane.f32.xlu0 %v8384_v13  ;;  %v9254_v45 = vsel %vm270_vm0, %v9246_v6, 0.0  ;;  %v9255_v23 = vsel %vm270_vm0, %v9247_v9, 0.0  ;;  %v9257_v34 = vsel %vm270_vm0, %v9248_v47, 0.0  ;;  %v9259_v5 = vsel %vm270_vm0, %v9249_v24, 0.0 }
0x3389   :  { %v9256_v58 = vadd.f32 %v9255_v23, %v9254_v45  ;;  %v9252_v57 = vmul.f32 %v15628_v63, %v15628_v63  ;;  %v9261_v16 = vsel %vm270_vm0, %v9250_v62, 0.0  ;;  %v9253_v2 = vmul.f32 %v15640_v59, %v15640_v59 }
0x338a   :  { %v9263_v14 = vsel %vm270_vm0, %v9251_v53, 0.0  ;;  %v8846_v6 = vsel %vm270_vm0, %v15652_v0, -inf  ;;  %v15662_v47 = vmul.f32 %v15579_v17, %v15419_v50  ;;  %v15669_v45 = vmul.f32 %v15581_v60, %v15527_v37 }
0x338b   :  { %v9258_v43 = vadd.f32 %v9257_v34, %v9256_v58  ;;  %v9265_v12 = vsel %vm270_vm0, %v9252_v57, 0.0  ;;  %v9267_v18 = vsel %vm270_vm0, %v9253_v2, 0.0  ;;  %v15675_v50 = vmul.f32 %v15579_v17, %v15435_v44 }
0x338c   :  { %8841 = vmax.xlane.f32.xlu0 %v8840_v54  ;;  %v8396_v24 = vsel %vm270_vm0, %v15662_v47, -inf  ;;  %v8852_v23 = vsel %vm270_vm0, %v15669_v45, -inf }
0x338d   :  { %v9260_v41 = vadd.f32 %v9259_v5, %v9258_v43  ;;  %v8402_v58 = vsel %vm270_vm0, %v15675_v50, -inf }
0x338f   :  { %v9262_v61 = vadd.f32 %v9261_v16, %v9260_v41  ;;  %v9686_v41 = vpop.xlane.xlu0 %9685 }
0x3390   :  { %8391 = vmax.xlane.f32.xlu0 %v8390_v3  ;;  %v9687_v57 = vrot.slane %v9686_v41, 4 }
0x3391   :  { %v9264_v38 = vadd.f32 %v9263_v14, %v9262_v61 }
0x3392   :  { %v9688_v16 = vadd.f32 %v9687_v57, %v9686_v41 }
0x3393   :  { %v9266_v9 = vadd.f32 %v9265_v12, %v9264_v38 }
0x3394   :  { %8847 = vmax.xlane.f32.xlu0 %v8846_v6  ;;  %v9689_v44 = vrot.slane %v9688_v16, 2 }
0x3395   :  { %v9268_v13 = vadd.f32 %v9267_v18, %v9266_v9 }
0x3396   :  { %v9690_v61 = vadd.f32 %v9689_v44, %v9688_v16 }
0x3397   :  { %9269 = vadd.xlane.f32.xlu1 %v9268_v13 }
0x3398   :  { %8397 = vmax.xlane.f32.xlu0 %v8396_v24  ;;  %v9691_v2 = vrot.slane %v9690_v61, 1 }
0x339a   :  { %v9692_v38 = vadd.f32 %v9691_v2, %v9690_v61 }
0x339c   :  { %8853 = vmax.xlane.f32.xlu0 %v8852_v23 }
0x33a0   :  { %8403 = vmax.xlane.f32.xlu0 %v8402_v58 }
0x3424   :  { %v9270_v62 = vpop.xlane.xlu1 %9269 }
0x3425   :  { %v9271_v34 = vrot.slane %v9270_v62, 4 }
0x3427   :  { %v9272_v54 = vadd.f32 %v9271_v34, %v9270_v62 }
0x3429   :  { %v9273_v43 = vrot.slane %v9272_v54, 2 }
0x342b   :  { %v9274_v53 = vadd.f32 %v9273_v43, %v9272_v54 }
0x342d   :  { %v9275_v37 = vrot.slane %v9274_v53, 1 }
0x342f   :  { %v9276_v5 = vadd.f32 %v9275_v37, %v9274_v53 }
0x3431   :  { %11979 = vpush %v9276_v5 }
0x3462   :  { %s11980_s21 = spop %11979 }
0x3463   :  { %s9278_s26 = smul.f32 0.00016276042, %s11980_s21 }
0x3465   :  { %s9279_s24 = sadd.f32 1e-05, %s9278_s26 }
0x3467   :  { %v9280_v3 = vstv %s9279_s24 }
0x3468   :  { %12379 = vrsqrt.f32 %v9280_v3 }
0x3472   :  { %v12380_v14 = vpop.eup %12379 }
0x3473   :  { %11981 = vpush %v12380_v14 }
0x3474   :  { %11983 = vpush %v9692_v38 }
0x34a4   :  { %s15679_s6 = spop %11981 }
0x34a5   :  { %s11984_s25 = spop %11983 }
0x34a6   :  { %s9694_s27 = smul.f32 0.00016276042, %s11984_s25 }
0x34a8   :  { %v9695_v12 = vstv %s9694_s27 }
0x34a9   :  { %v15682_v6 = vsub.f32 %v15550_v30, %v9695_v12  ;;  %v15685_v9 = vsub.f32 %v15546_v31, %v9695_v12  ;;  %v15688_v18 = vsub.f32 %v15556_v27, %v9695_v12  ;;  %v15691_v13 = vsub.f32 %v15554_v8, %v9695_v12 }
0x34aa   :  { %v15694_v24 = vsub.f32 %v15564_v46, %v9695_v12  ;;  %v15703_v31 = vsub.f32 %v15562_v10, %v9695_v12  ;;  %v15710_v34 = vsub.f32 %v15570_v36, %v9695_v12  ;;  %v15716_v10 = vsub.f32 %v15568_v25, %v9695_v12 }
0x34ab   :  { %v9704_v23 = vmul.f32 %v15682_v6, %v15682_v6  ;;  %v9705_v58 = vmul.f32 %v15685_v9, %v15685_v9  ;;  %v9706_v30 = vmul.f32 %v15688_v18, %v15688_v18  ;;  %v9707_v27 = vmul.f32 %v15691_v13, %v15691_v13 }
0x34ac   :  { %v9708_v54 = vmul.f32 %v15694_v24, %v15694_v24  ;;  %v9709_v37 = vmul.f32 %v15703_v31, %v15703_v31  ;;  %v9710_v57 = vmul.f32 %v15710_v34, %v15710_v34  ;;  %v9711_v44 = vmul.f32 %v15716_v10, %v15716_v10 }
0x34ad   :  { %v9712_v8 = vsel %vm270_vm0, %v9704_v23, 0.0  ;;  %v9713_v46 = vsel %vm270_vm0, %v9705_v58, 0.0  ;;  %v9715_v43 = vsel %vm270_vm0, %v9706_v30, 0.0  ;;  %v9717_v5 = vsel %vm270_vm0, %v9707_v27, 0.0 }
0x34ae   :  { %v9714_v62 = vadd.f32 %v9713_v46, %v9712_v8  ;;  %v9719_v36 = vsel %vm270_vm0, %v9708_v54, 0.0  ;;  %v9721_v3 = vsel %vm270_vm0, %v9709_v37, 0.0  ;;  %v9723_v25 = vsel %vm270_vm0, %v9710_v57, 0.0 }
0x34af   :  { %v9725_v14 = vsel %vm270_vm0, %v9711_v44, 0.0  ;;  %v15731_v12 = vmul.f32 %v15581_v60, %v15502_v29  ;;  %v15737_v58 = vmul.f32 %v15579_v17, %v15410_v15  ;;  %v15743_v27 = vmul.f32 %v15581_v60, %v15508_v4 }
0x34b0   :  { %v9716_v53 = vadd.f32 %v9715_v43, %v9714_v62  ;;  %v15749_v8 = vmul.f32 %v15579_v17, %v15416_v35  ;;  %v15755_v46 = vmul.f32 %v15581_v60, %v15520_v48  ;;  %v15761_v62 = vmul.f32 %v15579_v17, %v15428_v55 }
0x34b1   :  { %v8837_v23 = vsel %vm270_vm0, %v15731_v12, -inf  ;;  %v8387_v30 = vsel %vm270_vm0, %v15737_v58, -inf  ;;  %v8843_v29 = vsel %vm270_vm0, %v15743_v27, -inf  ;;  %v15767_v54 = vmul.f32 %v15581_v60, %v15533_v52 }
0x34b2   :  { %v9718_v41 = vadd.f32 %v9717_v5, %v9716_v53  ;;  %v8393_v15 = vsel %vm270_vm0, %v15749_v8, -inf  ;;  %v8849_v4 = vsel %vm270_vm0, %v15755_v46, -inf  ;;  %v8399_v35 = vsel %vm270_vm0, %v15761_v62, -inf }
0x34b3   :  { %v8855_v48 = vsel %vm270_vm0, %v15767_v54, -inf  ;;  %v15773_v43 = vmul.f32 %v15579_v17, %v15441_v11  ;;  %v8836_v17 = vpop.xlane.xlu0 %8835  ;;  %v15778_v44 = vstv %s15679_s6 }
0x34b4   :  { %v9720_v16 = vadd.f32 %v9719_v36, %v9718_v41 }
0x34b5   :  { %v8405_v55 = vsel %vm270_vm0, %v15773_v43, -inf }
0x34b6   :  { %v9722_v61 = vadd.f32 %v9721_v3, %v9720_v16 }
0x34b8   :  { %v9724_v2 = vadd.f32 %v9723_v25, %v9722_v61 }
0x34ba   :  { %v9726_v38 = vadd.f32 %v9725_v14, %v9724_v2  ;;  %v8386_v2 = vpop.xlane.xlu0 %8385 }
0x34bc   :  { %9727 = vadd.xlane.f32.xlu1 %v9726_v38 }
0x34c0   :  { %8838 = vmax.xlane.f32.xlu1 %v8837_v23 }
0x34c4   :  { %8388 = vmax.xlane.f32.xlu1 %v8387_v30  ;;  %v15792_v30 = vmul.f32 %v15778_v44, %v15597_v21  ;;  %v8842_v21 = vpop.xlane.xlu0 %8841 }
0x34c8   :  { %8844 = vmax.xlane.f32.xlu1 %v8843_v29  ;;  %v15796_v29 = vmul.f32 %v15778_v44, %v15594_v22 }
0x34cc   :  { %8394 = vmax.xlane.f32.xlu1 %v8393_v15 }
0x34d0   :  { %8850 = vmax.xlane.f32.xlu1 %v8849_v4 }
0x34d4   :  { %8400 = vmax.xlane.f32.xlu1 %v8399_v35 }
0x34d8   :  { %8856 = vmax.xlane.f32.xlu1 %v8855_v48 }
0x34dc   :  { %8406 = vmax.xlane.f32.xlu1 %v8405_v55  ;;  %v15814_v55 = vmul.f32 %v15778_v44, %v15603_v40 }
0x3549   :  { %v9728_v53 = vpop.xlane.xlu1 %9727 }
0x354a   :  { %v9729_v37 = vrot.slane %v9728_v53, 4 }
0x354c   :  { %v9730_v5 = vadd.f32 %v9729_v37, %v9728_v53  ;;  %v8392_v53 = vpop.xlane.xlu0 %8391 }
0x354d   :  { %v8839_v16 = vpop.xlane.xlu1 %8838 }
0x354e   :  { %v9731_v41 = vrot.slane %v9730_v5, 2  ;;  %v8859_v37 = vsub.f32 %v15731_v12, %v8839_v16 }
0x3550   :  { %v9732_v52 = vadd.f32 %v9731_v41, %v9730_v5  ;;  %v9301_v41 = vsel %vm270_vm0, %v15814_v55, -inf }
0x3551   :  { %v8389_v14 = vpop.xlane.xlu1 %8388 }
0x3552   :  { %v9733_v60 = vrot.slane %v9732_v52, 1  ;;  %v8409_v12 = vsub.f32 %v15737_v58, %v8389_v14  ;;  %v8860_v58 = vsub.f32 %v15618_v32, %v8842_v21 }
0x3554   :  { %v9734_v57 = vadd.f32 %v9733_v60, %v9732_v52  ;;  %v8870_v32 = vmul.f32 1.442695, %v8860_v58 }
0x3555   :  { %v8845_v35 = vpop.xlane.xlu1 %8844 }
0x3556   :  { %11985 = vpush %v9734_v57  ;;  %v8868_v57 = vmul.f32 1.442695, %v8859_v37  ;;  %v8861_v14 = vsub.f32 %v15743_v27, %v8845_v35 }
0x3558   :  { %v8872_v27 = vmul.f32 1.442695, %v8861_v14 }
0x3559   :  { %v8395_v5 = vpop.xlane.xlu1 %8394 }
0x355a   :  { %v8411_v21 = vsub.f32 %v15749_v8, %v8395_v5 }
0x355d   :  { %v8851_v16 = vpop.xlane.xlu1 %8850 }
0x3561   :  { %v8401_v35 = vpop.xlane.xlu1 %8400 }
0x3587   :  { %s11986_s29 = spop %11985 }
0x3588   :  { %s9736_s5 = smul.f32 0.00016276042, %s11986_s29 }
0x358a   :  { %s9737_s20 = sadd.f32 1e-05, %s9736_s5 }
0x358c   :  { %v9738_v36 = vstv %s9737_s20 }
0x358d   :  { %12381 = vrsqrt.f32 %v9738_v36 }
0x3597   :  { %v12382_v11 = vpop.eup %12381 }
0x3598   :  { %11987 = vpush %v12382_v11 }
0x35c9   :  { %s11988_s9 = spop %11987 }
0x35ca   :  { %v9741_v3 = vstv %s11988_s9 }
0x35cb   :  { %v15781_v61 = vmul.f32 %v9741_v3, %v15685_v9  ;;  %v15784_v25 = vmul.f32 %v9741_v3, %v15682_v6  ;;  %v9295_v6 = vsel %vm270_vm0, %v15792_v30, -inf  ;;  %v9292_v9 = vsel %vm270_vm0, %v15796_v29, -inf }
0x35cc   :  { %v15803_v15 = vmul.f32 %v9741_v3, %v15691_v13  ;;  %v15806_v4 = vmul.f32 %v9741_v3, %v15688_v18  ;;  %v15818_v13 = vmul.f32 %v15778_v44, %v15600_v7  ;;  %v8858_v18 = vsub.f32 %v15585_v49, %v8836_v17  ;;  %v8848_v17 = vpop.xlane.xlu0 %8847 }
0x35cd   :  { %v9753_v38 = vsel %vm270_vm0, %v15781_v61, -inf  ;;  %v9750_v23 = vsel %vm270_vm0, %v15784_v25, -inf  ;;  %v15827_v40 = vmul.f32 %v9741_v3, %v15703_v31  ;;  %v15830_v7 = vmul.f32 %v9741_v3, %v15694_v24 }
0x35ce   :  { %9754 = vmax.xlane.f32.xlu1 %v9753_v38  ;;  %9751 = vmax.xlane.f32.xlu0 %v9750_v23  ;;  %v9759_v22 = vsel %vm270_vm0, %v15803_v15, -inf  ;;  %v9756_v48 = vsel %vm270_vm0, %v15806_v4, -inf  ;;  %v9298_v52 = vsel %vm270_vm0, %v15818_v13, -inf  ;;  %v8866_v60 = vmul.f32 1.442695, %v8858_v18 }
0x35cf   :  { %v8408_v49 = vsub.f32 %v15591_v1, %v8386_v2  ;;  %v9765_v36 = vsel %vm270_vm0, %v15827_v40, -inf  ;;  %v9762_v11 = vsel %vm270_vm0, %v15830_v7, -inf  ;;  %v15840_v31 = vmul.f32 %v15778_v44, %v15621_v42 }
0x35d0   :  { %v15844_v24 = vmul.f32 %v15778_v44, %v15606_v51  ;;  %12383 = vpow2.f32 %v8866_v60  ;;  %v8418_v2 = vmul.f32 1.442695, %v8409_v12  ;;  %v15853_v51 = vmul.f32 %v9741_v3, %v15716_v10 }
0x35d1   :  { %v8416_v1 = vmul.f32 1.442695, %v8408_v49  ;;  %12385 = vpow2.f32 %v8868_v57  ;;  %v9307_v42 = vsel %vm270_vm0, %v15840_v31, -inf  ;;  %v15856_v23 = vmul.f32 %v9741_v3, %v15710_v34 }
0x35d2   :  { %9296 = vmax.xlane.f32.xlu1 %v9295_v6  ;;  %9293 = vmax.xlane.f32.xlu0 %v9292_v9  ;;  %v9304_v38 = vsel %vm270_vm0, %v15844_v24, -inf  ;;  %v8410_v6 = vsub.f32 %v15637_v56, %v8392_v53  ;;  %v8398_v9 = vpop.xlane.xlu0 %8397  ;;  %v15866_v34 = vmul.f32 %v15778_v44, %v15640_v59  ;;  %v15870_v3 = vmul.f32 %v15778_v44, %v15628_v63 }
0x35d3   :  { %12387 = vpow2.f32 %v8416_v1  ;;  %v9768_v10 = vsel %vm270_vm0, %v15856_v23, -inf  ;;  %v8862_v8 = vsub.f32 %v15652_v0, %v8848_v17  ;;  %v8863_v18 = vsub.f32 %v15755_v46, %v8851_v16 }
0x35d4   :  { %12389 = vpow2.f32 %v8418_v2  ;;  %v8420_v56 = vmul.f32 1.442695, %v8410_v6  ;;  %v9313_v59 = vsel %vm270_vm0, %v15866_v34, -inf  ;;  %v9310_v37 = vsel %vm270_vm0, %v15870_v3, -inf }
0x35d5   :  { %12391 = vpow2.f32 %v8870_v32  ;;  %v8874_v5 = vmul.f32 1.442695, %v8862_v8  ;;  %v8412_v0 = vsub.f32 %v15662_v47, %v8398_v9  ;;  %v8876_v46 = vmul.f32 1.442695, %v8863_v18 }
0x35d6   :  { %9760 = vmax.xlane.f32.xlu1 %v9759_v22  ;;  %9757 = vmax.xlane.f32.xlu0 %v9756_v48  ;;  %v9771_v22 = vsel %vm270_vm0, %v15853_v51, -inf  ;;  %12393 = vpow2.f32 %v8872_v27  ;;  %v8422_v48 = vmul.f32 1.442695, %v8411_v21  ;;  %v8854_v44 = vpop.xlane.xlu0 %8853 }
0x35d7   :  { %12395 = vpow2.f32 %v8420_v56  ;;  %v8864_v47 = vsub.f32 %v15669_v45, %v8854_v44 }
0x35d8   :  { %12397 = vpow2.f32 %v8422_v48 }
0x35d9   :  { %12399 = vpow2.f32 %v8874_v5  ;;  %v8878_v45 = vmul.f32 1.442695, %v8864_v47 }
0x35da   :  { %9302 = vmax.xlane.f32.xlu1 %v9301_v41  ;;  %9299 = vmax.xlane.f32.xlu0 %v9298_v52  ;;  %v15874_v53 = vpop.eup %12383  ;;  %v8857_v41 = vpop.xlane.xlu1 %8856  ;;  %v8413_v52 = vsub.f32 %v15761_v62, %v8401_v35  ;;  %12401 = vpow2.f32 %v8876_v46 }
0x35db   :  { %v15880_v63 = vpop.eup %12385  ;;  %v8882_v57 = vsel %vm270_vm0, %v15874_v53, 0.0  ;;  %v8865_v62 = vsub.f32 %v15767_v54, %v8857_v41 }
0x35dc   :  { %v8885_v49 = vsel %vm270_vm0, %v15880_v63, 0.0  ;;  %v8426_v17 = vmul.f32 1.442695, %v8413_v52 }
0x35dd   :  { %v15884_v60 = vpop.eup %12387 }
0x35de   :  { %9766 = vmax.xlane.f32.xlu1 %v9765_v36  ;;  %9763 = vmax.xlane.f32.xlu0 %v9762_v11  ;;  %v15890_v12 = vpop.eup %12389  ;;  %v8424_v36 = vmul.f32 1.442695, %v8412_v0  ;;  %v8404_v11 = vpop.xlane.xlu0 %8403  ;;  %v8432_v2 = vsel %vm270_vm0, %v15884_v60, 0.0 }
0x35df   :  { %v15894_v1 = vpop.eup %12391  ;;  %v8407_v58 = vpop.xlane.xlu1 %8406  ;;  %v8435_v16 = vsel %vm270_vm0, %v15890_v12, 0.0 }
0x35e0   :  { %v15900_v14 = vpop.eup %12393  ;;  %12403 = vpow2.f32 %v8424_v36  ;;  %v8415_v54 = vsub.f32 %v15773_v43, %v8407_v58  ;;  %v8888_v9 = vsel %vm270_vm0, %v15894_v1, 0.0 }
0x35e1   :  { %12405 = vpow2.f32 %v8426_v17  ;;  %v15904_v32 = vpop.eup %12395  ;;  %v8891_v6 = vsel %vm270_vm0, %v15900_v14, 0.0 }
0x35e2   :  { %9308 = vmax.xlane.f32.xlu1 %v9307_v42  ;;  %9305 = vmax.xlane.f32.xlu0 %v9304_v38  ;;  %v8414_v42 = vsub.f32 %v15675_v50, %v8404_v11  ;;  %v8880_v38 = vmul.f32 1.442695, %v8865_v62  ;;  %v15910_v27 = vpop.eup %12397  ;;  %12407 = vpow2.f32 %v8878_v45  ;;  %v8430_v50 = vmul.f32 1.442695, %v8415_v54 }
0x35e3   :  { %v15912_v35 = vpop.eup %12399  ;;  %v8441_v43 = vsel %vm270_vm0, %v15910_v27, 0.0 }
0x35e4   :  { %v8428_v21 = vmul.f32 1.442695, %v8414_v42  ;;  %12409 = vpow2.f32 %v8880_v38  ;;  %v8894_v48 = vsel %vm270_vm0, %v15912_v35, 0.0 }
0x35e6   :  { %9772 = vmax.xlane.f32.xlu1 %v9771_v22  ;;  %9769 = vmax.xlane.f32.xlu0 %v9768_v10  ;;  %v8438_v22 = vsel %vm270_vm0, %v15904_v32, 0.0  ;;  %v15918_v10 = vpop.eup %12401  ;;  %12411 = vpow2.f32 %v8428_v21 }
0x35e7   :  { %12413 = vpow2.f32 %v8430_v50  ;;  %v8897_v8 = vsel %vm270_vm0, %v15918_v10, 0.0 }
0x35ea   :  { %9314 = vmax.xlane.f32.xlu1 %v9313_v59  ;;  %9311 = vmax.xlane.f32.xlu0 %v9310_v37  ;;  %v15920_v56 = vpop.eup %12403 }
0x35eb   :  { %v15926_v18 = vpop.eup %12405  ;;  %v8444_v44 = vsel %vm270_vm0, %v15920_v56, 0.0 }
0x35ec   :  { %v15928_v59 = vpop.eup %12407  ;;  %v8447_v37 = vsel %vm270_vm0, %v15926_v18, 0.0 }
0x35ed   :  { %v8900_v46 = vsel %vm270_vm0, %v15928_v59, 0.0 }
0x35ee   :  { %8886 = vadd.xlane.f32.xlu1 %v8885_v49  ;;  %8883 = vadd.xlane.f32.xlu0 %v8882_v57  ;;  %v15934_v5 = vpop.eup %12409 }
0x35ef   :  { %v8903_v41 = vsel %vm270_vm0, %v15934_v5, 0.0 }
0x35f0   :  { %v15936_v0 = vpop.eup %12411 }
0x35f1   :  { %v15942_v52 = vpop.eup %12413  ;;  %v8450_v57 = vsel %vm270_vm0, %v15936_v0, 0.0 }
0x35f2   :  { %8436 = vadd.xlane.f32.xlu1 %v8435_v16  ;;  %8433 = vadd.xlane.f32.xlu0 %v8432_v2  ;;  %v8453_v49 = vsel %vm270_vm0, %v15942_v52, 0.0 }
0x35f6   :  { %8892 = vadd.xlane.f32.xlu1 %v8891_v6  ;;  %8889 = vadd.xlane.f32.xlu0 %v8888_v9 }
0x35fa   :  { %8442 = vadd.xlane.f32.xlu1 %v8441_v43  ;;  %8439 = vadd.xlane.f32.xlu0 %v8438_v22 }
0x35fe   :  { %8898 = vadd.xlane.f32.xlu1 %v8897_v8  ;;  %8895 = vadd.xlane.f32.xlu0 %v8894_v48 }
0x3602   :  { %8448 = vadd.xlane.f32.xlu1 %v8447_v37  ;;  %8445 = vadd.xlane.f32.xlu0 %v8444_v44 }
0x3606   :  { %8904 = vadd.xlane.f32.xlu1 %v8903_v41  ;;  %8901 = vadd.xlane.f32.xlu0 %v8900_v46 }
0x360a   :  { %8454 = vadd.xlane.f32.xlu1 %v8453_v49  ;;  %8451 = vadd.xlane.f32.xlu0 %v8450_v57 }
0x365b   :  { %v9755_v36 = vpop.xlane.xlu1 %9754  ;;  %v9752_v47 = vpop.xlane.xlu0 %9751 }
0x365c   :  { %v9775_v11 = vsub.f32 %v15781_v61, %v9755_v36  ;;  %v9774_v17 = vsub.f32 %v15784_v25, %v9752_v47 }
0x365e   :  { %v9784_v62 = vmul.f32 1.442695, %v9775_v11  ;;  %v9782_v58 = vmul.f32 1.442695, %v9774_v17 }
0x365f   :  { %v9297_v16 = vpop.xlane.xlu1 %9296  ;;  %v9294_v2 = vpop.xlane.xlu0 %9293 }
0x3660   :  { %12415 = vpow2.f32 %v9784_v62  ;;  %v9317_v45 = vsub.f32 %v15792_v30, %v9297_v16  ;;  %v9316_v42 = vsub.f32 %v15796_v29, %v9294_v2 }
0x3661   :  { %12417 = vpow2.f32 %v9782_v58 }
0x3662   :  { %v9326_v38 = vmul.f32 1.442695, %v9317_v45  ;;  %v9324_v54 = vmul.f32 1.442695, %v9316_v42 }
0x3663   :  { %v9761_v6 = vpop.xlane.xlu1 %9760  ;;  %v9758_v9 = vpop.xlane.xlu0 %9757 }
0x3664   :  { %12419 = vpow2.f32 %v9326_v38  ;;  %v9777_v21 = vsub.f32 %v15803_v15, %v9761_v6  ;;  %v9776_v61 = vsub.f32 %v15806_v4, %v9758_v9 }
0x3665   :  { %12421 = vpow2.f32 %v9324_v54 }
0x3666   :  { %v9788_v25 = vmul.f32 1.442695, %v9777_v21  ;;  %v9786_v50 = vmul.f32 1.442695, %v9776_v61 }
0x3667   :  { %v9303_v43 = vpop.xlane.xlu1 %9302  ;;  %v9300_v22 = vpop.xlane.xlu0 %9299 }
0x3668   :  { %12423 = vpow2.f32 %v9788_v25  ;;  %v9319_v30 = vsub.f32 %v15814_v55, %v9303_v43  ;;  %v9318_v29 = vsub.f32 %v15818_v13, %v9300_v22 }
0x3669   :  { %12425 = vpow2.f32 %v9786_v50 }
0x366a   :  { %v15956_v8 = vpop.eup %12415  ;;  %v9330_v48 = vmul.f32 1.442695, %v9319_v30  ;;  %v9328_v37 = vmul.f32 1.442695, %v9318_v29 }
0x366b   :  { %v15958_v44 = vpop.eup %12417  ;;  %v9767_v15 = vpop.xlane.xlu1 %9766  ;;  %v9801_v4 = vsel %vm270_vm0, %v15956_v8, 0.0 }
0x366c   :  { %v9764_v41 = vpop.xlane.xlu0 %9763  ;;  %12427 = vpow2.f32 %v9330_v48  ;;  %v9779_v46 = vsub.f32 %v15827_v40, %v9767_v15  ;;  %9802 = vadd.xlane.f32.xlu1 %v9801_v4  ;;  %v9798_v55 = vsel %vm270_vm0, %v15958_v44, 0.0 }
0x366d   :  { %v9778_v49 = vsub.f32 %v15830_v7, %v9764_v41  ;;  %12429 = vpow2.f32 %v9328_v37  ;;  %9799 = vadd.xlane.f32.xlu0 %v9798_v55 }
0x366e   :  { %v15966_v13 = vpop.eup %12419  ;;  %v9792_v57 = vmul.f32 1.442695, %v9779_v46 }
0x366f   :  { %v9790_v36 = vmul.f32 1.442695, %v9778_v49  ;;  %v15968_v47 = vpop.eup %12421  ;;  %v9309_v11 = vpop.xlane.xlu1 %9308  ;;  %v9343_v62 = vsel %vm270_vm0, %v15966_v13, 0.0 }
0x3670   :  { %v9306_v17 = vpop.xlane.xlu0 %9305  ;;  %12431 = vpow2.f32 %v9792_v57  ;;  %v9321_v40 = vsub.f32 %v15840_v31, %v9309_v11  ;;  %9344 = vadd.xlane.f32.xlu1 %v9343_v62  ;;  %v9340_v58 = vsel %vm270_vm0, %v15968_v47, 0.0 }
0x3671   :  { %v9320_v7 = vsub.f32 %v15844_v24, %v9306_v17  ;;  %12433 = vpow2.f32 %v9790_v36  ;;  %9341 = vadd.xlane.f32.xlu0 %v9340_v58 }
0x3672   :  { %v15976_v16 = vpop.eup %12423  ;;  %v9334_v2 = vmul.f32 1.442695, %v9321_v40 }
0x3673   :  { %v9332_v45 = vmul.f32 1.442695, %v9320_v7  ;;  %v15978_v42 = vpop.eup %12425  ;;  %v9773_v38 = vpop.xlane.xlu1 %9772  ;;  %v9807_v6 = vsel %vm270_vm0, %v15976_v16, 0.0 }
0x3674   :  { %v9770_v54 = vpop.xlane.xlu0 %9769  ;;  %12435 = vpow2.f32 %v9334_v2  ;;  %v9781_v31 = vsub.f32 %v15853_v51, %v9773_v38  ;;  %9808 = vadd.xlane.f32.xlu1 %v9807_v6  ;;  %v9804_v9 = vsel %vm270_vm0, %v15978_v42, 0.0 }
0x3675   :  { %v9780_v24 = vsub.f32 %v15856_v23, %v9770_v54  ;;  %12437 = vpow2.f32 %v9332_v45  ;;  %9805 = vadd.xlane.f32.xlu0 %v9804_v9 }
0x3676   :  { %v15986_v21 = vpop.eup %12427  ;;  %v9796_v61 = vmul.f32 1.442695, %v9781_v31 }
0x3677   :  { %v9794_v25 = vmul.f32 1.442695, %v9780_v24  ;;  %v15988_v50 = vpop.eup %12429  ;;  %v9315_v43 = vpop.xlane.xlu1 %9314  ;;  %v9349_v30 = vsel %vm270_vm0, %v15986_v21, 0.0 }
0x3678   :  { %v9312_v22 = vpop.xlane.xlu0 %9311  ;;  %12439 = vpow2.f32 %v9796_v61  ;;  %v9323_v51 = vsub.f32 %v15866_v34, %v9315_v43  ;;  %9350 = vadd.xlane.f32.xlu1 %v9349_v30  ;;  %v9346_v29 = vsel %vm270_vm0, %v15988_v50, 0.0 }
0x3679   :  { %v9322_v23 = vsub.f32 %v15870_v3, %v9312_v22  ;;  %12441 = vpow2.f32 %v9794_v25  ;;  %9347 = vadd.xlane.f32.xlu0 %v9346_v29 }
0x367a   :  { %v15996_v48 = vpop.eup %12431  ;;  %v9338_v37 = vmul.f32 1.442695, %v9323_v51 }
0x367b   :  { %v9336_v15 = vmul.f32 1.442695, %v9322_v23  ;;  %v15998_v41 = vpop.eup %12433  ;;  %v8887_v4 = vpop.xlane.xlu1 %8886  ;;  %v9813_v49 = vsel %vm270_vm0, %v15996_v48, 0.0 }
0x367c   :  { %v8884_v46 = vpop.xlane.xlu0 %8883  ;;  %12443 = vpow2.f32 %v9338_v37  ;;  %9814 = vadd.xlane.f32.xlu1 %v9813_v49  ;;  %v9810_v34 = vsel %vm270_vm0, %v15998_v41, 0.0 }
0x367d   :  { %12445 = vpow2.f32 %v9336_v15  ;;  %9811 = vadd.xlane.f32.xlu0 %v9810_v34 }
0x367e   :  { %v16004_v3 = vpop.eup %12435  ;;  %12447 = vrcp.f32 %v8887_v4 }
0x367f   :  { %v16006_v55 = vpop.eup %12437  ;;  %12449 = vrcp.f32 %v8884_v46  ;;  %v8437_v57 = vpop.xlane.xlu1 %8436  ;;  %v9355_v11 = vsel %vm270_vm0, %v16004_v3, 0.0 }
0x3680   :  { %v8434_v36 = vpop.xlane.xlu0 %8433  ;;  %12451 = vrcp.f32 %v8437_v57  ;;  %9356 = vadd.xlane.f32.xlu1 %v9355_v11  ;;  %v9352_v17 = vsel %vm270_vm0, %v16006_v55, 0.0 }
0x3681   :  { %12453 = vrcp.f32 %v8434_v36  ;;  %9353 = vadd.xlane.f32.xlu0 %v9352_v17 }
0x3682   :  { %v16012_v62 = vpop.eup %12439 }
0x3683   :  { %v16014_v40 = vpop.eup %12441  ;;  %v8893_v7 = vpop.xlane.xlu1 %8892  ;;  %v9819_v2 = vsel %vm270_vm0, %v16012_v62, 0.0 }
0x3684   :  { %v8890_v58 = vpop.xlane.xlu0 %8889  ;;  %12455 = vrcp.f32 %v8893_v7  ;;  %9820 = vadd.xlane.f32.xlu1 %v9819_v2  ;;  %v9816_v45 = vsel %vm270_vm0, %v16014_v40, 0.0 }
0x3685   :  { %12457 = vrcp.f32 %v8890_v58  ;;  %9817 = vadd.xlane.f32.xlu0 %v9816_v45 }
0x3686   :  { %v16020_v38 = vpop.eup %12443 }
0x3687   :  { %v16022_v54 = vpop.eup %12445  ;;  %v8443_v6 = vpop.xlane.xlu1 %8442  ;;  %v9361_v24 = vsel %vm270_vm0, %v16020_v38, 0.0 }
0x3688   :  { %v8440_v31 = vpop.xlane.xlu0 %8439  ;;  %v12448_v9 = vpop.eup %12447  ;;  %12459 = vrcp.f32 %v8443_v6  ;;  %9362 = vadd.xlane.f32.xlu1 %v9361_v24  ;;  %v9358_v61 = vsel %vm270_vm0, %v16022_v54, 0.0 }
0x3689   :  { %v12450_v25 = vpop.eup %12449  ;;  %12461 = vrcp.f32 %v8440_v31  ;;  %9359 = vadd.xlane.f32.xlu0 %v9358_v61  ;;  %v8909_v43 = vmul.f32 %v12448_v9, %v15880_v63 }
0x368a   :  { %v12452_v22 = vpop.eup %12451  ;;  %v8907_v30 = vmul.f32 %v12450_v25, %v15874_v53 }
0x368b   :  { %v12454_v51 = vpop.eup %12453  ;;  %v8459_v23 = vmul.f32 %v12452_v22, %v15890_v12  ;;  %v8899_v29 = vpop.xlane.xlu1 %8898 }
0x368c   :  { %v8896_v37 = vpop.xlane.xlu0 %8895  ;;  %v8457_v15 = vmul.f32 %v12454_v51, %v15884_v60  ;;  %12463 = vrcp.f32 %v8899_v29  ;;  %v11770_v4 = vpack.c.bf16 %v8909_v43, %v8907_v30 }
0x368d   :  { %v16032_v46 = vadd.f32 %v8909_v43, %v8459_v23  ;;  %12465 = vrcp.f32 %v8896_v37 }
0x368e   :  { %v12456_v49 = vpop.eup %12455  ;;  %v16034_v34 = vadd.f32 %v8907_v30, %v8457_v15  ;;  %11772 = vmatprep.subr.msk.bf16.mxu1 %vm13378_vm5, %v11770_v4  ;;  %v11773_v63 = vpack.c.bf16 %v8459_v23, %v8457_v15 }
0x368f   :  { %v12458_v53 = vpop.eup %12457  ;;  %v8449_v57 = vpop.xlane.xlu1 %8448  ;;  %v8913_v12 = vmul.f32 %v12456_v49, %v15900_v14 }
0x3690   :  { %v8446_v36 = vpop.xlane.xlu0 %8445  ;;  %12467 = vrcp.f32 %v8449_v57  ;;  %11775 = vmatpush1.bf16.xpose.msk.msra.mxu1 %vm13378_vm5, %v11773_v63  ;;  %v8911_v60 = vmul.f32 %v12458_v53, %v15894_v1 }
0x3691   :  { %12469 = vrcp.f32 %v8446_v36 }
0x3692   :  { %v12460_v11 = vpop.eup %12459  ;;  %v11776_v17 = vpack.c.bf16 %v8913_v12, %v8911_v60 }
0x3693   :  { %v12462_v7 = vpop.eup %12461  ;;  %v8463_v58 = vmul.f32 %v12460_v11, %v15910_v27  ;;  %v8905_v2 = vpop.xlane.xlu1 %8904 }
0x3694   :  { %v8902_v45 = vpop.xlane.xlu0 %8901  ;;  %v8461_v6 = vmul.f32 %v12462_v7, %v15904_v32  ;;  %12471 = vrcp.f32 %v8905_v2  ;;  %11778 = vmatprep.subr.msk.bf16.mxu1 %vm13378_vm5, %v11776_v17  ;;  %v10039_v7 = vld [vmem:[#allocation18 + $0x20] sm:$0xff] }
0x3695   :  { %v16046_v14 = vadd.f32 %v8913_v12, %v8463_v58  ;;  %12473 = vrcp.f32 %v8902_v45 }
0x3696   :  { %v12464_v31 = vpop.eup %12463  ;;  %v16048_v24 = vadd.f32 %v8911_v60, %v8461_v6  ;;  %v11779_v1 = vpack.c.bf16 %v8463_v58, %v8461_v6  ;;  %v10035_v60 = vld [vmem:[#allocation18] sm:$0xff]  ;;  %v10040_v58 = vld [vmem:[#allocation18 + $0x28] sm:$0xff] }
0x3697   :  { %v12466_v9 = vpop.eup %12465  ;;  %v8455_v61 = vpop.xlane.xlu1 %8454  ;;  %v8917_v27 = vmul.f32 %v12464_v31, %v15918_v10  ;;  %v11827_v2 = vpack.c.bf16 %v10040_v58, %v10039_v7 }
0x3698   :  { %v8452_v25 = vpop.xlane.xlu0 %8451  ;;  %12475 = vrcp.f32 %v8455_v61  ;;  %11781 = vmatpush1.bf16.xpose.msk.msra.mxu1 %vm13378_vm5, %v11779_v1  ;;  %v8915_v32 = vmul.f32 %v12466_v9, %v15912_v35 }
0x3699   :  { %12477 = vrcp.f32 %v8452_v25 }
0x369a   :  { %v12468_v43 = vpop.eup %12467  ;;  %v11782_v22 = vpack.c.bf16 %v8917_v27, %v8915_v32 }
0x369b   :  { %v12470_v30 = vpop.eup %12469  ;;  %v8467_v51 = vmul.f32 %v12468_v43, %v15926_v18 }
0x369c   :  { %v8465_v23 = vmul.f32 %v12470_v30, %v15920_v56  ;;  %11784 = vmatprep.subr.msk.bf16.mxu1 %vm13378_vm5, %v11782_v22 }
0x369d   :  { %v16058_v29 = vadd.f32 %v8917_v27, %v8467_v51 }
0x369e   :  { %v12472_v10 = vpop.eup %12471  ;;  %v16060_v37 = vadd.f32 %v8915_v32, %v8465_v23  ;;  %v11785_v15 = vpack.c.bf16 %v8467_v51, %v8465_v23 }
0x369f   :  { %v12474_v4 = vpop.eup %12473  ;;  %v8921_v35 = vmul.f32 %v12472_v10, %v15934_v5 }
0x36a0   :  { %11787 = vmatpush1.bf16.xpose.msk.msra.mxu1 %vm13378_vm5, %v11785_v15  ;;  %v8919_v49 = vmul.f32 %v12474_v4, %v15928_v59  ;;  %v10036_v59 = vld [vmem:[#allocation18 + $0x8] sm:$0xff] }
0x36a1   :  { %v11819_v11 = vpack.c.bf16 %v10036_v59, %v10035_v60 }
0x36a2   :  { %v12476_v18 = vpop.eup %12475  ;;  %v11788_v63 = vpack.c.bf16 %v8921_v35, %v8919_v49 }
0x36a3   :  { %v12478_v56 = vpop.eup %12477  ;;  %v8471_v53 = vmul.f32 %v12476_v18, %v15942_v52  ;;  %11821 = vmatpush3.bf16.xpose.msk.msra.mxu0 %vm14643_vm9, %v11819_v11  ;;  %v10038_v52 = vld [vmem:[#allocation18 + $0x18] sm:$0xff] }
0x36a4   :  { %v8469_v57 = vmul.f32 %v12478_v56, %v15936_v0  ;;  %11790 = vmatprep.subr.msk.bf16.mxu1 %vm13378_vm5, %v11788_v63  ;;  %11822 = vmatprep.subr.bf16.mxu0 %v12901_v26  ;;  %v10037_v0 = vld [vmem:[#allocation18 + $0x10] sm:$0xff] }
0x36a5   :  { %v16070_v36 = vadd.f32 %v8921_v35, %v8471_v53  ;;  %v11823_v17 = vpack.c.bf16 %v10038_v52, %v10037_v0 }
0x36a6   :  { %v16072_v12 = vadd.f32 %v8919_v49, %v8469_v57  ;;  %v11791_v5 = vpack.c.bf16 %v8471_v53, %v8469_v57 }
0x36a8   :  { %11793 = vmatpush1.bf16.xpose.msk.msra.mxu1 %vm13378_vm5, %v11791_v5 }
0x36ab   :  { %11825 = vmatpush3.bf16.xpose.msk.msra.mxu0 %vm14643_vm9, %v11823_v17 }
0x36ac   :  { %11826 = vmatprep.subr.bf16.mxu0 %v12901_v26 }
0x36af   :  { %9959 = vmatmul.mubr.f32.vlgmr.msra.gmra.mrb[122].mxu1 %v13245_v19  ;;  %v10041_v19 = vld [vmem:[#allocation18 + $0x30] sm:$0xff] }
0x36b0   :  { %10028 = vmatprep.mubr.f32.mxu1 %v13249_v20  ;;  %v10042_v20 = vld [vmem:[#allocation18 + $0x38] sm:$0xff] }
0x36b1   :  { %v11831_v45 = vpack.c.bf16 %v10042_v20, %v10041_v19 }
0x36b3   :  { %11829 = vmatpush3.bf16.xpose.msk.msra.mxu0 %vm14643_vm9, %v11827_v2 }
0x36b4   :  { %11830 = vmatprep.subr.bf16.mxu0 %v12901_v26 }
0x36bb   :  { %11833 = vmatpush3.bf16.xpose.msk.msra.mxu0 %vm14643_vm9, %v11831_v45 }
0x36f9   :  { %v9803_v6 = vpop.xlane.xlu1 %9802 }
0x36fa   :  { %12479 = vrcp.f32 %v9803_v6  ;;  %v9800_v31 = vpop.xlane.xlu0 %9799 }
0x36fb   :  { %12481 = vrcp.f32 %v9800_v31 }
0x36fd   :  { %v9345_v1 = vpop.xlane.xlu1 %9344 }
0x36fe   :  { %12483 = vrcp.f32 %v9345_v1  ;;  %v9342_v9 = vpop.xlane.xlu0 %9341 }
0x36ff   :  { %12485 = vrcp.f32 %v9342_v9 }
0x3701   :  { %v9809_v61 = vpop.xlane.xlu1 %9808 }
0x3702   :  { %12487 = vrcp.f32 %v9809_v61  ;;  %v9806_v25 = vpop.xlane.xlu0 %9805 }
0x3703   :  { %12489 = vrcp.f32 %v9806_v25 }
0x3704   :  { %v12480_v27 = vpop.eup %12479 }
0x3705   :  { %v12482_v26 = vpop.eup %12481  ;;  %v9351_v32 = vpop.xlane.xlu1 %9350  ;;  %v9825_v43 = vmul.f32 %v12480_v27, %v15956_v8 }
0x3706   :  { %12491 = vrcp.f32 %v9351_v32  ;;  %v9348_v33 = vpop.xlane.xlu0 %9347  ;;  %v9823_v22 = vmul.f32 %v12482_v26, %v15958_v44 }
0x3707   :  { %12493 = vrcp.f32 %v9348_v33 }
0x3708   :  { %v12484_v30 = vpop.eup %12483  ;;  %v11794_v51 = vpack.c.bf16 %v9825_v43, %v9823_v22 }
0x3709   :  { %v12486_v23 = vpop.eup %12485  ;;  %v9367_v10 = vmul.f32 %v12484_v30, %v15966_v13  ;;  %v9815_v15 = vpop.xlane.xlu1 %9814 }
0x370a   :  { %v9365_v4 = vmul.f32 %v12486_v23, %v15968_v47  ;;  %12495 = vrcp.f32 %v9815_v15  ;;  %11796 = vmatprep.subr.msk.bf16.mxu1 %vm13378_vm5, %v11794_v51  ;;  %v9812_v35 = vpop.xlane.xlu0 %9811 }
0x370b   :  { %v9381_v8 = vadd.f32 %v9367_v10, %v16032_v46  ;;  %12497 = vrcp.f32 %v9812_v35 }
0x370c   :  { %v12488_v49 = vpop.eup %12487  ;;  %v9380_v44 = vadd.f32 %v9365_v4, %v16034_v34  ;;  %v11797_v18 = vpack.c.bf16 %v9367_v10, %v9365_v4 }
0x370d   :  { %v12490_v63 = vpop.eup %12489  ;;  %v9839_v56 = vadd.f32 %v9825_v43, %v9381_v8  ;;  %v9357_v53 = vpop.xlane.xlu1 %9356  ;;  %v9829_v13 = vmul.f32 %v12488_v49, %v15976_v16 }
0x370e   :  { %v9838_v57 = vadd.f32 %v9823_v22, %v9380_v44  ;;  %12499 = vrcp.f32 %v9357_v53  ;;  %11799 = vmatpush1.bf16.xpose.msk.msra.mxu1 %vm13378_vm5, %v11797_v18  ;;  %v9354_v47 = vpop.xlane.xlu0 %9353  ;;  %v9827_v5 = vmul.f32 %v12490_v63, %v15978_v42 }
0x370f   :  { %v10143_v60 = vmul.f32 0.25, %v9839_v56  ;;  %12501 = vrcp.f32 %v9354_v47 }
0x3710   :  { %v12492_v46 = vpop.eup %12491  ;;  %v10142_v59 = vmul.f32 0.25, %v9838_v57  ;;  %v11800_v11 = vpack.c.bf16 %v9829_v13, %v9827_v5 }
0x3711   :  { %v12494_v34 = vpop.eup %12493  ;;  %v9371_v0 = vmul.f32 %v12492_v46, %v15986_v21  ;;  %10152 = vst.msk [vmem:[#allocation27 + $0x48] sm:$0xff] %vm270_vm0, %v10143_v60  ;;  %v9821_v52 = vpop.xlane.xlu1 %9820 }
0x3712   :  { %v9369_v16 = vmul.f32 %v12494_v34, %v15988_v50  ;;  %10151 = vst.msk [vmem:[#allocation27 + $0x40] sm:$0xff] %vm270_vm0, %v10142_v59  ;;  %12503 = vrcp.f32 %v9821_v52  ;;  %11802 = vmatprep.subr.msk.bf16.mxu1 %vm13378_vm5, %v11800_v11  ;;  %v9818_v42 = vpop.xlane.xlu0 %9817 }
0x3713   :  { %v9383_v17 = vadd.f32 %v9371_v0, %v16046_v14  ;;  %12505 = vrcp.f32 %v9818_v42 }
0x3714   :  { %v12496_v7 = vpop.eup %12495  ;;  %v9382_v58 = vadd.f32 %v9369_v16, %v16048_v24  ;;  %v11803_v2 = vpack.c.bf16 %v9371_v0, %v9369_v16 }
0x3715   :  { %v12498_v21 = vpop.eup %12497  ;;  %v9841_v19 = vadd.f32 %v9829_v13, %v9383_v17  ;;  %v9363_v20 = vpop.xlane.xlu1 %9362  ;;  %v9833_v45 = vmul.f32 %v12496_v7, %v15996_v48 }
0x3716   :  { %v9840_v50 = vadd.f32 %v9827_v5, %v9382_v58  ;;  %12507 = vrcp.f32 %v9363_v20  ;;  %11805 = vmatpush1.bf16.xpose.msk.msra.mxu1 %vm13378_vm5, %v11803_v2  ;;  %v9360_v6 = vpop.xlane.xlu0 %9359  ;;  %v9831_v31 = vmul.f32 %v12498_v21, %v15998_v41 }
0x3717   :  { %v10145_v1 = vmul.f32 0.25, %v9841_v19  ;;  %12509 = vrcp.f32 %v9360_v6 }
0x3718   :  { %v12500_v14 = vpop.eup %12499  ;;  %v10144_v9 = vmul.f32 0.25, %v9840_v50  ;;  %v11806_v61 = vpack.c.bf16 %v9833_v45, %v9831_v31 }
0x3719   :  { %v12502_v24 = vpop.eup %12501  ;;  %v9375_v25 = vmul.f32 %v12500_v14, %v16004_v3  ;;  %10154 = vst.msk [vmem:[#allocation27 + $0x58] sm:$0xff] %vm270_vm0, %v10145_v1 }
0x371a   :  { %v9373_v48 = vmul.f32 %v12502_v24, %v16006_v55  ;;  %10153 = vst.msk [vmem:[#allocation27 + $0x50] sm:$0xff] %vm270_vm0, %v10144_v9  ;;  %11808 = vmatprep.subr.msk.bf16.mxu1 %vm13378_vm5, %v11806_v61 }
0x371b   :  { %v9385_v27 = vadd.f32 %v9375_v25, %v16058_v29 }
0x371c   :  { %v12504_v41 = vpop.eup %12503  ;;  %v9384_v26 = vadd.f32 %v9373_v48, %v16060_v37  ;;  %v11809_v32 = vpack.c.bf16 %v9375_v25, %v9373_v48 }
0x371d   :  { %v12506_v43 = vpop.eup %12505  ;;  %v9843_v33 = vadd.f32 %v9833_v45, %v9385_v27  ;;  %v9837_v22 = vmul.f32 %v12504_v41, %v16012_v62 }
0x371e   :  { %v9842_v3 = vadd.f32 %v9831_v31, %v9384_v26  ;;  %11811 = vmatpush1.bf16.xpose.msk.msra.mxu1 %vm13378_vm5, %v11809_v32  ;;  %v9835_v55 = vmul.f32 %v12506_v43, %v16014_v40 }
0x371f   :  { %v10147_v30 = vmul.f32 0.25, %v9843_v33 }
0x3720   :  { %v12508_v51 = vpop.eup %12507  ;;  %v10146_v23 = vmul.f32 0.25, %v9842_v3  ;;  %v11812_v10 = vpack.c.bf16 %v9837_v22, %v9835_v55 }
0x3721   :  { %v12510_v15 = vpop.eup %12509  ;;  %v9379_v29 = vmul.f32 %v12508_v51, %v16020_v38  ;;  %10156 = vst.msk [vmem:[#allocation27 + $0x68] sm:$0xff] %vm270_vm0, %v10147_v30 }
0x3722   :  { %v9377_v37 = vmul.f32 %v12510_v15, %v16022_v54  ;;  %10155 = vst.msk [vmem:[#allocation27 + $0x60] sm:$0xff] %vm270_vm0, %v10146_v23  ;;  %11814 = vmatprep.subr.msk.bf16.mxu1 %vm13378_vm5, %v11812_v10 }
0x3723   :  { %v9387_v62 = vadd.f32 %v9379_v29, %v16070_v36 }
0x3724   :  { %v9386_v40 = vadd.f32 %v9377_v37, %v16072_v12  ;;  %v11815_v4 = vpack.c.bf16 %v9379_v29, %v9377_v37 }
0x3725   :  { %v9845_v35 = vadd.f32 %v9837_v22, %v9387_v62 }
0x3726   :  { %v9844_v8 = vadd.f32 %v9835_v55, %v9386_v40  ;;  %11817 = vmatpush1.bf16.xpose.msk.msra.mxu1 %vm13378_vm5, %v11815_v4 }
0x3727   :  { %v10149_v38 = vmul.f32 0.25, %v9845_v35 }
0x3728   :  { %v10148_v49 = vmul.f32 0.25, %v9844_v8 }
0x3729   :  { %10158 = vst.msk [vmem:[#allocation27 + $0x78] sm:$0xff] %vm270_vm0, %v10149_v38 }
0x372a   :  { %10157 = vst.msk [vmem:[#allocation27 + $0x70] sm:$0xff] %vm270_vm0, %v10148_v49 }
0x372d   :  { %10029 = vmatmul.mubr.f32.vlgmr.msra.gmra.mrb[122].mxu1 %v13262_v28 }
0x3800   :  { %v10030_v54 = vpop.f32.mrb[122].mxu1 }
0x3801   :  { %v10034_v44 = vmul.f32 0.25, %v10030_v54  ;;  %v10032_v18 = vpop.f32.mrb[123].mxu1 }
0x3803   :  { %11512 = vmatmul.mubr.msk.f32.vlgmr.msra.gmra.mrb[138].mxu0 %vm1146_vm4, %v10034_v44 }
0x3804   :  { %12742 = shalt.err (!%p12739_p0)
}
0x3805   :  { %s12743_s2 = scalar_lea.hbm %s16256_s12, 256 }
0x3806   :  { %p12744_p1 = scmp.ne.s32.totalorder %s16256_s12, %s12743_s2  ;;  %p12747_p2 = scmp.lt.u32.totalorder %s12743_s2, %s16256_s12 }
0x3808   :  { %p12749_p3 = pnand %p12747_p2, %p12744_p1 }
0x380a   :  { %12752 = shalt.err (!%p12749_p3)
}
0x380b   :  { %10182 = dma.vmem_to_hbm [thread:$0]  %s10177_s28, 256, %s16256_s12, [#allocation22], %s16268_s23, %s16268_s23, %s12886_s19  }
0x380c   :  { %s12753_s26 = scalar_lea.vmem %s16139_s18, 512  ;;  %p12758_p5 = scmp.lt.s32.totalorder %s16139_s18, %s16139_s18 }
0x380d   :  { %p12754_p4 = scmp.ne.s32.totalorder %s16139_s18, %s12753_s26  ;;  %p12759_p6 = scmp.lt.s32.totalorder %s12753_s26, %s12753_s26 }
0x380f   :  { %p12760_p7 = por %p12759_p6, %p12758_p5 }
0x3811   :  { %p12761_p8 = pnand %p12760_p7, %p12754_p4 }
0x3813   :  { %12764 = shalt.err (!%p12761_p8)
}
0x3814   :  { %s12765_s25 = scalar_lea.hbm %s16258_s14, 512 }
0x3815   :  { %p12766_p9 = scmp.ne.s32.totalorder %s16258_s14, %s12765_s25  ;;  %p12769_p10 = scmp.lt.u32.totalorder %s12765_s25, %s16258_s14 }
0x3817   :  { %p12771_p11 = pnand %p12769_p10, %p12766_p9 }
0x3819   :  { %12774 = shalt.err (!%p12771_p11)
}
0x381a   :  { %10206 = dma.vmem_to_hbm [thread:$0]  %s16139_s18, 512, %s16258_s14, [#allocation25], %s16268_s23, %s16268_s23, %s12886_s19  }
0x381b   :  { %s12905_s4 = smov [#allocation20]  }
0x381c   :  { %s10164_s28 = sshll.u32 %s12905_s4, 4  ;;  %s10165_s28 = int_to_ptr.vmem [resolvable:$true] %s10164_s28 }
0x381d   :  { %s12775_s30 = scalar_lea.vmem %s10165_s28, 256  ;;  %p12780_p13 = scmp.lt.s32.totalorder %s10165_s28, %s10165_s28 }
0x381e   :  { %p12776_p12 = scmp.ne.s32.totalorder %s10165_s28, %s12775_s30  ;;  %p12781_p0 = scmp.lt.s32.totalorder %s12775_s30, %s12775_s30 }
0x3820   :  { %p12782_p1 = por %p12781_p0, %p12780_p13 }
0x3822   :  { %p12783_p2 = pnand %p12782_p1, %p12776_p12 }
0x3824   :  { %12786 = shalt.err (!%p12783_p2)
}
0x3825   :  { %s12787_s1 = scalar_lea.hbm %s16255_s11, 256 }
0x3826   :  { %p12788_p3 = scmp.ne.s32.totalorder %s16255_s11, %s12787_s1  ;;  %p12791_p4 = scmp.lt.u32.totalorder %s12787_s1, %s16255_s11 }
0x3828   :  { %p12793_p5 = pnand %p12791_p4, %p12788_p3 }
0x382a   :  { %12796 = shalt.err (!%p12793_p5)
}
0x382b   :  { %10170 = dma.vmem_to_hbm [thread:$0]  %s10165_s28, 256, %s16255_s11, [#allocation5], %s16268_s23, %s16268_s23, %s12886_s19  }
0x382c   :  { %s12906_s3 = smov [#allocation26]   ;;  %s12907_s21 = smov [#allocation27]  }
0x382d   :  { %s10212_s7 = sshll.u32 %s12906_s3, 4  ;;  %s10224_s26 = sshll.u32 %s12907_s21, 4  ;;  %s10213_s7 = int_to_ptr.vmem [resolvable:$true] %s10212_s7  ;;  %s16191_s26 = int_to_ptr.vmem [resolvable:$true] %s10224_s26 }
0x382e   :  { %s12797_s24 = scalar_lea.vmem %s10213_s7, 1024  ;;  %p12802_p7 = scmp.lt.s32.totalorder %s10213_s7, %s10213_s7 }
0x382f   :  { %p12798_p6 = scmp.ne.s32.totalorder %s10213_s7, %s12797_s24  ;;  %p12803_p8 = scmp.lt.s32.totalorder %s12797_s24, %s12797_s24 }
0x3831   :  { %p12804_p9 = por %p12803_p8, %p12802_p7 }
0x3833   :  { %p12805_p10 = pnand %p12804_p9, %p12798_p6 }
0x3835   :  { %12808 = shalt.err (!%p12805_p10)
}
0x3836   :  { %s12809_s27 = scalar_lea.hbm %s16259_s15, 1024 }
0x3837   :  { %p12810_p11 = scmp.ne.s32.totalorder %s16259_s15, %s12809_s27  ;;  %p12813_p12 = scmp.lt.u32.totalorder %s12809_s27, %s16259_s15 }
0x3839   :  { %p12815_p13 = pnand %p12813_p12, %p12810_p11 }
0x383b   :  { %12818 = shalt.err (!%p12815_p13)
}
0x383c   :  { %10218 = dma.vmem_to_hbm [thread:$0]  %s10213_s7, 1024, %s16259_s15, [#allocation25], %s16268_s23, %s16268_s23, %s12886_s19  }
0x383d   :  { %s12819_s4 = scalar_lea.vmem %s16191_s26, 2048  ;;  %p12824_p1 = scmp.lt.s32.totalorder %s16191_s26, %s16191_s26 }
0x383e   :  { %p12820_p0 = scmp.ne.s32.totalorder %s16191_s26, %s12819_s4  ;;  %p12825_p2 = scmp.lt.s32.totalorder %s12819_s4, %s12819_s4 }
0x3840   :  { %p12826_p3 = por %p12825_p2, %p12824_p1 }
0x3842   :  { %p12827_p4 = pnand %p12826_p3, %p12820_p0 }
0x3844   :  { %12830 = shalt.err (!%p12827_p4)
}
0x3845   :  { %s12831_s8 = scalar_lea.hbm %s16260_s16, 2048 }
0x3846   :  { %p12832_p5 = scmp.ne.s32.totalorder %s16260_s16, %s12831_s8  ;;  %p12835_p6 = scmp.lt.u32.totalorder %s12831_s8, %s16260_s16 }
0x3848   :  { %p12837_p7 = pnand %p12835_p6, %p12832_p5 }
0x384a   :  { %12840 = shalt.err (!%p12837_p7)
}
0x384b   :  { %10230 = dma.vmem_to_hbm [thread:$0]  %s16191_s26, 2048, %s16260_s16, [#allocation28], %s16268_s23, %s16268_s23, %s12886_s19  }
0x384c   :  { %s12908_s14 = smov [#allocation23]  }
0x384d   :  { %s10188_s18 = sshll.u32 %s12908_s14, 4  ;;  %s10189_s18 = int_to_ptr.vmem [resolvable:$true] %s10188_s18 }
0x384e   :  { %s12841_s10 = scalar_lea.vmem %s10189_s18, 256  ;;  %p12846_p9 = scmp.lt.s32.totalorder %s10189_s18, %s10189_s18 }
0x384f   :  { %p12842_p8 = scmp.ne.s32.totalorder %s10189_s18, %s12841_s10  ;;  %p12847_p10 = scmp.lt.s32.totalorder %s12841_s10, %s12841_s10 }
0x3851   :  { %p12848_p11 = por %p12847_p10, %p12846_p9 }
0x3853   :  { %p12849_p12 = pnand %p12848_p11, %p12842_p8 }
0x38d6   :  { %v10136_v28 = vpop.f32.mrb[138].mxu0 }
0x38d7   :  { %10141 = vst.msk [vmem:[#allocation23 + $0x8] sm:$0xff] %vm1146_vm4, %v10136_v28  ;;  %v11513_v39 = vpop.f32.mrb[139].mxu0 }
0x38d8   :  { %12852 = shalt.err (!%p12849_p12)
}
0x38d9   :  { %s12853_s21 = scalar_lea.hbm %s16257_s13, 256 }
0x38da   :  { %p12854_p13 = scmp.ne.s32.totalorder %s16257_s13, %s12853_s21  ;;  %p12857_p0 = scmp.lt.u32.totalorder %s12853_s21, %s16257_s13 }
0x38dc   :  { %p12859_p1 = pnand %p12857_p0, %p12854_p13 }
0x38de   :  { %12862 = shalt.err (!%p12859_p1)
}
0x38df   :  { %10194 = dma.vmem_to_hbm [thread:$0]  %s10189_s18, 256, %s16257_s13, [#allocation22], %s16268_s23, %s16268_s23, %s12886_s19  }
0x38e0   :  { %12875 = dma.done.wait [#allocation5], 256  }
0x38e1   :  { %12876 = vsyncadd [#allocation5], 4294967040 }
0x38e2   :  { %12877 = dma.done.wait [#allocation22], 512  }
0x38e3   :  { %12878 = vsyncadd [#allocation22], 4294966784 }
0x38e4   :  { %12879 = dma.done.wait [#allocation25], 1536  }
0x38e5   :  { %12880 = vsyncadd [#allocation25], 4294965760 }
0x38e6   :  { %12881 = dma.done.wait [#allocation28], 2048  }
0x38e7   :  { %12882 = vsyncadd [#allocation28], 4294965248 }
0x38e8   :  { %10249 = vsyncpa [#allocation4], 1 }
0x38e9   :  { %10250 = vsyncpa [#allocation7], 1 }
0x38ea   :  { %10251 = vsyncpa [#allocation10], 1 }
0x38eb   :  { %10252 = vsyncpa [#allocation13], 1 }
0x38ec   :  { %10253 = vsyncpa [#allocation16], 1 }
0x38ed   :  { %10254 = vsyncpa [#allocation19], 1 }
0x38ee   :  { %10255 = vsyncpa [#allocation5], 1 }
0x38ef   :  { %10256 = vsyncpa [#allocation22], 1 }
0x38f0   :  { %10257 = vsyncpa [#allocation25], 1 }
0x38f1   :  { %10258 = vsyncpa [#allocation28], 1 }

</bundles_post_ra>
